<compile_context>
chip_gen: v7x
topology: tpu7x:2x2x1
jax: 0.10.0
libtpu: 0.0.40
codegen_flags: <defaults>
</compile_context>

<pallas_src>
import jax
import jax.numpy as jnp
import numpy as np
from jax.experimental import pallas as pl
from jax.experimental.pallas import tpu as pltpu

# (Cin, Cout, stride) for every Conv/BN/ReLU block in self.features.
_LAYER_CFG = [
    (32, 16, 2),
    (16, 24, 2),
    (24, 24, 1),
    (24, 40, 2),
    (40, 40, 1),
    (40, 40, 1),
    (40, 40, 1),
    (40, 80, 2),
    (80, 80, 1),
    (80, 80, 1),
]

_BN_EPS = 1e-5
_CPAD = 128                      # lane-dense channel padding
_COMPUTE_DTYPE = jnp.bfloat16    # MXU operand dtype (accumulation is f32)


# ---------------------------------------------------------------------------
# Static geometry / host-side constant builders
# ---------------------------------------------------------------------------

def _conv_out(n, stride):
    # kernel=3, pad=1
    return (n + 2 - 3) // stride + 1


def _build_gather_mats(h, w, stride):
    """g[t, i*wo+j, r*w+c] = 1 iff 3x3 tap t of output (i,j) reads input (r,c).

    Taps that fall on the zero padding have all-zero rows, so a plain matmul
    with these matrices implements pad=1 im2col (including stride) exactly.
    """
    ho, wo = _conv_out(h, stride), _conv_out(w, stride)
    g = np.zeros((9, ho * wo, h * w), np.float32)
    for kh in range(3):
        for kw in range(3):
            t = kh * 3 + kw
            for i in range(ho):
                r = stride * i + kh - 1
                if r < 0 or r >= h:
                    continue
                for j in range(wo):
                    c = stride * j + kw - 1
                    if c < 0 or c >= w:
                        continue
                    g[t, i * wo + j, r * w + c] = 1.0
    return g


def _build_schedule(in_h, in_w):
    """Static per-layer geometry + de-duplicated spatial gather matrices."""
    sched, g_list, g_cache = [], [], {}
    h, w = in_h, in_w
    for (cin, cout, stride) in _LAYER_CFG:
        ho, wo = _conv_out(h, stride), _conv_out(w, stride)
        if h == 1 and w == 1:
            g_idx = None          # only the centre tap sees real (non-pad) data
        else:
            key = (h, w, stride)
            if key not in g_cache:
                g_cache[key] = len(g_list)
                g_list.append(_build_gather_mats(h, w, stride))
            g_idx = g_cache[key]
        sched.append(dict(cin=cin, cout=cout, stride=stride,
                          h=h, w=w, ho=ho, wo=wo, g=g_idx))
        h, w = ho, wo
    return sched, g_list


# ---------------------------------------------------------------------------
# Fused Pallas kernel (whole network, one batch element per grid step)
# ---------------------------------------------------------------------------

def _make_kernel(sched, num_g):
    def kernel(x_ref, w_ref, scale_ref, bias_ref, *rest):
        g_refs = rest[:num_g]
        head_w_ref = rest[num_g]
        head_b_ref = rest[num_g + 1]
        out_ref = rest[num_g + 2]

        x = x_ref[0]                                   # (H0*W0, 128) bf16
        y = None
        for l, cfg in enumerate(sched):
            if cfg["h"] == 1 and cfg["w"] == 1:
                # 1x1 feature map: only the centre tap (kh=kw=1) hits real data.
                acc = jnp.dot(x, w_ref[l, 4],
                              preferred_element_type=jnp.float32)
            else:
                g = g_refs[cfg["g"]]
                acc = jnp.zeros((cfg["ho"] * cfg["wo"], _CPAD), jnp.float32)
                for t in range(9):
                    if cfg["stride"] == 1 and t == 4:
                        gathered = x                   # centre tap == identity
                    else:
                        gathered = jnp.dot(
                            g[t], x, preferred_element_type=jnp.float32
                        ).astype(_COMPUTE_DTYPE)
                    acc = acc + jnp.dot(gathered, w_ref[l, t],
                                        preferred_element_type=jnp.float32)
            # Folded eval-mode BatchNorm + ReLU; f32 epilogue (v5e-safe).
            y = jnp.maximum(acc * scale_ref[l] + bias_ref[l], 0.0)
            x = y.astype(_COMPUTE_DTYPE)

        # AdaptiveAvgPool2d(1) + Linear head fused into the same kernel.
        pooled = y if y.shape[0] == 1 else jnp.mean(y, axis=0, keepdims=True)
        logits = jnp.dot(pooled.astype(_COMPUTE_DTYPE), head_w_ref[...],
                         preferred_element_type=jnp.float32) + head_b_ref[...]
        out_ref[0] = logits                            # (1, 128) lane-dense

    return kernel


def make_forward(num_classes=80, image_hw=(16, 16), in_channels=32):
    in_h, in_w = image_hw
    sched, g_np = _build_schedule(in_h, in_w)
    num_g = len(g_np)
    kernel = _make_kernel(sched, num_g)
    hw0 = in_h * in_w

    def forward(x_nchw, params):
        b = x_nchw.shape[0]
        assert x_nchw.shape[1:] == (in_channels, in_h, in_w), x_nchw.shape
        # NCHW -> (B, H*W, C) rows ordered (h, w); channel-pad to 128; bf16.
        x = jnp.transpose(x_nchw, (0, 2, 3, 1)).reshape(b, hw0, in_channels)
        x = jnp.pad(x, ((0, 0), (0, 0), (0, _CPAD - in_channels)))
        x = x.astype(_COMPUTE_DTYPE)

        g = params["g"]
        in_specs = (
            [pl.BlockSpec((1, hw0, _CPAD), lambda i: (i, 0, 0)),
             pl.BlockSpec(params["w"].shape, lambda i: (0, 0, 0, 0)),
             pl.BlockSpec(params["scale"].shape, lambda i: (0, 0)),
             pl.BlockSpec(params["bias"].shape, lambda i: (0, 0))]
            + [pl.BlockSpec(gi.shape, lambda i: (0, 0, 0)) for gi in g]
            + [pl.BlockSpec(params["head_w"].shape, lambda i: (0, 0)),
               pl.BlockSpec(params["head_b"].shape, lambda i: (0, 0))]
        )
        out = pl.pallas_call(
            kernel,
            out_shape=jax.ShapeDtypeStruct((b, 1, _CPAD), jnp.float32),
            grid_spec=pltpu.PrefetchScalarGridSpec(
                num_scalar_prefetch=0,
                grid=(b,),
                in_specs=in_specs,
                out_specs=pl.BlockSpec((1, 1, _CPAD), lambda i: (i, 0, 0)),
            ),
            compiler_params=pltpu.CompilerParams(
                dimension_semantics=("parallel",)),
        )(x, params["w"], params["scale"], params["bias"], *g,
          params["head_w"], params["head_b"])
        return out.reshape(b, _CPAD)[:, :num_classes]

    return forward


# ---------------------------------------------------------------------------
# Parameters (packing hoisted out of the forward graph)
# ---------------------------------------------------------------------------

def init_params(key, num_classes=80, image_hw=(16, 16)):
    n_layers = len(_LAYER_CFG)
    w_all = np.zeros((n_layers, 9, _CPAD, _CPAD), np.float32)
    scale_all = np.zeros((n_layers, _CPAD), np.float32)   # zero-padded so
    bias_all = np.zeros((n_layers, _CPAD), np.float32)    # extra channels stay 0

    for l, (cin, cout, _stride) in enumerate(_LAYER_CFG):
        key, kw_, kg, kb, km, kv = jax.random.split(key, 6)
        w = 0.1 * jax.random.normal(kw_, (cout, cin, 3, 3), jnp.float32)
        gamma = 1.0 + 0.1 * jax.random.normal(kg, (cout,), jnp.float32)
        beta = 0.1 * jax.random.normal(kb, (cout,), jnp.float32)
        mean = 0.1 * jax.random.normal(km, (cout,), jnp.float32)
        var = jax.random.uniform(kv, (cout,), jnp.float32, 0.5, 1.5)
        # Eval-mode BatchNorm folded to per-channel scale/bias.
        scale = gamma / jnp.sqrt(var + _BN_EPS)
        bias = beta - mean * scale

        w_np = np.asarray(w)
        for kh in range(3):
            for kw in range(3):
                # (Cout, Cin) tap -> (Cin, Cout), zero-padded to (128, 128).
                w_all[l, kh * 3 + kw, :cin, :cout] = w_np[:, :, kh, kw].T
        scale_all[l, :cout] = np.asarray(scale)
        bias_all[l, :cout] = np.asarray(bias)

    c_last = _LAYER_CFG[-1][1]
    key, k1, k2 = jax.random.split(key, 3)
    lin_w = 0.05 * jax.random.normal(k1, (num_classes, c_last), jnp.float32)
    lin_b = 0.05 * jax.random.normal(k2, (num_classes,), jnp.float32)
    head_w = np.zeros((_CPAD, _CPAD), np.float32)
    head_w[:c_last, :num_classes] = np.asarray(lin_w).T    # x @ W.T + b
    head_b = np.zeros((1, _CPAD), np.float32)
    head_b[0, :num_classes] = np.asarray(lin_b)

    _sched, g_np = _build_schedule(*image_hw)
    return dict(
        w=jnp.asarray(w_all, _COMPUTE_DTYPE),
        scale=jnp.asarray(scale_all, jnp.float32),
        bias=jnp.asarray(bias_all, jnp.float32),
        head_w=jnp.asarray(head_w, _COMPUTE_DTYPE),
        head_b=jnp.asarray(head_b, jnp.float32),
        g=tuple(jnp.asarray(gm, _COMPUTE_DTYPE) for gm in g_np),
    )


# ---------------------------------------------------------------------------
# Main
# ---------------------------------------------------------------------------

if __name__ == "__main__":
    key = jax.random.PRNGKey(0)
    key, kx, kp = jax.random.split(key, 3)

    # First conv expects 32 input channels; 16x16 spatial -> 1x1 before pool.
    x = jax.random.normal(kx, (2, 32, 16, 16), jnp.float32)   # NCHW like PyTorch

    params = init_params(kp, num_classes=80, image_hw=(16, 16))
    forward = make_forward(num_classes=80, image_hw=(16, 16), in_channels=32)

    fwd = jax.jit(forward)
    out = jax.block_until_ready(fwd(x, params))

    assert out.shape == (2, 80), out.shape
    assert bool(jnp.all(jnp.isfinite(out)))
    print("KERNEL_OK")
</pallas_src>

<mosaic_0001>
module attributes {stable_mosaic.version = 11 : i64} {
  func.func @kernel(%arg0: i32, %arg1: memref<1x256x128xbf16, #tpu.memory_space<vmem>>, %arg2: memref<10x9x128x128xbf16, #tpu.memory_space<vmem>>, %arg3: memref<10x128xf32, #tpu.memory_space<vmem>>, %arg4: memref<10x128xf32, #tpu.memory_space<vmem>>, %arg5: memref<9x64x256xbf16, #tpu.memory_space<vmem>>, %arg6: memref<9x16x64xbf16, #tpu.memory_space<vmem>>, %arg7: memref<9x16x16xbf16, #tpu.memory_space<vmem>>, %arg8: memref<9x4x16xbf16, #tpu.memory_space<vmem>>, %arg9: memref<9x4x4xbf16, #tpu.memory_space<vmem>>, %arg10: memref<9x1x4xbf16, #tpu.memory_space<vmem>>, %arg11: memref<128x128xbf16, #tpu.memory_space<vmem>>, %arg12: memref<1x128xf32, #tpu.memory_space<vmem>>, %arg13: memref<1x1x128xf32, #tpu.memory_space<vmem>>) attributes {dimension_semantics = [#tpu.dimension_semantics<parallel>], iteration_bounds = array<i64: 2>, scalar_prefetch = 0 : i64, scratch_operands = 0 : i64, tpu.core_type = #tpu.core_type<tc>, window_params = [{transform_indices = @transform_0, window_bounds = array<i64: 1, 256, 128>}, {pipeline_mode = #tpu.pipeline_mode<synchronous>, transform_indices = @transform_1, window_bounds = array<i64: 10, 9, 128, 128>}, {pipeline_mode = #tpu.pipeline_mode<synchronous>, transform_indices = @transform_2, window_bounds = array<i64: 10, 128>}, {pipeline_mode = #tpu.pipeline_mode<synchronous>, transform_indices = @transform_3, window_bounds = array<i64: 10, 128>}, {pipeline_mode = #tpu.pipeline_mode<synchronous>, transform_indices = @transform_4, window_bounds = array<i64: 9, 64, 256>}, {pipeline_mode = #tpu.pipeline_mode<synchronous>, transform_indices = @transform_5, window_bounds = array<i64: 9, 16, 64>}, {pipeline_mode = #tpu.pipeline_mode<synchronous>, transform_indices = @transform_6, window_bounds = array<i64: 9, 16, 16>}, {pipeline_mode = #tpu.pipeline_mode<synchronous>, transform_indices = @transform_7, window_bounds = array<i64: 9, 4, 16>}, {pipeline_mode = #tpu.pipeline_mode<synchronous>, transform_indices = @transform_8, window_bounds = array<i64: 9, 4, 4>}, {pipeline_mode = #tpu.pipeline_mode<synchronous>, transform_indices = @transform_9, window_bounds = array<i64: 9, 1, 4>}, {pipeline_mode = #tpu.pipeline_mode<synchronous>, transform_indices = @transform_10, window_bounds = array<i64: 128, 128>}, {pipeline_mode = #tpu.pipeline_mode<synchronous>, transform_indices = @transform_11, window_bounds = array<i64: 1, 128>}, {transform_indices = @transform_12, window_bounds = array<i64: 1, 1, 128>}]} {
    %c0 = arith.constant 0 : index
    %c0_0 = arith.constant 0 : index
    %c0_1 = arith.constant 0 : index
    %0 = vector.load %arg1[%c0, %c0_0, %c0_1] : memref<1x256x128xbf16, #tpu.memory_space<vmem>>, vector<1x256x128xbf16>
    %1 = vector.shape_cast %0 : vector<1x256x128xbf16> to vector<256x128xbf16>
    %cst = arith.constant 0.000000e+00 : f32
    %2 = vector.broadcast %cst : f32 to vector<64x128xf32>
    %c0_2 = arith.constant 0 : index
    %c0_3 = arith.constant 0 : index
    %c0_4 = arith.constant 0 : index
    %3 = vector.load %arg5[%c0_2, %c0_3, %c0_4] : memref<9x64x256xbf16, #tpu.memory_space<vmem>>, vector<1x64x256xbf16>
    %4 = vector.shape_cast %3 : vector<1x64x256xbf16> to vector<64x256xbf16>
    %cst_5 = arith.constant dense<0.000000e+00> : vector<64x128xf32>
    %5 = tpu.matmul %4, %1, %cst_5 {dimension_numbers = #tpu.dot_dimension_numbers<[1], [0], [0], [1], [0, 0, 1, 1], [], []>} : vector<64x256xbf16>, vector<256x128xbf16>, vector<64x128xf32> -> vector<64x128xf32>
    %6 = arith.truncf %5 : vector<64x128xf32> to vector<64x128xbf16>
    %c0_6 = arith.constant 0 : index
    %c0_7 = arith.constant 0 : index
    %c0_8 = arith.constant 0 : index
    %c0_9 = arith.constant 0 : index
    %7 = vector.load %arg2[%c0_6, %c0_7, %c0_8, %c0_9] : memref<10x9x128x128xbf16, #tpu.memory_space<vmem>>, vector<1x1x128x128xbf16>
    %8 = vector.shape_cast %7 : vector<1x1x128x128xbf16> to vector<128x128xbf16>
    %cst_10 = arith.constant dense<0.000000e+00> : vector<64x128xf32>
    %9 = tpu.matmul %6, %8, %cst_10 {dimension_numbers = #tpu.dot_dimension_numbers<[1], [0], [0], [1], [0, 0, 1, 1], [], []>} : vector<64x128xbf16>, vector<128x128xbf16>, vector<64x128xf32> -> vector<64x128xf32>
    %10 = arith.addf %2, %9 : vector<64x128xf32>
    %c1 = arith.constant 1 : index
    %c0_11 = arith.constant 0 : index
    %c0_12 = arith.constant 0 : index
    %11 = vector.load %arg5[%c1, %c0_11, %c0_12] : memref<9x64x256xbf16, #tpu.memory_space<vmem>>, vector<1x64x256xbf16>
    %12 = vector.shape_cast %11 : vector<1x64x256xbf16> to vector<64x256xbf16>
    %cst_13 = arith.constant dense<0.000000e+00> : vector<64x128xf32>
    %13 = tpu.matmul %12, %1, %cst_13 {dimension_numbers = #tpu.dot_dimension_numbers<[1], [0], [0], [1], [0, 0, 1, 1], [], []>} : vector<64x256xbf16>, vector<256x128xbf16>, vector<64x128xf32> -> vector<64x128xf32>
    %14 = arith.truncf %13 : vector<64x128xf32> to vector<64x128xbf16>
    %c0_14 = arith.constant 0 : index
    %c1_15 = arith.constant 1 : index
    %c0_16 = arith.constant 0 : index
    %c0_17 = arith.constant 0 : index
    %15 = vector.load %arg2[%c0_14, %c1_15, %c0_16, %c0_17] : memref<10x9x128x128xbf16, #tpu.memory_space<vmem>>, vector<1x1x128x128xbf16>
    %16 = vector.shape_cast %15 : vector<1x1x128x128xbf16> to vector<128x128xbf16>
    %cst_18 = arith.constant dense<0.000000e+00> : vector<64x128xf32>
    %17 = tpu.matmul %14, %16, %cst_18 {dimension_numbers = #tpu.dot_dimension_numbers<[1], [0], [0], [1], [0, 0, 1, 1], [], []>} : vector<64x128xbf16>, vector<128x128xbf16>, vector<64x128xf32> -> vector<64x128xf32>
    %18 = arith.addf %10, %17 : vector<64x128xf32>
    %c2 = arith.constant 2 : index
    %c0_19 = arith.constant 0 : index
    %c0_20 = arith.constant 0 : index
    %19 = vector.load %arg5[%c2, %c0_19, %c0_20] : memref<9x64x256xbf16, #tpu.memory_space<vmem>>, vector<1x64x256xbf16>
    %20 = vector.shape_cast %19 : vector<1x64x256xbf16> to vector<64x256xbf16>
    %cst_21 = arith.constant dense<0.000000e+00> : vector<64x128xf32>
    %21 = tpu.matmul %20, %1, %cst_21 {dimension_numbers = #tpu.dot_dimension_numbers<[1], [0], [0], [1], [0, 0, 1, 1], [], []>} : vector<64x256xbf16>, vector<256x128xbf16>, vector<64x128xf32> -> vector<64x128xf32>
    %22 = arith.truncf %21 : vector<64x128xf32> to vector<64x128xbf16>
    %c0_22 = arith.constant 0 : index
    %c2_23 = arith.constant 2 : index
    %c0_24 = arith.constant 0 : index
    %c0_25 = arith.constant 0 : index
    %23 = vector.load %arg2[%c0_22, %c2_23, %c0_24, %c0_25] : memref<10x9x128x128xbf16, #tpu.memory_space<vmem>>, vector<1x1x128x128xbf16>
    %24 = vector.shape_cast %23 : vector<1x1x128x128xbf16> to vector<128x128xbf16>
    %cst_26 = arith.constant dense<0.000000e+00> : vector<64x128xf32>
    %25 = tpu.matmul %22, %24, %cst_26 {dimension_numbers = #tpu.dot_dimension_numbers<[1], [0], [0], [1], [0, 0, 1, 1], [], []>} : vector<64x128xbf16>, vector<128x128xbf16>, vector<64x128xf32> -> vector<64x128xf32>
    %26 = arith.addf %18, %25 : vector<64x128xf32>
    %c3 = arith.constant 3 : index
    %c0_27 = arith.constant 0 : index
    %c0_28 = arith.constant 0 : index
    %27 = vector.load %arg5[%c3, %c0_27, %c0_28] : memref<9x64x256xbf16, #tpu.memory_space<vmem>>, vector<1x64x256xbf16>
    %28 = vector.shape_cast %27 : vector<1x64x256xbf16> to vector<64x256xbf16>
    %cst_29 = arith.constant dense<0.000000e+00> : vector<64x128xf32>
    %29 = tpu.matmul %28, %1, %cst_29 {dimension_numbers = #tpu.dot_dimension_numbers<[1], [0], [0], [1], [0, 0, 1, 1], [], []>} : vector<64x256xbf16>, vector<256x128xbf16>, vector<64x128xf32> -> vector<64x128xf32>
    %30 = arith.truncf %29 : vector<64x128xf32> to vector<64x128xbf16>
    %c0_30 = arith.constant 0 : index
    %c3_31 = arith.constant 3 : index
    %c0_32 = arith.constant 0 : index
    %c0_33 = arith.constant 0 : index
    %31 = vector.load %arg2[%c0_30, %c3_31, %c0_32, %c0_33] : memref<10x9x128x128xbf16, #tpu.memory_space<vmem>>, vector<1x1x128x128xbf16>
    %32 = vector.shape_cast %31 : vector<1x1x128x128xbf16> to vector<128x128xbf16>
    %cst_34 = arith.constant dense<0.000000e+00> : vector<64x128xf32>
    %33 = tpu.matmul %30, %32, %cst_34 {dimension_numbers = #tpu.dot_dimension_numbers<[1], [0], [0], [1], [0, 0, 1, 1], [], []>} : vector<64x128xbf16>, vector<128x128xbf16>, vector<64x128xf32> -> vector<64x128xf32>
    %34 = arith.addf %26, %33 : vector<64x128xf32>
    %c4 = arith.constant 4 : index
    %c0_35 = arith.constant 0 : index
    %c0_36 = arith.constant 0 : index
    %35 = vector.load %arg5[%c4, %c0_35, %c0_36] : memref<9x64x256xbf16, #tpu.memory_space<vmem>>, vector<1x64x256xbf16>
    %36 = vector.shape_cast %35 : vector<1x64x256xbf16> to vector<64x256xbf16>
    %cst_37 = arith.constant dense<0.000000e+00> : vector<64x128xf32>
    %37 = tpu.matmul %36, %1, %cst_37 {dimension_numbers = #tpu.dot_dimension_numbers<[1], [0], [0], [1], [0, 0, 1, 1], [], []>} : vector<64x256xbf16>, vector<256x128xbf16>, vector<64x128xf32> -> vector<64x128xf32>
    %38 = arith.truncf %37 : vector<64x128xf32> to vector<64x128xbf16>
    %c0_38 = arith.constant 0 : index
    %c4_39 = arith.constant 4 : index
    %c0_40 = arith.constant 0 : index
    %c0_41 = arith.constant 0 : index
    %39 = vector.load %arg2[%c0_38, %c4_39, %c0_40, %c0_41] : memref<10x9x128x128xbf16, #tpu.memory_space<vmem>>, vector<1x1x128x128xbf16>
    %40 = vector.shape_cast %39 : vector<1x1x128x128xbf16> to vector<128x128xbf16>
    %cst_42 = arith.constant dense<0.000000e+00> : vector<64x128xf32>
    %41 = tpu.matmul %38, %40, %cst_42 {dimension_numbers = #tpu.dot_dimension_numbers<[1], [0], [0], [1], [0, 0, 1, 1], [], []>} : vector<64x128xbf16>, vector<128x128xbf16>, vector<64x128xf32> -> vector<64x128xf32>
    %42 = arith.addf %34, %41 : vector<64x128xf32>
    %c5 = arith.constant 5 : index
    %c0_43 = arith.constant 0 : index
    %c0_44 = arith.constant 0 : index
    %43 = vector.load %arg5[%c5, %c0_43, %c0_44] : memref<9x64x256xbf16, #tpu.memory_space<vmem>>, vector<1x64x256xbf16>
    %44 = vector.shape_cast %43 : vector<1x64x256xbf16> to vector<64x256xbf16>
    %cst_45 = arith.constant dense<0.000000e+00> : vector<64x128xf32>
    %45 = tpu.matmul %44, %1, %cst_45 {dimension_numbers = #tpu.dot_dimension_numbers<[1], [0], [0], [1], [0, 0, 1, 1], [], []>} : vector<64x256xbf16>, vector<256x128xbf16>, vector<64x128xf32> -> vector<64x128xf32>
    %46 = arith.truncf %45 : vector<64x128xf32> to vector<64x128xbf16>
    %c0_46 = arith.constant 0 : index
    %c5_47 = arith.constant 5 : index
    %c0_48 = arith.constant 0 : index
    %c0_49 = arith.constant 0 : index
    %47 = vector.load %arg2[%c0_46, %c5_47, %c0_48, %c0_49] : memref<10x9x128x128xbf16, #tpu.memory_space<vmem>>, vector<1x1x128x128xbf16>
    %48 = vector.shape_cast %47 : vector<1x1x128x128xbf16> to vector<128x128xbf16>
    %cst_50 = arith.constant dense<0.000000e+00> : vector<64x128xf32>
    %49 = tpu.matmul %46, %48, %cst_50 {dimension_numbers = #tpu.dot_dimension_numbers<[1], [0], [0], [1], [0, 0, 1, 1], [], []>} : vector<64x128xbf16>, vector<128x128xbf16>, vector<64x128xf32> -> vector<64x128xf32>
    %50 = arith.addf %42, %49 : vector<64x128xf32>
    %c6 = arith.constant 6 : index
    %c0_51 = arith.constant 0 : index
    %c0_52 = arith.constant 0 : index
    %51 = vector.load %arg5[%c6, %c0_51, %c0_52] : memref<9x64x256xbf16, #tpu.memory_space<vmem>>, vector<1x64x256xbf16>
    %52 = vector.shape_cast %51 : vector<1x64x256xbf16> to vector<64x256xbf16>
    %cst_53 = arith.constant dense<0.000000e+00> : vector<64x128xf32>
    %53 = tpu.matmul %52, %1, %cst_53 {dimension_numbers = #tpu.dot_dimension_numbers<[1], [0], [0], [1], [0, 0, 1, 1], [], []>} : vector<64x256xbf16>, vector<256x128xbf16>, vector<64x128xf32> -> vector<64x128xf32>
    %54 = arith.truncf %53 : vector<64x128xf32> to vector<64x128xbf16>
    %c0_54 = arith.constant 0 : index
    %c6_55 = arith.constant 6 : index
    %c0_56 = arith.constant 0 : index
    %c0_57 = arith.constant 0 : index
    %55 = vector.load %arg2[%c0_54, %c6_55, %c0_56, %c0_57] : memref<10x9x128x128xbf16, #tpu.memory_space<vmem>>, vector<1x1x128x128xbf16>
    %56 = vector.shape_cast %55 : vector<1x1x128x128xbf16> to vector<128x128xbf16>
    %cst_58 = arith.constant dense<0.000000e+00> : vector<64x128xf32>
    %57 = tpu.matmul %54, %56, %cst_58 {dimension_numbers = #tpu.dot_dimension_numbers<[1], [0], [0], [1], [0, 0, 1, 1], [], []>} : vector<64x128xbf16>, vector<128x128xbf16>, vector<64x128xf32> -> vector<64x128xf32>
    %58 = arith.addf %50, %57 : vector<64x128xf32>
    %c7 = arith.constant 7 : index
    %c0_59 = arith.constant 0 : index
    %c0_60 = arith.constant 0 : index
    %59 = vector.load %arg5[%c7, %c0_59, %c0_60] : memref<9x64x256xbf16, #tpu.memory_space<vmem>>, vector<1x64x256xbf16>
    %60 = vector.shape_cast %59 : vector<1x64x256xbf16> to vector<64x256xbf16>
    %cst_61 = arith.constant dense<0.000000e+00> : vector<64x128xf32>
    %61 = tpu.matmul %60, %1, %cst_61 {dimension_numbers = #tpu.dot_dimension_numbers<[1], [0], [0], [1], [0, 0, 1, 1], [], []>} : vector<64x256xbf16>, vector<256x128xbf16>, vector<64x128xf32> -> vector<64x128xf32>
    %62 = arith.truncf %61 : vector<64x128xf32> to vector<64x128xbf16>
    %c0_62 = arith.constant 0 : index
    %c7_63 = arith.constant 7 : index
    %c0_64 = arith.constant 0 : index
    %c0_65 = arith.constant 0 : index
    %63 = vector.load %arg2[%c0_62, %c7_63, %c0_64, %c0_65] : memref<10x9x128x128xbf16, #tpu.memory_space<vmem>>, vector<1x1x128x128xbf16>
    %64 = vector.shape_cast %63 : vector<1x1x128x128xbf16> to vector<128x128xbf16>
    %cst_66 = arith.constant dense<0.000000e+00> : vector<64x128xf32>
    %65 = tpu.matmul %62, %64, %cst_66 {dimension_numbers = #tpu.dot_dimension_numbers<[1], [0], [0], [1], [0, 0, 1, 1], [], []>} : vector<64x128xbf16>, vector<128x128xbf16>, vector<64x128xf32> -> vector<64x128xf32>
    %66 = arith.addf %58, %65 : vector<64x128xf32>
    %c8 = arith.constant 8 : index
    %c0_67 = arith.constant 0 : index
    %c0_68 = arith.constant 0 : index
    %67 = vector.load %arg5[%c8, %c0_67, %c0_68] : memref<9x64x256xbf16, #tpu.memory_space<vmem>>, vector<1x64x256xbf16>
    %68 = vector.shape_cast %67 : vector<1x64x256xbf16> to vector<64x256xbf16>
    %cst_69 = arith.constant dense<0.000000e+00> : vector<64x128xf32>
    %69 = tpu.matmul %68, %1, %cst_69 {dimension_numbers = #tpu.dot_dimension_numbers<[1], [0], [0], [1], [0, 0, 1, 1], [], []>} : vector<64x256xbf16>, vector<256x128xbf16>, vector<64x128xf32> -> vector<64x128xf32>
    %70 = arith.truncf %69 : vector<64x128xf32> to vector<64x128xbf16>
    %c0_70 = arith.constant 0 : index
    %c8_71 = arith.constant 8 : index
    %c0_72 = arith.constant 0 : index
    %c0_73 = arith.constant 0 : index
    %71 = vector.load %arg2[%c0_70, %c8_71, %c0_72, %c0_73] : memref<10x9x128x128xbf16, #tpu.memory_space<vmem>>, vector<1x1x128x128xbf16>
    %72 = vector.shape_cast %71 : vector<1x1x128x128xbf16> to vector<128x128xbf16>
    %cst_74 = arith.constant dense<0.000000e+00> : vector<64x128xf32>
    %73 = tpu.matmul %70, %72, %cst_74 {dimension_numbers = #tpu.dot_dimension_numbers<[1], [0], [0], [1], [0, 0, 1, 1], [], []>} : vector<64x128xbf16>, vector<128x128xbf16>, vector<64x128xf32> -> vector<64x128xf32>
    %74 = arith.addf %66, %73 : vector<64x128xf32>
    %c0_75 = arith.constant 0 : index
    %c0_76 = arith.constant 0 : index
    %75 = vector.load %arg3[%c0_75, %c0_76] : memref<10x128xf32, #tpu.memory_space<vmem>>, vector<1x128xf32>
    %76 = vector.shape_cast %75 : vector<1x128xf32> to vector<128xf32>
    %77 = vector.shape_cast %76 : vector<128xf32> to vector<1x128xf32>
    %78 = vector.broadcast %77 : vector<1x128xf32> to vector<64x128xf32>
    %79 = arith.mulf %74, %78 : vector<64x128xf32>
    %c0_77 = arith.constant 0 : index
    %c0_78 = arith.constant 0 : index
    %80 = vector.load %arg4[%c0_77, %c0_78] : memref<10x128xf32, #tpu.memory_space<vmem>>, vector<1x128xf32>
    %81 = vector.shape_cast %80 : vector<1x128xf32> to vector<128xf32>
    %82 = vector.shape_cast %81 : vector<128xf32> to vector<1x128xf32>
    %83 = vector.broadcast %82 : vector<1x128xf32> to vector<64x128xf32>
    %84 = arith.addf %79, %83 : vector<64x128xf32>
    %cst_79 = arith.constant 0.000000e+00 : f32
    %85 = vector.broadcast %cst_79 : f32 to vector<64x128xf32>
    %86 = arith.maximumf %84, %85 : vector<64x128xf32>
    %87 = arith.truncf %86 : vector<64x128xf32> to vector<64x128xbf16>
    %cst_80 = arith.constant 0.000000e+00 : f32
    %88 = vector.broadcast %cst_80 : f32 to vector<16x128xf32>
    %c0_81 = arith.constant 0 : index
    %c0_82 = arith.constant 0 : index
    %c0_83 = arith.constant 0 : index
    %89 = vector.load %arg6[%c0_81, %c0_82, %c0_83] : memref<9x16x64xbf16, #tpu.memory_space<vmem>>, vector<1x16x64xbf16>
    %90 = vector.shape_cast %89 : vector<1x16x64xbf16> to vector<16x64xbf16>
    %cst_84 = arith.constant dense<0.000000e+00> : vector<16x128xf32>
    %91 = tpu.matmul %90, %87, %cst_84 {dimension_numbers = #tpu.dot_dimension_numbers<[1], [0], [0], [1], [0, 0, 1, 1], [], []>} : vector<16x64xbf16>, vector<64x128xbf16>, vector<16x128xf32> -> vector<16x128xf32>
    %92 = arith.truncf %91 : vector<16x128xf32> to vector<16x128xbf16>
    %c1_85 = arith.constant 1 : index
    %c0_86 = arith.constant 0 : index
    %c0_87 = arith.constant 0 : index
    %c0_88 = arith.constant 0 : index
    %93 = vector.load %arg2[%c1_85, %c0_86, %c0_87, %c0_88] : memref<10x9x128x128xbf16, #tpu.memory_space<vmem>>, vector<1x1x128x128xbf16>
    %94 = vector.shape_cast %93 : vector<1x1x128x128xbf16> to vector<128x128xbf16>
    %cst_89 = arith.constant dense<0.000000e+00> : vector<16x128xf32>
    %95 = tpu.matmul %92, %94, %cst_89 {dimension_numbers = #tpu.dot_dimension_numbers<[1], [0], [0], [1], [0, 0, 1, 1], [], []>} : vector<16x128xbf16>, vector<128x128xbf16>, vector<16x128xf32> -> vector<16x128xf32>
    %96 = arith.addf %88, %95 : vector<16x128xf32>
    %c1_90 = arith.constant 1 : index
    %c0_91 = arith.constant 0 : index
    %c0_92 = arith.constant 0 : index
    %97 = vector.load %arg6[%c1_90, %c0_91, %c0_92] : memref<9x16x64xbf16, #tpu.memory_space<vmem>>, vector<1x16x64xbf16>
    %98 = vector.shape_cast %97 : vector<1x16x64xbf16> to vector<16x64xbf16>
    %cst_93 = arith.constant dense<0.000000e+00> : vector<16x128xf32>
    %99 = tpu.matmul %98, %87, %cst_93 {dimension_numbers = #tpu.dot_dimension_numbers<[1], [0], [0], [1], [0, 0, 1, 1], [], []>} : vector<16x64xbf16>, vector<64x128xbf16>, vector<16x128xf32> -> vector<16x128xf32>
    %100 = arith.truncf %99 : vector<16x128xf32> to vector<16x128xbf16>
    %c1_94 = arith.constant 1 : index
    %c1_95 = arith.constant 1 : index
    %c0_96 = arith.constant 0 : index
    %c0_97 = arith.constant 0 : index
    %101 = vector.load %arg2[%c1_94, %c1_95, %c0_96, %c0_97] : memref<10x9x128x128xbf16, #tpu.memory_space<vmem>>, vector<1x1x128x128xbf16>
    %102 = vector.shape_cast %101 : vector<1x1x128x128xbf16> to vector<128x128xbf16>
    %cst_98 = arith.constant dense<0.000000e+00> : vector<16x128xf32>
    %103 = tpu.matmul %100, %102, %cst_98 {dimension_numbers = #tpu.dot_dimension_numbers<[1], [0], [0], [1], [0, 0, 1, 1], [], []>} : vector<16x128xbf16>, vector<128x128xbf16>, vector<16x128xf32> -> vector<16x128xf32>
    %104 = arith.addf %96, %103 : vector<16x128xf32>
    %c2_99 = arith.constant 2 : index
    %c0_100 = arith.constant 0 : index
    %c0_101 = arith.constant 0 : index
    %105 = vector.load %arg6[%c2_99, %c0_100, %c0_101] : memref<9x16x64xbf16, #tpu.memory_space<vmem>>, vector<1x16x64xbf16>
    %106 = vector.shape_cast %105 : vector<1x16x64xbf16> to vector<16x64xbf16>
    %cst_102 = arith.constant dense<0.000000e+00> : vector<16x128xf32>
    %107 = tpu.matmul %106, %87, %cst_102 {dimension_numbers = #tpu.dot_dimension_numbers<[1], [0], [0], [1], [0, 0, 1, 1], [], []>} : vector<16x64xbf16>, vector<64x128xbf16>, vector<16x128xf32> -> vector<16x128xf32>
    %108 = arith.truncf %107 : vector<16x128xf32> to vector<16x128xbf16>
    %c1_103 = arith.constant 1 : index
    %c2_104 = arith.constant 2 : index
    %c0_105 = arith.constant 0 : index
    %c0_106 = arith.constant 0 : index
    %109 = vector.load %arg2[%c1_103, %c2_104, %c0_105, %c0_106] : memref<10x9x128x128xbf16, #tpu.memory_space<vmem>>, vector<1x1x128x128xbf16>
    %110 = vector.shape_cast %109 : vector<1x1x128x128xbf16> to vector<128x128xbf16>
    %cst_107 = arith.constant dense<0.000000e+00> : vector<16x128xf32>
    %111 = tpu.matmul %108, %110, %cst_107 {dimension_numbers = #tpu.dot_dimension_numbers<[1], [0], [0], [1], [0, 0, 1, 1], [], []>} : vector<16x128xbf16>, vector<128x128xbf16>, vector<16x128xf32> -> vector<16x128xf32>
    %112 = arith.addf %104, %111 : vector<16x128xf32>
    %c3_108 = arith.constant 3 : index
    %c0_109 = arith.constant 0 : index
    %c0_110 = arith.constant 0 : index
    %113 = vector.load %arg6[%c3_108, %c0_109, %c0_110] : memref<9x16x64xbf16, #tpu.memory_space<vmem>>, vector<1x16x64xbf16>
    %114 = vector.shape_cast %113 : vector<1x16x64xbf16> to vector<16x64xbf16>
    %cst_111 = arith.constant dense<0.000000e+00> : vector<16x128xf32>
    %115 = tpu.matmul %114, %87, %cst_111 {dimension_numbers = #tpu.dot_dimension_numbers<[1], [0], [0], [1], [0, 0, 1, 1], [], []>} : vector<16x64xbf16>, vector<64x128xbf16>, vector<16x128xf32> -> vector<16x128xf32>
    %116 = arith.truncf %115 : vector<16x128xf32> to vector<16x128xbf16>
    %c1_112 = arith.constant 1 : index
    %c3_113 = arith.constant 3 : index
    %c0_114 = arith.constant 0 : index
    %c0_115 = arith.constant 0 : index
    %117 = vector.load %arg2[%c1_112, %c3_113, %c0_114, %c0_115] : memref<10x9x128x128xbf16, #tpu.memory_space<vmem>>, vector<1x1x128x128xbf16>
    %118 = vector.shape_cast %117 : vector<1x1x128x128xbf16> to vector<128x128xbf16>
    %cst_116 = arith.constant dense<0.000000e+00> : vector<16x128xf32>
    %119 = tpu.matmul %116, %118, %cst_116 {dimension_numbers = #tpu.dot_dimension_numbers<[1], [0], [0], [1], [0, 0, 1, 1], [], []>} : vector<16x128xbf16>, vector<128x128xbf16>, vector<16x128xf32> -> vector<16x128xf32>
    %120 = arith.addf %112, %119 : vector<16x128xf32>
    %c4_117 = arith.constant 4 : index
    %c0_118 = arith.constant 0 : index
    %c0_119 = arith.constant 0 : index
    %121 = vector.load %arg6[%c4_117, %c0_118, %c0_119] : memref<9x16x64xbf16, #tpu.memory_space<vmem>>, vector<1x16x64xbf16>
    %122 = vector.shape_cast %121 : vector<1x16x64xbf16> to vector<16x64xbf16>
    %cst_120 = arith.constant dense<0.000000e+00> : vector<16x128xf32>
    %123 = tpu.matmul %122, %87, %cst_120 {dimension_numbers = #tpu.dot_dimension_numbers<[1], [0], [0], [1], [0, 0, 1, 1], [], []>} : vector<16x64xbf16>, vector<64x128xbf16>, vector<16x128xf32> -> vector<16x128xf32>
    %124 = arith.truncf %123 : vector<16x128xf32> to vector<16x128xbf16>
    %c1_121 = arith.constant 1 : index
    %c4_122 = arith.constant 4 : index
    %c0_123 = arith.constant 0 : index
    %c0_124 = arith.constant 0 : index
    %125 = vector.load %arg2[%c1_121, %c4_122, %c0_123, %c0_124] : memref<10x9x128x128xbf16, #tpu.memory_space<vmem>>, vector<1x1x128x128xbf16>
    %126 = vector.shape_cast %125 : vector<1x1x128x128xbf16> to vector<128x128xbf16>
    %cst_125 = arith.constant dense<0.000000e+00> : vector<16x128xf32>
    %127 = tpu.matmul %124, %126, %cst_125 {dimension_numbers = #tpu.dot_dimension_numbers<[1], [0], [0], [1], [0, 0, 1, 1], [], []>} : vector<16x128xbf16>, vector<128x128xbf16>, vector<16x128xf32> -> vector<16x128xf32>
    %128 = arith.addf %120, %127 : vector<16x128xf32>
    %c5_126 = arith.constant 5 : index
    %c0_127 = arith.constant 0 : index
    %c0_128 = arith.constant 0 : index
    %129 = vector.load %arg6[%c5_126, %c0_127, %c0_128] : memref<9x16x64xbf16, #tpu.memory_space<vmem>>, vector<1x16x64xbf16>
    %130 = vector.shape_cast %129 : vector<1x16x64xbf16> to vector<16x64xbf16>
    %cst_129 = arith.constant dense<0.000000e+00> : vector<16x128xf32>
    %131 = tpu.matmul %130, %87, %cst_129 {dimension_numbers = #tpu.dot_dimension_numbers<[1], [0], [0], [1], [0, 0, 1, 1], [], []>} : vector<16x64xbf16>, vector<64x128xbf16>, vector<16x128xf32> -> vector<16x128xf32>
    %132 = arith.truncf %131 : vector<16x128xf32> to vector<16x128xbf16>
    %c1_130 = arith.constant 1 : index
    %c5_131 = arith.constant 5 : index
    %c0_132 = arith.constant 0 : index
    %c0_133 = arith.constant 0 : index
    %133 = vector.load %arg2[%c1_130, %c5_131, %c0_132, %c0_133] : memref<10x9x128x128xbf16, #tpu.memory_space<vmem>>, vector<1x1x128x128xbf16>
    %134 = vector.shape_cast %133 : vector<1x1x128x128xbf16> to vector<128x128xbf16>
    %cst_134 = arith.constant dense<0.000000e+00> : vector<16x128xf32>
    %135 = tpu.matmul %132, %134, %cst_134 {dimension_numbers = #tpu.dot_dimension_numbers<[1], [0], [0], [1], [0, 0, 1, 1], [], []>} : vector<16x128xbf16>, vector<128x128xbf16>, vector<16x128xf32> -> vector<16x128xf32>
    %136 = arith.addf %128, %135 : vector<16x128xf32>
    %c6_135 = arith.constant 6 : index
    %c0_136 = arith.constant 0 : index
    %c0_137 = arith.constant 0 : index
    %137 = vector.load %arg6[%c6_135, %c0_136, %c0_137] : memref<9x16x64xbf16, #tpu.memory_space<vmem>>, vector<1x16x64xbf16>
    %138 = vector.shape_cast %137 : vector<1x16x64xbf16> to vector<16x64xbf16>
    %cst_138 = arith.constant dense<0.000000e+00> : vector<16x128xf32>
    %139 = tpu.matmul %138, %87, %cst_138 {dimension_numbers = #tpu.dot_dimension_numbers<[1], [0], [0], [1], [0, 0, 1, 1], [], []>} : vector<16x64xbf16>, vector<64x128xbf16>, vector<16x128xf32> -> vector<16x128xf32>
    %140 = arith.truncf %139 : vector<16x128xf32> to vector<16x128xbf16>
    %c1_139 = arith.constant 1 : index
    %c6_140 = arith.constant 6 : index
    %c0_141 = arith.constant 0 : index
    %c0_142 = arith.constant 0 : index
    %141 = vector.load %arg2[%c1_139, %c6_140, %c0_141, %c0_142] : memref<10x9x128x128xbf16, #tpu.memory_space<vmem>>, vector<1x1x128x128xbf16>
    %142 = vector.shape_cast %141 : vector<1x1x128x128xbf16> to vector<128x128xbf16>
    %cst_143 = arith.constant dense<0.000000e+00> : vector<16x128xf32>
    %143 = tpu.matmul %140, %142, %cst_143 {dimension_numbers = #tpu.dot_dimension_numbers<[1], [0], [0], [1], [0, 0, 1, 1], [], []>} : vector<16x128xbf16>, vector<128x128xbf16>, vector<16x128xf32> -> vector<16x128xf32>
    %144 = arith.addf %136, %143 : vector<16x128xf32>
    %c7_144 = arith.constant 7 : index
    %c0_145 = arith.constant 0 : index
    %c0_146 = arith.constant 0 : index
    %145 = vector.load %arg6[%c7_144, %c0_145, %c0_146] : memref<9x16x64xbf16, #tpu.memory_space<vmem>>, vector<1x16x64xbf16>
    %146 = vector.shape_cast %145 : vector<1x16x64xbf16> to vector<16x64xbf16>
    %cst_147 = arith.constant dense<0.000000e+00> : vector<16x128xf32>
    %147 = tpu.matmul %146, %87, %cst_147 {dimension_numbers = #tpu.dot_dimension_numbers<[1], [0], [0], [1], [0, 0, 1, 1], [], []>} : vector<16x64xbf16>, vector<64x128xbf16>, vector<16x128xf32> -> vector<16x128xf32>
    %148 = arith.truncf %147 : vector<16x128xf32> to vector<16x128xbf16>
    %c1_148 = arith.constant 1 : index
    %c7_149 = arith.constant 7 : index
    %c0_150 = arith.constant 0 : index
    %c0_151 = arith.constant 0 : index
    %149 = vector.load %arg2[%c1_148, %c7_149, %c0_150, %c0_151] : memref<10x9x128x128xbf16, #tpu.memory_space<vmem>>, vector<1x1x128x128xbf16>
    %150 = vector.shape_cast %149 : vector<1x1x128x128xbf16> to vector<128x128xbf16>
    %cst_152 = arith.constant dense<0.000000e+00> : vector<16x128xf32>
    %151 = tpu.matmul %148, %150, %cst_152 {dimension_numbers = #tpu.dot_dimension_numbers<[1], [0], [0], [1], [0, 0, 1, 1], [], []>} : vector<16x128xbf16>, vector<128x128xbf16>, vector<16x128xf32> -> vector<16x128xf32>
    %152 = arith.addf %144, %151 : vector<16x128xf32>
    %c8_153 = arith.constant 8 : index
    %c0_154 = arith.constant 0 : index
    %c0_155 = arith.constant 0 : index
    %153 = vector.load %arg6[%c8_153, %c0_154, %c0_155] : memref<9x16x64xbf16, #tpu.memory_space<vmem>>, vector<1x16x64xbf16>
    %154 = vector.shape_cast %153 : vector<1x16x64xbf16> to vector<16x64xbf16>
    %cst_156 = arith.constant dense<0.000000e+00> : vector<16x128xf32>
    %155 = tpu.matmul %154, %87, %cst_156 {dimension_numbers = #tpu.dot_dimension_numbers<[1], [0], [0], [1], [0, 0, 1, 1], [], []>} : vector<16x64xbf16>, vector<64x128xbf16>, vector<16x128xf32> -> vector<16x128xf32>
    %156 = arith.truncf %155 : vector<16x128xf32> to vector<16x128xbf16>
    %c1_157 = arith.constant 1 : index
    %c8_158 = arith.constant 8 : index
    %c0_159 = arith.constant 0 : index
    %c0_160 = arith.constant 0 : index
    %157 = vector.load %arg2[%c1_157, %c8_158, %c0_159, %c0_160] : memref<10x9x128x128xbf16, #tpu.memory_space<vmem>>, vector<1x1x128x128xbf16>
    %158 = vector.shape_cast %157 : vector<1x1x128x128xbf16> to vector<128x128xbf16>
    %cst_161 = arith.constant dense<0.000000e+00> : vector<16x128xf32>
    %159 = tpu.matmul %156, %158, %cst_161 {dimension_numbers = #tpu.dot_dimension_numbers<[1], [0], [0], [1], [0, 0, 1, 1], [], []>} : vector<16x128xbf16>, vector<128x128xbf16>, vector<16x128xf32> -> vector<16x128xf32>
    %160 = arith.addf %152, %159 : vector<16x128xf32>
    %c1_162 = arith.constant 1 : index
    %c0_163 = arith.constant 0 : index
    %161 = vector.load %arg3[%c1_162, %c0_163] : memref<10x128xf32, #tpu.memory_space<vmem>>, vector<1x128xf32>
    %162 = vector.shape_cast %161 : vector<1x128xf32> to vector<128xf32>
    %163 = vector.shape_cast %162 : vector<128xf32> to vector<1x128xf32>
    %164 = vector.broadcast %163 : vector<1x128xf32> to vector<16x128xf32>
    %165 = arith.mulf %160, %164 : vector<16x128xf32>
    %c1_164 = arith.constant 1 : index
    %c0_165 = arith.constant 0 : index
    %166 = vector.load %arg4[%c1_164, %c0_165] : memref<10x128xf32, #tpu.memory_space<vmem>>, vector<1x128xf32>
    %167 = vector.shape_cast %166 : vector<1x128xf32> to vector<128xf32>
    %168 = vector.shape_cast %167 : vector<128xf32> to vector<1x128xf32>
    %169 = vector.broadcast %168 : vector<1x128xf32> to vector<16x128xf32>
    %170 = arith.addf %165, %169 : vector<16x128xf32>
    %cst_166 = arith.constant 0.000000e+00 : f32
    %171 = vector.broadcast %cst_166 : f32 to vector<16x128xf32>
    %172 = arith.maximumf %170, %171 : vector<16x128xf32>
    %173 = arith.truncf %172 : vector<16x128xf32> to vector<16x128xbf16>
    %cst_167 = arith.constant 0.000000e+00 : f32
    %174 = vector.broadcast %cst_167 : f32 to vector<16x128xf32>
    %c0_168 = arith.constant 0 : index
    %c0_169 = arith.constant 0 : index
    %c0_170 = arith.constant 0 : index
    %175 = vector.load %arg7[%c0_168, %c0_169, %c0_170] : memref<9x16x16xbf16, #tpu.memory_space<vmem>>, vector<1x16x16xbf16>
    %176 = vector.shape_cast %175 : vector<1x16x16xbf16> to vector<16x16xbf16>
    %cst_171 = arith.constant dense<0.000000e+00> : vector<16x128xf32>
    %177 = tpu.matmul %176, %173, %cst_171 {dimension_numbers = #tpu.dot_dimension_numbers<[1], [0], [0], [1], [0, 0, 1, 1], [], []>} : vector<16x16xbf16>, vector<16x128xbf16>, vector<16x128xf32> -> vector<16x128xf32>
    %178 = arith.truncf %177 : vector<16x128xf32> to vector<16x128xbf16>
    %c2_172 = arith.constant 2 : index
    %c0_173 = arith.constant 0 : index
    %c0_174 = arith.constant 0 : index
    %c0_175 = arith.constant 0 : index
    %179 = vector.load %arg2[%c2_172, %c0_173, %c0_174, %c0_175] : memref<10x9x128x128xbf16, #tpu.memory_space<vmem>>, vector<1x1x128x128xbf16>
    %180 = vector.shape_cast %179 : vector<1x1x128x128xbf16> to vector<128x128xbf16>
    %cst_176 = arith.constant dense<0.000000e+00> : vector<16x128xf32>
    %181 = tpu.matmul %178, %180, %cst_176 {dimension_numbers = #tpu.dot_dimension_numbers<[1], [0], [0], [1], [0, 0, 1, 1], [], []>} : vector<16x128xbf16>, vector<128x128xbf16>, vector<16x128xf32> -> vector<16x128xf32>
    %182 = arith.addf %174, %181 : vector<16x128xf32>
    %c1_177 = arith.constant 1 : index
    %c0_178 = arith.constant 0 : index
    %c0_179 = arith.constant 0 : index
    %183 = vector.load %arg7[%c1_177, %c0_178, %c0_179] : memref<9x16x16xbf16, #tpu.memory_space<vmem>>, vector<1x16x16xbf16>
    %184 = vector.shape_cast %183 : vector<1x16x16xbf16> to vector<16x16xbf16>
    %cst_180 = arith.constant dense<0.000000e+00> : vector<16x128xf32>
    %185 = tpu.matmul %184, %173, %cst_180 {dimension_numbers = #tpu.dot_dimension_numbers<[1], [0], [0], [1], [0, 0, 1, 1], [], []>} : vector<16x16xbf16>, vector<16x128xbf16>, vector<16x128xf32> -> vector<16x128xf32>
    %186 = arith.truncf %185 : vector<16x128xf32> to vector<16x128xbf16>
    %c2_181 = arith.constant 2 : index
    %c1_182 = arith.constant 1 : index
    %c0_183 = arith.constant 0 : index
    %c0_184 = arith.constant 0 : index
    %187 = vector.load %arg2[%c2_181, %c1_182, %c0_183, %c0_184] : memref<10x9x128x128xbf16, #tpu.memory_space<vmem>>, vector<1x1x128x128xbf16>
    %188 = vector.shape_cast %187 : vector<1x1x128x128xbf16> to vector<128x128xbf16>
    %cst_185 = arith.constant dense<0.000000e+00> : vector<16x128xf32>
    %189 = tpu.matmul %186, %188, %cst_185 {dimension_numbers = #tpu.dot_dimension_numbers<[1], [0], [0], [1], [0, 0, 1, 1], [], []>} : vector<16x128xbf16>, vector<128x128xbf16>, vector<16x128xf32> -> vector<16x128xf32>
    %190 = arith.addf %182, %189 : vector<16x128xf32>
    %c2_186 = arith.constant 2 : index
    %c0_187 = arith.constant 0 : index
    %c0_188 = arith.constant 0 : index
    %191 = vector.load %arg7[%c2_186, %c0_187, %c0_188] : memref<9x16x16xbf16, #tpu.memory_space<vmem>>, vector<1x16x16xbf16>
    %192 = vector.shape_cast %191 : vector<1x16x16xbf16> to vector<16x16xbf16>
    %cst_189 = arith.constant dense<0.000000e+00> : vector<16x128xf32>
    %193 = tpu.matmul %192, %173, %cst_189 {dimension_numbers = #tpu.dot_dimension_numbers<[1], [0], [0], [1], [0, 0, 1, 1], [], []>} : vector<16x16xbf16>, vector<16x128xbf16>, vector<16x128xf32> -> vector<16x128xf32>
    %194 = arith.truncf %193 : vector<16x128xf32> to vector<16x128xbf16>
    %c2_190 = arith.constant 2 : index
    %c2_191 = arith.constant 2 : index
    %c0_192 = arith.constant 0 : index
    %c0_193 = arith.constant 0 : index
    %195 = vector.load %arg2[%c2_190, %c2_191, %c0_192, %c0_193] : memref<10x9x128x128xbf16, #tpu.memory_space<vmem>>, vector<1x1x128x128xbf16>
    %196 = vector.shape_cast %195 : vector<1x1x128x128xbf16> to vector<128x128xbf16>
    %cst_194 = arith.constant dense<0.000000e+00> : vector<16x128xf32>
    %197 = tpu.matmul %194, %196, %cst_194 {dimension_numbers = #tpu.dot_dimension_numbers<[1], [0], [0], [1], [0, 0, 1, 1], [], []>} : vector<16x128xbf16>, vector<128x128xbf16>, vector<16x128xf32> -> vector<16x128xf32>
    %198 = arith.addf %190, %197 : vector<16x128xf32>
    %c3_195 = arith.constant 3 : index
    %c0_196 = arith.constant 0 : index
    %c0_197 = arith.constant 0 : index
    %199 = vector.load %arg7[%c3_195, %c0_196, %c0_197] : memref<9x16x16xbf16, #tpu.memory_space<vmem>>, vector<1x16x16xbf16>
    %200 = vector.shape_cast %199 : vector<1x16x16xbf16> to vector<16x16xbf16>
    %cst_198 = arith.constant dense<0.000000e+00> : vector<16x128xf32>
    %201 = tpu.matmul %200, %173, %cst_198 {dimension_numbers = #tpu.dot_dimension_numbers<[1], [0], [0], [1], [0, 0, 1, 1], [], []>} : vector<16x16xbf16>, vector<16x128xbf16>, vector<16x128xf32> -> vector<16x128xf32>
    %202 = arith.truncf %201 : vector<16x128xf32> to vector<16x128xbf16>
    %c2_199 = arith.constant 2 : index
    %c3_200 = arith.constant 3 : index
    %c0_201 = arith.constant 0 : index
    %c0_202 = arith.constant 0 : index
    %203 = vector.load %arg2[%c2_199, %c3_200, %c0_201, %c0_202] : memref<10x9x128x128xbf16, #tpu.memory_space<vmem>>, vector<1x1x128x128xbf16>
    %204 = vector.shape_cast %203 : vector<1x1x128x128xbf16> to vector<128x128xbf16>
    %cst_203 = arith.constant dense<0.000000e+00> : vector<16x128xf32>
    %205 = tpu.matmul %202, %204, %cst_203 {dimension_numbers = #tpu.dot_dimension_numbers<[1], [0], [0], [1], [0, 0, 1, 1], [], []>} : vector<16x128xbf16>, vector<128x128xbf16>, vector<16x128xf32> -> vector<16x128xf32>
    %206 = arith.addf %198, %205 : vector<16x128xf32>
    %c2_204 = arith.constant 2 : index
    %c4_205 = arith.constant 4 : index
    %c0_206 = arith.constant 0 : index
    %c0_207 = arith.constant 0 : index
    %207 = vector.load %arg2[%c2_204, %c4_205, %c0_206, %c0_207] : memref<10x9x128x128xbf16, #tpu.memory_space<vmem>>, vector<1x1x128x128xbf16>
    %208 = vector.shape_cast %207 : vector<1x1x128x128xbf16> to vector<128x128xbf16>
    %cst_208 = arith.constant dense<0.000000e+00> : vector<16x128xf32>
    %209 = tpu.matmul %173, %208, %cst_208 {dimension_numbers = #tpu.dot_dimension_numbers<[1], [0], [0], [1], [0, 0, 1, 1], [], []>} : vector<16x128xbf16>, vector<128x128xbf16>, vector<16x128xf32> -> vector<16x128xf32>
    %210 = arith.addf %206, %209 : vector<16x128xf32>
    %c5_209 = arith.constant 5 : index
    %c0_210 = arith.constant 0 : index
    %c0_211 = arith.constant 0 : index
    %211 = vector.load %arg7[%c5_209, %c0_210, %c0_211] : memref<9x16x16xbf16, #tpu.memory_space<vmem>>, vector<1x16x16xbf16>
    %212 = vector.shape_cast %211 : vector<1x16x16xbf16> to vector<16x16xbf16>
    %cst_212 = arith.constant dense<0.000000e+00> : vector<16x128xf32>
    %213 = tpu.matmul %212, %173, %cst_212 {dimension_numbers = #tpu.dot_dimension_numbers<[1], [0], [0], [1], [0, 0, 1, 1], [], []>} : vector<16x16xbf16>, vector<16x128xbf16>, vector<16x128xf32> -> vector<16x128xf32>
    %214 = arith.truncf %213 : vector<16x128xf32> to vector<16x128xbf16>
    %c2_213 = arith.constant 2 : index
    %c5_214 = arith.constant 5 : index
    %c0_215 = arith.constant 0 : index
    %c0_216 = arith.constant 0 : index
    %215 = vector.load %arg2[%c2_213, %c5_214, %c0_215, %c0_216] : memref<10x9x128x128xbf16, #tpu.memory_space<vmem>>, vector<1x1x128x128xbf16>
    %216 = vector.shape_cast %215 : vector<1x1x128x128xbf16> to vector<128x128xbf16>
    %cst_217 = arith.constant dense<0.000000e+00> : vector<16x128xf32>
    %217 = tpu.matmul %214, %216, %cst_217 {dimension_numbers = #tpu.dot_dimension_numbers<[1], [0], [0], [1], [0, 0, 1, 1], [], []>} : vector<16x128xbf16>, vector<128x128xbf16>, vector<16x128xf32> -> vector<16x128xf32>
    %218 = arith.addf %210, %217 : vector<16x128xf32>
    %c6_218 = arith.constant 6 : index
    %c0_219 = arith.constant 0 : index
    %c0_220 = arith.constant 0 : index
    %219 = vector.load %arg7[%c6_218, %c0_219, %c0_220] : memref<9x16x16xbf16, #tpu.memory_space<vmem>>, vector<1x16x16xbf16>
    %220 = vector.shape_cast %219 : vector<1x16x16xbf16> to vector<16x16xbf16>
    %cst_221 = arith.constant dense<0.000000e+00> : vector<16x128xf32>
    %221 = tpu.matmul %220, %173, %cst_221 {dimension_numbers = #tpu.dot_dimension_numbers<[1], [0], [0], [1], [0, 0, 1, 1], [], []>} : vector<16x16xbf16>, vector<16x128xbf16>, vector<16x128xf32> -> vector<16x128xf32>
    %222 = arith.truncf %221 : vector<16x128xf32> to vector<16x128xbf16>
    %c2_222 = arith.constant 2 : index
    %c6_223 = arith.constant 6 : index
    %c0_224 = arith.constant 0 : index
    %c0_225 = arith.constant 0 : index
    %223 = vector.load %arg2[%c2_222, %c6_223, %c0_224, %c0_225] : memref<10x9x128x128xbf16, #tpu.memory_space<vmem>>, vector<1x1x128x128xbf16>
    %224 = vector.shape_cast %223 : vector<1x1x128x128xbf16> to vector<128x128xbf16>
    %cst_226 = arith.constant dense<0.000000e+00> : vector<16x128xf32>
    %225 = tpu.matmul %222, %224, %cst_226 {dimension_numbers = #tpu.dot_dimension_numbers<[1], [0], [0], [1], [0, 0, 1, 1], [], []>} : vector<16x128xbf16>, vector<128x128xbf16>, vector<16x128xf32> -> vector<16x128xf32>
    %226 = arith.addf %218, %225 : vector<16x128xf32>
    %c7_227 = arith.constant 7 : index
    %c0_228 = arith.constant 0 : index
    %c0_229 = arith.constant 0 : index
    %227 = vector.load %arg7[%c7_227, %c0_228, %c0_229] : memref<9x16x16xbf16, #tpu.memory_space<vmem>>, vector<1x16x16xbf16>
    %228 = vector.shape_cast %227 : vector<1x16x16xbf16> to vector<16x16xbf16>
    %cst_230 = arith.constant dense<0.000000e+00> : vector<16x128xf32>
    %229 = tpu.matmul %228, %173, %cst_230 {dimension_numbers = #tpu.dot_dimension_numbers<[1], [0], [0], [1], [0, 0, 1, 1], [], []>} : vector<16x16xbf16>, vector<16x128xbf16>, vector<16x128xf32> -> vector<16x128xf32>
    %230 = arith.truncf %229 : vector<16x128xf32> to vector<16x128xbf16>
    %c2_231 = arith.constant 2 : index
    %c7_232 = arith.constant 7 : index
    %c0_233 = arith.constant 0 : index
    %c0_234 = arith.constant 0 : index
    %231 = vector.load %arg2[%c2_231, %c7_232, %c0_233, %c0_234] : memref<10x9x128x128xbf16, #tpu.memory_space<vmem>>, vector<1x1x128x128xbf16>
    %232 = vector.shape_cast %231 : vector<1x1x128x128xbf16> to vector<128x128xbf16>
    %cst_235 = arith.constant dense<0.000000e+00> : vector<16x128xf32>
    %233 = tpu.matmul %230, %232, %cst_235 {dimension_numbers = #tpu.dot_dimension_numbers<[1], [0], [0], [1], [0, 0, 1, 1], [], []>} : vector<16x128xbf16>, vector<128x128xbf16>, vector<16x128xf32> -> vector<16x128xf32>
    %234 = arith.addf %226, %233 : vector<16x128xf32>
    %c8_236 = arith.constant 8 : index
    %c0_237 = arith.constant 0 : index
    %c0_238 = arith.constant 0 : index
    %235 = vector.load %arg7[%c8_236, %c0_237, %c0_238] : memref<9x16x16xbf16, #tpu.memory_space<vmem>>, vector<1x16x16xbf16>
    %236 = vector.shape_cast %235 : vector<1x16x16xbf16> to vector<16x16xbf16>
    %cst_239 = arith.constant dense<0.000000e+00> : vector<16x128xf32>
    %237 = tpu.matmul %236, %173, %cst_239 {dimension_numbers = #tpu.dot_dimension_numbers<[1], [0], [0], [1], [0, 0, 1, 1], [], []>} : vector<16x16xbf16>, vector<16x128xbf16>, vector<16x128xf32> -> vector<16x128xf32>
    %238 = arith.truncf %237 : vector<16x128xf32> to vector<16x128xbf16>
    %c2_240 = arith.constant 2 : index
    %c8_241 = arith.constant 8 : index
    %c0_242 = arith.constant 0 : index
    %c0_243 = arith.constant 0 : index
    %239 = vector.load %arg2[%c2_240, %c8_241, %c0_242, %c0_243] : memref<10x9x128x128xbf16, #tpu.memory_space<vmem>>, vector<1x1x128x128xbf16>
    %240 = vector.shape_cast %239 : vector<1x1x128x128xbf16> to vector<128x128xbf16>
    %cst_244 = arith.constant dense<0.000000e+00> : vector<16x128xf32>
    %241 = tpu.matmul %238, %240, %cst_244 {dimension_numbers = #tpu.dot_dimension_numbers<[1], [0], [0], [1], [0, 0, 1, 1], [], []>} : vector<16x128xbf16>, vector<128x128xbf16>, vector<16x128xf32> -> vector<16x128xf32>
    %242 = arith.addf %234, %241 : vector<16x128xf32>
    %c2_245 = arith.constant 2 : index
    %c0_246 = arith.constant 0 : index
    %243 = vector.load %arg3[%c2_245, %c0_246] : memref<10x128xf32, #tpu.memory_space<vmem>>, vector<1x128xf32>
    %244 = vector.shape_cast %243 : vector<1x128xf32> to vector<128xf32>
    %245 = vector.shape_cast %244 : vector<128xf32> to vector<1x128xf32>
    %246 = vector.broadcast %245 : vector<1x128xf32> to vector<16x128xf32>
    %247 = arith.mulf %242, %246 : vector<16x128xf32>
    %c2_247 = arith.constant 2 : index
    %c0_248 = arith.constant 0 : index
    %248 = vector.load %arg4[%c2_247, %c0_248] : memref<10x128xf32, #tpu.memory_space<vmem>>, vector<1x128xf32>
    %249 = vector.shape_cast %248 : vector<1x128xf32> to vector<128xf32>
    %250 = vector.shape_cast %249 : vector<128xf32> to vector<1x128xf32>
    %251 = vector.broadcast %250 : vector<1x128xf32> to vector<16x128xf32>
    %252 = arith.addf %247, %251 : vector<16x128xf32>
    %cst_249 = arith.constant 0.000000e+00 : f32
    %253 = vector.broadcast %cst_249 : f32 to vector<16x128xf32>
    %254 = arith.maximumf %252, %253 : vector<16x128xf32>
    %255 = arith.truncf %254 : vector<16x128xf32> to vector<16x128xbf16>
    %cst_250 = arith.constant 0.000000e+00 : f32
    %256 = vector.broadcast %cst_250 : f32 to vector<4x128xf32>
    %c0_251 = arith.constant 0 : index
    %c0_252 = arith.constant 0 : index
    %c0_253 = arith.constant 0 : index
    %257 = vector.load %arg8[%c0_251, %c0_252, %c0_253] : memref<9x4x16xbf16, #tpu.memory_space<vmem>>, vector<1x4x16xbf16>
    %258 = vector.shape_cast %257 : vector<1x4x16xbf16> to vector<4x16xbf16>
    %cst_254 = arith.constant dense<0.000000e+00> : vector<4x128xf32>
    %259 = tpu.matmul %258, %255, %cst_254 {dimension_numbers = #tpu.dot_dimension_numbers<[1], [0], [0], [1], [0, 0, 1, 1], [], []>} : vector<4x16xbf16>, vector<16x128xbf16>, vector<4x128xf32> -> vector<4x128xf32>
    %260 = arith.truncf %259 : vector<4x128xf32> to vector<4x128xbf16>
    %c3_255 = arith.constant 3 : index
    %c0_256 = arith.constant 0 : index
    %c0_257 = arith.constant 0 : index
    %c0_258 = arith.constant 0 : index
    %261 = vector.load %arg2[%c3_255, %c0_256, %c0_257, %c0_258] : memref<10x9x128x128xbf16, #tpu.memory_space<vmem>>, vector<1x1x128x128xbf16>
    %262 = vector.shape_cast %261 : vector<1x1x128x128xbf16> to vector<128x128xbf16>
    %cst_259 = arith.constant dense<0.000000e+00> : vector<4x128xf32>
    %263 = tpu.matmul %260, %262, %cst_259 {dimension_numbers = #tpu.dot_dimension_numbers<[1], [0], [0], [1], [0, 0, 1, 1], [], []>} : vector<4x128xbf16>, vector<128x128xbf16>, vector<4x128xf32> -> vector<4x128xf32>
    %264 = arith.addf %256, %263 : vector<4x128xf32>
    %c1_260 = arith.constant 1 : index
    %c0_261 = arith.constant 0 : index
    %c0_262 = arith.constant 0 : index
    %265 = vector.load %arg8[%c1_260, %c0_261, %c0_262] : memref<9x4x16xbf16, #tpu.memory_space<vmem>>, vector<1x4x16xbf16>
    %266 = vector.shape_cast %265 : vector<1x4x16xbf16> to vector<4x16xbf16>
    %cst_263 = arith.constant dense<0.000000e+00> : vector<4x128xf32>
    %267 = tpu.matmul %266, %255, %cst_263 {dimension_numbers = #tpu.dot_dimension_numbers<[1], [0], [0], [1], [0, 0, 1, 1], [], []>} : vector<4x16xbf16>, vector<16x128xbf16>, vector<4x128xf32> -> vector<4x128xf32>
    %268 = arith.truncf %267 : vector<4x128xf32> to vector<4x128xbf16>
    %c3_264 = arith.constant 3 : index
    %c1_265 = arith.constant 1 : index
    %c0_266 = arith.constant 0 : index
    %c0_267 = arith.constant 0 : index
    %269 = vector.load %arg2[%c3_264, %c1_265, %c0_266, %c0_267] : memref<10x9x128x128xbf16, #tpu.memory_space<vmem>>, vector<1x1x128x128xbf16>
    %270 = vector.shape_cast %269 : vector<1x1x128x128xbf16> to vector<128x128xbf16>
    %cst_268 = arith.constant dense<0.000000e+00> : vector<4x128xf32>
    %271 = tpu.matmul %268, %270, %cst_268 {dimension_numbers = #tpu.dot_dimension_numbers<[1], [0], [0], [1], [0, 0, 1, 1], [], []>} : vector<4x128xbf16>, vector<128x128xbf16>, vector<4x128xf32> -> vector<4x128xf32>
    %272 = arith.addf %264, %271 : vector<4x128xf32>
    %c2_269 = arith.constant 2 : index
    %c0_270 = arith.constant 0 : index
    %c0_271 = arith.constant 0 : index
    %273 = vector.load %arg8[%c2_269, %c0_270, %c0_271] : memref<9x4x16xbf16, #tpu.memory_space<vmem>>, vector<1x4x16xbf16>
    %274 = vector.shape_cast %273 : vector<1x4x16xbf16> to vector<4x16xbf16>
    %cst_272 = arith.constant dense<0.000000e+00> : vector<4x128xf32>
    %275 = tpu.matmul %274, %255, %cst_272 {dimension_numbers = #tpu.dot_dimension_numbers<[1], [0], [0], [1], [0, 0, 1, 1], [], []>} : vector<4x16xbf16>, vector<16x128xbf16>, vector<4x128xf32> -> vector<4x128xf32>
    %276 = arith.truncf %275 : vector<4x128xf32> to vector<4x128xbf16>
    %c3_273 = arith.constant 3 : index
    %c2_274 = arith.constant 2 : index
    %c0_275 = arith.constant 0 : index
    %c0_276 = arith.constant 0 : index
    %277 = vector.load %arg2[%c3_273, %c2_274, %c0_275, %c0_276] : memref<10x9x128x128xbf16, #tpu.memory_space<vmem>>, vector<1x1x128x128xbf16>
    %278 = vector.shape_cast %277 : vector<1x1x128x128xbf16> to vector<128x128xbf16>
    %cst_277 = arith.constant dense<0.000000e+00> : vector<4x128xf32>
    %279 = tpu.matmul %276, %278, %cst_277 {dimension_numbers = #tpu.dot_dimension_numbers<[1], [0], [0], [1], [0, 0, 1, 1], [], []>} : vector<4x128xbf16>, vector<128x128xbf16>, vector<4x128xf32> -> vector<4x128xf32>
    %280 = arith.addf %272, %279 : vector<4x128xf32>
    %c3_278 = arith.constant 3 : index
    %c0_279 = arith.constant 0 : index
    %c0_280 = arith.constant 0 : index
    %281 = vector.load %arg8[%c3_278, %c0_279, %c0_280] : memref<9x4x16xbf16, #tpu.memory_space<vmem>>, vector<1x4x16xbf16>
    %282 = vector.shape_cast %281 : vector<1x4x16xbf16> to vector<4x16xbf16>
    %cst_281 = arith.constant dense<0.000000e+00> : vector<4x128xf32>
    %283 = tpu.matmul %282, %255, %cst_281 {dimension_numbers = #tpu.dot_dimension_numbers<[1], [0], [0], [1], [0, 0, 1, 1], [], []>} : vector<4x16xbf16>, vector<16x128xbf16>, vector<4x128xf32> -> vector<4x128xf32>
    %284 = arith.truncf %283 : vector<4x128xf32> to vector<4x128xbf16>
    %c3_282 = arith.constant 3 : index
    %c3_283 = arith.constant 3 : index
    %c0_284 = arith.constant 0 : index
    %c0_285 = arith.constant 0 : index
    %285 = vector.load %arg2[%c3_282, %c3_283, %c0_284, %c0_285] : memref<10x9x128x128xbf16, #tpu.memory_space<vmem>>, vector<1x1x128x128xbf16>
    %286 = vector.shape_cast %285 : vector<1x1x128x128xbf16> to vector<128x128xbf16>
    %cst_286 = arith.constant dense<0.000000e+00> : vector<4x128xf32>
    %287 = tpu.matmul %284, %286, %cst_286 {dimension_numbers = #tpu.dot_dimension_numbers<[1], [0], [0], [1], [0, 0, 1, 1], [], []>} : vector<4x128xbf16>, vector<128x128xbf16>, vector<4x128xf32> -> vector<4x128xf32>
    %288 = arith.addf %280, %287 : vector<4x128xf32>
    %c4_287 = arith.constant 4 : index
    %c0_288 = arith.constant 0 : index
    %c0_289 = arith.constant 0 : index
    %289 = vector.load %arg8[%c4_287, %c0_288, %c0_289] : memref<9x4x16xbf16, #tpu.memory_space<vmem>>, vector<1x4x16xbf16>
    %290 = vector.shape_cast %289 : vector<1x4x16xbf16> to vector<4x16xbf16>
    %cst_290 = arith.constant dense<0.000000e+00> : vector<4x128xf32>
    %291 = tpu.matmul %290, %255, %cst_290 {dimension_numbers = #tpu.dot_dimension_numbers<[1], [0], [0], [1], [0, 0, 1, 1], [], []>} : vector<4x16xbf16>, vector<16x128xbf16>, vector<4x128xf32> -> vector<4x128xf32>
    %292 = arith.truncf %291 : vector<4x128xf32> to vector<4x128xbf16>
    %c3_291 = arith.constant 3 : index
    %c4_292 = arith.constant 4 : index
    %c0_293 = arith.constant 0 : index
    %c0_294 = arith.constant 0 : index
    %293 = vector.load %arg2[%c3_291, %c4_292, %c0_293, %c0_294] : memref<10x9x128x128xbf16, #tpu.memory_space<vmem>>, vector<1x1x128x128xbf16>
    %294 = vector.shape_cast %293 : vector<1x1x128x128xbf16> to vector<128x128xbf16>
    %cst_295 = arith.constant dense<0.000000e+00> : vector<4x128xf32>
    %295 = tpu.matmul %292, %294, %cst_295 {dimension_numbers = #tpu.dot_dimension_numbers<[1], [0], [0], [1], [0, 0, 1, 1], [], []>} : vector<4x128xbf16>, vector<128x128xbf16>, vector<4x128xf32> -> vector<4x128xf32>
    %296 = arith.addf %288, %295 : vector<4x128xf32>
    %c5_296 = arith.constant 5 : index
    %c0_297 = arith.constant 0 : index
    %c0_298 = arith.constant 0 : index
    %297 = vector.load %arg8[%c5_296, %c0_297, %c0_298] : memref<9x4x16xbf16, #tpu.memory_space<vmem>>, vector<1x4x16xbf16>
    %298 = vector.shape_cast %297 : vector<1x4x16xbf16> to vector<4x16xbf16>
    %cst_299 = arith.constant dense<0.000000e+00> : vector<4x128xf32>
    %299 = tpu.matmul %298, %255, %cst_299 {dimension_numbers = #tpu.dot_dimension_numbers<[1], [0], [0], [1], [0, 0, 1, 1], [], []>} : vector<4x16xbf16>, vector<16x128xbf16>, vector<4x128xf32> -> vector<4x128xf32>
    %300 = arith.truncf %299 : vector<4x128xf32> to vector<4x128xbf16>
    %c3_300 = arith.constant 3 : index
    %c5_301 = arith.constant 5 : index
    %c0_302 = arith.constant 0 : index
    %c0_303 = arith.constant 0 : index
    %301 = vector.load %arg2[%c3_300, %c5_301, %c0_302, %c0_303] : memref<10x9x128x128xbf16, #tpu.memory_space<vmem>>, vector<1x1x128x128xbf16>
    %302 = vector.shape_cast %301 : vector<1x1x128x128xbf16> to vector<128x128xbf16>
    %cst_304 = arith.constant dense<0.000000e+00> : vector<4x128xf32>
    %303 = tpu.matmul %300, %302, %cst_304 {dimension_numbers = #tpu.dot_dimension_numbers<[1], [0], [0], [1], [0, 0, 1, 1], [], []>} : vector<4x128xbf16>, vector<128x128xbf16>, vector<4x128xf32> -> vector<4x128xf32>
    %304 = arith.addf %296, %303 : vector<4x128xf32>
    %c6_305 = arith.constant 6 : index
    %c0_306 = arith.constant 0 : index
    %c0_307 = arith.constant 0 : index
    %305 = vector.load %arg8[%c6_305, %c0_306, %c0_307] : memref<9x4x16xbf16, #tpu.memory_space<vmem>>, vector<1x4x16xbf16>
    %306 = vector.shape_cast %305 : vector<1x4x16xbf16> to vector<4x16xbf16>
    %cst_308 = arith.constant dense<0.000000e+00> : vector<4x128xf32>
    %307 = tpu.matmul %306, %255, %cst_308 {dimension_numbers = #tpu.dot_dimension_numbers<[1], [0], [0], [1], [0, 0, 1, 1], [], []>} : vector<4x16xbf16>, vector<16x128xbf16>, vector<4x128xf32> -> vector<4x128xf32>
    %308 = arith.truncf %307 : vector<4x128xf32> to vector<4x128xbf16>
    %c3_309 = arith.constant 3 : index
    %c6_310 = arith.constant 6 : index
    %c0_311 = arith.constant 0 : index
    %c0_312 = arith.constant 0 : index
    %309 = vector.load %arg2[%c3_309, %c6_310, %c0_311, %c0_312] : memref<10x9x128x128xbf16, #tpu.memory_space<vmem>>, vector<1x1x128x128xbf16>
    %310 = vector.shape_cast %309 : vector<1x1x128x128xbf16> to vector<128x128xbf16>
    %cst_313 = arith.constant dense<0.000000e+00> : vector<4x128xf32>
    %311 = tpu.matmul %308, %310, %cst_313 {dimension_numbers = #tpu.dot_dimension_numbers<[1], [0], [0], [1], [0, 0, 1, 1], [], []>} : vector<4x128xbf16>, vector<128x128xbf16>, vector<4x128xf32> -> vector<4x128xf32>
    %312 = arith.addf %304, %311 : vector<4x128xf32>
    %c7_314 = arith.constant 7 : index
    %c0_315 = arith.constant 0 : index
    %c0_316 = arith.constant 0 : index
    %313 = vector.load %arg8[%c7_314, %c0_315, %c0_316] : memref<9x4x16xbf16, #tpu.memory_space<vmem>>, vector<1x4x16xbf16>
    %314 = vector.shape_cast %313 : vector<1x4x16xbf16> to vector<4x16xbf16>
    %cst_317 = arith.constant dense<0.000000e+00> : vector<4x128xf32>
    %315 = tpu.matmul %314, %255, %cst_317 {dimension_numbers = #tpu.dot_dimension_numbers<[1], [0], [0], [1], [0, 0, 1, 1], [], []>} : vector<4x16xbf16>, vector<16x128xbf16>, vector<4x128xf32> -> vector<4x128xf32>
    %316 = arith.truncf %315 : vector<4x128xf32> to vector<4x128xbf16>
    %c3_318 = arith.constant 3 : index
    %c7_319 = arith.constant 7 : index
    %c0_320 = arith.constant 0 : index
    %c0_321 = arith.constant 0 : index
    %317 = vector.load %arg2[%c3_318, %c7_319, %c0_320, %c0_321] : memref<10x9x128x128xbf16, #tpu.memory_space<vmem>>, vector<1x1x128x128xbf16>
    %318 = vector.shape_cast %317 : vector<1x1x128x128xbf16> to vector<128x128xbf16>
    %cst_322 = arith.constant dense<0.000000e+00> : vector<4x128xf32>
    %319 = tpu.matmul %316, %318, %cst_322 {dimension_numbers = #tpu.dot_dimension_numbers<[1], [0], [0], [1], [0, 0, 1, 1], [], []>} : vector<4x128xbf16>, vector<128x128xbf16>, vector<4x128xf32> -> vector<4x128xf32>
    %320 = arith.addf %312, %319 : vector<4x128xf32>
    %c8_323 = arith.constant 8 : index
    %c0_324 = arith.constant 0 : index
    %c0_325 = arith.constant 0 : index
    %321 = vector.load %arg8[%c8_323, %c0_324, %c0_325] : memref<9x4x16xbf16, #tpu.memory_space<vmem>>, vector<1x4x16xbf16>
    %322 = vector.shape_cast %321 : vector<1x4x16xbf16> to vector<4x16xbf16>
    %cst_326 = arith.constant dense<0.000000e+00> : vector<4x128xf32>
    %323 = tpu.matmul %322, %255, %cst_326 {dimension_numbers = #tpu.dot_dimension_numbers<[1], [0], [0], [1], [0, 0, 1, 1], [], []>} : vector<4x16xbf16>, vector<16x128xbf16>, vector<4x128xf32> -> vector<4x128xf32>
    %324 = arith.truncf %323 : vector<4x128xf32> to vector<4x128xbf16>
    %c3_327 = arith.constant 3 : index
    %c8_328 = arith.constant 8 : index
    %c0_329 = arith.constant 0 : index
    %c0_330 = arith.constant 0 : index
    %325 = vector.load %arg2[%c3_327, %c8_328, %c0_329, %c0_330] : memref<10x9x128x128xbf16, #tpu.memory_space<vmem>>, vector<1x1x128x128xbf16>
    %326 = vector.shape_cast %325 : vector<1x1x128x128xbf16> to vector<128x128xbf16>
    %cst_331 = arith.constant dense<0.000000e+00> : vector<4x128xf32>
    %327 = tpu.matmul %324, %326, %cst_331 {dimension_numbers = #tpu.dot_dimension_numbers<[1], [0], [0], [1], [0, 0, 1, 1], [], []>} : vector<4x128xbf16>, vector<128x128xbf16>, vector<4x128xf32> -> vector<4x128xf32>
    %328 = arith.addf %320, %327 : vector<4x128xf32>
    %c3_332 = arith.constant 3 : index
    %c0_333 = arith.constant 0 : index
    %329 = vector.load %arg3[%c3_332, %c0_333] : memref<10x128xf32, #tpu.memory_space<vmem>>, vector<1x128xf32>
    %330 = vector.shape_cast %329 : vector<1x128xf32> to vector<128xf32>
    %331 = vector.shape_cast %330 : vector<128xf32> to vector<1x128xf32>
    %332 = vector.broadcast %331 : vector<1x128xf32> to vector<4x128xf32>
    %333 = arith.mulf %328, %332 : vector<4x128xf32>
    %c3_334 = arith.constant 3 : index
    %c0_335 = arith.constant 0 : index
    %334 = vector.load %arg4[%c3_334, %c0_335] : memref<10x128xf32, #tpu.memory_space<vmem>>, vector<1x128xf32>
    %335 = vector.shape_cast %334 : vector<1x128xf32> to vector<128xf32>
    %336 = vector.shape_cast %335 : vector<128xf32> to vector<1x128xf32>
    %337 = vector.broadcast %336 : vector<1x128xf32> to vector<4x128xf32>
    %338 = arith.addf %333, %337 : vector<4x128xf32>
    %cst_336 = arith.constant 0.000000e+00 : f32
    %339 = vector.broadcast %cst_336 : f32 to vector<4x128xf32>
    %340 = arith.maximumf %338, %339 : vector<4x128xf32>
    %341 = arith.truncf %340 : vector<4x128xf32> to vector<4x128xbf16>
    %cst_337 = arith.constant 0.000000e+00 : f32
    %342 = vector.broadcast %cst_337 : f32 to vector<4x128xf32>
    %c0_338 = arith.constant 0 : index
    %c0_339 = arith.constant 0 : index
    %c0_340 = arith.constant 0 : index
    %343 = vector.load %arg9[%c0_338, %c0_339, %c0_340] : memref<9x4x4xbf16, #tpu.memory_space<vmem>>, vector<1x4x4xbf16>
    %344 = vector.shape_cast %343 : vector<1x4x4xbf16> to vector<4x4xbf16>
    %cst_341 = arith.constant dense<0.000000e+00> : vector<4x128xf32>
    %345 = tpu.matmul %344, %341, %cst_341 {dimension_numbers = #tpu.dot_dimension_numbers<[1], [0], [0], [1], [0, 0, 1, 1], [], []>} : vector<4x4xbf16>, vector<4x128xbf16>, vector<4x128xf32> -> vector<4x128xf32>
    %346 = arith.truncf %345 : vector<4x128xf32> to vector<4x128xbf16>
    %c4_342 = arith.constant 4 : index
    %c0_343 = arith.constant 0 : index
    %c0_344 = arith.constant 0 : index
    %c0_345 = arith.constant 0 : index
    %347 = vector.load %arg2[%c4_342, %c0_343, %c0_344, %c0_345] : memref<10x9x128x128xbf16, #tpu.memory_space<vmem>>, vector<1x1x128x128xbf16>
    %348 = vector.shape_cast %347 : vector<1x1x128x128xbf16> to vector<128x128xbf16>
    %cst_346 = arith.constant dense<0.000000e+00> : vector<4x128xf32>
    %349 = tpu.matmul %346, %348, %cst_346 {dimension_numbers = #tpu.dot_dimension_numbers<[1], [0], [0], [1], [0, 0, 1, 1], [], []>} : vector<4x128xbf16>, vector<128x128xbf16>, vector<4x128xf32> -> vector<4x128xf32>
    %350 = arith.addf %342, %349 : vector<4x128xf32>
    %c1_347 = arith.constant 1 : index
    %c0_348 = arith.constant 0 : index
    %c0_349 = arith.constant 0 : index
    %351 = vector.load %arg9[%c1_347, %c0_348, %c0_349] : memref<9x4x4xbf16, #tpu.memory_space<vmem>>, vector<1x4x4xbf16>
    %352 = vector.shape_cast %351 : vector<1x4x4xbf16> to vector<4x4xbf16>
    %cst_350 = arith.constant dense<0.000000e+00> : vector<4x128xf32>
    %353 = tpu.matmul %352, %341, %cst_350 {dimension_numbers = #tpu.dot_dimension_numbers<[1], [0], [0], [1], [0, 0, 1, 1], [], []>} : vector<4x4xbf16>, vector<4x128xbf16>, vector<4x128xf32> -> vector<4x128xf32>
    %354 = arith.truncf %353 : vector<4x128xf32> to vector<4x128xbf16>
    %c4_351 = arith.constant 4 : index
    %c1_352 = arith.constant 1 : index
    %c0_353 = arith.constant 0 : index
    %c0_354 = arith.constant 0 : index
    %355 = vector.load %arg2[%c4_351, %c1_352, %c0_353, %c0_354] : memref<10x9x128x128xbf16, #tpu.memory_space<vmem>>, vector<1x1x128x128xbf16>
    %356 = vector.shape_cast %355 : vector<1x1x128x128xbf16> to vector<128x128xbf16>
    %cst_355 = arith.constant dense<0.000000e+00> : vector<4x128xf32>
    %357 = tpu.matmul %354, %356, %cst_355 {dimension_numbers = #tpu.dot_dimension_numbers<[1], [0], [0], [1], [0, 0, 1, 1], [], []>} : vector<4x128xbf16>, vector<128x128xbf16>, vector<4x128xf32> -> vector<4x128xf32>
    %358 = arith.addf %350, %357 : vector<4x128xf32>
    %c2_356 = arith.constant 2 : index
    %c0_357 = arith.constant 0 : index
    %c0_358 = arith.constant 0 : index
    %359 = vector.load %arg9[%c2_356, %c0_357, %c0_358] : memref<9x4x4xbf16, #tpu.memory_space<vmem>>, vector<1x4x4xbf16>
    %360 = vector.shape_cast %359 : vector<1x4x4xbf16> to vector<4x4xbf16>
    %cst_359 = arith.constant dense<0.000000e+00> : vector<4x128xf32>
    %361 = tpu.matmul %360, %341, %cst_359 {dimension_numbers = #tpu.dot_dimension_numbers<[1], [0], [0], [1], [0, 0, 1, 1], [], []>} : vector<4x4xbf16>, vector<4x128xbf16>, vector<4x128xf32> -> vector<4x128xf32>
    %362 = arith.truncf %361 : vector<4x128xf32> to vector<4x128xbf16>
    %c4_360 = arith.constant 4 : index
    %c2_361 = arith.constant 2 : index
    %c0_362 = arith.constant 0 : index
    %c0_363 = arith.constant 0 : index
    %363 = vector.load %arg2[%c4_360, %c2_361, %c0_362, %c0_363] : memref<10x9x128x128xbf16, #tpu.memory_space<vmem>>, vector<1x1x128x128xbf16>
    %364 = vector.shape_cast %363 : vector<1x1x128x128xbf16> to vector<128x128xbf16>
    %cst_364 = arith.constant dense<0.000000e+00> : vector<4x128xf32>
    %365 = tpu.matmul %362, %364, %cst_364 {dimension_numbers = #tpu.dot_dimension_numbers<[1], [0], [0], [1], [0, 0, 1, 1], [], []>} : vector<4x128xbf16>, vector<128x128xbf16>, vector<4x128xf32> -> vector<4x128xf32>
    %366 = arith.addf %358, %365 : vector<4x128xf32>
    %c3_365 = arith.constant 3 : index
    %c0_366 = arith.constant 0 : index
    %c0_367 = arith.constant 0 : index
    %367 = vector.load %arg9[%c3_365, %c0_366, %c0_367] : memref<9x4x4xbf16, #tpu.memory_space<vmem>>, vector<1x4x4xbf16>
    %368 = vector.shape_cast %367 : vector<1x4x4xbf16> to vector<4x4xbf16>
    %cst_368 = arith.constant dense<0.000000e+00> : vector<4x128xf32>
    %369 = tpu.matmul %368, %341, %cst_368 {dimension_numbers = #tpu.dot_dimension_numbers<[1], [0], [0], [1], [0, 0, 1, 1], [], []>} : vector<4x4xbf16>, vector<4x128xbf16>, vector<4x128xf32> -> vector<4x128xf32>
    %370 = arith.truncf %369 : vector<4x128xf32> to vector<4x128xbf16>
    %c4_369 = arith.constant 4 : index
    %c3_370 = arith.constant 3 : index
    %c0_371 = arith.constant 0 : index
    %c0_372 = arith.constant 0 : index
    %371 = vector.load %arg2[%c4_369, %c3_370, %c0_371, %c0_372] : memref<10x9x128x128xbf16, #tpu.memory_space<vmem>>, vector<1x1x128x128xbf16>
    %372 = vector.shape_cast %371 : vector<1x1x128x128xbf16> to vector<128x128xbf16>
    %cst_373 = arith.constant dense<0.000000e+00> : vector<4x128xf32>
    %373 = tpu.matmul %370, %372, %cst_373 {dimension_numbers = #tpu.dot_dimension_numbers<[1], [0], [0], [1], [0, 0, 1, 1], [], []>} : vector<4x128xbf16>, vector<128x128xbf16>, vector<4x128xf32> -> vector<4x128xf32>
    %374 = arith.addf %366, %373 : vector<4x128xf32>
    %c4_374 = arith.constant 4 : index
    %c4_375 = arith.constant 4 : index
    %c0_376 = arith.constant 0 : index
    %c0_377 = arith.constant 0 : index
    %375 = vector.load %arg2[%c4_374, %c4_375, %c0_376, %c0_377] : memref<10x9x128x128xbf16, #tpu.memory_space<vmem>>, vector<1x1x128x128xbf16>
    %376 = vector.shape_cast %375 : vector<1x1x128x128xbf16> to vector<128x128xbf16>
    %cst_378 = arith.constant dense<0.000000e+00> : vector<4x128xf32>
    %377 = tpu.matmul %341, %376, %cst_378 {dimension_numbers = #tpu.dot_dimension_numbers<[1], [0], [0], [1], [0, 0, 1, 1], [], []>} : vector<4x128xbf16>, vector<128x128xbf16>, vector<4x128xf32> -> vector<4x128xf32>
    %378 = arith.addf %374, %377 : vector<4x128xf32>
    %c5_379 = arith.constant 5 : index
    %c0_380 = arith.constant 0 : index
    %c0_381 = arith.constant 0 : index
    %379 = vector.load %arg9[%c5_379, %c0_380, %c0_381] : memref<9x4x4xbf16, #tpu.memory_space<vmem>>, vector<1x4x4xbf16>
    %380 = vector.shape_cast %379 : vector<1x4x4xbf16> to vector<4x4xbf16>
    %cst_382 = arith.constant dense<0.000000e+00> : vector<4x128xf32>
    %381 = tpu.matmul %380, %341, %cst_382 {dimension_numbers = #tpu.dot_dimension_numbers<[1], [0], [0], [1], [0, 0, 1, 1], [], []>} : vector<4x4xbf16>, vector<4x128xbf16>, vector<4x128xf32> -> vector<4x128xf32>
    %382 = arith.truncf %381 : vector<4x128xf32> to vector<4x128xbf16>
    %c4_383 = arith.constant 4 : index
    %c5_384 = arith.constant 5 : index
    %c0_385 = arith.constant 0 : index
    %c0_386 = arith.constant 0 : index
    %383 = vector.load %arg2[%c4_383, %c5_384, %c0_385, %c0_386] : memref<10x9x128x128xbf16, #tpu.memory_space<vmem>>, vector<1x1x128x128xbf16>
    %384 = vector.shape_cast %383 : vector<1x1x128x128xbf16> to vector<128x128xbf16>
    %cst_387 = arith.constant dense<0.000000e+00> : vector<4x128xf32>
    %385 = tpu.matmul %382, %384, %cst_387 {dimension_numbers = #tpu.dot_dimension_numbers<[1], [0], [0], [1], [0, 0, 1, 1], [], []>} : vector<4x128xbf16>, vector<128x128xbf16>, vector<4x128xf32> -> vector<4x128xf32>
    %386 = arith.addf %378, %385 : vector<4x128xf32>
    %c6_388 = arith.constant 6 : index
    %c0_389 = arith.constant 0 : index
    %c0_390 = arith.constant 0 : index
    %387 = vector.load %arg9[%c6_388, %c0_389, %c0_390] : memref<9x4x4xbf16, #tpu.memory_space<vmem>>, vector<1x4x4xbf16>
    %388 = vector.shape_cast %387 : vector<1x4x4xbf16> to vector<4x4xbf16>
    %cst_391 = arith.constant dense<0.000000e+00> : vector<4x128xf32>
    %389 = tpu.matmul %388, %341, %cst_391 {dimension_numbers = #tpu.dot_dimension_numbers<[1], [0], [0], [1], [0, 0, 1, 1], [], []>} : vector<4x4xbf16>, vector<4x128xbf16>, vector<4x128xf32> -> vector<4x128xf32>
    %390 = arith.truncf %389 : vector<4x128xf32> to vector<4x128xbf16>
    %c4_392 = arith.constant 4 : index
    %c6_393 = arith.constant 6 : index
    %c0_394 = arith.constant 0 : index
    %c0_395 = arith.constant 0 : index
    %391 = vector.load %arg2[%c4_392, %c6_393, %c0_394, %c0_395] : memref<10x9x128x128xbf16, #tpu.memory_space<vmem>>, vector<1x1x128x128xbf16>
    %392 = vector.shape_cast %391 : vector<1x1x128x128xbf16> to vector<128x128xbf16>
    %cst_396 = arith.constant dense<0.000000e+00> : vector<4x128xf32>
    %393 = tpu.matmul %390, %392, %cst_396 {dimension_numbers = #tpu.dot_dimension_numbers<[1], [0], [0], [1], [0, 0, 1, 1], [], []>} : vector<4x128xbf16>, vector<128x128xbf16>, vector<4x128xf32> -> vector<4x128xf32>
    %394 = arith.addf %386, %393 : vector<4x128xf32>
    %c7_397 = arith.constant 7 : index
    %c0_398 = arith.constant 0 : index
    %c0_399 = arith.constant 0 : index
    %395 = vector.load %arg9[%c7_397, %c0_398, %c0_399] : memref<9x4x4xbf16, #tpu.memory_space<vmem>>, vector<1x4x4xbf16>
    %396 = vector.shape_cast %395 : vector<1x4x4xbf16> to vector<4x4xbf16>
    %cst_400 = arith.constant dense<0.000000e+00> : vector<4x128xf32>
    %397 = tpu.matmul %396, %341, %cst_400 {dimension_numbers = #tpu.dot_dimension_numbers<[1], [0], [0], [1], [0, 0, 1, 1], [], []>} : vector<4x4xbf16>, vector<4x128xbf16>, vector<4x128xf32> -> vector<4x128xf32>
    %398 = arith.truncf %397 : vector<4x128xf32> to vector<4x128xbf16>
    %c4_401 = arith.constant 4 : index
    %c7_402 = arith.constant 7 : index
    %c0_403 = arith.constant 0 : index
    %c0_404 = arith.constant 0 : index
    %399 = vector.load %arg2[%c4_401, %c7_402, %c0_403, %c0_404] : memref<10x9x128x128xbf16, #tpu.memory_space<vmem>>, vector<1x1x128x128xbf16>
    %400 = vector.shape_cast %399 : vector<1x1x128x128xbf16> to vector<128x128xbf16>
    %cst_405 = arith.constant dense<0.000000e+00> : vector<4x128xf32>
    %401 = tpu.matmul %398, %400, %cst_405 {dimension_numbers = #tpu.dot_dimension_numbers<[1], [0], [0], [1], [0, 0, 1, 1], [], []>} : vector<4x128xbf16>, vector<128x128xbf16>, vector<4x128xf32> -> vector<4x128xf32>
    %402 = arith.addf %394, %401 : vector<4x128xf32>
    %c8_406 = arith.constant 8 : index
    %c0_407 = arith.constant 0 : index
    %c0_408 = arith.constant 0 : index
    %403 = vector.load %arg9[%c8_406, %c0_407, %c0_408] : memref<9x4x4xbf16, #tpu.memory_space<vmem>>, vector<1x4x4xbf16>
    %404 = vector.shape_cast %403 : vector<1x4x4xbf16> to vector<4x4xbf16>
    %cst_409 = arith.constant dense<0.000000e+00> : vector<4x128xf32>
    %405 = tpu.matmul %404, %341, %cst_409 {dimension_numbers = #tpu.dot_dimension_numbers<[1], [0], [0], [1], [0, 0, 1, 1], [], []>} : vector<4x4xbf16>, vector<4x128xbf16>, vector<4x128xf32> -> vector<4x128xf32>
    %406 = arith.truncf %405 : vector<4x128xf32> to vector<4x128xbf16>
    %c4_410 = arith.constant 4 : index
    %c8_411 = arith.constant 8 : index
    %c0_412 = arith.constant 0 : index
    %c0_413 = arith.constant 0 : index
    %407 = vector.load %arg2[%c4_410, %c8_411, %c0_412, %c0_413] : memref<10x9x128x128xbf16, #tpu.memory_space<vmem>>, vector<1x1x128x128xbf16>
    %408 = vector.shape_cast %407 : vector<1x1x128x128xbf16> to vector<128x128xbf16>
    %cst_414 = arith.constant dense<0.000000e+00> : vector<4x128xf32>
    %409 = tpu.matmul %406, %408, %cst_414 {dimension_numbers = #tpu.dot_dimension_numbers<[1], [0], [0], [1], [0, 0, 1, 1], [], []>} : vector<4x128xbf16>, vector<128x128xbf16>, vector<4x128xf32> -> vector<4x128xf32>
    %410 = arith.addf %402, %409 : vector<4x128xf32>
    %c4_415 = arith.constant 4 : index
    %c0_416 = arith.constant 0 : index
    %411 = vector.load %arg3[%c4_415, %c0_416] : memref<10x128xf32, #tpu.memory_space<vmem>>, vector<1x128xf32>
    %412 = vector.shape_cast %411 : vector<1x128xf32> to vector<128xf32>
    %413 = vector.shape_cast %412 : vector<128xf32> to vector<1x128xf32>
    %414 = vector.broadcast %413 : vector<1x128xf32> to vector<4x128xf32>
    %415 = arith.mulf %410, %414 : vector<4x128xf32>
    %c4_417 = arith.constant 4 : index
    %c0_418 = arith.constant 0 : index
    %416 = vector.load %arg4[%c4_417, %c0_418] : memref<10x128xf32, #tpu.memory_space<vmem>>, vector<1x128xf32>
    %417 = vector.shape_cast %416 : vector<1x128xf32> to vector<128xf32>
    %418 = vector.shape_cast %417 : vector<128xf32> to vector<1x128xf32>
    %419 = vector.broadcast %418 : vector<1x128xf32> to vector<4x128xf32>
    %420 = arith.addf %415, %419 : vector<4x128xf32>
    %cst_419 = arith.constant 0.000000e+00 : f32
    %421 = vector.broadcast %cst_419 : f32 to vector<4x128xf32>
    %422 = arith.maximumf %420, %421 : vector<4x128xf32>
    %423 = arith.truncf %422 : vector<4x128xf32> to vector<4x128xbf16>
    %cst_420 = arith.constant 0.000000e+00 : f32
    %424 = vector.broadcast %cst_420 : f32 to vector<4x128xf32>
    %c0_421 = arith.constant 0 : index
    %c0_422 = arith.constant 0 : index
    %c0_423 = arith.constant 0 : index
    %425 = vector.load %arg9[%c0_421, %c0_422, %c0_423] : memref<9x4x4xbf16, #tpu.memory_space<vmem>>, vector<1x4x4xbf16>
    %426 = vector.shape_cast %425 : vector<1x4x4xbf16> to vector<4x4xbf16>
    %cst_424 = arith.constant dense<0.000000e+00> : vector<4x128xf32>
    %427 = tpu.matmul %426, %423, %cst_424 {dimension_numbers = #tpu.dot_dimension_numbers<[1], [0], [0], [1], [0, 0, 1, 1], [], []>} : vector<4x4xbf16>, vector<4x128xbf16>, vector<4x128xf32> -> vector<4x128xf32>
    %428 = arith.truncf %427 : vector<4x128xf32> to vector<4x128xbf16>
    %c5_425 = arith.constant 5 : index
    %c0_426 = arith.constant 0 : index
    %c0_427 = arith.constant 0 : index
    %c0_428 = arith.constant 0 : index
    %429 = vector.load %arg2[%c5_425, %c0_426, %c0_427, %c0_428] : memref<10x9x128x128xbf16, #tpu.memory_space<vmem>>, vector<1x1x128x128xbf16>
    %430 = vector.shape_cast %429 : vector<1x1x128x128xbf16> to vector<128x128xbf16>
    %cst_429 = arith.constant dense<0.000000e+00> : vector<4x128xf32>
    %431 = tpu.matmul %428, %430, %cst_429 {dimension_numbers = #tpu.dot_dimension_numbers<[1], [0], [0], [1], [0, 0, 1, 1], [], []>} : vector<4x128xbf16>, vector<128x128xbf16>, vector<4x128xf32> -> vector<4x128xf32>
    %432 = arith.addf %424, %431 : vector<4x128xf32>
    %c1_430 = arith.constant 1 : index
    %c0_431 = arith.constant 0 : index
    %c0_432 = arith.constant 0 : index
    %433 = vector.load %arg9[%c1_430, %c0_431, %c0_432] : memref<9x4x4xbf16, #tpu.memory_space<vmem>>, vector<1x4x4xbf16>
    %434 = vector.shape_cast %433 : vector<1x4x4xbf16> to vector<4x4xbf16>
    %cst_433 = arith.constant dense<0.000000e+00> : vector<4x128xf32>
    %435 = tpu.matmul %434, %423, %cst_433 {dimension_numbers = #tpu.dot_dimension_numbers<[1], [0], [0], [1], [0, 0, 1, 1], [], []>} : vector<4x4xbf16>, vector<4x128xbf16>, vector<4x128xf32> -> vector<4x128xf32>
    %436 = arith.truncf %435 : vector<4x128xf32> to vector<4x128xbf16>
    %c5_434 = arith.constant 5 : index
    %c1_435 = arith.constant 1 : index
    %c0_436 = arith.constant 0 : index
    %c0_437 = arith.constant 0 : index
    %437 = vector.load %arg2[%c5_434, %c1_435, %c0_436, %c0_437] : memref<10x9x128x128xbf16, #tpu.memory_space<vmem>>, vector<1x1x128x128xbf16>
    %438 = vector.shape_cast %437 : vector<1x1x128x128xbf16> to vector<128x128xbf16>
    %cst_438 = arith.constant dense<0.000000e+00> : vector<4x128xf32>
    %439 = tpu.matmul %436, %438, %cst_438 {dimension_numbers = #tpu.dot_dimension_numbers<[1], [0], [0], [1], [0, 0, 1, 1], [], []>} : vector<4x128xbf16>, vector<128x128xbf16>, vector<4x128xf32> -> vector<4x128xf32>
    %440 = arith.addf %432, %439 : vector<4x128xf32>
    %c2_439 = arith.constant 2 : index
    %c0_440 = arith.constant 0 : index
    %c0_441 = arith.constant 0 : index
    %441 = vector.load %arg9[%c2_439, %c0_440, %c0_441] : memref<9x4x4xbf16, #tpu.memory_space<vmem>>, vector<1x4x4xbf16>
    %442 = vector.shape_cast %441 : vector<1x4x4xbf16> to vector<4x4xbf16>
    %cst_442 = arith.constant dense<0.000000e+00> : vector<4x128xf32>
    %443 = tpu.matmul %442, %423, %cst_442 {dimension_numbers = #tpu.dot_dimension_numbers<[1], [0], [0], [1], [0, 0, 1, 1], [], []>} : vector<4x4xbf16>, vector<4x128xbf16>, vector<4x128xf32> -> vector<4x128xf32>
    %444 = arith.truncf %443 : vector<4x128xf32> to vector<4x128xbf16>
    %c5_443 = arith.constant 5 : index
    %c2_444 = arith.constant 2 : index
    %c0_445 = arith.constant 0 : index
    %c0_446 = arith.constant 0 : index
    %445 = vector.load %arg2[%c5_443, %c2_444, %c0_445, %c0_446] : memref<10x9x128x128xbf16, #tpu.memory_space<vmem>>, vector<1x1x128x128xbf16>
    %446 = vector.shape_cast %445 : vector<1x1x128x128xbf16> to vector<128x128xbf16>
    %cst_447 = arith.constant dense<0.000000e+00> : vector<4x128xf32>
    %447 = tpu.matmul %444, %446, %cst_447 {dimension_numbers = #tpu.dot_dimension_numbers<[1], [0], [0], [1], [0, 0, 1, 1], [], []>} : vector<4x128xbf16>, vector<128x128xbf16>, vector<4x128xf32> -> vector<4x128xf32>
    %448 = arith.addf %440, %447 : vector<4x128xf32>
    %c3_448 = arith.constant 3 : index
    %c0_449 = arith.constant 0 : index
    %c0_450 = arith.constant 0 : index
    %449 = vector.load %arg9[%c3_448, %c0_449, %c0_450] : memref<9x4x4xbf16, #tpu.memory_space<vmem>>, vector<1x4x4xbf16>
    %450 = vector.shape_cast %449 : vector<1x4x4xbf16> to vector<4x4xbf16>
    %cst_451 = arith.constant dense<0.000000e+00> : vector<4x128xf32>
    %451 = tpu.matmul %450, %423, %cst_451 {dimension_numbers = #tpu.dot_dimension_numbers<[1], [0], [0], [1], [0, 0, 1, 1], [], []>} : vector<4x4xbf16>, vector<4x128xbf16>, vector<4x128xf32> -> vector<4x128xf32>
    %452 = arith.truncf %451 : vector<4x128xf32> to vector<4x128xbf16>
    %c5_452 = arith.constant 5 : index
    %c3_453 = arith.constant 3 : index
    %c0_454 = arith.constant 0 : index
    %c0_455 = arith.constant 0 : index
    %453 = vector.load %arg2[%c5_452, %c3_453, %c0_454, %c0_455] : memref<10x9x128x128xbf16, #tpu.memory_space<vmem>>, vector<1x1x128x128xbf16>
    %454 = vector.shape_cast %453 : vector<1x1x128x128xbf16> to vector<128x128xbf16>
    %cst_456 = arith.constant dense<0.000000e+00> : vector<4x128xf32>
    %455 = tpu.matmul %452, %454, %cst_456 {dimension_numbers = #tpu.dot_dimension_numbers<[1], [0], [0], [1], [0, 0, 1, 1], [], []>} : vector<4x128xbf16>, vector<128x128xbf16>, vector<4x128xf32> -> vector<4x128xf32>
    %456 = arith.addf %448, %455 : vector<4x128xf32>
    %c5_457 = arith.constant 5 : index
    %c4_458 = arith.constant 4 : index
    %c0_459 = arith.constant 0 : index
    %c0_460 = arith.constant 0 : index
    %457 = vector.load %arg2[%c5_457, %c4_458, %c0_459, %c0_460] : memref<10x9x128x128xbf16, #tpu.memory_space<vmem>>, vector<1x1x128x128xbf16>
    %458 = vector.shape_cast %457 : vector<1x1x128x128xbf16> to vector<128x128xbf16>
    %cst_461 = arith.constant dense<0.000000e+00> : vector<4x128xf32>
    %459 = tpu.matmul %423, %458, %cst_461 {dimension_numbers = #tpu.dot_dimension_numbers<[1], [0], [0], [1], [0, 0, 1, 1], [], []>} : vector<4x128xbf16>, vector<128x128xbf16>, vector<4x128xf32> -> vector<4x128xf32>
    %460 = arith.addf %456, %459 : vector<4x128xf32>
    %c5_462 = arith.constant 5 : index
    %c0_463 = arith.constant 0 : index
    %c0_464 = arith.constant 0 : index
    %461 = vector.load %arg9[%c5_462, %c0_463, %c0_464] : memref<9x4x4xbf16, #tpu.memory_space<vmem>>, vector<1x4x4xbf16>
    %462 = vector.shape_cast %461 : vector<1x4x4xbf16> to vector<4x4xbf16>
    %cst_465 = arith.constant dense<0.000000e+00> : vector<4x128xf32>
    %463 = tpu.matmul %462, %423, %cst_465 {dimension_numbers = #tpu.dot_dimension_numbers<[1], [0], [0], [1], [0, 0, 1, 1], [], []>} : vector<4x4xbf16>, vector<4x128xbf16>, vector<4x128xf32> -> vector<4x128xf32>
    %464 = arith.truncf %463 : vector<4x128xf32> to vector<4x128xbf16>
    %c5_466 = arith.constant 5 : index
    %c5_467 = arith.constant 5 : index
    %c0_468 = arith.constant 0 : index
    %c0_469 = arith.constant 0 : index
    %465 = vector.load %arg2[%c5_466, %c5_467, %c0_468, %c0_469] : memref<10x9x128x128xbf16, #tpu.memory_space<vmem>>, vector<1x1x128x128xbf16>
    %466 = vector.shape_cast %465 : vector<1x1x128x128xbf16> to vector<128x128xbf16>
    %cst_470 = arith.constant dense<0.000000e+00> : vector<4x128xf32>
    %467 = tpu.matmul %464, %466, %cst_470 {dimension_numbers = #tpu.dot_dimension_numbers<[1], [0], [0], [1], [0, 0, 1, 1], [], []>} : vector<4x128xbf16>, vector<128x128xbf16>, vector<4x128xf32> -> vector<4x128xf32>
    %468 = arith.addf %460, %467 : vector<4x128xf32>
    %c6_471 = arith.constant 6 : index
    %c0_472 = arith.constant 0 : index
    %c0_473 = arith.constant 0 : index
    %469 = vector.load %arg9[%c6_471, %c0_472, %c0_473] : memref<9x4x4xbf16, #tpu.memory_space<vmem>>, vector<1x4x4xbf16>
    %470 = vector.shape_cast %469 : vector<1x4x4xbf16> to vector<4x4xbf16>
    %cst_474 = arith.constant dense<0.000000e+00> : vector<4x128xf32>
    %471 = tpu.matmul %470, %423, %cst_474 {dimension_numbers = #tpu.dot_dimension_numbers<[1], [0], [0], [1], [0, 0, 1, 1], [], []>} : vector<4x4xbf16>, vector<4x128xbf16>, vector<4x128xf32> -> vector<4x128xf32>
    %472 = arith.truncf %471 : vector<4x128xf32> to vector<4x128xbf16>
    %c5_475 = arith.constant 5 : index
    %c6_476 = arith.constant 6 : index
    %c0_477 = arith.constant 0 : index
    %c0_478 = arith.constant 0 : index
    %473 = vector.load %arg2[%c5_475, %c6_476, %c0_477, %c0_478] : memref<10x9x128x128xbf16, #tpu.memory_space<vmem>>, vector<1x1x128x128xbf16>
    %474 = vector.shape_cast %473 : vector<1x1x128x128xbf16> to vector<128x128xbf16>
    %cst_479 = arith.constant dense<0.000000e+00> : vector<4x128xf32>
    %475 = tpu.matmul %472, %474, %cst_479 {dimension_numbers = #tpu.dot_dimension_numbers<[1], [0], [0], [1], [0, 0, 1, 1], [], []>} : vector<4x128xbf16>, vector<128x128xbf16>, vector<4x128xf32> -> vector<4x128xf32>
    %476 = arith.addf %468, %475 : vector<4x128xf32>
    %c7_480 = arith.constant 7 : index
    %c0_481 = arith.constant 0 : index
    %c0_482 = arith.constant 0 : index
    %477 = vector.load %arg9[%c7_480, %c0_481, %c0_482] : memref<9x4x4xbf16, #tpu.memory_space<vmem>>, vector<1x4x4xbf16>
    %478 = vector.shape_cast %477 : vector<1x4x4xbf16> to vector<4x4xbf16>
    %cst_483 = arith.constant dense<0.000000e+00> : vector<4x128xf32>
    %479 = tpu.matmul %478, %423, %cst_483 {dimension_numbers = #tpu.dot_dimension_numbers<[1], [0], [0], [1], [0, 0, 1, 1], [], []>} : vector<4x4xbf16>, vector<4x128xbf16>, vector<4x128xf32> -> vector<4x128xf32>
    %480 = arith.truncf %479 : vector<4x128xf32> to vector<4x128xbf16>
    %c5_484 = arith.constant 5 : index
    %c7_485 = arith.constant 7 : index
    %c0_486 = arith.constant 0 : index
    %c0_487 = arith.constant 0 : index
    %481 = vector.load %arg2[%c5_484, %c7_485, %c0_486, %c0_487] : memref<10x9x128x128xbf16, #tpu.memory_space<vmem>>, vector<1x1x128x128xbf16>
    %482 = vector.shape_cast %481 : vector<1x1x128x128xbf16> to vector<128x128xbf16>
    %cst_488 = arith.constant dense<0.000000e+00> : vector<4x128xf32>
    %483 = tpu.matmul %480, %482, %cst_488 {dimension_numbers = #tpu.dot_dimension_numbers<[1], [0], [0], [1], [0, 0, 1, 1], [], []>} : vector<4x128xbf16>, vector<128x128xbf16>, vector<4x128xf32> -> vector<4x128xf32>
    %484 = arith.addf %476, %483 : vector<4x128xf32>
    %c8_489 = arith.constant 8 : index
    %c0_490 = arith.constant 0 : index
    %c0_491 = arith.constant 0 : index
    %485 = vector.load %arg9[%c8_489, %c0_490, %c0_491] : memref<9x4x4xbf16, #tpu.memory_space<vmem>>, vector<1x4x4xbf16>
    %486 = vector.shape_cast %485 : vector<1x4x4xbf16> to vector<4x4xbf16>
    %cst_492 = arith.constant dense<0.000000e+00> : vector<4x128xf32>
    %487 = tpu.matmul %486, %423, %cst_492 {dimension_numbers = #tpu.dot_dimension_numbers<[1], [0], [0], [1], [0, 0, 1, 1], [], []>} : vector<4x4xbf16>, vector<4x128xbf16>, vector<4x128xf32> -> vector<4x128xf32>
    %488 = arith.truncf %487 : vector<4x128xf32> to vector<4x128xbf16>
    %c5_493 = arith.constant 5 : index
    %c8_494 = arith.constant 8 : index
    %c0_495 = arith.constant 0 : index
    %c0_496 = arith.constant 0 : index
    %489 = vector.load %arg2[%c5_493, %c8_494, %c0_495, %c0_496] : memref<10x9x128x128xbf16, #tpu.memory_space<vmem>>, vector<1x1x128x128xbf16>
    %490 = vector.shape_cast %489 : vector<1x1x128x128xbf16> to vector<128x128xbf16>
    %cst_497 = arith.constant dense<0.000000e+00> : vector<4x128xf32>
    %491 = tpu.matmul %488, %490, %cst_497 {dimension_numbers = #tpu.dot_dimension_numbers<[1], [0], [0], [1], [0, 0, 1, 1], [], []>} : vector<4x128xbf16>, vector<128x128xbf16>, vector<4x128xf32> -> vector<4x128xf32>
    %492 = arith.addf %484, %491 : vector<4x128xf32>
    %c5_498 = arith.constant 5 : index
    %c0_499 = arith.constant 0 : index
    %493 = vector.load %arg3[%c5_498, %c0_499] : memref<10x128xf32, #tpu.memory_space<vmem>>, vector<1x128xf32>
    %494 = vector.shape_cast %493 : vector<1x128xf32> to vector<128xf32>
    %495 = vector.shape_cast %494 : vector<128xf32> to vector<1x128xf32>
    %496 = vector.broadcast %495 : vector<1x128xf32> to vector<4x128xf32>
    %497 = arith.mulf %492, %496 : vector<4x128xf32>
    %c5_500 = arith.constant 5 : index
    %c0_501 = arith.constant 0 : index
    %498 = vector.load %arg4[%c5_500, %c0_501] : memref<10x128xf32, #tpu.memory_space<vmem>>, vector<1x128xf32>
    %499 = vector.shape_cast %498 : vector<1x128xf32> to vector<128xf32>
    %500 = vector.shape_cast %499 : vector<128xf32> to vector<1x128xf32>
    %501 = vector.broadcast %500 : vector<1x128xf32> to vector<4x128xf32>
    %502 = arith.addf %497, %501 : vector<4x128xf32>
    %cst_502 = arith.constant 0.000000e+00 : f32
    %503 = vector.broadcast %cst_502 : f32 to vector<4x128xf32>
    %504 = arith.maximumf %502, %503 : vector<4x128xf32>
    %505 = arith.truncf %504 : vector<4x128xf32> to vector<4x128xbf16>
    %cst_503 = arith.constant 0.000000e+00 : f32
    %506 = vector.broadcast %cst_503 : f32 to vector<4x128xf32>
    %c0_504 = arith.constant 0 : index
    %c0_505 = arith.constant 0 : index
    %c0_506 = arith.constant 0 : index
    %507 = vector.load %arg9[%c0_504, %c0_505, %c0_506] : memref<9x4x4xbf16, #tpu.memory_space<vmem>>, vector<1x4x4xbf16>
    %508 = vector.shape_cast %507 : vector<1x4x4xbf16> to vector<4x4xbf16>
    %cst_507 = arith.constant dense<0.000000e+00> : vector<4x128xf32>
    %509 = tpu.matmul %508, %505, %cst_507 {dimension_numbers = #tpu.dot_dimension_numbers<[1], [0], [0], [1], [0, 0, 1, 1], [], []>} : vector<4x4xbf16>, vector<4x128xbf16>, vector<4x128xf32> -> vector<4x128xf32>
    %510 = arith.truncf %509 : vector<4x128xf32> to vector<4x128xbf16>
    %c6_508 = arith.constant 6 : index
    %c0_509 = arith.constant 0 : index
    %c0_510 = arith.constant 0 : index
    %c0_511 = arith.constant 0 : index
    %511 = vector.load %arg2[%c6_508, %c0_509, %c0_510, %c0_511] : memref<10x9x128x128xbf16, #tpu.memory_space<vmem>>, vector<1x1x128x128xbf16>
    %512 = vector.shape_cast %511 : vector<1x1x128x128xbf16> to vector<128x128xbf16>
    %cst_512 = arith.constant dense<0.000000e+00> : vector<4x128xf32>
    %513 = tpu.matmul %510, %512, %cst_512 {dimension_numbers = #tpu.dot_dimension_numbers<[1], [0], [0], [1], [0, 0, 1, 1], [], []>} : vector<4x128xbf16>, vector<128x128xbf16>, vector<4x128xf32> -> vector<4x128xf32>
    %514 = arith.addf %506, %513 : vector<4x128xf32>
    %c1_513 = arith.constant 1 : index
    %c0_514 = arith.constant 0 : index
    %c0_515 = arith.constant 0 : index
    %515 = vector.load %arg9[%c1_513, %c0_514, %c0_515] : memref<9x4x4xbf16, #tpu.memory_space<vmem>>, vector<1x4x4xbf16>
    %516 = vector.shape_cast %515 : vector<1x4x4xbf16> to vector<4x4xbf16>
    %cst_516 = arith.constant dense<0.000000e+00> : vector<4x128xf32>
    %517 = tpu.matmul %516, %505, %cst_516 {dimension_numbers = #tpu.dot_dimension_numbers<[1], [0], [0], [1], [0, 0, 1, 1], [], []>} : vector<4x4xbf16>, vector<4x128xbf16>, vector<4x128xf32> -> vector<4x128xf32>
    %518 = arith.truncf %517 : vector<4x128xf32> to vector<4x128xbf16>
    %c6_517 = arith.constant 6 : index
    %c1_518 = arith.constant 1 : index
    %c0_519 = arith.constant 0 : index
    %c0_520 = arith.constant 0 : index
    %519 = vector.load %arg2[%c6_517, %c1_518, %c0_519, %c0_520] : memref<10x9x128x128xbf16, #tpu.memory_space<vmem>>, vector<1x1x128x128xbf16>
    %520 = vector.shape_cast %519 : vector<1x1x128x128xbf16> to vector<128x128xbf16>
    %cst_521 = arith.constant dense<0.000000e+00> : vector<4x128xf32>
    %521 = tpu.matmul %518, %520, %cst_521 {dimension_numbers = #tpu.dot_dimension_numbers<[1], [0], [0], [1], [0, 0, 1, 1], [], []>} : vector<4x128xbf16>, vector<128x128xbf16>, vector<4x128xf32> -> vector<4x128xf32>
    %522 = arith.addf %514, %521 : vector<4x128xf32>
    %c2_522 = arith.constant 2 : index
    %c0_523 = arith.constant 0 : index
    %c0_524 = arith.constant 0 : index
    %523 = vector.load %arg9[%c2_522, %c0_523, %c0_524] : memref<9x4x4xbf16, #tpu.memory_space<vmem>>, vector<1x4x4xbf16>
    %524 = vector.shape_cast %523 : vector<1x4x4xbf16> to vector<4x4xbf16>
    %cst_525 = arith.constant dense<0.000000e+00> : vector<4x128xf32>
    %525 = tpu.matmul %524, %505, %cst_525 {dimension_numbers = #tpu.dot_dimension_numbers<[1], [0], [0], [1], [0, 0, 1, 1], [], []>} : vector<4x4xbf16>, vector<4x128xbf16>, vector<4x128xf32> -> vector<4x128xf32>
    %526 = arith.truncf %525 : vector<4x128xf32> to vector<4x128xbf16>
    %c6_526 = arith.constant 6 : index
    %c2_527 = arith.constant 2 : index
    %c0_528 = arith.constant 0 : index
    %c0_529 = arith.constant 0 : index
    %527 = vector.load %arg2[%c6_526, %c2_527, %c0_528, %c0_529] : memref<10x9x128x128xbf16, #tpu.memory_space<vmem>>, vector<1x1x128x128xbf16>
    %528 = vector.shape_cast %527 : vector<1x1x128x128xbf16> to vector<128x128xbf16>
    %cst_530 = arith.constant dense<0.000000e+00> : vector<4x128xf32>
    %529 = tpu.matmul %526, %528, %cst_530 {dimension_numbers = #tpu.dot_dimension_numbers<[1], [0], [0], [1], [0, 0, 1, 1], [], []>} : vector<4x128xbf16>, vector<128x128xbf16>, vector<4x128xf32> -> vector<4x128xf32>
    %530 = arith.addf %522, %529 : vector<4x128xf32>
    %c3_531 = arith.constant 3 : index
    %c0_532 = arith.constant 0 : index
    %c0_533 = arith.constant 0 : index
    %531 = vector.load %arg9[%c3_531, %c0_532, %c0_533] : memref<9x4x4xbf16, #tpu.memory_space<vmem>>, vector<1x4x4xbf16>
    %532 = vector.shape_cast %531 : vector<1x4x4xbf16> to vector<4x4xbf16>
    %cst_534 = arith.constant dense<0.000000e+00> : vector<4x128xf32>
    %533 = tpu.matmul %532, %505, %cst_534 {dimension_numbers = #tpu.dot_dimension_numbers<[1], [0], [0], [1], [0, 0, 1, 1], [], []>} : vector<4x4xbf16>, vector<4x128xbf16>, vector<4x128xf32> -> vector<4x128xf32>
    %534 = arith.truncf %533 : vector<4x128xf32> to vector<4x128xbf16>
    %c6_535 = arith.constant 6 : index
    %c3_536 = arith.constant 3 : index
    %c0_537 = arith.constant 0 : index
    %c0_538 = arith.constant 0 : index
    %535 = vector.load %arg2[%c6_535, %c3_536, %c0_537, %c0_538] : memref<10x9x128x128xbf16, #tpu.memory_space<vmem>>, vector<1x1x128x128xbf16>
    %536 = vector.shape_cast %535 : vector<1x1x128x128xbf16> to vector<128x128xbf16>
    %cst_539 = arith.constant dense<0.000000e+00> : vector<4x128xf32>
    %537 = tpu.matmul %534, %536, %cst_539 {dimension_numbers = #tpu.dot_dimension_numbers<[1], [0], [0], [1], [0, 0, 1, 1], [], []>} : vector<4x128xbf16>, vector<128x128xbf16>, vector<4x128xf32> -> vector<4x128xf32>
    %538 = arith.addf %530, %537 : vector<4x128xf32>
    %c6_540 = arith.constant 6 : index
    %c4_541 = arith.constant 4 : index
    %c0_542 = arith.constant 0 : index
    %c0_543 = arith.constant 0 : index
    %539 = vector.load %arg2[%c6_540, %c4_541, %c0_542, %c0_543] : memref<10x9x128x128xbf16, #tpu.memory_space<vmem>>, vector<1x1x128x128xbf16>
    %540 = vector.shape_cast %539 : vector<1x1x128x128xbf16> to vector<128x128xbf16>
    %cst_544 = arith.constant dense<0.000000e+00> : vector<4x128xf32>
    %541 = tpu.matmul %505, %540, %cst_544 {dimension_numbers = #tpu.dot_dimension_numbers<[1], [0], [0], [1], [0, 0, 1, 1], [], []>} : vector<4x128xbf16>, vector<128x128xbf16>, vector<4x128xf32> -> vector<4x128xf32>
    %542 = arith.addf %538, %541 : vector<4x128xf32>
    %c5_545 = arith.constant 5 : index
    %c0_546 = arith.constant 0 : index
    %c0_547 = arith.constant 0 : index
    %543 = vector.load %arg9[%c5_545, %c0_546, %c0_547] : memref<9x4x4xbf16, #tpu.memory_space<vmem>>, vector<1x4x4xbf16>
    %544 = vector.shape_cast %543 : vector<1x4x4xbf16> to vector<4x4xbf16>
    %cst_548 = arith.constant dense<0.000000e+00> : vector<4x128xf32>
    %545 = tpu.matmul %544, %505, %cst_548 {dimension_numbers = #tpu.dot_dimension_numbers<[1], [0], [0], [1], [0, 0, 1, 1], [], []>} : vector<4x4xbf16>, vector<4x128xbf16>, vector<4x128xf32> -> vector<4x128xf32>
    %546 = arith.truncf %545 : vector<4x128xf32> to vector<4x128xbf16>
    %c6_549 = arith.constant 6 : index
    %c5_550 = arith.constant 5 : index
    %c0_551 = arith.constant 0 : index
    %c0_552 = arith.constant 0 : index
    %547 = vector.load %arg2[%c6_549, %c5_550, %c0_551, %c0_552] : memref<10x9x128x128xbf16, #tpu.memory_space<vmem>>, vector<1x1x128x128xbf16>
    %548 = vector.shape_cast %547 : vector<1x1x128x128xbf16> to vector<128x128xbf16>
    %cst_553 = arith.constant dense<0.000000e+00> : vector<4x128xf32>
    %549 = tpu.matmul %546, %548, %cst_553 {dimension_numbers = #tpu.dot_dimension_numbers<[1], [0], [0], [1], [0, 0, 1, 1], [], []>} : vector<4x128xbf16>, vector<128x128xbf16>, vector<4x128xf32> -> vector<4x128xf32>
    %550 = arith.addf %542, %549 : vector<4x128xf32>
    %c6_554 = arith.constant 6 : index
    %c0_555 = arith.constant 0 : index
    %c0_556 = arith.constant 0 : index
    %551 = vector.load %arg9[%c6_554, %c0_555, %c0_556] : memref<9x4x4xbf16, #tpu.memory_space<vmem>>, vector<1x4x4xbf16>
    %552 = vector.shape_cast %551 : vector<1x4x4xbf16> to vector<4x4xbf16>
    %cst_557 = arith.constant dense<0.000000e+00> : vector<4x128xf32>
    %553 = tpu.matmul %552, %505, %cst_557 {dimension_numbers = #tpu.dot_dimension_numbers<[1], [0], [0], [1], [0, 0, 1, 1], [], []>} : vector<4x4xbf16>, vector<4x128xbf16>, vector<4x128xf32> -> vector<4x128xf32>
    %554 = arith.truncf %553 : vector<4x128xf32> to vector<4x128xbf16>
    %c6_558 = arith.constant 6 : index
    %c6_559 = arith.constant 6 : index
    %c0_560 = arith.constant 0 : index
    %c0_561 = arith.constant 0 : index
    %555 = vector.load %arg2[%c6_558, %c6_559, %c0_560, %c0_561] : memref<10x9x128x128xbf16, #tpu.memory_space<vmem>>, vector<1x1x128x128xbf16>
    %556 = vector.shape_cast %555 : vector<1x1x128x128xbf16> to vector<128x128xbf16>
    %cst_562 = arith.constant dense<0.000000e+00> : vector<4x128xf32>
    %557 = tpu.matmul %554, %556, %cst_562 {dimension_numbers = #tpu.dot_dimension_numbers<[1], [0], [0], [1], [0, 0, 1, 1], [], []>} : vector<4x128xbf16>, vector<128x128xbf16>, vector<4x128xf32> -> vector<4x128xf32>
    %558 = arith.addf %550, %557 : vector<4x128xf32>
    %c7_563 = arith.constant 7 : index
    %c0_564 = arith.constant 0 : index
    %c0_565 = arith.constant 0 : index
    %559 = vector.load %arg9[%c7_563, %c0_564, %c0_565] : memref<9x4x4xbf16, #tpu.memory_space<vmem>>, vector<1x4x4xbf16>
    %560 = vector.shape_cast %559 : vector<1x4x4xbf16> to vector<4x4xbf16>
    %cst_566 = arith.constant dense<0.000000e+00> : vector<4x128xf32>
    %561 = tpu.matmul %560, %505, %cst_566 {dimension_numbers = #tpu.dot_dimension_numbers<[1], [0], [0], [1], [0, 0, 1, 1], [], []>} : vector<4x4xbf16>, vector<4x128xbf16>, vector<4x128xf32> -> vector<4x128xf32>
    %562 = arith.truncf %561 : vector<4x128xf32> to vector<4x128xbf16>
    %c6_567 = arith.constant 6 : index
    %c7_568 = arith.constant 7 : index
    %c0_569 = arith.constant 0 : index
    %c0_570 = arith.constant 0 : index
    %563 = vector.load %arg2[%c6_567, %c7_568, %c0_569, %c0_570] : memref<10x9x128x128xbf16, #tpu.memory_space<vmem>>, vector<1x1x128x128xbf16>
    %564 = vector.shape_cast %563 : vector<1x1x128x128xbf16> to vector<128x128xbf16>
    %cst_571 = arith.constant dense<0.000000e+00> : vector<4x128xf32>
    %565 = tpu.matmul %562, %564, %cst_571 {dimension_numbers = #tpu.dot_dimension_numbers<[1], [0], [0], [1], [0, 0, 1, 1], [], []>} : vector<4x128xbf16>, vector<128x128xbf16>, vector<4x128xf32> -> vector<4x128xf32>
    %566 = arith.addf %558, %565 : vector<4x128xf32>
    %c8_572 = arith.constant 8 : index
    %c0_573 = arith.constant 0 : index
    %c0_574 = arith.constant 0 : index
    %567 = vector.load %arg9[%c8_572, %c0_573, %c0_574] : memref<9x4x4xbf16, #tpu.memory_space<vmem>>, vector<1x4x4xbf16>
    %568 = vector.shape_cast %567 : vector<1x4x4xbf16> to vector<4x4xbf16>
    %cst_575 = arith.constant dense<0.000000e+00> : vector<4x128xf32>
    %569 = tpu.matmul %568, %505, %cst_575 {dimension_numbers = #tpu.dot_dimension_numbers<[1], [0], [0], [1], [0, 0, 1, 1], [], []>} : vector<4x4xbf16>, vector<4x128xbf16>, vector<4x128xf32> -> vector<4x128xf32>
    %570 = arith.truncf %569 : vector<4x128xf32> to vector<4x128xbf16>
    %c6_576 = arith.constant 6 : index
    %c8_577 = arith.constant 8 : index
    %c0_578 = arith.constant 0 : index
    %c0_579 = arith.constant 0 : index
    %571 = vector.load %arg2[%c6_576, %c8_577, %c0_578, %c0_579] : memref<10x9x128x128xbf16, #tpu.memory_space<vmem>>, vector<1x1x128x128xbf16>
    %572 = vector.shape_cast %571 : vector<1x1x128x128xbf16> to vector<128x128xbf16>
    %cst_580 = arith.constant dense<0.000000e+00> : vector<4x128xf32>
    %573 = tpu.matmul %570, %572, %cst_580 {dimension_numbers = #tpu.dot_dimension_numbers<[1], [0], [0], [1], [0, 0, 1, 1], [], []>} : vector<4x128xbf16>, vector<128x128xbf16>, vector<4x128xf32> -> vector<4x128xf32>
    %574 = arith.addf %566, %573 : vector<4x128xf32>
    %c6_581 = arith.constant 6 : index
    %c0_582 = arith.constant 0 : index
    %575 = vector.load %arg3[%c6_581, %c0_582] : memref<10x128xf32, #tpu.memory_space<vmem>>, vector<1x128xf32>
    %576 = vector.shape_cast %575 : vector<1x128xf32> to vector<128xf32>
    %577 = vector.shape_cast %576 : vector<128xf32> to vector<1x128xf32>
    %578 = vector.broadcast %577 : vector<1x128xf32> to vector<4x128xf32>
    %579 = arith.mulf %574, %578 : vector<4x128xf32>
    %c6_583 = arith.constant 6 : index
    %c0_584 = arith.constant 0 : index
    %580 = vector.load %arg4[%c6_583, %c0_584] : memref<10x128xf32, #tpu.memory_space<vmem>>, vector<1x128xf32>
    %581 = vector.shape_cast %580 : vector<1x128xf32> to vector<128xf32>
    %582 = vector.shape_cast %581 : vector<128xf32> to vector<1x128xf32>
    %583 = vector.broadcast %582 : vector<1x128xf32> to vector<4x128xf32>
    %584 = arith.addf %579, %583 : vector<4x128xf32>
    %cst_585 = arith.constant 0.000000e+00 : f32
    %585 = vector.broadcast %cst_585 : f32 to vector<4x128xf32>
    %586 = arith.maximumf %584, %585 : vector<4x128xf32>
    %587 = arith.truncf %586 : vector<4x128xf32> to vector<4x128xbf16>
    %cst_586 = arith.constant 0.000000e+00 : f32
    %588 = vector.broadcast %cst_586 : f32 to vector<1x128xf32>
    %c0_587 = arith.constant 0 : index
    %c0_588 = arith.constant 0 : index
    %c0_589 = arith.constant 0 : index
    %589 = vector.load %arg10[%c0_587, %c0_588, %c0_589] : memref<9x1x4xbf16, #tpu.memory_space<vmem>>, vector<1x1x4xbf16>
    %590 = vector.shape_cast %589 : vector<1x1x4xbf16> to vector<1x4xbf16>
    %cst_590 = arith.constant dense<0.000000e+00> : vector<1x128xf32>
    %591 = tpu.matmul %590, %587, %cst_590 {dimension_numbers = #tpu.dot_dimension_numbers<[1], [0], [0], [1], [0, 0, 1, 1], [], []>} : vector<1x4xbf16>, vector<4x128xbf16>, vector<1x128xf32> -> vector<1x128xf32>
    %592 = arith.truncf %591 : vector<1x128xf32> to vector<1x128xbf16>
    %c7_591 = arith.constant 7 : index
    %c0_592 = arith.constant 0 : index
    %c0_593 = arith.constant 0 : index
    %c0_594 = arith.constant 0 : index
    %593 = vector.load %arg2[%c7_591, %c0_592, %c0_593, %c0_594] : memref<10x9x128x128xbf16, #tpu.memory_space<vmem>>, vector<1x1x128x128xbf16>
    %594 = vector.shape_cast %593 : vector<1x1x128x128xbf16> to vector<128x128xbf16>
    %cst_595 = arith.constant dense<0.000000e+00> : vector<1x128xf32>
    %595 = tpu.matmul %592, %594, %cst_595 {dimension_numbers = #tpu.dot_dimension_numbers<[1], [0], [0], [1], [0, 0, 1, 1], [], []>} : vector<1x128xbf16>, vector<128x128xbf16>, vector<1x128xf32> -> vector<1x128xf32>
    %596 = arith.addf %588, %595 : vector<1x128xf32>
    %c1_596 = arith.constant 1 : index
    %c0_597 = arith.constant 0 : index
    %c0_598 = arith.constant 0 : index
    %597 = vector.load %arg10[%c1_596, %c0_597, %c0_598] : memref<9x1x4xbf16, #tpu.memory_space<vmem>>, vector<1x1x4xbf16>
    %598 = vector.shape_cast %597 : vector<1x1x4xbf16> to vector<1x4xbf16>
    %cst_599 = arith.constant dense<0.000000e+00> : vector<1x128xf32>
    %599 = tpu.matmul %598, %587, %cst_599 {dimension_numbers = #tpu.dot_dimension_numbers<[1], [0], [0], [1], [0, 0, 1, 1], [], []>} : vector<1x4xbf16>, vector<4x128xbf16>, vector<1x128xf32> -> vector<1x128xf32>
    %600 = arith.truncf %599 : vector<1x128xf32> to vector<1x128xbf16>
    %c7_600 = arith.constant 7 : index
    %c1_601 = arith.constant 1 : index
    %c0_602 = arith.constant 0 : index
    %c0_603 = arith.constant 0 : index
    %601 = vector.load %arg2[%c7_600, %c1_601, %c0_602, %c0_603] : memref<10x9x128x128xbf16, #tpu.memory_space<vmem>>, vector<1x1x128x128xbf16>
    %602 = vector.shape_cast %601 : vector<1x1x128x128xbf16> to vector<128x128xbf16>
    %cst_604 = arith.constant dense<0.000000e+00> : vector<1x128xf32>
    %603 = tpu.matmul %600, %602, %cst_604 {dimension_numbers = #tpu.dot_dimension_numbers<[1], [0], [0], [1], [0, 0, 1, 1], [], []>} : vector<1x128xbf16>, vector<128x128xbf16>, vector<1x128xf32> -> vector<1x128xf32>
    %604 = arith.addf %596, %603 : vector<1x128xf32>
    %c2_605 = arith.constant 2 : index
    %c0_606 = arith.constant 0 : index
    %c0_607 = arith.constant 0 : index
    %605 = vector.load %arg10[%c2_605, %c0_606, %c0_607] : memref<9x1x4xbf16, #tpu.memory_space<vmem>>, vector<1x1x4xbf16>
    %606 = vector.shape_cast %605 : vector<1x1x4xbf16> to vector<1x4xbf16>
    %cst_608 = arith.constant dense<0.000000e+00> : vector<1x128xf32>
    %607 = tpu.matmul %606, %587, %cst_608 {dimension_numbers = #tpu.dot_dimension_numbers<[1], [0], [0], [1], [0, 0, 1, 1], [], []>} : vector<1x4xbf16>, vector<4x128xbf16>, vector<1x128xf32> -> vector<1x128xf32>
    %608 = arith.truncf %607 : vector<1x128xf32> to vector<1x128xbf16>
    %c7_609 = arith.constant 7 : index
    %c2_610 = arith.constant 2 : index
    %c0_611 = arith.constant 0 : index
    %c0_612 = arith.constant 0 : index
    %609 = vector.load %arg2[%c7_609, %c2_610, %c0_611, %c0_612] : memref<10x9x128x128xbf16, #tpu.memory_space<vmem>>, vector<1x1x128x128xbf16>
    %610 = vector.shape_cast %609 : vector<1x1x128x128xbf16> to vector<128x128xbf16>
    %cst_613 = arith.constant dense<0.000000e+00> : vector<1x128xf32>
    %611 = tpu.matmul %608, %610, %cst_613 {dimension_numbers = #tpu.dot_dimension_numbers<[1], [0], [0], [1], [0, 0, 1, 1], [], []>} : vector<1x128xbf16>, vector<128x128xbf16>, vector<1x128xf32> -> vector<1x128xf32>
    %612 = arith.addf %604, %611 : vector<1x128xf32>
    %c3_614 = arith.constant 3 : index
    %c0_615 = arith.constant 0 : index
    %c0_616 = arith.constant 0 : index
    %613 = vector.load %arg10[%c3_614, %c0_615, %c0_616] : memref<9x1x4xbf16, #tpu.memory_space<vmem>>, vector<1x1x4xbf16>
    %614 = vector.shape_cast %613 : vector<1x1x4xbf16> to vector<1x4xbf16>
    %cst_617 = arith.constant dense<0.000000e+00> : vector<1x128xf32>
    %615 = tpu.matmul %614, %587, %cst_617 {dimension_numbers = #tpu.dot_dimension_numbers<[1], [0], [0], [1], [0, 0, 1, 1], [], []>} : vector<1x4xbf16>, vector<4x128xbf16>, vector<1x128xf32> -> vector<1x128xf32>
    %616 = arith.truncf %615 : vector<1x128xf32> to vector<1x128xbf16>
    %c7_618 = arith.constant 7 : index
    %c3_619 = arith.constant 3 : index
    %c0_620 = arith.constant 0 : index
    %c0_621 = arith.constant 0 : index
    %617 = vector.load %arg2[%c7_618, %c3_619, %c0_620, %c0_621] : memref<10x9x128x128xbf16, #tpu.memory_space<vmem>>, vector<1x1x128x128xbf16>
    %618 = vector.shape_cast %617 : vector<1x1x128x128xbf16> to vector<128x128xbf16>
    %cst_622 = arith.constant dense<0.000000e+00> : vector<1x128xf32>
    %619 = tpu.matmul %616, %618, %cst_622 {dimension_numbers = #tpu.dot_dimension_numbers<[1], [0], [0], [1], [0, 0, 1, 1], [], []>} : vector<1x128xbf16>, vector<128x128xbf16>, vector<1x128xf32> -> vector<1x128xf32>
    %620 = arith.addf %612, %619 : vector<1x128xf32>
    %c4_623 = arith.constant 4 : index
    %c0_624 = arith.constant 0 : index
    %c0_625 = arith.constant 0 : index
    %621 = vector.load %arg10[%c4_623, %c0_624, %c0_625] : memref<9x1x4xbf16, #tpu.memory_space<vmem>>, vector<1x1x4xbf16>
    %622 = vector.shape_cast %621 : vector<1x1x4xbf16> to vector<1x4xbf16>
    %cst_626 = arith.constant dense<0.000000e+00> : vector<1x128xf32>
    %623 = tpu.matmul %622, %587, %cst_626 {dimension_numbers = #tpu.dot_dimension_numbers<[1], [0], [0], [1], [0, 0, 1, 1], [], []>} : vector<1x4xbf16>, vector<4x128xbf16>, vector<1x128xf32> -> vector<1x128xf32>
    %624 = arith.truncf %623 : vector<1x128xf32> to vector<1x128xbf16>
    %c7_627 = arith.constant 7 : index
    %c4_628 = arith.constant 4 : index
    %c0_629 = arith.constant 0 : index
    %c0_630 = arith.constant 0 : index
    %625 = vector.load %arg2[%c7_627, %c4_628, %c0_629, %c0_630] : memref<10x9x128x128xbf16, #tpu.memory_space<vmem>>, vector<1x1x128x128xbf16>
    %626 = vector.shape_cast %625 : vector<1x1x128x128xbf16> to vector<128x128xbf16>
    %cst_631 = arith.constant dense<0.000000e+00> : vector<1x128xf32>
    %627 = tpu.matmul %624, %626, %cst_631 {dimension_numbers = #tpu.dot_dimension_numbers<[1], [0], [0], [1], [0, 0, 1, 1], [], []>} : vector<1x128xbf16>, vector<128x128xbf16>, vector<1x128xf32> -> vector<1x128xf32>
    %628 = arith.addf %620, %627 : vector<1x128xf32>
    %c5_632 = arith.constant 5 : index
    %c0_633 = arith.constant 0 : index
    %c0_634 = arith.constant 0 : index
    %629 = vector.load %arg10[%c5_632, %c0_633, %c0_634] : memref<9x1x4xbf16, #tpu.memory_space<vmem>>, vector<1x1x4xbf16>
    %630 = vector.shape_cast %629 : vector<1x1x4xbf16> to vector<1x4xbf16>
    %cst_635 = arith.constant dense<0.000000e+00> : vector<1x128xf32>
    %631 = tpu.matmul %630, %587, %cst_635 {dimension_numbers = #tpu.dot_dimension_numbers<[1], [0], [0], [1], [0, 0, 1, 1], [], []>} : vector<1x4xbf16>, vector<4x128xbf16>, vector<1x128xf32> -> vector<1x128xf32>
    %632 = arith.truncf %631 : vector<1x128xf32> to vector<1x128xbf16>
    %c7_636 = arith.constant 7 : index
    %c5_637 = arith.constant 5 : index
    %c0_638 = arith.constant 0 : index
    %c0_639 = arith.constant 0 : index
    %633 = vector.load %arg2[%c7_636, %c5_637, %c0_638, %c0_639] : memref<10x9x128x128xbf16, #tpu.memory_space<vmem>>, vector<1x1x128x128xbf16>
    %634 = vector.shape_cast %633 : vector<1x1x128x128xbf16> to vector<128x128xbf16>
    %cst_640 = arith.constant dense<0.000000e+00> : vector<1x128xf32>
    %635 = tpu.matmul %632, %634, %cst_640 {dimension_numbers = #tpu.dot_dimension_numbers<[1], [0], [0], [1], [0, 0, 1, 1], [], []>} : vector<1x128xbf16>, vector<128x128xbf16>, vector<1x128xf32> -> vector<1x128xf32>
    %636 = arith.addf %628, %635 : vector<1x128xf32>
    %c6_641 = arith.constant 6 : index
    %c0_642 = arith.constant 0 : index
    %c0_643 = arith.constant 0 : index
    %637 = vector.load %arg10[%c6_641, %c0_642, %c0_643] : memref<9x1x4xbf16, #tpu.memory_space<vmem>>, vector<1x1x4xbf16>
    %638 = vector.shape_cast %637 : vector<1x1x4xbf16> to vector<1x4xbf16>
    %cst_644 = arith.constant dense<0.000000e+00> : vector<1x128xf32>
    %639 = tpu.matmul %638, %587, %cst_644 {dimension_numbers = #tpu.dot_dimension_numbers<[1], [0], [0], [1], [0, 0, 1, 1], [], []>} : vector<1x4xbf16>, vector<4x128xbf16>, vector<1x128xf32> -> vector<1x128xf32>
    %640 = arith.truncf %639 : vector<1x128xf32> to vector<1x128xbf16>
    %c7_645 = arith.constant 7 : index
    %c6_646 = arith.constant 6 : index
    %c0_647 = arith.constant 0 : index
    %c0_648 = arith.constant 0 : index
    %641 = vector.load %arg2[%c7_645, %c6_646, %c0_647, %c0_648] : memref<10x9x128x128xbf16, #tpu.memory_space<vmem>>, vector<1x1x128x128xbf16>
    %642 = vector.shape_cast %641 : vector<1x1x128x128xbf16> to vector<128x128xbf16>
    %cst_649 = arith.constant dense<0.000000e+00> : vector<1x128xf32>
    %643 = tpu.matmul %640, %642, %cst_649 {dimension_numbers = #tpu.dot_dimension_numbers<[1], [0], [0], [1], [0, 0, 1, 1], [], []>} : vector<1x128xbf16>, vector<128x128xbf16>, vector<1x128xf32> -> vector<1x128xf32>
    %644 = arith.addf %636, %643 : vector<1x128xf32>
    %c7_650 = arith.constant 7 : index
    %c0_651 = arith.constant 0 : index
    %c0_652 = arith.constant 0 : index
    %645 = vector.load %arg10[%c7_650, %c0_651, %c0_652] : memref<9x1x4xbf16, #tpu.memory_space<vmem>>, vector<1x1x4xbf16>
    %646 = vector.shape_cast %645 : vector<1x1x4xbf16> to vector<1x4xbf16>
    %cst_653 = arith.constant dense<0.000000e+00> : vector<1x128xf32>
    %647 = tpu.matmul %646, %587, %cst_653 {dimension_numbers = #tpu.dot_dimension_numbers<[1], [0], [0], [1], [0, 0, 1, 1], [], []>} : vector<1x4xbf16>, vector<4x128xbf16>, vector<1x128xf32> -> vector<1x128xf32>
    %648 = arith.truncf %647 : vector<1x128xf32> to vector<1x128xbf16>
    %c7_654 = arith.constant 7 : index
    %c7_655 = arith.constant 7 : index
    %c0_656 = arith.constant 0 : index
    %c0_657 = arith.constant 0 : index
    %649 = vector.load %arg2[%c7_654, %c7_655, %c0_656, %c0_657] : memref<10x9x128x128xbf16, #tpu.memory_space<vmem>>, vector<1x1x128x128xbf16>
    %650 = vector.shape_cast %649 : vector<1x1x128x128xbf16> to vector<128x128xbf16>
    %cst_658 = arith.constant dense<0.000000e+00> : vector<1x128xf32>
    %651 = tpu.matmul %648, %650, %cst_658 {dimension_numbers = #tpu.dot_dimension_numbers<[1], [0], [0], [1], [0, 0, 1, 1], [], []>} : vector<1x128xbf16>, vector<128x128xbf16>, vector<1x128xf32> -> vector<1x128xf32>
    %652 = arith.addf %644, %651 : vector<1x128xf32>
    %c8_659 = arith.constant 8 : index
    %c0_660 = arith.constant 0 : index
    %c0_661 = arith.constant 0 : index
    %653 = vector.load %arg10[%c8_659, %c0_660, %c0_661] : memref<9x1x4xbf16, #tpu.memory_space<vmem>>, vector<1x1x4xbf16>
    %654 = vector.shape_cast %653 : vector<1x1x4xbf16> to vector<1x4xbf16>
    %cst_662 = arith.constant dense<0.000000e+00> : vector<1x128xf32>
    %655 = tpu.matmul %654, %587, %cst_662 {dimension_numbers = #tpu.dot_dimension_numbers<[1], [0], [0], [1], [0, 0, 1, 1], [], []>} : vector<1x4xbf16>, vector<4x128xbf16>, vector<1x128xf32> -> vector<1x128xf32>
    %656 = arith.truncf %655 : vector<1x128xf32> to vector<1x128xbf16>
    %c7_663 = arith.constant 7 : index
    %c8_664 = arith.constant 8 : index
    %c0_665 = arith.constant 0 : index
    %c0_666 = arith.constant 0 : index
    %657 = vector.load %arg2[%c7_663, %c8_664, %c0_665, %c0_666] : memref<10x9x128x128xbf16, #tpu.memory_space<vmem>>, vector<1x1x128x128xbf16>
    %658 = vector.shape_cast %657 : vector<1x1x128x128xbf16> to vector<128x128xbf16>
    %cst_667 = arith.constant dense<0.000000e+00> : vector<1x128xf32>
    %659 = tpu.matmul %656, %658, %cst_667 {dimension_numbers = #tpu.dot_dimension_numbers<[1], [0], [0], [1], [0, 0, 1, 1], [], []>} : vector<1x128xbf16>, vector<128x128xbf16>, vector<1x128xf32> -> vector<1x128xf32>
    %660 = arith.addf %652, %659 : vector<1x128xf32>
    %c7_668 = arith.constant 7 : index
    %c0_669 = arith.constant 0 : index
    %661 = vector.load %arg3[%c7_668, %c0_669] : memref<10x128xf32, #tpu.memory_space<vmem>>, vector<1x128xf32>
    %662 = vector.shape_cast %661 : vector<1x128xf32> to vector<128xf32>
    %663 = vector.shape_cast %662 : vector<128xf32> to vector<1x128xf32>
    %664 = arith.mulf %660, %663 : vector<1x128xf32>
    %c7_670 = arith.constant 7 : index
    %c0_671 = arith.constant 0 : index
    %665 = vector.load %arg4[%c7_670, %c0_671] : memref<10x128xf32, #tpu.memory_space<vmem>>, vector<1x128xf32>
    %666 = vector.shape_cast %665 : vector<1x128xf32> to vector<128xf32>
    %667 = vector.shape_cast %666 : vector<128xf32> to vector<1x128xf32>
    %668 = arith.addf %664, %667 : vector<1x128xf32>
    %cst_672 = arith.constant 0.000000e+00 : f32
    %669 = vector.broadcast %cst_672 : f32 to vector<1x128xf32>
    %670 = arith.maximumf %668, %669 : vector<1x128xf32>
    %671 = arith.truncf %670 : vector<1x128xf32> to vector<1x128xbf16>
    %c8_673 = arith.constant 8 : index
    %c4_674 = arith.constant 4 : index
    %c0_675 = arith.constant 0 : index
    %c0_676 = arith.constant 0 : index
    %672 = vector.load %arg2[%c8_673, %c4_674, %c0_675, %c0_676] : memref<10x9x128x128xbf16, #tpu.memory_space<vmem>>, vector<1x1x128x128xbf16>
    %673 = vector.shape_cast %672 : vector<1x1x128x128xbf16> to vector<128x128xbf16>
    %cst_677 = arith.constant dense<0.000000e+00> : vector<1x128xf32>
    %674 = tpu.matmul %671, %673, %cst_677 {dimension_numbers = #tpu.dot_dimension_numbers<[1], [0], [0], [1], [0, 0, 1, 1], [], []>} : vector<1x128xbf16>, vector<128x128xbf16>, vector<1x128xf32> -> vector<1x128xf32>
    %c8_678 = arith.constant 8 : index
    %c0_679 = arith.constant 0 : index
    %675 = vector.load %arg3[%c8_678, %c0_679] : memref<10x128xf32, #tpu.memory_space<vmem>>, vector<1x128xf32>
    %676 = vector.shape_cast %675 : vector<1x128xf32> to vector<128xf32>
    %677 = vector.shape_cast %676 : vector<128xf32> to vector<1x128xf32>
    %678 = arith.mulf %674, %677 : vector<1x128xf32>
    %c8_680 = arith.constant 8 : index
    %c0_681 = arith.constant 0 : index
    %679 = vector.load %arg4[%c8_680, %c0_681] : memref<10x128xf32, #tpu.memory_space<vmem>>, vector<1x128xf32>
    %680 = vector.shape_cast %679 : vector<1x128xf32> to vector<128xf32>
    %681 = vector.shape_cast %680 : vector<128xf32> to vector<1x128xf32>
    %682 = arith.addf %678, %681 : vector<1x128xf32>
    %cst_682 = arith.constant 0.000000e+00 : f32
    %683 = vector.broadcast %cst_682 : f32 to vector<1x128xf32>
    %684 = arith.maximumf %682, %683 : vector<1x128xf32>
    %685 = arith.truncf %684 : vector<1x128xf32> to vector<1x128xbf16>
    %c9 = arith.constant 9 : index
    %c4_683 = arith.constant 4 : index
    %c0_684 = arith.constant 0 : index
    %c0_685 = arith.constant 0 : index
    %686 = vector.load %arg2[%c9, %c4_683, %c0_684, %c0_685] : memref<10x9x128x128xbf16, #tpu.memory_space<vmem>>, vector<1x1x128x128xbf16>
    %687 = vector.shape_cast %686 : vector<1x1x128x128xbf16> to vector<128x128xbf16>
    %cst_686 = arith.constant dense<0.000000e+00> : vector<1x128xf32>
    %688 = tpu.matmul %685, %687, %cst_686 {dimension_numbers = #tpu.dot_dimension_numbers<[1], [0], [0], [1], [0, 0, 1, 1], [], []>} : vector<1x128xbf16>, vector<128x128xbf16>, vector<1x128xf32> -> vector<1x128xf32>
    %c9_687 = arith.constant 9 : index
    %c0_688 = arith.constant 0 : index
    %689 = vector.load %arg3[%c9_687, %c0_688] : memref<10x128xf32, #tpu.memory_space<vmem>>, vector<1x128xf32>
    %690 = vector.shape_cast %689 : vector<1x128xf32> to vector<128xf32>
    %691 = vector.shape_cast %690 : vector<128xf32> to vector<1x128xf32>
    %692 = arith.mulf %688, %691 : vector<1x128xf32>
    %c9_689 = arith.constant 9 : index
    %c0_690 = arith.constant 0 : index
    %693 = vector.load %arg4[%c9_689, %c0_690] : memref<10x128xf32, #tpu.memory_space<vmem>>, vector<1x128xf32>
    %694 = vector.shape_cast %693 : vector<1x128xf32> to vector<128xf32>
    %695 = vector.shape_cast %694 : vector<128xf32> to vector<1x128xf32>
    %696 = arith.addf %692, %695 : vector<1x128xf32>
    %cst_691 = arith.constant 0.000000e+00 : f32
    %697 = vector.broadcast %cst_691 : f32 to vector<1x128xf32>
    %698 = arith.maximumf %696, %697 : vector<1x128xf32>
    %699 = arith.truncf %698 : vector<1x128xf32> to vector<1x128xbf16>
    %c0_692 = arith.constant 0 : index
    %c0_693 = arith.constant 0 : index
    %700 = vector.load %arg11[%c0_692, %c0_693] : memref<128x128xbf16, #tpu.memory_space<vmem>>, vector<128x128xbf16>
    %cst_694 = arith.constant dense<0.000000e+00> : vector<1x128xf32>
    %701 = tpu.matmul %699, %700, %cst_694 {dimension_numbers = #tpu.dot_dimension_numbers<[1], [0], [0], [1], [0, 0, 1, 1], [], []>} : vector<1x128xbf16>, vector<128x128xbf16>, vector<1x128xf32> -> vector<1x128xf32>
    %c0_695 = arith.constant 0 : index
    %c0_696 = arith.constant 0 : index
    %702 = vector.load %arg12[%c0_695, %c0_696] : memref<1x128xf32, #tpu.memory_space<vmem>>, vector<1x128xf32>
    %703 = arith.addf %701, %702 : vector<1x128xf32>
    %c0_697 = arith.constant 0 : index
    %c0_698 = arith.constant 0 : index
    %c0_699 = arith.constant 0 : index
    %704 = vector.load %arg13[%c0_697, %c0_698, %c0_699] : memref<1x1x128xf32, #tpu.memory_space<vmem>>, vector<1x1x128xf32>
    %705 = vector.shape_cast %704 : vector<1x1x128xf32> to vector<1x128xf32>
    %706 = vector.shape_cast %703 : vector<1x128xf32> to vector<1x1x128xf32>
    tpu.vector_store %arg13[%c0_697, %c0_698, %c0_699], %706 {strides = array<i32>} : memref<1x1x128xf32, #tpu.memory_space<vmem>>, vector<1x1x128xf32>,
    return
  }
  func.func @transform_0(%arg0: i32) -> (i32, i32, i32) {
    %c0_i32 = arith.constant 0 : i32
    %c0_i32_0 = arith.constant 0 : i32
    %c0_i32_1 = arith.constant 0 : i32
    return %arg0, %c0_i32, %c0_i32_0 : i32, i32, i32
  }
  func.func @transform_1(%arg0: i32) -> (i32, i32, i32, i32) {
    %c0_i32 = arith.constant 0 : i32
    %c0_i32_0 = arith.constant 0 : i32
    %c0_i32_1 = arith.constant 0 : i32
    %c0_i32_2 = arith.constant 0 : i32
    %c0_i32_3 = arith.constant 0 : i32
    return %c0_i32, %c0_i32_0, %c0_i32_1, %c0_i32_2 : i32, i32, i32, i32
  }
  func.func @transform_2(%arg0: i32) -> (i32, i32) {
    %c0_i32 = arith.constant 0 : i32
    %c0_i32_0 = arith.constant 0 : i32
    %c0_i32_1 = arith.constant 0 : i32
    return %c0_i32, %c0_i32_0 : i32, i32
  }
  func.func @transform_3(%arg0: i32) -> (i32, i32) {
    %c0_i32 = arith.constant 0 : i32
    %c0_i32_0 = arith.constant 0 : i32
    %c0_i32_1 = arith.constant 0 : i32
    return %c0_i32, %c0_i32_0 : i32, i32
  }
  func.func @transform_4(%arg0: i32) -> (i32, i32, i32) {
    %c0_i32 = arith.constant 0 : i32
    %c0_i32_0 = arith.constant 0 : i32
    %c0_i32_1 = arith.constant 0 : i32
    %c0_i32_2 = arith.constant 0 : i32
    return %c0_i32, %c0_i32_0, %c0_i32_1 : i32, i32, i32
  }
  func.func @transform_5(%arg0: i32) -> (i32, i32, i32) {
    %c0_i32 = arith.constant 0 : i32
    %c0_i32_0 = arith.constant 0 : i32
    %c0_i32_1 = arith.constant 0 : i32
    %c0_i32_2 = arith.constant 0 : i32
    return %c0_i32, %c0_i32_0, %c0_i32_1 : i32, i32, i32
  }
  func.func @transform_6(%arg0: i32) -> (i32, i32, i32) {
    %c0_i32 = arith.constant 0 : i32
    %c0_i32_0 = arith.constant 0 : i32
    %c0_i32_1 = arith.constant 0 : i32
    %c0_i32_2 = arith.constant 0 : i32
    return %c0_i32, %c0_i32_0, %c0_i32_1 : i32, i32, i32
  }
  func.func @transform_7(%arg0: i32) -> (i32, i32, i32) {
    %c0_i32 = arith.constant 0 : i32
    %c0_i32_0 = arith.constant 0 : i32
    %c0_i32_1 = arith.constant 0 : i32
    %c0_i32_2 = arith.constant 0 : i32
    return %c0_i32, %c0_i32_0, %c0_i32_1 : i32, i32, i32
  }
  func.func @transform_8(%arg0: i32) -> (i32, i32, i32) {
    %c0_i32 = arith.constant 0 : i32
    %c0_i32_0 = arith.constant 0 : i32
    %c0_i32_1 = arith.constant 0 : i32
    %c0_i32_2 = arith.constant 0 : i32
    return %c0_i32, %c0_i32_0, %c0_i32_1 : i32, i32, i32
  }
  func.func @transform_9(%arg0: i32) -> (i32, i32, i32) {
    %c0_i32 = arith.constant 0 : i32
    %c0_i32_0 = arith.constant 0 : i32
    %c0_i32_1 = arith.constant 0 : i32
    %c0_i32_2 = arith.constant 0 : i32
    return %c0_i32, %c0_i32_0, %c0_i32_1 : i32, i32, i32
  }
  func.func @transform_10(%arg0: i32) -> (i32, i32) {
    %c0_i32 = arith.constant 0 : i32
    %c0_i32_0 = arith.constant 0 : i32
    %c0_i32_1 = arith.constant 0 : i32
    return %c0_i32, %c0_i32_0 : i32, i32
  }
  func.func @transform_11(%arg0: i32) -> (i32, i32) {
    %c0_i32 = arith.constant 0 : i32
    %c0_i32_0 = arith.constant 0 : i32
    %c0_i32_1 = arith.constant 0 : i32
    return %c0_i32, %c0_i32_0 : i32, i32
  }
  func.func @transform_12(%arg0: i32) -> (i32, i32, i32) {
    %c0_i32 = arith.constant 0 : i32
    %c0_i32_0 = arith.constant 0 : i32
    %c0_i32_1 = arith.constant 0 : i32
    return %arg0, %c0_i32, %c0_i32_0 : i32, i32, i32
  }
}

</mosaic_0001>

<bundles_post_ra>
// kernel: forward.1
= control target key start
LH: loop header
LB: loop body
LE: loop exit
PB: predicated region body
PF: predicated region fallthrough
CT: control target
= control target key end

     0   :  { %s20833_s0 = inlined_call_operand.vmem [shape: bf16[2,256,128], index: 0, kind: input, shape index: {}]   ;;  %s20834_s1 = inlined_call_operand.hbm [shape: bf16[10,9,128,128], index: 1, kind: input, shape index: {}]   ;;  %s20835_s2 = inlined_call_operand.hbm [shape: f32[10,128], index: 2, kind: input, shape index: {}]   ;;  %s20836_s3 = inlined_call_operand.hbm [shape: f32[10,128], index: 3, kind: input, shape index: {}]   ;;  %s20837_s4 = inlined_call_operand.hbm [shape: bf16[9,64,256], index: 4, kind: input, shape index: {}]   ;;  %s20838_s5 = inlined_call_operand.hbm [shape: bf16[9,16,64], index: 5, kind: input, shape index: {}]   ;;  %s20839_s6 = inlined_call_operand.hbm [shape: bf16[9,16,16], index: 6, kind: input, shape index: {}]   ;;  %s20840_s7 = inlined_call_operand.hbm [shape: bf16[9,4,16], index: 7, kind: input, shape index: {}]   ;;  %s20841_s8 = inlined_call_operand.vmem [shape: bf16[9,4,4], index: 8, kind: input, shape index: {}]   ;;  %s20842_s9 = inlined_call_operand.vmem [shape: bf16[9,1,4], index: 9, kind: input, shape index: {}]   ;;  %s20843_s10 = inlined_call_operand.hbm [shape: bf16[128,128], index: 10, kind: input, shape index: {}]   ;;  %s20844_s11 = inlined_call_operand.hbm [shape: f32[1,128], index: 11, kind: input, shape index: {}]   ;;  %s20845_s12 = inlined_call_operand.hbm [shape: f32[2,1,128], index: 12, kind: output, shape index: {}]  }
   0x1   :  { %20860 = sst [smem:[#allocation30_spill]] %s20835_s2 }
   0x2   :  { %20861 = sst [smem:[#allocation31_spill]] %s20845_s12 }
   0x3   :  { %17 = vsyncpa [#allocation3], 0 }
   0x4   :  { %18 = vsyncpa [#allocation6], 0 }
   0x5   :  { %19 = vsyncpa [#allocation9], 0 }
   0x6   :  { %20 = vsyncpa [#allocation12], 0 }
   0x7   :  { %21 = vsyncpa [#allocation15], 0 }
   0x8   :  { %22 = vsyncpa [#allocation4], 0 }
   0x9   :  { %24 = vsyncpa [#allocation4 + $0x1], 0  ;;  %s18615_s21 = smov 0   ;;  %s18617_s22 = smov 0  }
   0xa   :  { %s18619_s23 = smov 0   ;;  %s18621_s24 = smov 0  }
   0xb LB: > { %20862 = sst [smem:[#allocation24_spill]] %s18518_s21  ;;  %s18636_s25 = sadd.s32 4294967295, %s18530_s24   ;;  %s18530_s24 = sphi %s18621_s24, %s20895_s24   ;;  %s18526_s23 = sphi %s18619_s23, %s20897_s23   ;;  %s18522_s22 = sphi %s18617_s22, %s20899_s22   ;;  %s18518_s21 = sphi %s18615_s21, %s20898_s21  }
   0xc   : > { %20863 = sst [smem:[#allocation25_spill]] %s18526_s23  ;;  %s13033_s26 = sadd.s32 4294967294, %s18530_s24  }
   0xd   : > { %20864 = sst [smem:[#allocation26_spill]] %s18530_s24  ;;  %s18640_s27 = sadd.s32 1, %s18530_s24  }
   0xe   : > { %20865 = sst [smem:[#allocation27_spill]] %s18640_s27  ;;  %s294_s28 = sadd.s32 1, %s18526_s23 }
   0xf   : > { %s291_s29 = ssub.s32 %s18530_s24, %s18640_s27  ;;  %p304_p0 = scmp.ne.s32.totalorder %s18526_s23, %s18522_s22 }
  0x10   : > { %p292_p1 = scmp.eq.s32.totalorder %s291_s29, 0  ;;  %p305_p2 = scmp.eq.s32.totalorder %s18636_s25, 1 }
  0x11   : > { %p310_p3 = scmp.ne.s32.totalorder %s18522_s22, %s18518_s21  ;;  %p311_p4 = scmp.eq.s32.totalorder %s13033_s26, 1 }
  0x12   : > { %s18651_s30 = scalar_select %p292_p1, %s18526_s23, %s294_s28  }
  0x13   : > { %p18653_p5 = por %p305_p2, %p304_p0  ;;  %p18657_p6 = por %p311_p4, %p310_p3 }
  0x14   : > { %20866 = sst [smem:[#allocation28_spill]] %s18651_s30  ;;  %p13034_p7 = scmp.ge.s32.totalorder %s18530_s24, 1 }
  0x15   : > { %s20867_s13 = scalar_select %p18653_p5, 1, 0 }
  0x16   : > { %s20868_s14 = scalar_select %p18657_p6, 1, 0 }
  0x17   : > { %p318_p8 = scmp.lt.s32.totalorder %s18530_s24, 3  ;;  %p20849_p9 = scmp.eq.s32.totalorder %s18636_s25, 0 }
  0x18   : > { %20869 = sst [smem:[#allocation29_spill]] %s20868_s14  ;;  %s18532_s16 = smov [#allocation5]  }
  0x19   : > { %p18664_p10 = pnand %p13034_p7, %p318_p8  ;;  %s343_s17 = sshll.u32 %s18532_s16, 4  ;;  %s344_s17 = int_to_ptr.vmem [resolvable:$true] %s343_s17 }
  0x1a   : > { %s18533_s19 = smov [#allocation8]   ;;  %s20872_s2 = sld [smem:[#allocation30_spill]] }
  0x1b   : > { %s20870_s15 = scalar_select %p18664_p10, 1, 0 }
  0x1c   : > { %p17331_p11 = pneg %p18664_p10  ;;  %s369_s20 = sshll.u32 %s18533_s19, 4  ;;  %s18676_s20 = int_to_ptr.vmem [resolvable:$true] %s369_s20 }
  0x1e   : > { %p18672_p12 = pnand %p20849_p9, %p17331_p11 }
  0x20   : > { %s18196_s29 = scalar_lea.hbm %s20872_s2, 256  ;;  %p18686_p0 = pneg %p18672_p12 }
  0x21   : > { %p18197_p13 = scmp.ne.s32.totalorder %s20872_s2, %s18196_s29  ;;  %p18203_p3 = scmp.lt.u32.totalorder %s18196_s29, %s20872_s2 }
  0x23   : > { %p18199_p1 = pnand %p18686_p0, %p18197_p13 }
  0x25   : > { %p18200_p2 = pneg %p18199_p1 }
  0x27   : > { %p18205_p4 = pnand %p18203_p3, %p18200_p2 }
  0x29   : > { %18208 = shalt.err (!%p18205_p4)
}
  0x2a   : > { %s18209_s26 = scalar_lea.vmem %s344_s17, 256  ;;  %p18217_p9 = scmp.lt.s32.totalorder %s344_s17, %s344_s17 }
  0x2b   : > { %p18210_p7 = scmp.ne.s32.totalorder %s344_s17, %s18209_s26  ;;  %p18218_p6 = scmp.lt.s32.totalorder %s18209_s26, %s18209_s26 }
  0x2d   : > { %p18212_p8 = pnand %p18210_p7, %p18686_p0  ;;  %p18219_p5 = por %p18218_p6, %p18217_p9 }
  0x2f   : > { %p18213_p11 = pneg %p18212_p8 }
  0x31   : > { %p18220_p10 = pnand %p18219_p5, %p18213_p11 }
  0x33   : > { %18223 = shalt.err (!%p18220_p10)
}
  0x34   : > { %s20856_s23 = smov 128   ;;  %s20857_s30 = smov 8  }
  0x35   : > { %17337 = dma.hbm_to_vmem [thread:$0]  (!%p18672_p12), %s20872_s2, 256, %s344_s17, [#allocation6], %s20856_s23, %s20856_s23, %s20857_s30  }
  0x36   : > { %s18224_s14 = scalar_lea.hbm %s20837_s4, 9216 }
  0x37   : > { %p18225_p5 = scmp.ne.s32.totalorder %s20837_s4, %s18224_s14  ;;  %p18231_p10 = scmp.lt.u32.totalorder %s18224_s14, %s20837_s4 }
  0x39   : > { %p18227_p6 = pnand %p18225_p5, %p18686_p0 }
  0x3b   : > { %p18228_p9 = pneg %p18227_p6 }
  0x3d   : > { %p18233_p13 = pnand %p18231_p10, %p18228_p9 }
  0x3f   : > { %18236 = shalt.err (!%p18233_p13)
}
  0x40   : > { %s18237_s17 = scalar_lea.vmem %s18676_s20, 9216  ;;  %p18245_p4 = scmp.lt.s32.totalorder %s18676_s20, %s18676_s20 }
  0x41   : > { %p18238_p1 = scmp.ne.s32.totalorder %s18676_s20, %s18237_s17  ;;  %p18246_p7 = scmp.lt.s32.totalorder %s18237_s17, %s18237_s17 }
  0x43   : > { %p18240_p2 = pnand %p18238_p1, %p18686_p0  ;;  %p18247_p8 = por %p18246_p7, %p18245_p4 }
  0x45   : > { %p18241_p3 = pneg %p18240_p2 }
  0x47   : > { %p18248_p11 = pnand %p18247_p8, %p18241_p3 }
  0x49   : > { %18251 = shalt.err (!%p18248_p11)
}
  0x4a   : > { %17343 = dma.hbm_to_vmem [thread:$0]  (!%p18672_p12), %s20837_s4, 9216, %s18676_s20, [#allocation9], %s20856_s23, %s20856_s23, %s20857_s30  }
  0x4b   : > { %s18536_s24 = smov [#allocation11]   ;;  %s18537_s27 = smov [#allocation14]  }
  0x4c   : > { %s395_s14 = sshll.u32 %s18536_s24, 4  ;;  %s427_s28 = sshll.u32 %s18537_s27, 4  ;;  %s396_s14 = int_to_ptr.vmem [resolvable:$true] %s395_s14  ;;  %s18731_s28 = int_to_ptr.vmem [resolvable:$true] %s427_s28 }
  0x4d   : > { %s18252_s26 = scalar_lea.hbm %s20839_s6, 1152 }
  0x4e   : > { %p18253_p5 = scmp.ne.s32.totalorder %s20839_s6, %s18252_s26  ;;  %p18259_p10 = scmp.lt.u32.totalorder %s18252_s26, %s20839_s6 }
  0x50   : > { %p18255_p6 = pnand %p18253_p5, %p18686_p0 }
  0x52   : > { %p18256_p9 = pneg %p18255_p6 }
  0x54   : > { %p18261_p13 = pnand %p18259_p10, %p18256_p9 }
  0x56   : > { %18264 = shalt.err (!%p18261_p13)
}
  0x57   : > { %s18265_s21 = scalar_lea.vmem %s396_s14, 1152  ;;  %p18273_p4 = scmp.lt.s32.totalorder %s396_s14, %s396_s14 }
  0x58   : > { %p18266_p1 = scmp.ne.s32.totalorder %s396_s14, %s18265_s21  ;;  %p18274_p7 = scmp.lt.s32.totalorder %s18265_s21, %s18265_s21 }
  0x5a   : > { %p18268_p2 = pnand %p18266_p1, %p18686_p0  ;;  %p18275_p8 = por %p18274_p7, %p18273_p4 }
  0x5c   : > { %p18269_p3 = pneg %p18268_p2 }
  0x5e   : > { %p18276_p11 = pnand %p18275_p8, %p18269_p3 }
  0x60   : > { %18279 = shalt.err (!%p18276_p11)
}
  0x61   : > { %s20858_s2 = smov 64   ;;  %s20859_s24 = smov 4  }
  0x62   : > { %17349 = dma.hbm_to_vmem [thread:$0]  (!%p18672_p12), %s20839_s6, 1152, %s396_s14, [#allocation12], %s20858_s2, %s20858_s2, %s20859_s24  }
  0x63   : > { %s18280_s17 = scalar_lea.hbm %s20843_s10, 1024 }
  0x64   : > { %p18281_p5 = scmp.ne.s32.totalorder %s20843_s10, %s18280_s17  ;;  %p18287_p10 = scmp.lt.u32.totalorder %s18280_s17, %s20843_s10 }
  0x66   : > { %p18283_p6 = pnand %p18281_p5, %p18686_p0 }
  0x68   : > { %p18284_p9 = pneg %p18283_p6 }
  0x6a   : > { %p18289_p13 = pnand %p18287_p10, %p18284_p9 }
  0x6c   : > { %18292 = shalt.err (!%p18289_p13)
}
  0x6d   : > { %s18293_s14 = scalar_lea.vmem %s18731_s28, 1024  ;;  %p18301_p4 = scmp.lt.s32.totalorder %s18731_s28, %s18731_s28 }
  0x6e   : > { %p18294_p1 = scmp.ne.s32.totalorder %s18731_s28, %s18293_s14  ;;  %p18302_p7 = scmp.lt.s32.totalorder %s18293_s14, %s18293_s14 }
  0x70   : > { %p18296_p2 = pnand %p18294_p1, %p18686_p0  ;;  %p18303_p8 = por %p18302_p7, %p18301_p4 }
  0x72   : > { %p18297_p3 = pneg %p18296_p2 }
  0x74   : > { %p18304_p11 = pnand %p18303_p8, %p18297_p3 }
  0x76   : > { %18307 = shalt.err (!%p18304_p11)
}
  0x77   : > { %17355 = dma.hbm_to_vmem [thread:$0]  (!%p18672_p12), %s20843_s10, 1024, %s18731_s28, [#allocation15], %s20858_s2, %s20858_s2, %s20859_s24  }
  0x78   : > { %s18540_s29 = smov [#allocation2]   ;;  %s18541_s26 = smov [#allocation7]  }
  0x79   : > { %s330_s19 = sshll.u32 %s18540_s29, 4  ;;  %s356_s17 = sshll.u32 %s18541_s26, 4  ;;  %s331_s19 = int_to_ptr.vmem [resolvable:$true] %s330_s19  ;;  %s18780_s17 = int_to_ptr.vmem [resolvable:$true] %s356_s17 }
  0x7a   : > { %s18308_s21 = scalar_lea.hbm %s20834_s1, 92160 }
  0x7b   : > { %p18309_p5 = scmp.ne.s32.totalorder %s20834_s1, %s18308_s21  ;;  %p18315_p10 = scmp.lt.u32.totalorder %s18308_s21, %s20834_s1 }
  0x7d   : > { %p18311_p6 = pnand %p18309_p5, %p18686_p0 }
  0x7f   : > { %p18312_p9 = pneg %p18311_p6 }
  0x81   : > { %p18317_p13 = pnand %p18315_p10, %p18312_p9 }
  0x83   : > { %18320 = shalt.err (!%p18317_p13)
}
  0x84   : > { %s18321_s27 = scalar_lea.vmem %s331_s19, 92160  ;;  %p18329_p4 = scmp.lt.s32.totalorder %s331_s19, %s331_s19 }
  0x85   : > { %p18322_p1 = scmp.ne.s32.totalorder %s331_s19, %s18321_s27  ;;  %p18330_p7 = scmp.lt.s32.totalorder %s18321_s27, %s18321_s27 }
  0x87   : > { %p18324_p2 = pnand %p18322_p1, %p18686_p0  ;;  %p18331_p8 = por %p18330_p7, %p18329_p4 }
  0x89   : > { %p18325_p3 = pneg %p18324_p2 }
  0x8b   : > { %p18332_p11 = pnand %p18331_p8, %p18325_p3 }
  0x8d   : > { %18335 = shalt.err (!%p18332_p11)
}
  0x8e   : > { %17334 = dma.hbm_to_vmem [thread:$0]  (!%p18672_p12), %s20834_s1, 92160, %s331_s19, [#allocation3], %s20858_s2, %s20858_s2, %s20859_s24  }
  0x8f   : > { %s18336_s20 = scalar_lea.hbm %s20836_s3, 256 }
  0x90   : > { %p18337_p5 = scmp.ne.s32.totalorder %s20836_s3, %s18336_s20  ;;  %p18343_p10 = scmp.lt.u32.totalorder %s18336_s20, %s20836_s3 }
  0x92   : > { %p18339_p6 = pnand %p18337_p5, %p18686_p0 }
  0x94   : > { %p18340_p9 = pneg %p18339_p6 }
  0x96   : > { %p18345_p13 = pnand %p18343_p10, %p18340_p9 }
  0x98   : > { %18348 = shalt.err (!%p18345_p13)
}
  0x99   : > { %s18349_s19 = scalar_lea.vmem %s18780_s17, 256  ;;  %p18357_p4 = scmp.lt.s32.totalorder %s18780_s17, %s18780_s17 }
  0x9a   : > { %p18350_p1 = scmp.ne.s32.totalorder %s18780_s17, %s18349_s19  ;;  %p18358_p7 = scmp.lt.s32.totalorder %s18349_s19, %s18349_s19 }
  0x9c   : > { %p18352_p2 = pnand %p18350_p1, %p18686_p0  ;;  %p18359_p8 = por %p18358_p7, %p18357_p4 }
  0x9e   : > { %p18353_p3 = pneg %p18352_p2 }
  0xa0   : > { %p18360_p11 = pnand %p18359_p8, %p18353_p3 }
  0xa2   : > { %18363 = shalt.err (!%p18360_p11)
}
  0xa3   : > { %s20874_s27 = smov 8   ;;  %s20875_s30 = smov 128  }
  0xa4   : > { %17340 = dma.hbm_to_vmem [thread:$0]  (!%p18672_p12), %s20836_s3, 256, %s18780_s17, [#allocation6], %s20875_s30, %s20875_s30, %s20874_s27  }
  0xa5   : > { %s18542_s12 = smov [#allocation10]   ;;  %s18543_s21 = smov [#allocation13]  }
  0xa6   : > { %s382_s20 = sshll.u32 %s18542_s12, 4  ;;  %s408_s14 = sshll.u32 %s18543_s21, 4  ;;  %s383_s20 = int_to_ptr.vmem [resolvable:$true] %s382_s20  ;;  %s18829_s14 = int_to_ptr.vmem [resolvable:$true] %s408_s14 }
  0xa7   : > { %s18364_s19 = scalar_lea.hbm %s20838_s5, 1152 }
  0xa8   : > { %p18365_p5 = scmp.ne.s32.totalorder %s20838_s5, %s18364_s19  ;;  %p18371_p10 = scmp.lt.u32.totalorder %s18364_s19, %s20838_s5 }
  0xaa   : > { %p18367_p6 = pnand %p18365_p5, %p18686_p0 }
  0xac   : > { %p18368_p9 = pneg %p18367_p6 }
  0xae   : > { %p18373_p13 = pnand %p18371_p10, %p18368_p9 }
  0xb0   : > { %18376 = shalt.err (!%p18373_p13)
}
  0xb1   : > { %s18377_s27 = scalar_lea.vmem %s383_s20, 1152  ;;  %p18385_p4 = scmp.lt.s32.totalorder %s383_s20, %s383_s20 }
  0xb2   : > { %p18378_p1 = scmp.ne.s32.totalorder %s383_s20, %s18377_s27  ;;  %p18386_p7 = scmp.lt.s32.totalorder %s18377_s27, %s18377_s27 }
  0xb4   : > { %p18380_p2 = pnand %p18378_p1, %p18686_p0  ;;  %p18387_p8 = por %p18386_p7, %p18385_p4 }
  0xb6   : > { %p18381_p3 = pneg %p18380_p2 }
  0xb8   : > { %p18388_p11 = pnand %p18387_p8, %p18381_p3 }
  0xba   : > { %18391 = shalt.err (!%p18388_p11)
}
  0xbb   : > { %s20876_s2 = smov 4   ;;  %s20877_s24 = smov 64  }
  0xbc   : > { %17346 = dma.hbm_to_vmem [thread:$0]  (!%p18672_p12), %s20838_s5, 1152, %s383_s20, [#allocation9], %s20877_s24, %s20877_s24, %s20876_s2  }
  0xbd   : > { %s18392_s23 = scalar_lea.hbm %s20840_s7, 288 }
  0xbe   : > { %p18393_p5 = scmp.ne.s32.totalorder %s20840_s7, %s18392_s23  ;;  %p18399_p10 = scmp.lt.u32.totalorder %s18392_s23, %s20840_s7 }
  0xc0   : > { %p18395_p6 = pnand %p18393_p5, %p18686_p0 }
  0xc2   : > { %p18396_p9 = pneg %p18395_p6 }
  0xc4   : > { %p18401_p13 = pnand %p18399_p10, %p18396_p9 }
  0xc6   : > { %18404 = shalt.err (!%p18401_p13)
}
  0xc7   : > { %s18405_s20 = scalar_lea.vmem %s18829_s14, 288  ;;  %p18413_p4 = scmp.lt.s32.totalorder %s18829_s14, %s18829_s14 }
  0xc8   : > { %p18406_p1 = scmp.ne.s32.totalorder %s18829_s14, %s18405_s20  ;;  %p18414_p7 = scmp.lt.s32.totalorder %s18405_s20, %s18405_s20 }
  0xca   : > { %p18408_p2 = pnand %p18406_p1, %p18686_p0  ;;  %p18415_p8 = por %p18414_p7, %p18413_p4 }
  0xcc   : > { %p18409_p3 = pneg %p18408_p2 }
  0xce   : > { %p18416_p11 = pnand %p18415_p8, %p18409_p3 }
  0xd0   : > { %18419 = shalt.err (!%p18416_p11)
}
  0xd1   : > { %s18544_s27 = smov 32   ;;  %s18545_s2 = smov 2  }
  0xd2   : > { %17352 = dma.hbm_to_vmem [thread:$0]  (!%p18672_p12), %s20840_s7, 288, %s18829_s14, [#allocation12], %s18544_s27, %s18544_s27, %s18545_s2  }
  0xd3   : > { %s18546_s26 = smov [#allocation16]   ;;  %s18420_s28 = scalar_lea.hbm %s20844_s11, 16 }
  0xd4   : > { %s441_s12 = sshll.u32 %s18546_s26, 4  ;;  %p18421_p5 = scmp.ne.s32.totalorder %s20844_s11, %s18420_s28  ;;  %s442_s12 = int_to_ptr.vmem [resolvable:$true] %s441_s12 }
  0xd5   : > { %p18427_p10 = scmp.lt.u32.totalorder %s18420_s28, %s20844_s11 }
  0xd6   : > { %p18423_p6 = pnand %p18421_p5, %p18686_p0 }
  0xd8   : > { %p18424_p9 = pneg %p18423_p6 }
  0xda   : > { %p18429_p13 = pnand %p18427_p10, %p18424_p9 }
  0xdc   : > { %18432 = shalt.err (!%p18429_p13)
}
  0xdd   : > { %s18433_s14 = scalar_lea.vmem %s442_s12, 16  ;;  %s18440_s27 = scalar_lea.vmem %s442_s12, 32 }
  0xde   : > { %p18434_p1 = scmp.ne.s32.totalorder %s442_s12, %s18433_s14  ;;  %p18441_p4 = scmp.lt.s32.totalorder %s442_s12, %s442_s12 }
  0xdf   : > { %p18442_p7 = scmp.lt.s32.totalorder %s18440_s27, %s18433_s14 }
  0xe0   : > { %p18436_p2 = pnand %p18434_p1, %p18686_p0 }
  0xe1   : > { %p18443_p8 = por %p18442_p7, %p18441_p4 }
  0xe2   : > { %p18437_p3 = pneg %p18436_p2 }
  0xe4   : > { %p18444_p11 = pnand %p18443_p8, %p18437_p3 }
  0xe6   : > { %18447 = shalt.err (!%p18444_p11)
}
  0xe7   : > { %17358 = dma.hbm_to_vmem [thread:$0]  (!%p18672_p12), %s20844_s11, 16, %s442_s12, [#allocation15]  }
  0xe8   : > { %p20878_p5 = scmp.ne.s32.totalorder %s20870_s15, 0 }
  0xe9   : > { %p20879_p6 = scmp.eq.s32.totalorder (!%p20878_p5), %s18636_s25, 0 }
  0xea   : > { %462 = sbr.rel (%p20878_p5) target bundleno = 8915 (0x22d3), region = 68 }
  0xf1   : > { %18493 = dma.done.wait (%p20879_p6), [#allocation3], 92160   ;;  %p20880_p0 = pmov %p20879_p6 }
  0xf3   : > { %18495 = vsyncadd (%p20880_p0), [#allocation3], 4294875136  ;;  %p20881_p9 = pmov %p20880_p0 }
  0xf4   : > { %p20882_p10 = pmov %p20880_p0 }
  0xf5   : > { %18497 = dma.done.wait (%p20881_p9), [#allocation6], 512  }
  0xf6   : > { %18499 = vsyncadd (%p20882_p10), [#allocation6], 4294966784  ;;  %p20883_p13 = pmov %p20880_p0 }
  0xf7   : > { %p20884_p12 = pmov %p20880_p0 }
  0xf8   : > { %18501 = dma.done.wait (%p20883_p13), [#allocation9], 10368  }
  0xf9   : > { %18503 = vsyncadd (%p20884_p12), [#allocation9], 4294956928  ;;  %p20885_p1 = pmov %p20880_p0 }
  0xfa   : > { %p20886_p2 = pmov %p20880_p0 }
  0xfb   : > { %18505 = dma.done.wait (%p20885_p1), [#allocation12], 1440  }
  0xfc   : > { %18507 = vsyncadd (%p20886_p2), [#allocation12], 4294965856  ;;  %p20887_p3 = pmov %p20880_p0 }
  0xfd   : > { %p20888_p4 = pmov %p20880_p0 }
  0xfe   : > { %18509 = dma.done.wait (%p20887_p3), [#allocation15], 1040  }
  0xff   : > { %18511 = vsyncadd (%p20888_p4), [#allocation15], 4294966256  ;;  %p535_p7 = scmp.lt.s32.totalorder %s18636_s25, 1  ;;  %v17449_v11 = vld [vmem:[#allocation8 + $0x4] ss:$8 sps:$4 sm:$0xff]   ;;  %vm18548_vm0 = vmmov 0  }
 0x100   : > { %749 = vmatprep.mubr.bf16.mxu0 %v17449_v11  ;;  %v17473_v17 = vld [vmem:[#allocation8 + $0x84] ss:$8 sps:$4 sm:$0xff]   ;;  %v17447_v18 = vld [vmem:[#allocation8] ss:$8 sps:$4 sm:$0xff]   ;;  %v17450_v19 = vld [vmem:[#allocation8 + $0x14] ss:$8 sps:$4 sm:$0xff]  }
 0x101   : > { %s536_s15 = scalar_select %p535_p7, %s18636_s25, 1  ;;  %1244 = vmatprep.mubr.bf16.mxu1 %v17473_v17  ;;  %v17471_v20 = vld [vmem:[#allocation8 + $0x80] ss:$8 sps:$4 sm:$0xff]   ;;  %v17474_v21 = vld [vmem:[#allocation8 + $0x94] ss:$8 sps:$4 sm:$0xff]   ;;  %vm3000_vm1 = vcmask 523264  }
 0x102   : > { %v17452_v22 = vld [vmem:[#allocation8 + $0x10] ss:$8 sps:$4 sm:$0xff]   ;;  %v17453_v23 = vld [vmem:[#allocation8 + $0x24] ss:$8 sps:$4 sm:$0xff]   ;;  %v17455_v26 = vld [vmem:[#allocation8 + $0x20] ss:$8 sps:$4 sm:$0xff]  }
 0x103   : > { %s13853_s18 = sshll.u32 %s536_s15, 7  ;;  %v17476_v24 = vld [vmem:[#allocation8 + $0x90] ss:$8 sps:$4 sm:$0xff]   ;;  %v17477_v25 = vld [vmem:[#allocation8 + $0xa4] ss:$8 sps:$4 sm:$0xff]   ;;  %vm4462_vm2 = vcmask 130048  }
 0x104   : > { %s18920_s26 = scalar_lea.vmem %s20833_s0, %s13853_s18  ;;  %v17456_v27 = vld [vmem:[#allocation8 + $0x34] ss:$8 sps:$4 sm:$0xff]   ;;  %v17479_v28 = vld [vmem:[#allocation8 + $0xa0] ss:$8 sps:$4 sm:$0xff]   ;;  %v17458_v30 = vld [vmem:[#allocation8 + $0x30] ss:$8 sps:$4 sm:$0xff]  }
 0x105   : > { %v18923_v0 = vld [vmem:[%s18920_s26 + $0x40] sm:$0xff]   ;;  %v18930_v2 = vld [vmem:[%s18920_s26 + $0x48] sm:$0xff]   ;;  %v18940_v4 = vld [vmem:[%s18920_s26 + $0x50] sm:$0xff]   ;;  %vm7248_vm3 = vcmask 1041408   ;;  %vm7244_vm4 = vcmask 31744   ;;  %s13850_s12 = sshll.u32 %s18636_s25, 4 }
 0x106   : > { %v18926_v1 = vld [vmem:[%s18920_s26] sm:$0xff]   ;;  %13854 = vmatprep.subr.bf16.mxu0 %v18923_v0  ;;  %13958 = vmatprep.subr.bf16.mxu1 %v18923_v0  ;;  %v18935_v3 = vld [vmem:[%s18920_s26 + $0x8] sm:$0xff]   ;;  %v18945_v5 = vld [vmem:[%s18920_s26 + $0x10] sm:$0xff]   ;;  %s20889_s29 = sld [smem:[#allocation31_spill]]  ;;  %p20890_p11 = scmp.ne.s32.totalorder %s20867_s13, 0 }
 0x107   : > { %13855 = vmatpush3.bf16.msra.mxu0 %v18926_v1  ;;  %13959 = vmatpush3.bf16.msra.mxu1 %v18926_v1  ;;  %v18950_v6 = vld [vmem:[%s18920_s26 + $0x58] sm:$0xff]   ;;  %v18960_v8 = vld [vmem:[%s18920_s26 + $0x60] sm:$0xff]   ;;  %v18970_v10 = vld [vmem:[%s18920_s26 + $0x68] sm:$0xff]   ;;  %s18549_s14 = smov [#allocation17]  }
 0x108   : > { %13856 = vmatprep.subr.bf16.mxu0 %v18930_v2  ;;  %13960 = vmatprep.subr.bf16.mxu1 %v18930_v2  ;;  %v18955_v7 = vld [vmem:[%s18920_s26 + $0x18] sm:$0xff]   ;;  %v18965_v9 = vld [vmem:[%s18920_s26 + $0x20] sm:$0xff]   ;;  %v18975_v12 = vld [vmem:[%s18920_s26 + $0x28] sm:$0xff]   ;;  %s18452_s27 = sshll.u32 %s18549_s14, 4  ;;  %s18453_s27 = int_to_ptr.vmem [resolvable:$false] %s18452_s27 }
 0x109   : > { %v18979_v13 = vld [vmem:[%s18920_s26 + $0x70] sm:$0xff]   ;;  %v18989_v15 = vld [vmem:[%s18920_s26 + $0x78] sm:$0xff]   ;;  %v17461_v31 = vld [vmem:[#allocation8 + $0x44] ss:$8 sps:$4 sm:$0xff]   ;;  %s18454_s2 = scalar_lea.vmem %s18453_s27, 32 }
 0x10a   : > { %v18985_v14 = vld [vmem:[%s18920_s26 + $0x30] sm:$0xff]   ;;  %v18995_v16 = vld [vmem:[%s18920_s26 + $0x38] sm:$0xff]   ;;  %v17485_v33 = vld [vmem:[#allocation8 + $0xc4] ss:$8 sps:$4 sm:$0xff]  }
 0x10b   : > { %13857 = vmatpush3.bf16.msra.mxu0 %v18935_v3  ;;  %13961 = vmatpush3.bf16.msra.mxu1 %v18935_v3  ;;  %v17480_v29 = vld [vmem:[#allocation8 + $0xb4] ss:$8 sps:$4 sm:$0xff]   ;;  %v17482_v32 = vld [vmem:[#allocation8 + $0xb0] ss:$8 sps:$4 sm:$0xff]   ;;  %v17459_v34 = vld [vmem:[#allocation8 + $0x40] ss:$8 sps:$4 sm:$0xff]  }
 0x10c   : > { %13858 = vmatprep.subr.bf16.mxu0 %v18940_v4  ;;  %13962 = vmatprep.subr.bf16.mxu1 %v18940_v4  ;;  %v17462_v35 = vld [vmem:[#allocation8 + $0x54] ss:$8 sps:$4 sm:$0xff]   ;;  %v17483_v36 = vld [vmem:[#allocation8 + $0xc0] ss:$8 sps:$4 sm:$0xff]   ;;  %v17464_v38 = vld [vmem:[#allocation8 + $0x50] ss:$8 sps:$4 sm:$0xff]   ;;  %s20791_s17 = scalar_lea.hbm %s20889_s29, %s13850_s12 }
 0x10d   : > { %v17486_v37 = vld [vmem:[#allocation8 + $0xd4] ss:$8 sps:$4 sm:$0xff]   ;;  %v17465_v39 = vld [vmem:[#allocation8 + $0x64] ss:$8 sps:$4 sm:$0xff]   ;;  %v17488_v40 = vld [vmem:[#allocation8 + $0xd0] ss:$8 sps:$4 sm:$0xff]  }
 0x10e   : > { %v17489_v41 = vld [vmem:[#allocation8 + $0xe4] ss:$8 sps:$4 sm:$0xff]   ;;  %v17467_v42 = vld [vmem:[#allocation8 + $0x60] ss:$8 sps:$4 sm:$0xff]   ;;  %v17468_v43 = vld [vmem:[#allocation8 + $0x74] ss:$8 sps:$4 sm:$0xff]  }
 0x10f   : > { %13859 = vmatpush3.bf16.msra.mxu0 %v18945_v5  ;;  %13963 = vmatpush3.bf16.msra.mxu1 %v18945_v5  ;;  %v17491_v44 = vld [vmem:[#allocation8 + $0xe0] ss:$8 sps:$4 sm:$0xff]   ;;  %v17492_v45 = vld [vmem:[#allocation8 + $0xf4] ss:$8 sps:$4 sm:$0xff]   ;;  %v17470_v46 = vld [vmem:[#allocation8 + $0x70] ss:$8 sps:$4 sm:$0xff]  }
 0x110   : > { %13860 = vmatprep.subr.bf16.mxu0 %v18950_v6  ;;  %13964 = vmatprep.subr.bf16.mxu1 %v18950_v6  ;;  %v17494_v47 = vld [vmem:[#allocation8 + $0xf0] ss:$8 sps:$4 sm:$0xff]   ;;  %v17497_v48 = vld [vmem:[#allocation8 + $0x104] ss:$8 sps:$4 sm:$0xff]   ;;  %v17495_v49 = vld [vmem:[#allocation8 + $0x100] ss:$8 sps:$4 sm:$0xff]  }
 0x111   : > { %v17498_v50 = vld [vmem:[#allocation8 + $0x114] ss:$8 sps:$4 sm:$0xff]   ;;  %v17500_v51 = vld [vmem:[#allocation8 + $0x110] ss:$8 sps:$4 sm:$0xff]   ;;  %v17501_v52 = vld [vmem:[#allocation8 + $0x124] ss:$8 sps:$4 sm:$0xff]  }
 0x112   : > { %v17503_v53 = vld [vmem:[#allocation8 + $0x120] ss:$8 sps:$4 sm:$0xff]   ;;  %v17504_v54 = vld [vmem:[#allocation8 + $0x134] ss:$8 sps:$4 sm:$0xff]   ;;  %v17506_v55 = vld [vmem:[#allocation8 + $0x130] ss:$8 sps:$4 sm:$0xff]  }
 0x113   : > { %13861 = vmatpush3.bf16.msra.mxu0 %v18955_v7  ;;  %13965 = vmatpush3.bf16.msra.mxu1 %v18955_v7  ;;  %v17509_v56 = vld [vmem:[#allocation8 + $0x144] ss:$8 sps:$4 sm:$0xff]   ;;  %v17507_v57 = vld [vmem:[#allocation8 + $0x140] ss:$8 sps:$4 sm:$0xff]   ;;  %v17510_v58 = vld [vmem:[#allocation8 + $0x154] ss:$8 sps:$4 sm:$0xff]  }
 0x114   : > { %13862 = vmatprep.subr.bf16.mxu0 %v18960_v8  ;;  %13966 = vmatprep.subr.bf16.mxu1 %v18960_v8  ;;  %v19067_v59 = vld [vmem:[%s18920_s26 + $0x40] sm:$0xff]   ;;  %v19075_v62 = vld [vmem:[%s18920_s26 + $0x48] sm:$0xff]   ;;  %v17512_v63 = vld [vmem:[#allocation8 + $0x150] ss:$8 sps:$4 sm:$0xff]  }
 0x115   : > { %v17525_v60 = vld [vmem:[#allocation2 + $0x40] sm:$0xff]  }
 0x116   : > { %v19071_v61 = vld [vmem:[%s18920_s26] sm:$0xff]  }
 0x117   : > { %13863 = vmatpush3.bf16.msra.mxu0 %v18965_v9  ;;  %13967 = vmatpush3.bf16.msra.mxu1 %v18965_v9  ;;  %v19099_v11 = vld [vmem:[%s18920_s26 + $0x60] sm:$0xff]  }
 0x118   : > { %13864 = vmatprep.subr.bf16.mxu0 %v18970_v10  ;;  %13968 = vmatprep.subr.bf16.mxu1 %v18970_v10  ;;  %v17521_v17 = vld [vmem:[#allocation8 + $0x184] ss:$8 sps:$4 sm:$0xff]  }
 0x11b   : > { %13865 = vmatpush3.bf16.msra.mxu0 %v18975_v12  ;;  %13969 = vmatpush3.bf16.msra.mxu1 %v18975_v12 }
 0x11c   : > { %13866 = vmatprep.subr.bf16.mxu0 %v18979_v13  ;;  %13970 = vmatprep.subr.bf16.mxu1 %v18979_v13 }
 0x11f   : > { %13867 = vmatpush3.bf16.msra.mxu0 %v18985_v14  ;;  %13971 = vmatpush3.bf16.msra.mxu1 %v18985_v14 }
 0x120   : > { %13868 = vmatprep.subr.bf16.mxu0 %v18989_v15  ;;  %13972 = vmatprep.subr.bf16.mxu1 %v18989_v15 }
 0x123   : > { %13869 = vmatpush3.bf16.msra.mxu0 %v18995_v16  ;;  %13973 = vmatpush3.bf16.msra.mxu1 %v18995_v16 }
 0x124   : > { %13894 = vmatprep.subr.bf16.mxu0 %v18923_v0  ;;  %14010 = vmatprep.subr.bf16.mxu1 %v18923_v0 }
 0x126   : > { %750 = vmatmul.mubr.bf16.vlgmr.msra.gmra.mrb[0].mxu0 %v17447_v18  ;;  %1245 = vmatmul.mubr.bf16.vlgmr.msra.gmra.mrb[0].mxu1 %v17471_v20  ;;  %v19111_v18 = vld [vmem:[%s18920_s26 + $0x28] sm:$0xff]   ;;  %v17540_v20 = vld [vmem:[#allocation2 + $0x70] sm:$0xff]  }
 0x127   : > { %13895 = vmatpush3.bf16.msra.mxu0 %v18926_v1  ;;  %757 = vmatprep.mubr.bf16.mxu0 %v17450_v19  ;;  %v19115_v19 = vld [vmem:[%s18920_s26 + $0x70] sm:$0xff]  }
 0x128   : > { %13896 = vmatprep.subr.bf16.mxu0 %v18930_v2  ;;  %14011 = vmatpush3.bf16.msra.mxu1 %v18926_v1 }
 0x129   : > { %1252 = vmatprep.mubr.bf16.mxu1 %v17474_v21  ;;  %14012 = vmatprep.subr.bf16.mxu1 %v18930_v2  ;;  %v19119_v21 = vld [vmem:[%s18920_s26 + $0x30] sm:$0xff]  }
 0x12b   : > { %13897 = vmatpush3.bf16.msra.mxu0 %v18935_v3 }
 0x12c   : > { %13898 = vmatprep.subr.bf16.mxu0 %v18940_v4  ;;  %14013 = vmatpush3.bf16.msra.mxu1 %v18935_v3 }
 0x12d   : > { %14014 = vmatprep.subr.bf16.mxu1 %v18940_v4 }
 0x12e   : > { %758 = vmatmul.mubr.bf16.gmra.mrb[4].mxu0 %v17452_v22  ;;  %1253 = vmatmul.mubr.bf16.gmra.mrb[4].mxu1 %v17476_v24  ;;  %v19123_v22 = vld [vmem:[%s18920_s26 + $0x78] sm:$0xff]  }
 0x12f   : > { %13899 = vmatpush3.bf16.msra.mxu0 %v18945_v5  ;;  %765 = vmatprep.mubr.bf16.mxu0 %v17453_v23  ;;  %v17519_v23 = vld [vmem:[#allocation8 + $0x180] ss:$8 sps:$4 sm:$0xff]   ;;  %v17541_v24 = vld [vmem:[#allocation2 + $0x78] sm:$0xff]  }
 0x130   : > { %13900 = vmatprep.subr.bf16.mxu0 %v18950_v6  ;;  %14015 = vmatpush3.bf16.msra.mxu1 %v18945_v5 }
 0x131   : > { %1260 = vmatprep.mubr.bf16.mxu1 %v17477_v25  ;;  %14016 = vmatprep.subr.bf16.mxu1 %v18950_v6  ;;  %v17522_v25 = vld [vmem:[#allocation8 + $0x194] ss:$8 sps:$4 sm:$0xff]  }
 0x133   : > { %13901 = vmatpush3.bf16.msra.mxu0 %v18955_v7 }
 0x134   : > { %13902 = vmatprep.subr.bf16.mxu0 %v18960_v8  ;;  %14017 = vmatpush3.bf16.msra.mxu1 %v18955_v7 }
 0x135   : > { %14018 = vmatprep.subr.bf16.mxu1 %v18960_v8 }
 0x136   : > { %766 = vmatmul.mubr.bf16.gmra.mrb[8].mxu0 %v17455_v26  ;;  %1261 = vmatmul.mubr.bf16.gmra.mrb[8].mxu1 %v17479_v28  ;;  %v19127_v26 = vld [vmem:[%s18920_s26 + $0x38] sm:$0xff]  }
 0x137   : > { %13903 = vmatpush3.bf16.msra.mxu0 %v18965_v9  ;;  %773 = vmatprep.mubr.bf16.mxu0 %v17456_v27  ;;  %v19131_v27 = vld [vmem:[#allocation2] sm:$0xff]   ;;  %v17524_v28 = vld [vmem:[#allocation8 + $0x190] ss:$8 sps:$4 sm:$0xff]  }
 0x138   : > { %13904 = vmatprep.subr.bf16.mxu0 %v18970_v10  ;;  %14019 = vmatpush3.bf16.msra.mxu1 %v18965_v9 }
 0x139   : > { %1268 = vmatprep.mubr.bf16.mxu1 %v17480_v29  ;;  %14020 = vmatprep.subr.bf16.mxu1 %v18970_v10  ;;  %v17527_v29 = vld [vmem:[#allocation8 + $0x1a4] ss:$8 sps:$4 sm:$0xff]  }
 0x13b   : > { %13905 = vmatpush3.bf16.msra.mxu0 %v18975_v12 }
 0x13c   : > { %13906 = vmatprep.subr.bf16.mxu0 %v18979_v13  ;;  %14021 = vmatpush3.bf16.msra.mxu1 %v18975_v12 }
 0x13d   : > { %14022 = vmatprep.subr.bf16.mxu1 %v18979_v13 }
 0x13e   : > { %774 = vmatmul.mubr.bf16.gmra.mrb[12].mxu0 %v17458_v30  ;;  %1269 = vmatmul.mubr.bf16.gmra.mrb[12].mxu1 %v17482_v32  ;;  %v17529_v30 = vld [vmem:[#allocation8 + $0x1a0] ss:$8 sps:$4 sm:$0xff]   ;;  %v17534_v32 = vld [vmem:[#allocation8 + $0x1b0] ss:$8 sps:$4 sm:$0xff]  }
 0x13f   : > { %13907 = vmatpush3.bf16.msra.mxu0 %v18985_v14  ;;  %883 = vmatprep.mubr.bf16.mxu0 %v17461_v31  ;;  %v17532_v31 = vld [vmem:[#allocation8 + $0x1b4] ss:$8 sps:$4 sm:$0xff]  }
 0x140   : > { %13908 = vmatprep.subr.bf16.mxu0 %v18989_v15  ;;  %14023 = vmatpush3.bf16.msra.mxu1 %v18985_v14 }
 0x141   : > { %1500 = vmatprep.mubr.bf16.mxu1 %v17485_v33  ;;  %14024 = vmatprep.subr.bf16.mxu1 %v18989_v15  ;;  %v17539_v33 = vld [vmem:[#allocation8 + $0x1c4] ss:$8 sps:$4 sm:$0xff]  }
 0x143   : > { %13909 = vmatpush3.bf16.msra.mxu0 %v18995_v16 }
 0x144   : > { %14025 = vmatpush3.bf16.msra.mxu1 %v18995_v16  ;;  %15061 = vmatprep.subr.bf16.mxu0 %v17525_v60 }
 0x145   : > { %14062 = vmatprep.subr.bf16.mxu1 %v18923_v0 }
 0x146   : > { %884 = vmatmul.mubr.bf16.vlgmr.msra.gmra.mrb[16].mxu0 %v17459_v34  ;;  %v17537_v34 = vld [vmem:[#allocation8 + $0x1c0] ss:$8 sps:$4 sm:$0xff]  }
 0x147   : > { %891 = vmatprep.mubr.bf16.mxu0 %v17462_v35  ;;  %1501 = vmatmul.mubr.bf16.vlgmr.msra.gmra.mrb[16].mxu1 %v17483_v36  ;;  %v17542_v35 = vld [vmem:[#allocation8 + $0x1d4] ss:$8 sps:$4 sm:$0xff]   ;;  %v17544_v36 = vld [vmem:[#allocation8 + $0x1d0] ss:$8 sps:$4 sm:$0xff]  }
 0x148   : > { %14063 = vmatpush3.bf16.msra.mxu1 %v18926_v1  ;;  %1508 = vmatprep.mubr.bf16.mxu1 %v17486_v37  ;;  %v17547_v37 = vld [vmem:[#allocation8 + $0x1e4] ss:$8 sps:$4 sm:$0xff]  }
 0x149   : > { %14064 = vmatprep.subr.bf16.mxu1 %v18930_v2  ;;  %15062 = vmatpush3.bf16.msra.mxu0 %v17525_v60 }
 0x14c   : > { %14065 = vmatpush3.bf16.msra.mxu1 %v18935_v3 }
 0x14d   : > { %14066 = vmatprep.subr.bf16.mxu1 %v18940_v4 }
 0x14e   : > { %892 = vmatmul.mubr.bf16.gmra.mrb[20].mxu0 %v17464_v38  ;;  %v17549_v38 = vld [vmem:[#allocation8 + $0x1e0] ss:$8 sps:$4 sm:$0xff]  }
 0x14f   : > { %899 = vmatprep.mubr.bf16.mxu0 %v17465_v39  ;;  %1509 = vmatmul.mubr.bf16.gmra.mrb[20].mxu1 %v17488_v40  ;;  %v17552_v39 = vld [vmem:[#allocation8 + $0x1f4] ss:$8 sps:$4 sm:$0xff]   ;;  %v17554_v40 = vld [vmem:[#allocation8 + $0x1f0] ss:$8 sps:$4 sm:$0xff]  }
 0x150   : > { %14067 = vmatpush3.bf16.msra.mxu1 %v18945_v5  ;;  %1516 = vmatprep.mubr.bf16.mxu1 %v17489_v41  ;;  %v17559_v41 = vld [vmem:[#allocation8 + $0x204] ss:$8 sps:$4 sm:$0xff]  }
 0x151   : > { %14068 = vmatprep.subr.bf16.mxu1 %v18950_v6 }
 0x154   : > { %14069 = vmatpush3.bf16.msra.mxu1 %v18955_v7 }
 0x155   : > { %14070 = vmatprep.subr.bf16.mxu1 %v18960_v8 }
 0x156   : > { %900 = vmatmul.mubr.bf16.gmra.mrb[24].mxu0 %v17467_v42  ;;  %v17557_v42 = vld [vmem:[#allocation8 + $0x200] ss:$8 sps:$4 sm:$0xff]  }
 0x157   : > { %907 = vmatprep.mubr.bf16.mxu0 %v17468_v43  ;;  %1517 = vmatmul.mubr.bf16.gmra.mrb[24].mxu1 %v17491_v44  ;;  %v17562_v43 = vld [vmem:[#allocation8 + $0x214] ss:$8 sps:$4 sm:$0xff]   ;;  %v17564_v44 = vld [vmem:[#allocation8 + $0x210] ss:$8 sps:$4 sm:$0xff]  }
 0x158   : > { %14071 = vmatpush3.bf16.msra.mxu1 %v18965_v9  ;;  %1524 = vmatprep.mubr.bf16.mxu1 %v17492_v45  ;;  %v17567_v45 = vld [vmem:[#allocation8 + $0x224] ss:$8 sps:$4 sm:$0xff]  }
 0x159   : > { %14072 = vmatprep.subr.bf16.mxu1 %v18970_v10 }
 0x15c   : > { %14073 = vmatpush3.bf16.msra.mxu1 %v18975_v12 }
 0x15d   : > { %14074 = vmatprep.subr.bf16.mxu1 %v18979_v13 }
 0x15e   : > { %908 = vmatmul.mubr.bf16.gmra.mrb[28].mxu0 %v17470_v46  ;;  %v17569_v46 = vld [vmem:[#allocation8 + $0x220] ss:$8 sps:$4 sm:$0xff]  }
 0x15f   : > { %1525 = vmatmul.mubr.bf16.gmra.mrb[28].mxu1 %v17494_v47  ;;  %v17572_v47 = vld [vmem:[#allocation8 + $0x234] ss:$8 sps:$4 sm:$0xff]  }
 0x160   : > { %14075 = vmatpush3.bf16.msra.mxu1 %v18985_v14  ;;  %1756 = vmatprep.mubr.bf16.mxu1 %v17497_v48 }
 0x161   : > { %14076 = vmatprep.subr.bf16.mxu1 %v18989_v15 }
 0x164   : > { %14077 = vmatpush3.bf16.msra.mxu1 %v18995_v16 }
 0x165   : > { %14114 = vmatprep.subr.bf16.mxu1 %v18923_v0  ;;  %v17526_v0 = vld [vmem:[#allocation2 + $0x48] sm:$0xff]  }
 0x166   : > { %15063 = vmatprep.subr.bf16.mxu0 %v17526_v0 }
 0x167   : > { %1757 = vmatmul.mubr.bf16.vlgmr.msra.gmra.mrb[32].mxu1 %v17495_v49  ;;  %15064 = vmatpush3.bf16.msra.mxu0 %v17526_v0 }
 0x168   : > { %14115 = vmatpush3.bf16.msra.mxu1 %v18926_v1  ;;  %1764 = vmatprep.mubr.bf16.mxu1 %v17498_v50  ;;  %v17513_v1 = vld [vmem:[#allocation8 + $0x164] ss:$8 sps:$4 sm:$0xff]   ;;  %v17574_v50 = vld [vmem:[#allocation8 + $0x230] ss:$8 sps:$4 sm:$0xff]  }
 0x169   : > { %14116 = vmatprep.subr.bf16.mxu1 %v18930_v2  ;;  %v19079_v2 = vld [vmem:[%s18920_s26 + $0x8] sm:$0xff]  }
 0x16c   : > { %14117 = vmatpush3.bf16.msra.mxu1 %v18935_v3  ;;  %v19083_v3 = vld [vmem:[%s18920_s26 + $0x50] sm:$0xff]  }
 0x16d   : > { %14118 = vmatprep.subr.bf16.mxu1 %v18940_v4  ;;  %v17530_v4 = vld [vmem:[#allocation2 + $0x50] sm:$0xff]  }
 0x16e   : > { %15065 = vmatprep.subr.bf16.mxu0 %v17530_v4 }
 0x16f   : > { %1765 = vmatmul.mubr.bf16.gmra.mrb[36].mxu1 %v17500_v51  ;;  %15066 = vmatpush3.bf16.msra.mxu0 %v17530_v4 }
 0x170   : > { %14119 = vmatpush3.bf16.msra.mxu1 %v18945_v5  ;;  %1772 = vmatprep.mubr.bf16.mxu1 %v17501_v52  ;;  %v19087_v5 = vld [vmem:[%s18920_s26 + $0x10] sm:$0xff]  }
 0x171   : > { %14120 = vmatprep.subr.bf16.mxu1 %v18950_v6  ;;  %v19091_v6 = vld [vmem:[%s18920_s26 + $0x58] sm:$0xff]  }
 0x174   : > { %14121 = vmatpush3.bf16.msra.mxu1 %v18955_v7  ;;  %v17515_v7 = vld [vmem:[#allocation8 + $0x160] ss:$8 sps:$4 sm:$0xff]  }
 0x175   : > { %14122 = vmatprep.subr.bf16.mxu1 %v18960_v8  ;;  %v17531_v8 = vld [vmem:[#allocation2 + $0x58] sm:$0xff]  }
 0x176   : > { %15067 = vmatprep.subr.bf16.mxu0 %v17531_v8 }
 0x177   : > { %1773 = vmatmul.mubr.bf16.gmra.mrb[40].mxu1 %v17503_v53  ;;  %15068 = vmatpush3.bf16.msra.mxu0 %v17531_v8 }
 0x178   : > { %14123 = vmatpush3.bf16.msra.mxu1 %v18965_v9  ;;  %1780 = vmatprep.mubr.bf16.mxu1 %v17504_v54  ;;  %v17516_v9 = vld [vmem:[#allocation8 + $0x174] ss:$8 sps:$4 sm:$0xff]  }
 0x179   : > { %14124 = vmatprep.subr.bf16.mxu1 %v18970_v10  ;;  %v19095_v10 = vld [vmem:[%s18920_s26 + $0x18] sm:$0xff]  }
 0x17c   : > { %14125 = vmatpush3.bf16.msra.mxu1 %v18975_v12  ;;  %v17535_v12 = vld [vmem:[#allocation2 + $0x60] sm:$0xff]  }
 0x17d   : > { %14126 = vmatprep.subr.bf16.mxu1 %v18979_v13  ;;  %15069 = vmatprep.subr.bf16.mxu0 %v17535_v12  ;;  %v19103_v13 = vld [vmem:[%s18920_s26 + $0x20] sm:$0xff]  }
 0x17e   : > { %15070 = vmatpush3.bf16.msra.mxu0 %v17535_v12 }
 0x17f   : > { %1781 = vmatmul.mubr.bf16.gmra.mrb[44].mxu1 %v17506_v55 }
 0x180   : > { %14127 = vmatpush3.bf16.msra.mxu1 %v18985_v14  ;;  %2012 = vmatprep.mubr.bf16.mxu1 %v17509_v56  ;;  %v19107_v14 = vld [vmem:[%s18920_s26 + $0x68] sm:$0xff]   ;;  %s533_s26 = sand.u32 1, %s18522_s22  }
 0x181   : > { %14128 = vmatprep.subr.bf16.mxu1 %v18989_v15  ;;  %v17518_v15 = vld [vmem:[#allocation8 + $0x170] ss:$8 sps:$4 sm:$0xff]   ;;  %s534_s21 = scalar_lea.vmem [#allocation17], %s533_s26  ;;  %s12878_s20 = scalar_lea.sflag [#allocation4], %s533_s26 }
 0x182   : > { %s12890_s23 = sshll.u32 %s534_s21, 4  ;;  %s20793_s23 = int_to_ptr.vmem [resolvable:$true] %s12890_s23 }
 0x183   : > { %s18448_s25 = scalar_lea.vmem %s20793_s23, 16  ;;  %p18455_p0 = scmp.lt.s32.totalorder %s20793_s23, %s18453_s27 }
 0x184   : > { %14129 = vmatpush3.bf16.msra.mxu1 %v18995_v16  ;;  %v17536_v16 = vld [vmem:[#allocation2 + $0x68] sm:$0xff]   ;;  %p18449_p8 = scmp.ne.s32.totalorder %s20793_s23, %s18448_s25  ;;  %p18456_p9 = scmp.lt.s32.totalorder %s18454_s2, %s18448_s25 }
 0x185   : > { %14166 = vmatprep.subr.bf16.mxu1 %v19067_v59  ;;  %15071 = vmatprep.subr.bf16.mxu0 %v17536_v16 }
 0x186   : > { %15072 = vmatpush3.bf16.msra.mxu0 %v17536_v16  ;;  %p18450_p5 = pnand %p18449_p8, %p20890_p11  ;;  %p18457_p10 = por %p18456_p9, %p18455_p0 }
 0x187   : > { %2013 = vmatmul.mubr.bf16.vlgmr.msra.gmra.mrb[48].mxu1 %v17507_v57  ;;  %15073 = vmatprep.subr.bf16.mxu0 %v17540_v20 }
 0x188   : > { %14167 = vmatpush3.bf16.msra.mxu1 %v19071_v61  ;;  %2020 = vmatprep.mubr.bf16.mxu1 %v17510_v58  ;;  %p18451_p6 = pneg %p18450_p5 }
 0x189   : > { %14168 = vmatprep.subr.bf16.mxu1 %v19075_v62 }
 0x18a   : > { %15074 = vmatpush3.bf16.msra.mxu0 %v17540_v20  ;;  %p18458_p13 = pnand %p18457_p10, %p18451_p6 }
 0x18b   : > { %15075 = vmatprep.subr.bf16.mxu0 %v17541_v24 }
 0x18c   : > { %14169 = vmatpush3.bf16.msra.mxu1 %v19079_v2 }
 0x18d   : > { %14170 = vmatprep.subr.bf16.mxu1 %v19083_v3 }
 0x18e   : > { %15076 = vmatpush3.bf16.msra.mxu0 %v17541_v24 }
 0x18f   : > { %2021 = vmatmul.mubr.bf16.gmra.mrb[52].mxu1 %v17512_v63  ;;  %15085 = vmatprep.subr.bf16.mxu0 %v19131_v27 }
 0x190   : > { %14171 = vmatpush3.bf16.msra.mxu1 %v19087_v5  ;;  %2028 = vmatprep.mubr.bf16.mxu1 %v17513_v1 }
 0x191   : > { %14172 = vmatprep.subr.bf16.mxu1 %v19091_v6 }
 0x194   : > { %14173 = vmatpush3.bf16.msra.mxu1 %v19095_v10 }
 0x195   : > { %14174 = vmatprep.subr.bf16.mxu1 %v19099_v11 }
 0x197   : > { %2029 = vmatmul.mubr.bf16.gmra.mrb[56].mxu1 %v17515_v7 }
 0x198   : > { %14175 = vmatpush3.bf16.msra.mxu1 %v19103_v13  ;;  %2036 = vmatprep.mubr.bf16.mxu1 %v17516_v9 }
 0x199   : > { %14176 = vmatprep.subr.bf16.mxu1 %v19107_v14 }
 0x19c   : > { %14177 = vmatpush3.bf16.msra.mxu1 %v19111_v18 }
 0x19d   : > { %14178 = vmatprep.subr.bf16.mxu1 %v19115_v19 }
 0x19f   : > { %2037 = vmatmul.mubr.bf16.gmra.mrb[60].mxu1 %v17518_v15 }
 0x1a0   : > { %14179 = vmatpush3.bf16.msra.mxu1 %v19119_v21  ;;  %2268 = vmatprep.mubr.bf16.mxu1 %v17521_v17 }
 0x1a1   : > { %14180 = vmatprep.subr.bf16.mxu1 %v19123_v22 }
 0x1a4   : > { %14181 = vmatpush3.bf16.msra.mxu1 %v19127_v26 }
 0x1a5   : > { %14218 = vmatprep.subr.bf16.mxu1 %v19067_v59 }
 0x1a7   : > { %2269 = vmatmul.mubr.bf16.vlgmr.msra.gmra.mrb[64].mxu1 %v17519_v23 }
 0x1a8   : > { %14219 = vmatpush3.bf16.msra.mxu1 %v19071_v61  ;;  %2276 = vmatprep.mubr.bf16.mxu1 %v17522_v25 }
 0x1a9   : > { %14220 = vmatprep.subr.bf16.mxu1 %v19075_v62 }
 0x1ac   : > { %14221 = vmatpush3.bf16.msra.mxu1 %v19079_v2 }
 0x1ad   : > { %14222 = vmatprep.subr.bf16.mxu1 %v19083_v3 }
 0x1af   : > { %2277 = vmatmul.mubr.bf16.gmra.mrb[68].mxu1 %v17524_v28 }
 0x1b0   : > { %14223 = vmatpush3.bf16.msra.mxu1 %v19087_v5  ;;  %2284 = vmatprep.mubr.bf16.mxu1 %v17527_v29 }
 0x1b1   : > { %14224 = vmatprep.subr.bf16.mxu1 %v19091_v6 }
 0x1b4   : > { %14225 = vmatpush3.bf16.msra.mxu1 %v19095_v10 }
 0x1b5   : > { %14226 = vmatprep.subr.bf16.mxu1 %v19099_v11 }
 0x1b7   : > { %2285 = vmatmul.mubr.bf16.gmra.mrb[72].mxu1 %v17529_v30 }
 0x1b8   : > { %14227 = vmatpush3.bf16.msra.mxu1 %v19103_v13  ;;  %2292 = vmatprep.mubr.bf16.mxu1 %v17532_v31 }
 0x1b9   : > { %14228 = vmatprep.subr.bf16.mxu1 %v19107_v14 }
 0x1bc   : > { %14229 = vmatpush3.bf16.msra.mxu1 %v19111_v18 }
 0x1bd   : > { %14230 = vmatprep.subr.bf16.mxu1 %v19115_v19 }
 0x1bf   : > { %2293 = vmatmul.mubr.bf16.gmra.mrb[76].mxu1 %v17534_v32 }
 0x1c0   : > { %14231 = vmatpush3.bf16.msra.mxu1 %v19119_v21  ;;  %2524 = vmatprep.mubr.bf16.mxu1 %v17539_v33 }
 0x1c1   : > { %14232 = vmatprep.subr.bf16.mxu1 %v19123_v22 }
 0x1c4   : > { %14233 = vmatpush3.bf16.msra.mxu1 %v19127_v26 }
 0x1c5   : > { %14270 = vmatprep.subr.bf16.mxu1 %v19067_v59 }
 0x1c7   : > { %2525 = vmatmul.mubr.bf16.vlgmr.msra.gmra.mrb[80].mxu1 %v17537_v34 }
 0x1c8   : > { %14271 = vmatpush3.bf16.msra.mxu1 %v19071_v61  ;;  %2532 = vmatprep.mubr.bf16.mxu1 %v17542_v35 }
 0x1c9   : > { %14272 = vmatprep.subr.bf16.mxu1 %v19075_v62 }
 0x1cc   : > { %14273 = vmatpush3.bf16.msra.mxu1 %v19079_v2 }
 0x1cd   : > { %14274 = vmatprep.subr.bf16.mxu1 %v19083_v3 }
 0x1cf   : > { %2533 = vmatmul.mubr.bf16.gmra.mrb[84].mxu1 %v17544_v36 }
 0x1d0   : > { %14275 = vmatpush3.bf16.msra.mxu1 %v19087_v5  ;;  %2540 = vmatprep.mubr.bf16.mxu1 %v17547_v37 }
 0x1d1   : > { %14276 = vmatprep.subr.bf16.mxu1 %v19091_v6 }
 0x1d4   : > { %14277 = vmatpush3.bf16.msra.mxu1 %v19095_v10 }
 0x1d5   : > { %14278 = vmatprep.subr.bf16.mxu1 %v19099_v11 }
 0x1d7   : > { %2541 = vmatmul.mubr.bf16.gmra.mrb[88].mxu1 %v17549_v38 }
 0x1d8   : > { %14279 = vmatpush3.bf16.msra.mxu1 %v19103_v13  ;;  %2548 = vmatprep.mubr.bf16.mxu1 %v17552_v39 }
 0x1d9   : > { %14280 = vmatprep.subr.bf16.mxu1 %v19107_v14 }
 0x1dc   : > { %14281 = vmatpush3.bf16.msra.mxu1 %v19111_v18 }
 0x1dd   : > { %14282 = vmatprep.subr.bf16.mxu1 %v19115_v19 }
 0x1df   : > { %2549 = vmatmul.mubr.bf16.gmra.mrb[92].mxu1 %v17554_v40 }
 0x1e0   : > { %14283 = vmatpush3.bf16.msra.mxu1 %v19119_v21  ;;  %2780 = vmatprep.mubr.bf16.mxu1 %v17559_v41 }
 0x1e1   : > { %14284 = vmatprep.subr.bf16.mxu1 %v19123_v22 }
 0x1e4   : > { %14285 = vmatpush3.bf16.msra.mxu1 %v19127_v26 }
 0x1e7   : > { %2781 = vmatmul.mubr.bf16.vlgmr.msra.gmra.mrb[96].mxu1 %v17557_v42 }
 0x1e8   : > { %2788 = vmatprep.mubr.bf16.mxu1 %v17562_v43 }
 0x1ef   : > { %2789 = vmatmul.mubr.bf16.gmra.mrb[100].mxu1 %v17564_v44 }
 0x1f0   : > { %2796 = vmatprep.mubr.bf16.mxu1 %v17567_v45 }
 0x1f7   : > { %2797 = vmatmul.mubr.bf16.gmra.mrb[104].mxu1 %v17569_v46 }
 0x1f8   : > { %2804 = vmatprep.mubr.bf16.mxu1 %v17572_v47 }
 0x1f9   : > { %v13870_v48 = vpop.f32.mrb[0].mxu0  ;;  %v13974_v53 = vpop.f32.mrb[0].mxu1 }
 0x1fa   : > { %v13871_v49 = vpop.f32.mrb[1].mxu0  ;;  %v13975_v55 = vpop.f32.mrb[1].mxu1 }
 0x1fb   : > { %v19165_v51 = vadd.f32 %v13871_v49, %v13870_v48  ;;  %v13873_v52 = vpop.f32.mrb[2].mxu0  ;;  %v19169_v57 = vadd.f32 %v13975_v55, %v13974_v53  ;;  %v13977_v58 = vpop.f32.mrb[2].mxu1 }
 0x1fc   : > { %v13874_v54 = vpop.f32.mrb[3].mxu0  ;;  %v13978_v59 = vpop.f32.mrb[3].mxu1 }
 0x1fd   : > { %v19167_v56 = vadd.f32 %v13874_v54, %v13873_v52  ;;  %v19173_v61 = vadd.f32 %v13978_v59, %v13977_v58 }
 0x1ff   : > { %v782_v60 = vpack.c.bf16 %v19167_v56, %v19165_v51  ;;  %2805 = vmatmul.mubr.bf16.gmra.mrb[108].mxu1 %v17574_v50  ;;  %v1277_v63 = vpack.c.bf16 %v19173_v61, %v19169_v57  ;;  %v17565_v51 = vld [vmem:[#allocation2 + $0x80] sm:$0xff]   ;;  %v17577_v57 = vld [vmem:[#allocation2 + $0xb0] sm:$0xff]  }
 0x201   : > { %v13876_v62 = vpop.f32.mrb[4].mxu0  ;;  %v13980_v3 = vpop.f32.mrb[4].mxu1 }
 0x202   : > { %v13877_v0 = vpop.f32.mrb[5].mxu0  ;;  %v13981_v5 = vpop.f32.mrb[5].mxu1 }
 0x203   : > { %v19177_v1 = vadd.f32 %v13877_v0, %v13876_v62  ;;  %v13879_v2 = vpop.f32.mrb[6].mxu0  ;;  %v19181_v7 = vadd.f32 %v13981_v5, %v13980_v3  ;;  %v13983_v8 = vpop.f32.mrb[6].mxu1 }
 0x204   : > { %v13880_v4 = vpop.f32.mrb[7].mxu0  ;;  %v13984_v9 = vpop.f32.mrb[7].mxu1 }
 0x205   : > { %v19179_v6 = vadd.f32 %v13880_v4, %v13879_v2  ;;  %v19185_v11 = vadd.f32 %v13984_v9, %v13983_v8 }
 0x207   : > { %v783_v10 = vpack.c.bf16 %v19179_v6, %v19177_v1  ;;  %v1278_v13 = vpack.c.bf16 %v19185_v11, %v19181_v7 }
 0x209   : > { %v13882_v12 = vpop.f32.mrb[8].mxu0  ;;  %v13986_v17 = vpop.f32.mrb[8].mxu1 }
 0x20a   : > { %v13883_v14 = vpop.f32.mrb[9].mxu0  ;;  %v13987_v19 = vpop.f32.mrb[9].mxu1 }
 0x20b   : > { %v19189_v15 = vadd.f32 %v13883_v14, %v13882_v12  ;;  %v13885_v16 = vpop.f32.mrb[10].mxu0  ;;  %v19193_v21 = vadd.f32 %v13987_v19, %v13986_v17  ;;  %v13989_v22 = vpop.f32.mrb[10].mxu1  ;;  %v17546_v17 = vld [vmem:[#allocation2 + $0x8] sm:$0xff]  }
 0x20c   : > { %v13886_v18 = vpop.f32.mrb[11].mxu0  ;;  %v13990_v23 = vpop.f32.mrb[11].mxu1 }
 0x20d   : > { %v19191_v20 = vadd.f32 %v13886_v18, %v13885_v16  ;;  %v19197_v25 = vadd.f32 %v13990_v23, %v13989_v22 }
 0x20f   : > { %v784_v24 = vpack.c.bf16 %v19191_v20, %v19189_v15  ;;  %v1279_v28 = vpack.c.bf16 %v19197_v25, %v19193_v21 }
 0x211   : > { %v13888_v26 = vpop.f32.mrb[12].mxu0  ;;  %v13992_v32 = vpop.f32.mrb[12].mxu1 }
 0x212   : > { %v13889_v29 = vpop.f32.mrb[13].mxu0  ;;  %v13993_v34 = vpop.f32.mrb[13].mxu1 }
 0x213   : > { %v19201_v30 = vadd.f32 %v13889_v29, %v13888_v26  ;;  %v13891_v31 = vpop.f32.mrb[14].mxu0  ;;  %v19205_v36 = vadd.f32 %v13993_v34, %v13992_v32  ;;  %v13995_v37 = vpop.f32.mrb[14].mxu1  ;;  %v17550_v26 = vld [vmem:[#allocation2 + $0x10] sm:$0xff]  }
 0x214   : > { %v13892_v33 = vpop.f32.mrb[15].mxu0  ;;  %v13996_v38 = vpop.f32.mrb[15].mxu1 }
 0x215   : > { %v19203_v35 = vadd.f32 %v13892_v33, %v13891_v31  ;;  %v19209_v40 = vadd.f32 %v13996_v38, %v13995_v37 }
 0x217   : > { %v785_v39 = vpack.c.bf16 %v19203_v35, %v19201_v30  ;;  %v1280_v42 = vpack.c.bf16 %v19209_v40, %v19205_v36 }
 0x219   : > { %v13910_v41 = vpop.f32.mrb[16].mxu0 }
 0x21a   : > { %v13911_v43 = vpop.f32.mrb[17].mxu0  ;;  %v14026_v46 = vpop.f32.mrb[16].mxu1 }
 0x21b   : > { %v13912_v44 = vadd.f32 %v13911_v43, %v13910_v41  ;;  %v13913_v45 = vpop.f32.mrb[18].mxu0  ;;  %v14027_v48 = vpop.f32.mrb[17].mxu1  ;;  %v17551_v43 = vld [vmem:[#allocation2 + $0x18] sm:$0xff]  }
 0x21c   : > { %v13914_v47 = vpop.f32.mrb[19].mxu0  ;;  %v19213_v50 = vadd.f32 %v14027_v48, %v14026_v46  ;;  %v14029_v52 = vpop.f32.mrb[18].mxu1 }
 0x21d   : > { %v13915_v49 = vadd.f32 %v13914_v47, %v13913_v45  ;;  %v14030_v53 = vpop.f32.mrb[19].mxu1 }
 0x21e   : > { %v19215_v55 = vadd.f32 %v14030_v53, %v14029_v52 }
 0x21f   : > { %v916_v54 = vpack.c.bf16 %v13915_v49, %v13912_v44  ;;  %v17555_v49 = vld [vmem:[#allocation2 + $0x20] sm:$0xff]  }
 0x220   : > { %v1533_v59 = vpack.c.bf16 %v19215_v55, %v19213_v50 }
 0x221   : > { %v13916_v58 = vpop.f32.mrb[20].mxu0  ;;  %15077 = vmatprep.mubr.bf16.mxu0 %v916_v54 }
 0x222   : > { %v13917_v62 = vpop.f32.mrb[21].mxu0  ;;  %v14032_v3 = vpop.f32.mrb[20].mxu1 }
 0x223   : > { %v13918_v0 = vadd.f32 %v13917_v62, %v13916_v58  ;;  %v13919_v2 = vpop.f32.mrb[22].mxu0  ;;  %v14033_v5 = vpop.f32.mrb[21].mxu1 }
 0x224   : > { %v13920_v4 = vpop.f32.mrb[23].mxu0  ;;  %v19219_v9 = vadd.f32 %v14033_v5, %v14032_v3  ;;  %v14035_v12 = vpop.f32.mrb[22].mxu1 }
 0x225   : > { %v13921_v8 = vadd.f32 %v13920_v4, %v13919_v2  ;;  %v14036_v14 = vpop.f32.mrb[23].mxu1  ;;  %v17556_v4 = vld [vmem:[#allocation2 + $0x28] sm:$0xff]  }
 0x226   : > { %v19221_v18 = vadd.f32 %v14036_v14, %v14035_v12 }
 0x227   : > { %v917_v16 = vpack.c.bf16 %v13921_v8, %v13918_v0 }
 0x228   : > { %v1534_v22 = vpack.c.bf16 %v19221_v18, %v19219_v9 }
 0x229   : > { %15078 = vmatmul.mubr.bf16.vlgmr.msra.gmra.mrb[32].mxu0 %v917_v16  ;;  %v13922_v19 = vpop.f32.mrb[24].mxu0  ;;  %v17560_v16 = vld [vmem:[#allocation2 + $0x30] sm:$0xff]  }
 0x22a   : > { %15086 = vmatpush3.bf16.msra.mxu0 %v19131_v27  ;;  %v13923_v23 = vpop.f32.mrb[25].mxu0  ;;  %v14038_v32 = vpop.f32.mrb[24].mxu1 }
 0x22b   : > { %15087 = vmatprep.subr.bf16.mxu0 %v17546_v17  ;;  %v13924_v29 = vadd.f32 %v13923_v23, %v13922_v19  ;;  %v13925_v31 = vpop.f32.mrb[26].mxu0  ;;  %v14039_v34 = vpop.f32.mrb[25].mxu1 }
 0x22c   : > { %v13926_v33 = vpop.f32.mrb[27].mxu0  ;;  %v19226_v38 = vadd.f32 %v14039_v34, %v14038_v32  ;;  %v14041_v41 = vpop.f32.mrb[26].mxu1 }
 0x22d   : > { %v13927_v37 = vadd.f32 %v13926_v33, %v13925_v31  ;;  %v14042_v44 = vpop.f32.mrb[27].mxu1 }
 0x22e   : > { %15088 = vmatpush3.bf16.msra.mxu0 %v17546_v17  ;;  %v19228_v46 = vadd.f32 %v14042_v44, %v14041_v41 }
 0x22f   : > { %v918_v45 = vpack.c.bf16 %v13927_v37, %v13924_v29  ;;  %15089 = vmatprep.subr.bf16.mxu0 %v17550_v26  ;;  %v17561_v29 = vld [vmem:[#allocation2 + $0x38] sm:$0xff]  }
 0x230   : > { %v1535_v47 = vpack.c.bf16 %v19228_v46, %v19226_v38 }
 0x231   : > { %v13928_v27 = vpop.f32.mrb[28].mxu0  ;;  %15081 = vmatprep.mubr.bf16.mxu0 %v918_v45 }
 0x232   : > { %15090 = vmatpush3.bf16.msra.mxu0 %v17550_v26  ;;  %v13929_v48 = vpop.f32.mrb[29].mxu0  ;;  %v14044_v54 = vpop.f32.mrb[28].mxu1 }
 0x233   : > { %v13930_v52 = vadd.f32 %v13929_v48, %v13928_v27  ;;  %v13931_v53 = vpop.f32.mrb[30].mxu0  ;;  %15091 = vmatprep.subr.bf16.mxu0 %v17551_v43  ;;  %v14045_v62 = vpop.f32.mrb[29].mxu1  ;;  %v17570_v27 = vld [vmem:[#allocation2 + $0x90] sm:$0xff]  }
 0x234   : > { %v13932_v58 = vpop.f32.mrb[31].mxu0  ;;  %v19232_v2 = vadd.f32 %v14045_v62, %v14044_v54  ;;  %v14047_v3 = vpop.f32.mrb[30].mxu1  ;;  %v17571_v54 = vld [vmem:[#allocation2 + $0x98] sm:$0xff]  }
 0x235   : > { %v13933_v0 = vadd.f32 %v13932_v58, %v13931_v53  ;;  %v14048_v5 = vpop.f32.mrb[31].mxu1 }
 0x236   : > { %15092 = vmatpush3.bf16.msra.mxu0 %v17551_v43  ;;  %v19234_v12 = vadd.f32 %v14048_v5, %v14047_v3  ;;  %v17566_v43 = vld [vmem:[#allocation2 + $0x88] sm:$0xff]   ;;  %v17578_v5 = vld [vmem:[#allocation2 + $0xb8] sm:$0xff]  }
 0x237   : > { %v919_v8 = vpack.c.bf16 %v13933_v0, %v13930_v52  ;;  %15093 = vmatprep.subr.bf16.mxu0 %v17555_v49  ;;  %v17576_v0 = vld [vmem:[#allocation2 + $0xa8] sm:$0xff]  }
 0x238   : > { %v1536_v14 = vpack.c.bf16 %v19234_v12, %v19232_v2 }
 0x239   : > { %15082 = vmatmul.mubr.bf16.gmra.mrb[36].mxu0 %v919_v8 }
 0x23a   : > { %15094 = vmatpush3.bf16.msra.mxu0 %v17555_v49  ;;  %15101 = vmatprep.mubr.bf16.mxu0 %v782_v60  ;;  %v14078_v17 = vpop.f32.mrb[32].mxu1 }
 0x23b   : > { %15095 = vmatprep.subr.bf16.mxu0 %v17556_v4  ;;  %v14079_v19 = vpop.f32.mrb[33].mxu1 }
 0x23c   : > { %v19241_v23 = vadd.f32 %v14079_v19, %v14078_v17  ;;  %v14081_v26 = vpop.f32.mrb[34].mxu1  ;;  %v17579_v19 = vld [vmem:[#allocation2 + $0xc0] sm:$0xff]  }
 0x23d   : > { %v14082_v31 = vpop.f32.mrb[35].mxu1 }
 0x23e   : > { %15096 = vmatpush3.bf16.msra.mxu0 %v17556_v4  ;;  %v19243_v32 = vadd.f32 %v14082_v31, %v14081_v26 }
 0x23f   : > { %15097 = vmatprep.subr.bf16.mxu0 %v17560_v16 }
 0x240   : > { %v1789_v33 = vpack.c.bf16 %v19243_v32, %v19241_v23 }
 0x242   : > { %15098 = vmatpush3.bf16.msra.mxu0 %v17560_v16  ;;  %v14084_v56 = vpop.f32.mrb[36].mxu1 }
 0x243   : > { %15099 = vmatprep.subr.bf16.mxu0 %v17561_v29  ;;  %v14085_v60 = vpop.f32.mrb[37].mxu1 }
 0x244   : > { %v19247_v34 = vadd.f32 %v14085_v60, %v14084_v56  ;;  %v14087_v37 = vpop.f32.mrb[38].mxu1  ;;  %v17580_v60 = vld [vmem:[#allocation2 + $0xc8] sm:$0xff]  }
 0x245   : > { %v14088_v41 = vpop.f32.mrb[39].mxu1 }
 0x246   : > { %15100 = vmatpush3.bf16.msra.mxu0 %v17561_v29  ;;  %v19249_v44 = vadd.f32 %v14088_v41, %v14087_v37 }
 0x247   : > { %15109 = vmatprep.subr.bf16.mxu0 %v17565_v51 }
 0x248   : > { %v1790_v45 = vpack.c.bf16 %v19249_v44, %v19247_v34 }
 0x249   : > { %15102 = vmatmul.mubr.bf16.vlgmr.msra.gmra.mrb[32].mxu0 %v783_v10  ;;  %v17575_v10 = vld [vmem:[#allocation2 + $0xa0] sm:$0xff]  }
 0x24a   : > { %15105 = vmatprep.mubr.bf16.mxu0 %v784_v24  ;;  %15110 = vmatpush3.bf16.msra.mxu0 %v17565_v51  ;;  %v14090_v48 = vpop.f32.mrb[40].mxu1 }
 0x24b   : > { %15111 = vmatprep.subr.bf16.mxu0 %v17566_v43  ;;  %v14091_v49 = vpop.f32.mrb[41].mxu1 }
 0x24c   : > { %v19259_v52 = vadd.f32 %v14091_v49, %v14090_v48  ;;  %v14093_v53 = vpop.f32.mrb[42].mxu1 }
 0x24d   : > { %v14094_v58 = vpop.f32.mrb[43].mxu1 }
 0x24e   : > { %15112 = vmatpush3.bf16.msra.mxu0 %v17566_v43  ;;  %v19261_v1 = vadd.f32 %v14094_v58, %v14093_v53  ;;  %v17581_v43 = vld [vmem:[#allocation2 + $0xd0] sm:$0xff]  }
 0x24f   : > { %15113 = vmatprep.subr.bf16.mxu0 %v17570_v27 }
 0x250   : > { %v1791_v6 = vpack.c.bf16 %v19261_v1, %v19259_v52 }
 0x251   : > { %15106 = vmatmul.mubr.bf16.gmra.mrb[36].mxu0 %v785_v39 }
 0x252   : > { %15114 = vmatpush3.bf16.msra.mxu0 %v17570_v27  ;;  %15125 = vmatprep.mubr.bf16.mxu0 %v1277_v63  ;;  %v14096_v15 = vpop.f32.mrb[44].mxu1 }
 0x253   : > { %15115 = vmatprep.subr.bf16.mxu0 %v17571_v54  ;;  %v14097_v20 = vpop.f32.mrb[45].mxu1 }
 0x254   : > { %v19271_v24 = vadd.f32 %v14097_v20, %v14096_v15  ;;  %v14099_v62 = vpop.f32.mrb[46].mxu1  ;;  %v17584_v15 = vld [vmem:[#allocation2 + $0xe8] sm:$0xff]  }
 0x255   : > { %v14100_v3 = vpop.f32.mrb[47].mxu1 }
 0x256   : > { %15116 = vmatpush3.bf16.msra.mxu0 %v17571_v54  ;;  %v19273_v30 = vadd.f32 %v14100_v3, %v14099_v62  ;;  %v17582_v54 = vld [vmem:[#allocation2 + $0xd8] sm:$0xff]  }
 0x257   : > { %15117 = vmatprep.subr.bf16.mxu0 %v17575_v10 }
 0x258   : > { %v1792_v35 = vpack.c.bf16 %v19273_v30, %v19271_v24 }
 0x25a   : > { %15118 = vmatpush3.bf16.msra.mxu0 %v17575_v10  ;;  %v14130_v61 = vpop.f32.mrb[48].mxu1 }
 0x25b   : > { %15119 = vmatprep.subr.bf16.mxu0 %v17576_v0  ;;  %v14131_v63 = vpop.f32.mrb[49].mxu1 }
 0x25c   : > { %v19277_v39 = vadd.f32 %v14131_v63, %v14130_v61  ;;  %v14133_v4 = vpop.f32.mrb[50].mxu1  ;;  %v17587_v63 = vld [vmem:[#allocation2 + $0x100] sm:$0xff]  }
 0x25d   : > { %v14134_v8 = vpop.f32.mrb[51].mxu1 }
 0x25e   : > { %15120 = vmatpush3.bf16.msra.mxu0 %v17576_v0  ;;  %v19279_v16 = vadd.f32 %v14134_v8, %v14133_v4  ;;  %v17586_v0 = vld [vmem:[#allocation2 + $0xf8] sm:$0xff]  }
 0x25f   : > { %15121 = vmatprep.subr.bf16.mxu0 %v17577_v57 }
 0x260   : > { %v2045_v17 = vpack.c.bf16 %v19279_v16, %v19277_v39 }
 0x262   : > { %15122 = vmatpush3.bf16.msra.mxu0 %v17577_v57  ;;  %v14136_v26 = vpop.f32.mrb[52].mxu1 }
 0x263   : > { %15123 = vmatprep.subr.bf16.mxu0 %v17578_v5  ;;  %v14137_v29 = vpop.f32.mrb[53].mxu1 }
 0x264   : > { %v19283_v31 = vadd.f32 %v14137_v29, %v14136_v26  ;;  %v14139_v51 = vpop.f32.mrb[54].mxu1  ;;  %v17588_v29 = vld [vmem:[#allocation2 + $0x108] sm:$0xff]  }
 0x265   : > { %v14140_v56 = vpop.f32.mrb[55].mxu1 }
 0x266   : > { %15124 = vmatpush3.bf16.msra.mxu0 %v17578_v5  ;;  %v19285_v37 = vadd.f32 %v14140_v56, %v14139_v51 }
 0x267   : > { %15133 = vmatprep.subr.bf16.mxu0 %v17579_v19 }
 0x268   : > { %v2046_v41 = vpack.c.bf16 %v19285_v37, %v19283_v31 }
 0x269   : > { %15126 = vmatmul.mubr.bf16.vlgmr.msra.gmra.mrb[32].mxu0 %v1278_v13  ;;  %v17583_v13 = vld [vmem:[#allocation2 + $0xe0] sm:$0xff]  }
 0x26a   : > { %15134 = vmatpush3.bf16.msra.mxu0 %v17579_v19  ;;  %15129 = vmatprep.mubr.bf16.mxu0 %v1279_v28  ;;  %v14142_v27 = vpop.f32.mrb[56].mxu1 }
 0x26b   : > { %15135 = vmatprep.subr.bf16.mxu0 %v17580_v60  ;;  %v14143_v48 = vpop.f32.mrb[57].mxu1 }
 0x26c   : > { %v19295_v49 = vadd.f32 %v14143_v48, %v14142_v27  ;;  %v14145_v53 = vpop.f32.mrb[58].mxu1 }
 0x26d   : > { %v14146_v58 = vpop.f32.mrb[59].mxu1 }
 0x26e   : > { %15136 = vmatpush3.bf16.msra.mxu0 %v17580_v60  ;;  %v19297_v7 = vadd.f32 %v14146_v58, %v14145_v53  ;;  %v17589_v60 = vld [vmem:[#allocation2 + $0x110] sm:$0xff]  }
 0x26f   : > { %15137 = vmatprep.subr.bf16.mxu0 %v17581_v43 }
 0x270   : > { %v2047_v11 = vpack.c.bf16 %v19297_v7, %v19295_v49 }
 0x271   : > { %15130 = vmatmul.mubr.bf16.gmra.mrb[36].mxu0 %v1280_v42  ;;  %v17585_v42 = vld [vmem:[#allocation2 + $0xf0] sm:$0xff]  }
 0x272   : > { %15138 = vmatpush3.bf16.msra.mxu0 %v17581_v43  ;;  %15149 = vmatprep.mubr.bf16.mxu0 %v1533_v59  ;;  %v14148_v21 = vpop.f32.mrb[60].mxu1 }
 0x273   : > { %15139 = vmatprep.subr.bf16.mxu0 %v17582_v54  ;;  %v14149_v25 = vpop.f32.mrb[61].mxu1 }
 0x274   : > { %v19307_v28 = vadd.f32 %v14149_v25, %v14148_v21  ;;  %v14151_v10 = vpop.f32.mrb[62].mxu1  ;;  %v17592_v21 = vld [vmem:[#allocation2 + $0x128] sm:$0xff]  }
 0x275   : > { %v14152_v20 = vpop.f32.mrb[63].mxu1 }
 0x276   : > { %15140 = vmatpush3.bf16.msra.mxu0 %v17582_v54  ;;  %v19309_v36 = vadd.f32 %v14152_v20, %v14151_v10  ;;  %v17590_v54 = vld [vmem:[#allocation2 + $0x118] sm:$0xff]  }
 0x277   : > { %15141 = vmatprep.subr.bf16.mxu0 %v17583_v13 }
 0x278   : > { %v2048_v40 = vpack.c.bf16 %v19309_v36, %v19307_v28  ;;  %v17609_v36 = vld [vmem:[#allocation2 + $0x1b0] sm:$0xff]  }
 0x27a   : > { %15142 = vmatpush3.bf16.msra.mxu0 %v17583_v13  ;;  %v14182_v50 = vpop.f32.mrb[64].mxu1 }
 0x27b   : > { %15143 = vmatprep.subr.bf16.mxu0 %v17584_v15  ;;  %v14183_v55 = vpop.f32.mrb[65].mxu1 }
 0x27c   : > { %v19313_v59 = vadd.f32 %v14183_v55, %v14182_v50  ;;  %v14185_v62 = vpop.f32.mrb[66].mxu1  ;;  %v17595_v55 = vld [vmem:[#allocation2 + $0x140] sm:$0xff]  }
 0x27d   : > { %v14186_v3 = vpop.f32.mrb[67].mxu1 }
 0x27e   : > { %15144 = vmatpush3.bf16.msra.mxu0 %v17584_v15  ;;  %v19315_v57 = vadd.f32 %v14186_v3, %v14185_v62  ;;  %v17594_v15 = vld [vmem:[#allocation2 + $0x138] sm:$0xff]  }
 0x27f   : > { %15145 = vmatprep.subr.bf16.mxu0 %v17585_v42 }
 0x280   : > { %v2301_v61 = vpack.c.bf16 %v19315_v57, %v19313_v59  ;;  %v17610_v59 = vld [vmem:[#allocation2 + $0x1b8] sm:$0xff]   ;;  %v17611_v57 = vld [vmem:[#allocation2 + $0x1c0] sm:$0xff]  }
 0x282   : > { %15146 = vmatpush3.bf16.msra.mxu0 %v17585_v42  ;;  %v14188_v4 = vpop.f32.mrb[68].mxu1 }
 0x283   : > { %15147 = vmatprep.subr.bf16.mxu0 %v17586_v0  ;;  %v14189_v5 = vpop.f32.mrb[69].mxu1 }
 0x284   : > { %v19319_v8 = vadd.f32 %v14189_v5, %v14188_v4  ;;  %v14191_v19 = vpop.f32.mrb[70].mxu1  ;;  %v17596_v4 = vld [vmem:[#allocation2 + $0x148] sm:$0xff]  }
 0x285   : > { %v14192_v26 = vpop.f32.mrb[71].mxu1 }
 0x286   : > { %15148 = vmatpush3.bf16.msra.mxu0 %v17586_v0  ;;  %v19321_v51 = vadd.f32 %v14192_v26, %v14191_v19 }
 0x287   : > { %15157 = vmatprep.subr.bf16.mxu0 %v17587_v63 }
 0x288   : > { %v2302_v56 = vpack.c.bf16 %v19321_v51, %v19319_v8  ;;  %v17616_v8 = vld [vmem:[#allocation2 + $0x1e8] sm:$0xff]   ;;  %v17617_v51 = vld [vmem:[#allocation2 + $0x1f0] sm:$0xff]  }
 0x289   : > { %15150 = vmatmul.mubr.bf16.vlgmr.msra.gmra.mrb[32].mxu0 %v1534_v22  ;;  %v17591_v22 = vld [vmem:[#allocation2 + $0x120] sm:$0xff]  }
 0x28a   : > { %15158 = vmatpush3.bf16.msra.mxu0 %v17587_v63  ;;  %15153 = vmatprep.mubr.bf16.mxu0 %v1535_v47  ;;  %v14194_v43 = vpop.f32.mrb[72].mxu1 }
 0x28b   : > { %15159 = vmatprep.subr.bf16.mxu0 %v17588_v29  ;;  %v14195_v27 = vpop.f32.mrb[73].mxu1 }
 0x28c   : > { %v19331_v48 = vadd.f32 %v14195_v27, %v14194_v43  ;;  %v14197_v53 = vpop.f32.mrb[74].mxu1 }
 0x28d   : > { %v14198_v58 = vpop.f32.mrb[75].mxu1 }
 0x28e   : > { %15160 = vmatpush3.bf16.msra.mxu0 %v17588_v29  ;;  %v19333_v9 = vadd.f32 %v14198_v58, %v14197_v53  ;;  %v17597_v29 = vld [vmem:[#allocation2 + $0x150] sm:$0xff]  }
 0x28f   : > { %15161 = vmatprep.subr.bf16.mxu0 %v17589_v60 }
 0x290   : > { %v2303_v18 = vpack.c.bf16 %v19333_v9, %v19331_v48  ;;  %v17619_v48 = vld [vmem:[#allocation2 + $0x200] sm:$0xff]   ;;  %v17620_v9 = vld [vmem:[#allocation2 + $0x208] sm:$0xff]  }
 0x291   : > { %15154 = vmatmul.mubr.bf16.gmra.mrb[36].mxu0 %v1536_v14  ;;  %v17593_v14 = vld [vmem:[#allocation2 + $0x130] sm:$0xff]  }
 0x292   : > { %15162 = vmatpush3.bf16.msra.mxu0 %v17589_v60  ;;  %15173 = vmatprep.mubr.bf16.mxu0 %v1789_v33  ;;  %v14200_v38 = vpop.f32.mrb[76].mxu1 }
 0x293   : > { %15163 = vmatprep.subr.bf16.mxu0 %v17590_v54  ;;  %v14201_v46 = vpop.f32.mrb[77].mxu1 }
 0x294   : > { %v19343_v47 = vadd.f32 %v14201_v46, %v14200_v38  ;;  %v14203_v13 = vpop.f32.mrb[78].mxu1  ;;  %v17600_v38 = vld [vmem:[#allocation2 + $0x168] sm:$0xff]  }
 0x295   : > { %v14204_v25 = vpop.f32.mrb[79].mxu1 }
 0x296   : > { %15164 = vmatpush3.bf16.msra.mxu0 %v17590_v54  ;;  %v19345_v2 = vadd.f32 %v14204_v25, %v14203_v13  ;;  %v17598_v54 = vld [vmem:[#allocation2 + $0x158] sm:$0xff]  }
 0x297   : > { %15165 = vmatprep.subr.bf16.mxu0 %v17591_v22 }
 0x298   : > { %v2304_v12 = vpack.c.bf16 %v19345_v2, %v19343_v47  ;;  %v17622_v47 = vld [vmem:[#allocation2 + $0x218] sm:$0xff]   ;;  %v17623_v2 = vld [vmem:[#allocation2 + $0x220] sm:$0xff]  }
 0x29a   : > { %15166 = vmatpush3.bf16.msra.mxu0 %v17591_v22  ;;  %v14234_v23 = vpop.f32.mrb[80].mxu1 }
 0x29b   : > { %15167 = vmatprep.subr.bf16.mxu0 %v17592_v21  ;;  %v14235_v32 = vpop.f32.mrb[81].mxu1 }
 0x29c   : > { %v19349_v33 = vadd.f32 %v14235_v32, %v14234_v23  ;;  %v14237_v10 = vpop.f32.mrb[82].mxu1  ;;  %v17603_v32 = vld [vmem:[#allocation2 + $0x180] sm:$0xff]  }
 0x29d   : > { %v14238_v20 = vpop.f32.mrb[83].mxu1 }
 0x29e   : > { %15168 = vmatpush3.bf16.msra.mxu0 %v17592_v21  ;;  %v19351_v42 = vadd.f32 %v14238_v20, %v14237_v10  ;;  %v17602_v21 = vld [vmem:[#allocation2 + $0x178] sm:$0xff]  }
 0x29f   : > { %15169 = vmatprep.subr.bf16.mxu0 %v17593_v14 }
 0x2a0   : > { %v2557_v50 = vpack.c.bf16 %v19351_v42, %v19349_v33  ;;  %v17625_v33 = vld [vmem:[#allocation2 + $0x230] sm:$0xff]   ;;  %v17626_v42 = vld [vmem:[#allocation2 + $0x238] sm:$0xff]  }
 0x2a2   : > { %15170 = vmatpush3.bf16.msra.mxu0 %v17593_v14  ;;  %v14240_v62 = vpop.f32.mrb[84].mxu1 }
 0x2a3   : > { %15171 = vmatprep.subr.bf16.mxu0 %v17594_v15  ;;  %v14241_v0 = vpop.f32.mrb[85].mxu1 }
 0x2a4   : > { %v19355_v3 = vadd.f32 %v14241_v0, %v14240_v62  ;;  %v14243_v63 = vpop.f32.mrb[86].mxu1  ;;  %v17604_v62 = vld [vmem:[#allocation2 + $0x188] sm:$0xff]  }
 0x2a5   : > { %v14244_v5 = vpop.f32.mrb[87].mxu1 }
 0x2a6   : > { %15172 = vmatpush3.bf16.msra.mxu0 %v17594_v15  ;;  %v19357_v19 = vadd.f32 %v14244_v5, %v14243_v63  ;;  %v17605_v5 = vld [vmem:[#allocation2 + $0x190] sm:$0xff]  }
 0x2a7   : > { %15181 = vmatprep.subr.bf16.mxu0 %v17595_v55 }
 0x2a8   : > { %v2558_v26 = vpack.c.bf16 %v19357_v19, %v19355_v3  ;;  %v13217_v3 = vld [vmem:[#allocation5] ss:$0 sm:$0xff] }
 0x2a9   : > { %15174 = vmatmul.mubr.bf16.vlgmr.msra.gmra.mrb[32].mxu0 %v1790_v45  ;;  %v17599_v45 = vld [vmem:[#allocation2 + $0x160] sm:$0xff]  }
 0x2aa   : > { %15182 = vmatpush3.bf16.msra.mxu0 %v17595_v55  ;;  %15177 = vmatprep.mubr.bf16.mxu0 %v1791_v6  ;;  %v14246_v60 = vpop.f32.mrb[88].mxu1 }
 0x2ab   : > { %15183 = vmatprep.subr.bf16.mxu0 %v17596_v4  ;;  %v14247_v43 = vpop.f32.mrb[89].mxu1 }
 0x2ac   : > { %v19367_v27 = vadd.f32 %v14247_v43, %v14246_v60  ;;  %v14249_v53 = vpop.f32.mrb[90].mxu1 }
 0x2ad   : > { %v14250_v58 = vpop.f32.mrb[91].mxu1 }
 0x2ae   : > { %15184 = vmatpush3.bf16.msra.mxu0 %v17596_v4  ;;  %v19369_v34 = vadd.f32 %v14250_v58, %v14249_v53 }
 0x2af   : > { %15185 = vmatprep.subr.bf16.mxu0 %v17597_v29 }
 0x2b0   : > { %v2559_v44 = vpack.c.bf16 %v19369_v34, %v19367_v27 }
 0x2b1   : > { %15178 = vmatmul.mubr.bf16.gmra.mrb[36].mxu0 %v1792_v35  ;;  %v17601_v35 = vld [vmem:[#allocation2 + $0x170] sm:$0xff]  }
 0x2b2   : > { %15186 = vmatpush3.bf16.msra.mxu0 %v17597_v29  ;;  %15197 = vmatprep.mubr.bf16.mxu0 %v2045_v17  ;;  %v14252_v52 = vpop.f32.mrb[92].mxu1 }
 0x2b3   : > { %15187 = vmatprep.subr.bf16.mxu0 %v17598_v54  ;;  %v14253_v1 = vpop.f32.mrb[93].mxu1 }
 0x2b4   : > { %v19379_v6 = vadd.f32 %v14253_v1, %v14252_v52  ;;  %v14255_v22 = vpop.f32.mrb[94].mxu1  ;;  %v17608_v52 = vld [vmem:[#allocation2 + $0x1a8] sm:$0xff]  }
 0x2b5   : > { %v14256_v46 = vpop.f32.mrb[95].mxu1 }
 0x2b6   : > { %15188 = vmatpush3.bf16.msra.mxu0 %v17598_v54  ;;  %v19381_v24 = vadd.f32 %v14256_v46, %v14255_v22  ;;  %v17606_v54 = vld [vmem:[#allocation2 + $0x198] sm:$0xff]   ;;  %v17613_v22 = vld [vmem:[#allocation2 + $0x1d0] sm:$0xff]   ;;  %v17615_v46 = vld [vmem:[#allocation2 + $0x1e0] sm:$0xff]  }
 0x2b7   : > { %15189 = vmatprep.subr.bf16.mxu0 %v17599_v45 }
 0x2b8   : > { %v2560_v30 = vpack.c.bf16 %v19381_v24, %v19379_v6 }
 0x2ba   : > { %15190 = vmatpush3.bf16.msra.mxu0 %v17599_v45  ;;  %v14286_v39 = vpop.f32.mrb[96].mxu1 }
 0x2bb   : > { %15191 = vmatprep.subr.bf16.mxu0 %v17600_v38  ;;  %v14287_v16 = vpop.f32.mrb[97].mxu1 }
 0x2bc   : > { %v19385_v17 = vadd.f32 %v14287_v16, %v14286_v39  ;;  %v14289_v13 = vpop.f32.mrb[98].mxu1 }
 0x2bd   : > { %v14290_v25 = vpop.f32.mrb[99].mxu1 }
 0x2be   : > { %15192 = vmatpush3.bf16.msra.mxu0 %v17600_v38  ;;  %v19387_v14 = vadd.f32 %v14290_v25, %v14289_v13  ;;  %v17614_v38 = vld [vmem:[#allocation2 + $0x1d8] sm:$0xff]  }
 0x2bf   : > { %15193 = vmatprep.subr.bf16.mxu0 %v17601_v35 }
 0x2c0   : > { %v2813_v23 = vpack.c.bf16 %v19387_v14, %v19385_v17 }
 0x2c2   : > { %15194 = vmatpush3.bf16.msra.mxu0 %v17601_v35  ;;  %v14292_v10 = vpop.f32.mrb[100].mxu1 }
 0x2c3   : > { %15195 = vmatprep.subr.bf16.mxu0 %v17602_v21  ;;  %v14293_v15 = vpop.f32.mrb[101].mxu1 }
 0x2c4   : > { %v19391_v20 = vadd.f32 %v14293_v15, %v14292_v10  ;;  %v14295_v55 = vpop.f32.mrb[102].mxu1 }
 0x2c5   : > { %v14296_v0 = vpop.f32.mrb[103].mxu1 }
 0x2c6   : > { %15196 = vmatpush3.bf16.msra.mxu0 %v17602_v21  ;;  %v19393_v63 = vadd.f32 %v14296_v0, %v14295_v55 }
 0x2c7   : > { %15205 = vmatprep.subr.bf16.mxu0 %v17603_v32 }
 0x2c8   : > { %v2814_v4 = vpack.c.bf16 %v19393_v63, %v19391_v20 }
 0x2c9   : > { %15198 = vmatmul.mubr.bf16.vlgmr.msra.gmra.mrb[32].mxu0 %v2046_v41  ;;  %v17607_v41 = vld [vmem:[#allocation2 + $0x1a0] sm:$0xff]  }
 0x2ca   : > { %15206 = vmatpush3.bf16.msra.mxu0 %v17603_v32  ;;  %15201 = vmatprep.mubr.bf16.mxu0 %v2047_v11  ;;  %v14298_v29 = vpop.f32.mrb[104].mxu1 }
 0x2cb   : > { %15207 = vmatprep.subr.bf16.mxu0 %v17604_v62  ;;  %v14299_v60 = vpop.f32.mrb[105].mxu1 }
 0x2cc   : > { %v19403_v43 = vadd.f32 %v14299_v60, %v14298_v29  ;;  %v14301_v53 = vpop.f32.mrb[106].mxu1 }
 0x2cd   : > { %v14302_v58 = vpop.f32.mrb[107].mxu1 }
 0x2ce   : > { %15208 = vmatpush3.bf16.msra.mxu0 %v17604_v62  ;;  %v19405_v31 = vadd.f32 %v14302_v58, %v14301_v53 }
 0x2cf   : > { %15209 = vmatprep.subr.bf16.mxu0 %v17605_v5 }
 0x2d0   : > { %v2815_v37 = vpack.c.bf16 %v19405_v31, %v19403_v43 }
 0x2d1   : > { %15202 = vmatmul.mubr.bf16.gmra.mrb[36].mxu0 %v2048_v40 }
 0x2d2   : > { %15210 = vmatpush3.bf16.msra.mxu0 %v17605_v5  ;;  %15221 = vmatprep.mubr.bf16.mxu0 %v2301_v61  ;;  %v14304_v49 = vpop.f32.mrb[108].mxu1  ;;  %v17612_v61 = vld [vmem:[#allocation2 + $0x1c8] sm:$0xff]  }
 0x2d3   : > { %15211 = vmatprep.subr.bf16.mxu0 %v17606_v54  ;;  %v14305_v7 = vpop.f32.mrb[109].mxu1 }
 0x2d4   : > { %v19415_v11 = vadd.f32 %v14305_v7, %v14304_v49  ;;  %v14307_v45 = vpop.f32.mrb[110].mxu1  ;;  %v17627_v7 = vld [vmem:[#allocation10] sm:$0xff]  }
 0x2d5   : > { %v14308_v1 = vpop.f32.mrb[111].mxu1 }
 0x2d6   : > { %15212 = vmatpush3.bf16.msra.mxu0 %v17606_v54  ;;  %v19417_v28 = vadd.f32 %v14308_v1, %v14307_v45  ;;  %v17629_v45 = vld [vmem:[#allocation10 + $0x8] sm:$0xff]   ;;  %v17635_v1 = vld [vmem:[#allocation2 + $0x280] sm:$0xff]  }
 0x2d7   : > { %15213 = vmatprep.subr.bf16.mxu0 %v17607_v41 }
 0x2d8   : > { %v2816_v40 = vpack.c.bf16 %v19417_v28, %v19415_v11  ;;  %v17628_v11 = vld [vmem:[#allocation10 + $0x10] sm:$0xff]   ;;  %v17636_v28 = vld [vmem:[#allocation2 + $0x288] sm:$0xff]  }
 0x2da   : > { %15214 = vmatpush3.bf16.msra.mxu0 %v17607_v41 }
 0x2db   : > { %15215 = vmatprep.subr.bf16.mxu0 %v17608_v52 }
 0x2de   : > { %15216 = vmatpush3.bf16.msra.mxu0 %v17608_v52  ;;  %v17630_v52 = vld [vmem:[#allocation10 + $0x18] sm:$0xff]  }
 0x2df   : > { %15217 = vmatprep.subr.bf16.mxu0 %v17609_v36 }
 0x2e2   : > { %15218 = vmatpush3.bf16.msra.mxu0 %v17609_v36  ;;  %v17637_v36 = vld [vmem:[#allocation2 + $0x290] sm:$0xff]  }
 0x2e3   : > { %15219 = vmatprep.subr.bf16.mxu0 %v17610_v59 }
 0x2e6   : > { %15220 = vmatpush3.bf16.msra.mxu0 %v17610_v59  ;;  %v17631_v59 = vld [vmem:[#allocation10 + $0x20] sm:$0xff]  }
 0x2e7   : > { %15229 = vmatprep.subr.bf16.mxu0 %v17611_v57 }
 0x2e9   : > { %15222 = vmatmul.mubr.bf16.vlgmr.msra.gmra.mrb[32].mxu0 %v2302_v56  ;;  %v17618_v56 = vld [vmem:[#allocation2 + $0x1f8] sm:$0xff]  }
 0x2ea   : > { %15230 = vmatpush3.bf16.msra.mxu0 %v17611_v57  ;;  %15225 = vmatprep.mubr.bf16.mxu0 %v2303_v18  ;;  %v17621_v18 = vld [vmem:[#allocation2 + $0x210] sm:$0xff]   ;;  %v17639_v57 = vld [vmem:[#allocation2 + $0x2a0] sm:$0xff]  }
 0x2eb   : > { %15231 = vmatprep.subr.bf16.mxu0 %v17612_v61 }
 0x2ee   : > { %15232 = vmatpush3.bf16.msra.mxu0 %v17612_v61  ;;  %v17632_v61 = vld [vmem:[#allocation10 + $0x28] sm:$0xff]  }
 0x2ef   : > { %15233 = vmatprep.subr.bf16.mxu0 %v17613_v22 }
 0x2f1   : > { %15226 = vmatmul.mubr.bf16.gmra.mrb[36].mxu0 %v2304_v12  ;;  %v17624_v12 = vld [vmem:[#allocation2 + $0x228] sm:$0xff]  }
 0x2f2   : > { %15234 = vmatpush3.bf16.msra.mxu0 %v17613_v22  ;;  %15245 = vmatprep.mubr.bf16.mxu0 %v2557_v50  ;;  %v18547_v50 = vmov 0.0   ;;  %v17633_v22 = vld [vmem:[#allocation10 + $0x30] sm:$0xff]  }
 0x2f3   : > { %15235 = vmatprep.subr.bf16.mxu0 %v17614_v38  ;;  %15277 = vmatprep.subr.bf16.mxu1 %v18547_v50 }
 0x2f4   : > { %15285 = vmatprep.mubr.msk.bf16.mxu1 %vm18548_vm0, %v18547_v50 }
 0x2f6   : > { %15236 = vmatpush3.bf16.msra.mxu0 %v17614_v38  ;;  %v17634_v38 = vld [vmem:[#allocation10 + $0x38] sm:$0xff]  }
 0x2f7   : > { %15237 = vmatprep.subr.bf16.mxu0 %v17615_v46 }
 0x2fa   : > { %15238 = vmatpush3.bf16.msra.mxu0 %v17615_v46  ;;  %v17640_v46 = vld [vmem:[#allocation2 + $0x2a8] sm:$0xff]  }
 0x2fb   : > { %15239 = vmatprep.subr.bf16.mxu0 %v17616_v8 }
 0x2fe   : > { %15240 = vmatpush3.bf16.msra.mxu0 %v17616_v8  ;;  %v17641_v8 = vld [vmem:[#allocation2 + $0x2b0] sm:$0xff]  }
 0x2ff   : > { %15241 = vmatprep.subr.bf16.mxu0 %v17617_v51 }
 0x302   : > { %15242 = vmatpush3.bf16.msra.mxu0 %v17617_v51  ;;  %v17642_v51 = vld [vmem:[#allocation2 + $0x2b8] sm:$0xff]  }
 0x303   : > { %15243 = vmatprep.subr.bf16.mxu0 %v17618_v56 }
 0x306   : > { %15244 = vmatpush3.bf16.msra.mxu0 %v17618_v56  ;;  %v17653_v56 = vld [vmem:[#allocation10 + $0x40] sm:$0xff]  }
 0x307   : > { %15253 = vmatprep.subr.bf16.mxu0 %v17619_v48 }
 0x309   : > { %15246 = vmatmul.mubr.bf16.vlgmr.msra.gmra.mrb[32].mxu0 %v2558_v26  ;;  %v13218_v26 = vld [vmem:[#allocation7] ss:$0 sm:$0xff] }
 0x30a   : > { %15254 = vmatpush3.bf16.msra.mxu0 %v17619_v48  ;;  %15249 = vmatprep.mubr.bf16.mxu0 %v2559_v44 }
 0x30b   : > { %15255 = vmatprep.subr.bf16.mxu0 %v17620_v9 }
 0x30e   : > { %15256 = vmatpush3.bf16.msra.mxu0 %v17620_v9 }
 0x30f   : > { %15257 = vmatprep.subr.bf16.mxu0 %v17621_v18 }
 0x311   : > { %15250 = vmatmul.mubr.bf16.gmra.mrb[36].mxu0 %v2560_v30 }
 0x312   : > { %15258 = vmatpush3.bf16.msra.mxu0 %v17621_v18  ;;  %15269 = vmatprep.mubr.bf16.mxu0 %v2813_v23 }
 0x313   : > { %15259 = vmatprep.subr.bf16.mxu0 %v17622_v47 }
 0x316   : > { %15260 = vmatpush3.bf16.msra.mxu0 %v17622_v47 }
 0x317   : > { %15261 = vmatprep.subr.bf16.mxu0 %v17623_v2 }
 0x31a   : > { %15262 = vmatpush3.bf16.msra.mxu0 %v17623_v2 }
 0x31b   : > { %15263 = vmatprep.subr.bf16.mxu0 %v17624_v12 }
 0x31e   : > { %15264 = vmatpush3.bf16.msra.mxu0 %v17624_v12 }
 0x31f   : > { %15265 = vmatprep.subr.bf16.mxu0 %v17625_v33 }
 0x322   : > { %15266 = vmatpush3.bf16.msra.mxu0 %v17625_v33 }
 0x323   : > { %15267 = vmatprep.subr.bf16.mxu0 %v17626_v42 }
 0x326   : > { %15268 = vmatpush3.bf16.msra.mxu0 %v17626_v42 }
 0x327   : > { %15341 = vmatprep.subr.bf16.mxu0 %v18547_v50 }
 0x329   : > { %15270 = vmatmul.mubr.bf16.vlgmr.msra.gmra.mrb[32].mxu0 %v2814_v4 }
 0x32a   : > { %15273 = vmatprep.mubr.bf16.mxu0 %v2815_v37 }
 0x331   : > { %15274 = vmatmul.mubr.bf16.gmra.mrb[36].mxu0 %v2816_v40  ;;  %v17638_v40 = vld [vmem:[#allocation2 + $0x298] sm:$0xff]  }
 0x332   : > { %15349 = vmatprep.mubr.msk.bf16.mxu0 %vm18548_vm0, %v18547_v50 }
 0x3fc   : > { %v15271_v19 = vpop.f32.mrb[32].mxu0 }
 0x3fd   : > { %v2962_v27 = vmul.f32 %v15271_v19, %v13217_v3  ;;  %v2916_v34 = vpop.f32.mrb[33].mxu0 }
 0x3fe   : > { %v2960_v44 = vmul.f32 %v13217_v3, %v2916_v34  ;;  %v15272_v6 = vpop.f32.mrb[34].mxu0 }
 0x3ff   : > { %v2975_v24 = vadd.f32 %v13218_v26, %v2962_v27  ;;  %v2963_v30 = vmul.f32 %v15272_v6, %v13217_v3  ;;  %v2919_v35 = vpop.f32.mrb[35].mxu0 }
 0x400   : > { %v2973_v39 = vadd.f32 %v13218_v26, %v2960_v44  ;;  %v2961_v16 = vmul.f32 %v13217_v3, %v2919_v35 }
 0x401   : > { %v2976_v17 = vadd.f32 %v13218_v26, %v2963_v30  ;;  %v2983_v21 = vmax.f32 %v2975_v24, 0.0  ;;  %v17643_v24 = vld [vmem:[#allocation2 + $0x240] sm:$0xff]  }
 0x402   : > { %v2974_v13 = vadd.f32 %v13218_v26, %v2961_v16  ;;  %v2981_v14 = vmax.f32 %v2973_v39, 0.0 }
 0x403   : > { %v2984_v25 = vmax.f32 %v2976_v17, 0.0 }
 0x404   : > { %v2982_v23 = vmax.f32 %v2974_v13, 0.0  ;;  %v15275_v32 = vpop.f32.mrb[36].mxu0  ;;  %v17644_v13 = vld [vmem:[#allocation2 + $0x248] sm:$0xff]  }
 0x405   : > { %v19460_v10 = vpack.c.bf16 %v2984_v25, %v2983_v21  ;;  %v2966_v15 = vmul.f32 %v15275_v32, %v13217_v3  ;;  %v2932_v20 = vpop.f32.mrb[37].mxu0  ;;  %v17645_v21 = vld [vmem:[#allocation2 + $0x250] sm:$0xff]   ;;  %v17646_v25 = vld [vmem:[#allocation2 + $0x258] sm:$0xff]   ;;  %v17647_v32 = vld [vmem:[#allocation2 + $0x260] sm:$0xff]  }
 0x406   : > { %v19462_v55 = vpack.c.bf16 %v2982_v23, %v2981_v14  ;;  %v2964_v62 = vmul.f32 %v13217_v3, %v2932_v20  ;;  %v15276_v0 = vpop.f32.mrb[38].mxu0 }
 0x407   : > { %v2979_v63 = vadd.f32 %v13218_v26, %v2966_v15  ;;  %v2967_v4 = vmul.f32 %v15276_v0, %v13217_v3  ;;  %v2935_v5 = vpop.f32.mrb[39].mxu0  ;;  %v17650_v0 = vld [vmem:[#allocation2 + $0x278] sm:$0xff]  }
 0x408   : > { %v2977_v29 = vadd.f32 %v13218_v26, %v2964_v62  ;;  %v2965_v60 = vmul.f32 %v13217_v3, %v2935_v5  ;;  %15278 = vmatpush3.bf16.msra.mxu1 %v19462_v55  ;;  %15342 = vmatpush3.bf16.msra.mxu0 %v19462_v55  ;;  %v17649_v62 = vld [vmem:[#allocation2 + $0x270] sm:$0xff]   ;;  %v17651_v5 = vld [vmem:[#allocation2 + $0x2c0] sm:$0xff]  }
 0x409   : > { %v2980_v43 = vadd.f32 %v13218_v26, %v2967_v4  ;;  %15279 = vmatprep.subr.bf16.mxu1 %v18547_v50  ;;  %15343 = vmatprep.subr.bf16.mxu0 %v18547_v50  ;;  %v2987_v54 = vmax.f32 %v2979_v63, 0.0 }
 0x40a   : > { %v2978_v53 = vadd.f32 %v13218_v26, %v2965_v60  ;;  %v2985_v31 = vmax.f32 %v2977_v29, 0.0 }
 0x40b   : > { %v2988_v58 = vmax.f32 %v2980_v43, 0.0 }
 0x40c   : > { %v2986_v37 = vmax.f32 %v2978_v53, 0.0  ;;  %15280 = vmatpush3.bf16.msra.mxu1 %v19460_v10  ;;  %15344 = vmatpush3.bf16.msra.mxu0 %v19460_v10  ;;  %v17652_v53 = vld [vmem:[#allocation2 + $0x2c8] sm:$0xff]  }
 0x40d   : > { %v19470_v41 = vpack.c.bf16 %v2988_v58, %v2987_v54  ;;  %15281 = vmatprep.subr.bf16.mxu1 %v18547_v50  ;;  %15345 = vmatprep.subr.bf16.mxu0 %v18547_v50  ;;  %v17654_v54 = vld [vmem:[#allocation2 + $0x2d0] sm:$0xff]   ;;  %v17655_v58 = vld [vmem:[#allocation2 + $0x2d8] sm:$0xff]  }
 0x40e   : > { %v19474_v49 = vpack.c.bf16 %v2986_v37, %v2985_v31  ;;  %v17656_v31 = vld [vmem:[#allocation2 + $0x2e0] sm:$0xff]   ;;  %v17657_v37 = vld [vmem:[#allocation2 + $0x2e8] sm:$0xff]  }
 0x410   : > { %15282 = vmatpush3.bf16.msra.mxu1 %v19474_v49  ;;  %15346 = vmatpush3.bf16.msra.mxu0 %v19474_v49 }
 0x411   : > { %15283 = vmatprep.subr.bf16.mxu1 %v18547_v50  ;;  %15347 = vmatprep.subr.bf16.mxu0 %v18547_v50 }
 0x414   : > { %15284 = vmatpush3.bf16.msra.mxu1 %v19470_v41  ;;  %15348 = vmatpush3.bf16.msra.mxu0 %v19470_v41 }
 0x415   : > { %15289 = vmatprep.subr.bf16.mxu1 %v18547_v50  ;;  %15373 = vmatprep.subr.bf16.mxu0 %v18547_v50 }
 0x417   : > { %15286 = vmatmul.mubr.msk.bf16.vlgmr.msra.gmra.mrb[112].mxu1 %vm3000_vm1, %v17627_v7  ;;  %15350 = vmatmul.mubr.msk.bf16.vlgmr.msra.gmra.mrb[40].mxu0 %vm3000_vm1, %v17628_v11 }
 0x418   : > { %15290 = vmatpush3.bf16.msra.mxu1 %v19462_v55  ;;  %15374 = vmatpush3.bf16.msra.mxu0 %v19462_v55 }
 0x419   : > { %15291 = vmatprep.subr.bf16.mxu1 %v18547_v50  ;;  %15375 = vmatprep.subr.bf16.mxu0 %v18547_v50 }
 0x41a   : > { %15297 = vmatprep.mubr.msk.bf16.mxu1 %vm18548_vm0, %v18547_v50  ;;  %15381 = vmatprep.mubr.msk.bf16.mxu0 %vm18548_vm0, %v18547_v50 }
 0x41c   : > { %15292 = vmatpush3.bf16.msra.mxu1 %v19460_v10  ;;  %15376 = vmatpush3.bf16.msra.mxu0 %v19460_v10 }
 0x41d   : > { %15293 = vmatprep.subr.bf16.mxu1 %v18547_v50  ;;  %15377 = vmatprep.subr.bf16.mxu0 %v18547_v50 }
 0x420   : > { %15294 = vmatpush3.bf16.msra.mxu1 %v19474_v49  ;;  %15378 = vmatpush3.bf16.msra.mxu0 %v19474_v49 }
 0x421   : > { %15295 = vmatprep.subr.bf16.mxu1 %v18547_v50  ;;  %15379 = vmatprep.subr.bf16.mxu0 %v18547_v50 }
 0x424   : > { %15296 = vmatpush3.bf16.msra.mxu1 %v19470_v41  ;;  %15380 = vmatpush3.bf16.msra.mxu0 %v19470_v41 }
 0x425   : > { %15405 = vmatprep.subr.bf16.mxu0 %v18547_v50  ;;  %15301 = vmatprep.subr.bf16.mxu1 %v18547_v50 }
 0x427   : > { %15298 = vmatmul.mubr.msk.bf16.vlgmr.msra.gmra.mrb[116].mxu1 %vm3000_vm1, %v17629_v45  ;;  %15382 = vmatmul.mubr.msk.bf16.vlgmr.msra.gmra.mrb[44].mxu0 %vm3000_vm1, %v17630_v52 }
 0x428   : > { %15406 = vmatpush3.bf16.msra.mxu0 %v19462_v55  ;;  %15413 = vmatprep.mubr.msk.bf16.mxu0 %vm18548_vm0, %v18547_v50 }
 0x429   : > { %15407 = vmatprep.subr.bf16.mxu0 %v18547_v50  ;;  %15302 = vmatpush3.bf16.msra.mxu1 %v17635_v1  ;;  %v17660_v1 = vld [vmem:[#allocation2 + $0x300] sm:$0xff]  }
 0x42a   : > { %15303 = vmatprep.subr.bf16.mxu1 %v18547_v50  ;;  %15317 = vmatprep.mubr.msk.bf16.mxu1 %vm18548_vm0, %v18547_v50 }
 0x42c   : > { %15408 = vmatpush3.bf16.msra.mxu0 %v19460_v10 }
 0x42d   : > { %15409 = vmatprep.subr.bf16.mxu0 %v18547_v50  ;;  %15304 = vmatpush3.bf16.msra.mxu1 %v17636_v28 }
 0x42e   : > { %15305 = vmatprep.subr.bf16.mxu1 %v18547_v50 }
 0x430   : > { %15410 = vmatpush3.bf16.msra.mxu0 %v19474_v49 }
 0x431   : > { %15411 = vmatprep.subr.bf16.mxu0 %v18547_v50  ;;  %15306 = vmatpush3.bf16.msra.mxu1 %v17637_v36  ;;  %v17661_v36 = vld [vmem:[#allocation2 + $0x308] sm:$0xff]  }
 0x432   : > { %15307 = vmatprep.subr.bf16.mxu1 %v18547_v50 }
 0x434   : > { %15412 = vmatpush3.bf16.msra.mxu0 %v19470_v41 }
 0x435   : > { %15437 = vmatprep.subr.bf16.mxu0 %v18547_v50  ;;  %15308 = vmatpush3.bf16.msra.mxu1 %v17638_v40  ;;  %v17662_v40 = vld [vmem:[#allocation2 + $0x310] sm:$0xff]  }
 0x436   : > { %15309 = vmatprep.subr.bf16.mxu1 %v18547_v50 }
 0x437   : > { %15414 = vmatmul.mubr.msk.bf16.vlgmr.msra.gmra.mrb[48].mxu0 %vm3000_vm1, %v17631_v59  ;;  %v17663_v59 = vld [vmem:[#allocation2 + $0x318] sm:$0xff]  }
 0x438   : > { %15438 = vmatpush3.bf16.msra.mxu0 %v19462_v55  ;;  %15445 = vmatprep.mubr.msk.bf16.mxu0 %vm18548_vm0, %v18547_v50 }
 0x439   : > { %15439 = vmatprep.subr.bf16.mxu0 %v18547_v50  ;;  %15310 = vmatpush3.bf16.msra.mxu1 %v17639_v57  ;;  %v17664_v57 = vld [vmem:[#allocation2 + $0x320] sm:$0xff]  }
 0x43a   : > { %15311 = vmatprep.subr.bf16.mxu1 %v18547_v50 }
 0x43c   : > { %15440 = vmatpush3.bf16.msra.mxu0 %v19460_v10 }
 0x43d   : > { %15441 = vmatprep.subr.bf16.mxu0 %v18547_v50  ;;  %15312 = vmatpush3.bf16.msra.mxu1 %v17640_v46 }
 0x43e   : > { %15313 = vmatprep.subr.bf16.mxu1 %v18547_v50 }
 0x440   : > { %15442 = vmatpush3.bf16.msra.mxu0 %v19474_v49 }
 0x441   : > { %15443 = vmatprep.subr.bf16.mxu0 %v18547_v50  ;;  %15314 = vmatpush3.bf16.msra.mxu1 %v17641_v8 }
 0x442   : > { %15315 = vmatprep.subr.bf16.mxu1 %v18547_v50 }
 0x444   : > { %15444 = vmatpush3.bf16.msra.mxu0 %v19470_v41 }
 0x445   : > { %15469 = vmatprep.subr.bf16.mxu0 %v18547_v50  ;;  %15316 = vmatpush3.bf16.msra.mxu1 %v17642_v51 }
 0x446   : > { %15321 = vmatprep.subr.bf16.mxu1 %v18547_v50 }
 0x447   : > { %15446 = vmatmul.mubr.msk.bf16.vlgmr.msra.gmra.mrb[52].mxu0 %vm3000_vm1, %v17632_v61  ;;  %v17665_v61 = vld [vmem:[#allocation2 + $0x328] sm:$0xff]  }
 0x448   : > { %15470 = vmatpush3.bf16.msra.mxu0 %v19462_v55  ;;  %15477 = vmatprep.mubr.msk.bf16.mxu0 %vm18548_vm0, %v18547_v50 }
 0x449   : > { %15471 = vmatprep.subr.bf16.mxu0 %v18547_v50 }
 0x44c   : > { %15472 = vmatpush3.bf16.msra.mxu0 %v19460_v10 }
 0x44d   : > { %15473 = vmatprep.subr.bf16.mxu0 %v18547_v50 }
 0x450   : > { %15474 = vmatpush3.bf16.msra.mxu0 %v19474_v49 }
 0x451   : > { %15475 = vmatprep.subr.bf16.mxu0 %v18547_v50 }
 0x454   : > { %15476 = vmatpush3.bf16.msra.mxu0 %v19470_v41 }
 0x455   : > { %15501 = vmatprep.subr.bf16.mxu0 %v18547_v50 }
 0x457   : > { %15478 = vmatmul.mubr.msk.bf16.vlgmr.msra.gmra.mrb[56].mxu0 %vm3000_vm1, %v17633_v22  ;;  %v17666_v22 = vld [vmem:[#allocation2 + $0x330] sm:$0xff]  }
 0x458   : > { %15502 = vmatpush3.bf16.msra.mxu0 %v19462_v55  ;;  %15509 = vmatprep.mubr.msk.bf16.mxu0 %vm18548_vm0, %v18547_v50 }
 0x459   : > { %15503 = vmatprep.subr.bf16.mxu0 %v18547_v50 }
 0x45c   : > { %15504 = vmatpush3.bf16.msra.mxu0 %v19460_v10 }
 0x45d   : > { %15505 = vmatprep.subr.bf16.mxu0 %v18547_v50 }
 0x460   : > { %15506 = vmatpush3.bf16.msra.mxu0 %v19474_v49 }
 0x461   : > { %15507 = vmatprep.subr.bf16.mxu0 %v18547_v50 }
 0x464   : > { %15508 = vmatpush3.bf16.msra.mxu0 %v19470_v41 }
 0x465   : > { %15533 = vmatprep.subr.bf16.mxu0 %v18547_v50 }
 0x467   : > { %15510 = vmatmul.mubr.msk.bf16.vlgmr.msra.gmra.mrb[60].mxu0 %vm3000_vm1, %v17634_v38  ;;  %v17667_v38 = vld [vmem:[#allocation2 + $0x338] sm:$0xff]  }
 0x468   : > { %15534 = vmatpush3.bf16.msra.mxu0 %v19462_v55  ;;  %15541 = vmatprep.mubr.msk.bf16.mxu0 %vm18548_vm0, %v18547_v50  ;;  %v17648_v55 = vld [vmem:[#allocation2 + $0x268] sm:$0xff]  }
 0x469   : > { %15535 = vmatprep.subr.bf16.mxu0 %v18547_v50 }
 0x46c   : > { %15536 = vmatpush3.bf16.msra.mxu0 %v19460_v10 }
 0x46d   : > { %15537 = vmatprep.subr.bf16.mxu0 %v18547_v50 }
 0x470   : > { %15538 = vmatpush3.bf16.msra.mxu0 %v19474_v49  ;;  %v17659_v49 = vld [vmem:[#allocation2 + $0x2f8] sm:$0xff]  }
 0x471   : > { %15539 = vmatprep.subr.bf16.mxu0 %v18547_v50 }
 0x474   : > { %15540 = vmatpush3.bf16.msra.mxu0 %v19470_v41  ;;  %v17658_v41 = vld [vmem:[#allocation2 + $0x2f0] sm:$0xff]  }
 0x475   : > { %15571 = vmatprep.subr.bf16.mxu0 %v18547_v50 }
 0x477   : > { %15542 = vmatmul.mubr.msk.bf16.vlgmr.msra.gmra.mrb[64].mxu0 %vm3000_vm1, %v17653_v56 }
 0x478   : > { %15573 = vmatprep.mubr.msk.bf16.mxu0 %vm18548_vm0, %v18547_v50 }
 0x4ea   : > { %v3038_v48 = vpop.f32.mrb[112].mxu1  ;;  %v19575_v9 = vpop.f32.mrb[40].mxu0 }
 0x4eb   : > { %v15287_v18 = vpop.f32.mrb[113].mxu1  ;;  %v15351_v47 = vpop.f32.mrb[41].mxu0 }
 0x4ec   : > { %v3041_v2 = vpop.f32.mrb[114].mxu1  ;;  %v19577_v12 = vpop.f32.mrb[42].mxu0  ;;  %v17669_v18 = vld [vmem:[#allocation2 + $0x348] sm:$0xff]   ;;  %v17670_v47 = vld [vmem:[#allocation2 + $0x350] sm:$0xff]  }
 0x4ed   : > { %v3045_v33 = vpack.c.bf16 %v3041_v2, %v3038_v48  ;;  %v15288_v42 = vpop.f32.mrb[115].mxu1  ;;  %v3363_v3 = vpack.c.bf16 %v19577_v12, %v19575_v9  ;;  %v15352_v19 = vpop.f32.mrb[43].mxu0  ;;  %v17668_v48 = vld [vmem:[#allocation2 + $0x340] sm:$0xff]   ;;  %v17671_v2 = vld [vmem:[#allocation2 + $0x358] sm:$0xff]  }
 0x4ee   : > { %v17672_v12 = vld [vmem:[#allocation2 + $0x360] sm:$0xff]   ;;  %v17674_v42 = vld [vmem:[#allocation2 + $0x370] sm:$0xff]   ;;  %v17675_v19 = vld [vmem:[#allocation2 + $0x378] sm:$0xff]  }
 0x4fa   : > { %v3108_v26 = vpop.f32.mrb[116].mxu1  ;;  %v19581_v27 = vpop.f32.mrb[44].mxu0 }
 0x4fb   : > { %v15299_v34 = vpop.f32.mrb[117].mxu1  ;;  %v15383_v44 = vpop.f32.mrb[45].mxu0 }
 0x4fc   : > { %v3111_v6 = vpop.f32.mrb[118].mxu1  ;;  %v19583_v30 = vpop.f32.mrb[46].mxu0 }
 0x4fd   : > { %v3115_v35 = vpack.c.bf16 %v3111_v6, %v3108_v26  ;;  %v15300_v39 = vpop.f32.mrb[119].mxu1  ;;  %v3524_v16 = vpack.c.bf16 %v19583_v30, %v19581_v27  ;;  %v15384_v17 = vpop.f32.mrb[47].mxu0  ;;  %v17676_v6 = vld [vmem:[#allocation2 + $0x380] sm:$0xff]   ;;  %v17678_v30 = vld [vmem:[#allocation2 + $0x390] sm:$0xff]  }
 0x4fe   : > { %v17680_v39 = vld [vmem:[#allocation2 + $0x3a0] sm:$0xff]   ;;  %v17682_v17 = vld [vmem:[#allocation2 + $0x3b0] sm:$0xff]  }
 0x4ff   : > { %15318 = vmatmul.mubr.bf16.vlgmr.msra.gmra.mrb[120].mxu1 %v3115_v35  ;;  %v17679_v35 = vld [vmem:[#allocation2 + $0x398] sm:$0xff]  }
 0x500   : > { %15322 = vmatpush3.bf16.msra.mxu1 %v17643_v24  ;;  %15337 = vmatprep.mubr.msk.bf16.mxu1 %vm18548_vm0, %v18547_v50  ;;  %v17677_v24 = vld [vmem:[#allocation2 + $0x388] sm:$0xff]  }
 0x501   : > { %15323 = vmatprep.subr.bf16.mxu1 %v18547_v50 }
 0x504   : > { %15324 = vmatpush3.bf16.msra.mxu1 %v17644_v13  ;;  %v17683_v13 = vld [vmem:[#allocation2 + $0x3b8] sm:$0xff]  }
 0x505   : > { %15325 = vmatprep.subr.bf16.mxu1 %v18547_v50 }
 0x508   : > { %15326 = vmatpush3.bf16.msra.mxu1 %v17645_v21  ;;  %v17684_v21 = vld [vmem:[#allocation2 + $0x3c0] sm:$0xff]  }
 0x509   : > { %15327 = vmatprep.subr.bf16.mxu1 %v18547_v50 }
 0x50a   : > { %v19592_v14 = vpop.f32.mrb[48].mxu0 }
 0x50b   : > { %v15415_v23 = vpop.f32.mrb[49].mxu0 }
 0x50c   : > { %15328 = vmatpush3.bf16.msra.mxu1 %v17646_v25  ;;  %v19594_v10 = vpop.f32.mrb[50].mxu0  ;;  %v17685_v25 = vld [vmem:[#allocation2 + $0x3c8] sm:$0xff]   ;;  %v17687_v23 = vld [vmem:[#allocation2 + $0x3d8] sm:$0xff]  }
 0x50d   : > { %15329 = vmatprep.subr.bf16.mxu1 %v18547_v50  ;;  %v3685_v15 = vpack.c.bf16 %v19594_v10, %v19592_v14  ;;  %v15416_v20 = vpop.f32.mrb[51].mxu0  ;;  %v17686_v14 = vld [vmem:[#allocation2 + $0x3d0] sm:$0xff]   ;;  %v17689_v10 = vld [vmem:[#allocation2 + $0x3e8] sm:$0xff]  }
 0x50e   : > { %v17691_v20 = vld [vmem:[#allocation2 + $0x3f8] sm:$0xff]  }
 0x510   : > { %15330 = vmatpush3.bf16.msra.mxu1 %v17647_v32  ;;  %v17688_v32 = vld [vmem:[#allocation2 + $0x3e0] sm:$0xff]  }
 0x511   : > { %15331 = vmatprep.subr.bf16.mxu1 %v18547_v50 }
 0x514   : > { %15332 = vmatpush3.bf16.msra.mxu1 %v17648_v55  ;;  %v17692_v55 = vld [vmem:[#allocation2 + $0x400] sm:$0xff]  }
 0x515   : > { %15333 = vmatprep.subr.bf16.mxu1 %v18547_v50 }
 0x518   : > { %15334 = vmatpush3.bf16.msra.mxu1 %v17649_v62  ;;  %v17693_v62 = vld [vmem:[#allocation2 + $0x408] sm:$0xff]  }
 0x519   : > { %15335 = vmatprep.subr.bf16.mxu1 %v18547_v50 }
 0x51a   : > { %v19602_v63 = vpop.f32.mrb[52].mxu0 }
 0x51b   : > { %v15447_v4 = vpop.f32.mrb[53].mxu0 }
 0x51c   : > { %15336 = vmatpush3.bf16.msra.mxu1 %v17650_v0  ;;  %v19604_v29 = vpop.f32.mrb[54].mxu0  ;;  %v17694_v0 = vld [vmem:[#allocation2 + $0x410] sm:$0xff]   ;;  %v17696_v4 = vld [vmem:[#allocation2 + $0x420] sm:$0xff]  }
 0x51d   : > { %15353 = vmatprep.subr.bf16.mxu1 %v18547_v50  ;;  %v3846_v60 = vpack.c.bf16 %v19604_v29, %v19602_v63  ;;  %v15448_v43 = vpop.f32.mrb[55].mxu0  ;;  %v17695_v63 = vld [vmem:[#allocation2 + $0x418] sm:$0xff]   ;;  %v17698_v29 = vld [vmem:[#allocation2 + $0x430] sm:$0xff]  }
 0x51e   : > { %v17700_v43 = vld [vmem:[#allocation2 + $0x440] sm:$0xff]  }
 0x51f   : > { %15338 = vmatmul.mubr.bf16.vlgmr.msra.gmra.mrb[120].mxu1 %v3045_v33  ;;  %v17673_v33 = vld [vmem:[#allocation2 + $0x368] sm:$0xff]  }
 0x520   : > { %15354 = vmatpush3.bf16.msra.mxu1 %v17651_v5  ;;  %15369 = vmatprep.mubr.msk.bf16.mxu1 %vm18548_vm0, %v18547_v50  ;;  %v17697_v5 = vld [vmem:[#allocation2 + $0x428] sm:$0xff]  }
 0x521   : > { %15355 = vmatprep.subr.bf16.mxu1 %v18547_v50 }
 0x524   : > { %15356 = vmatpush3.bf16.msra.mxu1 %v17652_v53  ;;  %v17701_v53 = vld [vmem:[#allocation2 + $0x448] sm:$0xff]  }
 0x525   : > { %15357 = vmatprep.subr.bf16.mxu1 %v18547_v50 }
 0x528   : > { %15358 = vmatpush3.bf16.msra.mxu1 %v17654_v54  ;;  %v17702_v54 = vld [vmem:[#allocation2 + $0x450] sm:$0xff]  }
 0x529   : > { %15359 = vmatprep.subr.bf16.mxu1 %v18547_v50 }
 0x52a   : > { %v19617_v7 = vpop.f32.mrb[56].mxu0 }
 0x52b   : > { %v15479_v11 = vpop.f32.mrb[57].mxu0 }
 0x52c   : > { %15360 = vmatpush3.bf16.msra.mxu1 %v17655_v58  ;;  %v19620_v45 = vpop.f32.mrb[58].mxu0  ;;  %v17703_v58 = vld [vmem:[#allocation2 + $0x458] sm:$0xff]  }
 0x52d   : > { %15361 = vmatprep.subr.bf16.mxu1 %v18547_v50  ;;  %v15480_v52 = vpop.f32.mrb[59].mxu0  ;;  %v4007_v28 = vpack.c.bf16 %v19620_v45, %v19617_v7  ;;  %v13309_v7 = vld [vmem:[#allocation5 + $0x1] ss:$0 sm:$0xff]  ;;  %v13310_v45 = vld [vmem:[#allocation7 + $0x1] ss:$0 sm:$0xff] }
 0x530   : > { %15362 = vmatpush3.bf16.msra.mxu1 %v17656_v31  ;;  %v17704_v31 = vld [vmem:[#allocation2 + $0x460] sm:$0xff]  }
 0x531   : > { %15363 = vmatprep.subr.bf16.mxu1 %v18547_v50 }
 0x534   : > { %15364 = vmatpush3.bf16.msra.mxu1 %v17657_v37  ;;  %v17705_v37 = vld [vmem:[#allocation2 + $0x468] sm:$0xff]  }
 0x535   : > { %15365 = vmatprep.subr.bf16.mxu1 %v18547_v50 }
 0x538   : > { %15366 = vmatpush3.bf16.msra.mxu1 %v17658_v41  ;;  %v17706_v41 = vld [vmem:[#allocation2 + $0x470] sm:$0xff]  }
 0x539   : > { %15367 = vmatprep.subr.bf16.mxu1 %v18547_v50 }
 0x53a   : > { %v19636_v46 = vpop.f32.mrb[60].mxu0 }
 0x53b   : > { %v15511_v8 = vpop.f32.mrb[61].mxu0 }
 0x53c   : > { %15368 = vmatpush3.bf16.msra.mxu1 %v17659_v49  ;;  %v19639_v51 = vpop.f32.mrb[62].mxu0  ;;  %v17707_v49 = vld [vmem:[#allocation2 + $0x478] sm:$0xff]   ;;  %v17709_v8 = vld [vmem:[#allocation11 + $0x8] sm:$0xff]  }
 0x53d   : > { %15385 = vmatprep.subr.bf16.mxu1 %v18547_v50  ;;  %v15512_v56 = vpop.f32.mrb[63].mxu0  ;;  %v4168_v9 = vpack.c.bf16 %v19639_v51, %v19636_v46  ;;  %v17708_v46 = vld [vmem:[#allocation11] sm:$0xff]   ;;  %v17713_v51 = vld [vmem:[#allocation2 + $0x4c0] sm:$0xff]  }
 0x53e   : > { %v17714_v56 = vld [vmem:[#allocation2 + $0x4c8] sm:$0xff]  }
 0x53f   : > { %15370 = vmatmul.mubr.bf16.vlgmr.msra.gmra.mrb[120].mxu1 %v3363_v3 }
 0x540   : > { %15386 = vmatpush3.bf16.msra.mxu1 %v17660_v1  ;;  %15401 = vmatprep.mubr.msk.bf16.mxu1 %vm18548_vm0, %v18547_v50 }
 0x541   : > { %15387 = vmatprep.subr.bf16.mxu1 %v18547_v50 }
 0x544   : > { %15388 = vmatpush3.bf16.msra.mxu1 %v17661_v36 }
 0x545   : > { %15389 = vmatprep.subr.bf16.mxu1 %v18547_v50 }
 0x548   : > { %15390 = vmatpush3.bf16.msra.mxu1 %v17662_v40 }
 0x549   : > { %15391 = vmatprep.subr.bf16.mxu1 %v18547_v50 }
 0x54a   : > { %v19655_v3 = vpop.f32.mrb[64].mxu0 }
 0x54b   : > { %v15543_v26 = vpop.f32.mrb[65].mxu0 }
 0x54c   : > { %15392 = vmatpush3.bf16.msra.mxu1 %v17663_v59  ;;  %v19658_v27 = vpop.f32.mrb[66].mxu0 }
 0x54d   : > { %15393 = vmatprep.subr.bf16.mxu1 %v18547_v50  ;;  %v4329_v34 = vpack.c.bf16 %v19658_v27, %v19655_v3  ;;  %v15544_v44 = vpop.f32.mrb[67].mxu0  ;;  %v17720_v3 = vld [vmem:[#allocation2 + $0x4f8] sm:$0xff]  }
 0x550   : > { %15394 = vmatpush3.bf16.msra.mxu1 %v17664_v57 }
 0x551   : > { %15395 = vmatprep.subr.bf16.mxu1 %v18547_v50 }
 0x554   : > { %15396 = vmatpush3.bf16.msra.mxu1 %v17665_v61 }
 0x555   : > { %15397 = vmatprep.subr.bf16.mxu1 %v18547_v50 }
 0x558   : > { %15398 = vmatpush3.bf16.msra.mxu1 %v17666_v22 }
 0x559   : > { %15399 = vmatprep.subr.bf16.mxu1 %v18547_v50 }
 0x55c   : > { %15400 = vmatpush3.bf16.msra.mxu1 %v17667_v38 }
 0x55d   : > { %15417 = vmatprep.subr.bf16.mxu1 %v18547_v50 }
 0x55f   : > { %15402 = vmatmul.mubr.bf16.vlgmr.msra.gmra.mrb[120].mxu1 %v3524_v16  ;;  %v17681_v16 = vld [vmem:[#allocation2 + $0x3a8] sm:$0xff]  }
 0x560   : > { %15418 = vmatpush3.bf16.msra.mxu1 %v17668_v48  ;;  %15433 = vmatprep.mubr.msk.bf16.mxu1 %vm18548_vm0, %v18547_v50  ;;  %v17710_v48 = vld [vmem:[#allocation11 + $0x28] sm:$0xff]  }
 0x561   : > { %15419 = vmatprep.subr.bf16.mxu1 %v18547_v50 }
 0x564   : > { %15420 = vmatpush3.bf16.msra.mxu1 %v17669_v18  ;;  %v17716_v18 = vld [vmem:[#allocation2 + $0x4d8] sm:$0xff]  }
 0x565   : > { %15421 = vmatprep.subr.bf16.mxu1 %v18547_v50 }
 0x568   : > { %15422 = vmatpush3.bf16.msra.mxu1 %v17670_v47  ;;  %v17711_v47 = vld [vmem:[#allocation11 + $0x30] sm:$0xff]  }
 0x569   : > { %15423 = vmatprep.subr.bf16.mxu1 %v18547_v50 }
 0x56c   : > { %15424 = vmatpush3.bf16.msra.mxu1 %v17671_v2  ;;  %v17717_v2 = vld [vmem:[#allocation2 + $0x4e0] sm:$0xff]  }
 0x56d   : > { %15425 = vmatprep.subr.bf16.mxu1 %v18547_v50 }
 0x570   : > { %15426 = vmatpush3.bf16.msra.mxu1 %v17672_v12  ;;  %v17718_v12 = vld [vmem:[#allocation2 + $0x4e8] sm:$0xff]  }
 0x571   : > { %15427 = vmatprep.subr.bf16.mxu1 %v18547_v50 }
 0x574   : > { %15428 = vmatpush3.bf16.msra.mxu1 %v17673_v33  ;;  %v17712_v33 = vld [vmem:[#allocation11 + $0x38] sm:$0xff]  }
 0x575   : > { %15429 = vmatprep.subr.bf16.mxu1 %v18547_v50 }
 0x578   : > { %15430 = vmatpush3.bf16.msra.mxu1 %v17674_v42  ;;  %v17719_v42 = vld [vmem:[#allocation2 + $0x4f0] sm:$0xff]  }
 0x579   : > { %15431 = vmatprep.subr.bf16.mxu1 %v18547_v50 }
 0x57c   : > { %15432 = vmatpush3.bf16.msra.mxu1 %v17675_v19 }
 0x57d   : > { %15449 = vmatprep.subr.bf16.mxu1 %v18547_v50 }
 0x57f   : > { %15434 = vmatmul.mubr.bf16.vlgmr.msra.gmra.mrb[120].mxu1 %v3685_v15  ;;  %v17690_v15 = vld [vmem:[#allocation2 + $0x3f0] sm:$0xff]  }
 0x580   : > { %15450 = vmatpush3.bf16.msra.mxu1 %v17676_v6  ;;  %15465 = vmatprep.mubr.msk.bf16.mxu1 %vm18548_vm0, %v18547_v50  ;;  %v17721_v6 = vld [vmem:[#allocation2 + $0x480] sm:$0xff]  }
 0x581   : > { %15451 = vmatprep.subr.bf16.mxu1 %v18547_v50 }
 0x584   : > { %15452 = vmatpush3.bf16.msra.mxu1 %v17677_v24 }
 0x585   : > { %15453 = vmatprep.subr.bf16.mxu1 %v18547_v50 }
 0x588   : > { %15454 = vmatpush3.bf16.msra.mxu1 %v17678_v30 }
 0x589   : > { %15455 = vmatprep.subr.bf16.mxu1 %v18547_v50 }
 0x58c   : > { %15456 = vmatpush3.bf16.msra.mxu1 %v17679_v35 }
 0x58d   : > { %15457 = vmatprep.subr.bf16.mxu1 %v18547_v50 }
 0x590   : > { %15458 = vmatpush3.bf16.msra.mxu1 %v17680_v39 }
 0x591   : > { %15459 = vmatprep.subr.bf16.mxu1 %v18547_v50 }
 0x594   : > { %15460 = vmatpush3.bf16.msra.mxu1 %v17681_v16 }
 0x595   : > { %15461 = vmatprep.subr.bf16.mxu1 %v18547_v50 }
 0x598   : > { %15462 = vmatpush3.bf16.msra.mxu1 %v17682_v17  ;;  %v17722_v17 = vld [vmem:[#allocation2 + $0x488] sm:$0xff]  }
 0x599   : > { %15463 = vmatprep.subr.bf16.mxu1 %v18547_v50 }
 0x59c   : > { %15464 = vmatpush3.bf16.msra.mxu1 %v17683_v13  ;;  %v17723_v13 = vld [vmem:[#allocation2 + $0x490] sm:$0xff]  }
 0x59d   : > { %15481 = vmatprep.subr.bf16.mxu1 %v18547_v50 }
 0x59f   : > { %15466 = vmatmul.mubr.bf16.vlgmr.msra.gmra.mrb[120].mxu1 %v3846_v60  ;;  %v17699_v60 = vld [vmem:[#allocation2 + $0x438] sm:$0xff]  }
 0x5a0   : > { %15482 = vmatpush3.bf16.msra.mxu1 %v17684_v21  ;;  %15497 = vmatprep.mubr.msk.bf16.mxu1 %vm18548_vm0, %v18547_v50  ;;  %v17724_v21 = vld [vmem:[#allocation2 + $0x498] sm:$0xff]  }
 0x5a1   : > { %15483 = vmatprep.subr.bf16.mxu1 %v18547_v50 }
 0x5a4   : > { %15484 = vmatpush3.bf16.msra.mxu1 %v17685_v25  ;;  %v17725_v25 = vld [vmem:[#allocation2 + $0x4a0] sm:$0xff]  }
 0x5a5   : > { %15485 = vmatprep.subr.bf16.mxu1 %v18547_v50 }
 0x5a8   : > { %15486 = vmatpush3.bf16.msra.mxu1 %v17686_v14  ;;  %v17726_v14 = vld [vmem:[#allocation2 + $0x4a8] sm:$0xff]  }
 0x5a9   : > { %15487 = vmatprep.subr.bf16.mxu1 %v18547_v50 }
 0x5ac   : > { %15488 = vmatpush3.bf16.msra.mxu1 %v17687_v23  ;;  %v17727_v23 = vld [vmem:[#allocation2 + $0x4b0] sm:$0xff]  }
 0x5ad   : > { %15489 = vmatprep.subr.bf16.mxu1 %v18547_v50 }
 0x5b0   : > { %15490 = vmatpush3.bf16.msra.mxu1 %v17688_v32  ;;  %v17728_v32 = vld [vmem:[#allocation2 + $0x4b8] sm:$0xff]  }
 0x5b1   : > { %15491 = vmatprep.subr.bf16.mxu1 %v18547_v50 }
 0x5b4   : > { %15492 = vmatpush3.bf16.msra.mxu1 %v17689_v10  ;;  %v17729_v10 = vld [vmem:[#allocation11 + $0x10] sm:$0xff]  }
 0x5b5   : > { %15493 = vmatprep.subr.bf16.mxu1 %v18547_v50 }
 0x5b8   : > { %15494 = vmatpush3.bf16.msra.mxu1 %v17690_v15  ;;  %v17730_v15 = vld [vmem:[#allocation2 + $0x500] sm:$0xff]  }
 0x5b9   : > { %15495 = vmatprep.subr.bf16.mxu1 %v18547_v50 }
 0x5bc   : > { %15496 = vmatpush3.bf16.msra.mxu1 %v17691_v20  ;;  %v17731_v20 = vld [vmem:[#allocation2 + $0x508] sm:$0xff]  }
 0x5bd   : > { %15513 = vmatprep.subr.bf16.mxu1 %v18547_v50 }
 0x5bf   : > { %15498 = vmatmul.mubr.bf16.vlgmr.msra.gmra.mrb[120].mxu1 %v4007_v28 }
 0x5c0   : > { %15514 = vmatpush3.bf16.msra.mxu1 %v17692_v55  ;;  %15529 = vmatprep.mubr.msk.bf16.mxu1 %vm18548_vm0, %v18547_v50  ;;  %v17732_v55 = vld [vmem:[#allocation2 + $0x510] sm:$0xff]  }
 0x5c1   : > { %15515 = vmatprep.subr.bf16.mxu1 %v18547_v50 }
 0x5c4   : > { %15516 = vmatpush3.bf16.msra.mxu1 %v17693_v62  ;;  %v17733_v62 = vld [vmem:[#allocation2 + $0x518] sm:$0xff]  }
 0x5c5   : > { %15517 = vmatprep.subr.bf16.mxu1 %v18547_v50 }
 0x5c8   : > { %15518 = vmatpush3.bf16.msra.mxu1 %v17694_v0  ;;  %v17734_v0 = vld [vmem:[#allocation2 + $0x520] sm:$0xff]  }
 0x5c9   : > { %15519 = vmatprep.subr.bf16.mxu1 %v18547_v50 }
 0x5cc   : > { %15520 = vmatpush3.bf16.msra.mxu1 %v17695_v63  ;;  %v17735_v63 = vld [vmem:[#allocation2 + $0x528] sm:$0xff]  }
 0x5cd   : > { %15521 = vmatprep.subr.bf16.mxu1 %v18547_v50 }
 0x5d0   : > { %15522 = vmatpush3.bf16.msra.mxu1 %v17696_v4  ;;  %v17736_v4 = vld [vmem:[#allocation2 + $0x530] sm:$0xff]  }
 0x5d1   : > { %15523 = vmatprep.subr.bf16.mxu1 %v18547_v50 }
 0x5d4   : > { %15524 = vmatpush3.bf16.msra.mxu1 %v17697_v5  ;;  %v17737_v5 = vld [vmem:[#allocation2 + $0x538] sm:$0xff]  }
 0x5d5   : > { %15525 = vmatprep.subr.bf16.mxu1 %v18547_v50 }
 0x5d8   : > { %15526 = vmatpush3.bf16.msra.mxu1 %v17698_v29  ;;  %v17739_v29 = vld [vmem:[#allocation11 + $0x40] sm:$0xff]  }
 0x5d9   : > { %15527 = vmatprep.subr.bf16.mxu1 %v18547_v50 }
 0x5dc   : > { %15528 = vmatpush3.bf16.msra.mxu1 %v17699_v60 }
 0x5dd   : > { %15545 = vmatprep.subr.bf16.mxu1 %v18547_v50 }
 0x5df   : > { %15530 = vmatmul.mubr.bf16.vlgmr.msra.gmra.mrb[120].mxu1 %v4168_v9  ;;  %v17715_v9 = vld [vmem:[#allocation2 + $0x4d0] sm:$0xff]  }
 0x5e0   : > { %15546 = vmatpush3.bf16.msra.mxu1 %v17700_v43  ;;  %15561 = vmatprep.mubr.msk.bf16.mxu1 %vm18548_vm0, %v18547_v50 }
 0x5e1   : > { %15547 = vmatprep.subr.bf16.mxu1 %v18547_v50 }
 0x5e4   : > { %15548 = vmatpush3.bf16.msra.mxu1 %v17701_v53 }
 0x5e5   : > { %15549 = vmatprep.subr.bf16.mxu1 %v18547_v50 }
 0x5e8   : > { %15550 = vmatpush3.bf16.msra.mxu1 %v17702_v54 }
 0x5e9   : > { %15551 = vmatprep.subr.bf16.mxu1 %v18547_v50 }
 0x5ec   : > { %15552 = vmatpush3.bf16.msra.mxu1 %v17703_v58 }
 0x5ed   : > { %15553 = vmatprep.subr.bf16.mxu1 %v18547_v50 }
 0x5f0   : > { %15554 = vmatpush3.bf16.msra.mxu1 %v17704_v31  ;;  %v17738_v31 = vld [vmem:[#allocation11 + $0x18] sm:$0xff]  }
 0x5f1   : > { %15555 = vmatprep.subr.bf16.mxu1 %v18547_v50 }
 0x5f4   : > { %15556 = vmatpush3.bf16.msra.mxu1 %v17705_v37  ;;  %v17740_v37 = vld [vmem:[#allocation2 + $0x540] sm:$0xff]  }
 0x5f5   : > { %15557 = vmatprep.subr.bf16.mxu1 %v18547_v50 }
 0x5f8   : > { %15558 = vmatpush3.bf16.msra.mxu1 %v17706_v41  ;;  %v17741_v41 = vld [vmem:[#allocation2 + $0x548] sm:$0xff]  }
 0x5f9   : > { %15559 = vmatprep.subr.bf16.mxu1 %v18547_v50 }
 0x5fc   : > { %15560 = vmatpush3.bf16.msra.mxu1 %v17707_v49  ;;  %v17742_v49 = vld [vmem:[#allocation2 + $0x550] sm:$0xff]  }
 0x5fd   : > { %15565 = vmatprep.subr.bf16.mxu1 %v18547_v50 }
 0x5ff   : > { %15562 = vmatmul.mubr.bf16.vlgmr.msra.gmra.mrb[120].mxu1 %v4329_v34 }
 0x600   : > { %15567 = vmatprep.mubr.msk.bf16.mxu1 %vm18548_vm0, %v18547_v50 }
 0x6d2   : > { %v4429_v11 = vpop.f32.mrb[120].mxu1 }
 0x6d3   : > { %v4443_v52 = vmul.f32 %v13309_v7, %v4429_v11  ;;  %v15563_v1 = vpop.f32.mrb[121].mxu1  ;;  %v17744_v11 = vld [vmem:[#allocation2 + $0x560] sm:$0xff]  }
 0x6d4   : > { %v4432_v28 = vpop.f32.mrb[122].mxu1  ;;  %v17747_v1 = vld [vmem:[#allocation2 + $0x578] sm:$0xff]  }
 0x6d5   : > { %v4450_v36 = vadd.f32 %v13310_v45, %v4443_v52  ;;  %v4444_v40 = vmul.f32 %v13309_v7, %v4432_v28  ;;  %v15564_v59 = vpop.f32.mrb[123].mxu1  ;;  %v17743_v7 = vld [vmem:[#allocation2 + $0x558] sm:$0xff]   ;;  %v17746_v52 = vld [vmem:[#allocation2 + $0x570] sm:$0xff]  }
 0x6d7   : > { %v4451_v57 = vadd.f32 %v13310_v45, %v4444_v40  ;;  %v4452_v61 = vmax.f32 %v4450_v36, 0.0  ;;  %v17745_v45 = vld [vmem:[#allocation2 + $0x568] sm:$0xff]  }
 0x6d9   : > { %v4453_v22 = vmax.f32 %v4451_v57, 0.0 }
 0x6db   : > { %v19720_v38 = vpack.c.bf16 %v4453_v22, %v4452_v61 }
 0x6dd   : > { %15566 = vmatpush3.bf16.msra.mxu1 %v19720_v38  ;;  %15572 = vmatpush3.bf16.msra.mxu0 %v19720_v38 }
 0x6de   : > { %15689 = vmatprep.subr.bf16.mxu1 %v18547_v50  ;;  %15577 = vmatprep.subr.bf16.mxu0 %v18547_v50 }
 0x6e0   : > { %15568 = vmatmul.mubr.msk.bf16.vlgmr.msra.gmra.mrb[124].mxu1 %vm4462_vm2, %v17708_v46  ;;  %15574 = vmatmul.mubr.msk.bf16.vlgmr.msra.gmra.mrb[68].mxu0 %vm4462_vm2, %v17709_v8 }
 0x6e1   : > { %15690 = vmatpush3.bf16.msra.mxu1 %v19720_v38  ;;  %15691 = vmatprep.mubr.msk.bf16.mxu1 %vm18548_vm0, %v18547_v50 }
 0x6e2   : > { %15715 = vmatprep.subr.bf16.mxu1 %v18547_v50  ;;  %15578 = vmatpush3.bf16.msra.mxu0 %v17713_v51 }
 0x6e3   : > { %15579 = vmatprep.subr.bf16.mxu0 %v18547_v50  ;;  %15593 = vmatprep.mubr.msk.bf16.mxu0 %vm18548_vm0, %v18547_v50 }
 0x6e6   : > { %15580 = vmatpush3.bf16.msra.mxu0 %v17714_v56 }
 0x6e7   : > { %15581 = vmatprep.subr.bf16.mxu0 %v18547_v50 }
 0x6e8   : > { %15692 = vmatmul.mubr.msk.bf16.vlgmr.msra.gmra.mrb[128].mxu1 %vm4462_vm2, %v17710_v48 }
 0x6e9   : > { %15716 = vmatpush3.bf16.msra.mxu1 %v19720_v38  ;;  %15717 = vmatprep.mubr.msk.bf16.mxu1 %vm18548_vm0, %v18547_v50 }
 0x6ea   : > { %15741 = vmatprep.subr.bf16.mxu1 %v18547_v50  ;;  %15582 = vmatpush3.bf16.msra.mxu0 %v17715_v9 }
 0x6eb   : > { %15583 = vmatprep.subr.bf16.mxu0 %v18547_v50 }
 0x6ee   : > { %15584 = vmatpush3.bf16.msra.mxu0 %v17716_v18 }
 0x6ef   : > { %15585 = vmatprep.subr.bf16.mxu0 %v18547_v50 }
 0x6f0   : > { %15718 = vmatmul.mubr.msk.bf16.vlgmr.msra.gmra.mrb[132].mxu1 %vm4462_vm2, %v17711_v47 }
 0x6f1   : > { %15742 = vmatpush3.bf16.msra.mxu1 %v19720_v38  ;;  %15743 = vmatprep.mubr.msk.bf16.mxu1 %vm18548_vm0, %v18547_v50 }
 0x6f2   : > { %15767 = vmatprep.subr.bf16.mxu1 %v18547_v50  ;;  %15586 = vmatpush3.bf16.msra.mxu0 %v17717_v2 }
 0x6f3   : > { %15587 = vmatprep.subr.bf16.mxu0 %v18547_v50 }
 0x6f6   : > { %15588 = vmatpush3.bf16.msra.mxu0 %v17718_v12 }
 0x6f7   : > { %15589 = vmatprep.subr.bf16.mxu0 %v18547_v50 }
 0x6f8   : > { %15744 = vmatmul.mubr.msk.bf16.vlgmr.msra.gmra.mrb[136].mxu1 %vm4462_vm2, %v17712_v33  ;;  %v17748_v33 = vld [vmem:[#allocation2 + $0x580] sm:$0xff]  }
 0x6f9   : > { %15768 = vmatpush3.bf16.msra.mxu1 %v19720_v38  ;;  %15769 = vmatprep.mubr.msk.bf16.mxu1 %vm18548_vm0, %v18547_v50 }
 0x6fa   : > { %15590 = vmatpush3.bf16.msra.mxu0 %v17719_v42  ;;  %15793 = vmatprep.subr.bf16.mxu1 %v18547_v50 }
 0x6fb   : > { %15591 = vmatprep.subr.bf16.mxu0 %v18547_v50 }
 0x6fe   : > { %15592 = vmatpush3.bf16.msra.mxu0 %v17720_v3 }
 0x6ff   : > { %15597 = vmatprep.subr.bf16.mxu0 %v18547_v50 }
 0x700   : > { %15770 = vmatmul.mubr.msk.bf16.vlgmr.msra.gmra.mrb[140].mxu1 %vm4462_vm2, %v17739_v29  ;;  %v17771_v29 = vld [vmem:[#allocation2 + $0x638] sm:$0xff]  }
 0x701   : > { %15795 = vmatprep.mubr.msk.bf16.mxu1 %vm18548_vm0, %v18547_v50 }
 0x7b3   : > { %v4570_v19 = vpop.f32.mrb[68].mxu0  ;;  %v4500_v26 = vpop.f32.mrb[124].mxu1 }
 0x7b4   : > { %v15575_v27 = vpop.f32.mrb[69].mxu0  ;;  %v15569_v34 = vpop.f32.mrb[125].mxu1 }
 0x7b5   : > { %v4573_v44 = vpop.f32.mrb[70].mxu0  ;;  %v4503_v24 = vpop.f32.mrb[126].mxu1  ;;  %v17750_v27 = vld [vmem:[#allocation2 + $0x590] sm:$0xff]   ;;  %v17751_v34 = vld [vmem:[#allocation2 + $0x598] sm:$0xff]  }
 0x7b6   : > { %v4577_v30 = vpack.c.bf16 %v4573_v44, %v4570_v19  ;;  %v15576_v35 = vpop.f32.mrb[71].mxu0  ;;  %v4507_v39 = vpack.c.bf16 %v4503_v24, %v4500_v26  ;;  %v15570_v16 = vpop.f32.mrb[127].mxu1  ;;  %v17749_v26 = vld [vmem:[#allocation2 + $0x588] sm:$0xff]   ;;  %v17752_v44 = vld [vmem:[#allocation2 + $0x5a0] sm:$0xff]   ;;  %v17754_v24 = vld [vmem:[#allocation2 + $0x5b0] sm:$0xff]  }
 0x7b7   : > { %v17755_v35 = vld [vmem:[#allocation2 + $0x5b8] sm:$0xff]  }
 0x7b8   : > { %15594 = vmatmul.mubr.bf16.vlgmr.msra.gmra.mrb[72].mxu0 %v4577_v30 }
 0x7b9   : > { %15598 = vmatpush3.bf16.msra.mxu0 %v17721_v6  ;;  %15613 = vmatprep.mubr.msk.bf16.mxu0 %vm18548_vm0, %v18547_v50  ;;  %v17753_v6 = vld [vmem:[#allocation2 + $0x5a8] sm:$0xff]  }
 0x7ba   : > { %15599 = vmatprep.subr.bf16.mxu0 %v18547_v50 }
 0x7bb   : > { %v19800_v28 = vpop.f32.mrb[128].mxu1 }
 0x7bc   : > { %v15693_v36 = vpop.f32.mrb[129].mxu1 }
 0x7bd   : > { %15600 = vmatpush3.bf16.msra.mxu0 %v17722_v17  ;;  %v19802_v40 = vpop.f32.mrb[130].mxu1  ;;  %v17787_v36 = vld [vmem:[#allocation2 + $0x6b8] sm:$0xff]  }
 0x7be   : > { %15601 = vmatprep.subr.bf16.mxu0 %v18547_v50  ;;  %v15694_v59 = vpop.f32.mrb[131].mxu1  ;;  %v5255_v57 = vpack.c.bf16 %v19802_v40, %v19800_v28  ;;  %v17786_v28 = vld [vmem:[#allocation2 + $0x6b0] sm:$0xff]   ;;  %v13399_v40 = vld [vmem:[#allocation5 + $0x2] ss:$0 sm:$0xff] }
 0x7c1   : > { %15602 = vmatpush3.bf16.msra.mxu0 %v17723_v13 }
 0x7c2   : > { %15603 = vmatprep.subr.bf16.mxu0 %v18547_v50 }
 0x7c3   : > { %v19806_v61 = vpop.f32.mrb[132].mxu1 }
 0x7c4   : > { %v15719_v22 = vpop.f32.mrb[133].mxu1 }
 0x7c5   : > { %15604 = vmatpush3.bf16.msra.mxu0 %v17724_v21  ;;  %v19808_v46 = vpop.f32.mrb[134].mxu1  ;;  %v17756_v21 = vld [vmem:[#allocation2 + $0x5c0] sm:$0xff]  }
 0x7c6   : > { %15605 = vmatprep.subr.bf16.mxu0 %v18547_v50  ;;  %v15720_v8 = vpop.f32.mrb[135].mxu1  ;;  %v5416_v51 = vpack.c.bf16 %v19808_v46, %v19806_v61 }
 0x7c9   : > { %15606 = vmatpush3.bf16.msra.mxu0 %v17725_v25  ;;  %v17757_v25 = vld [vmem:[#allocation2 + $0x5c8] sm:$0xff]  }
 0x7ca   : > { %15607 = vmatprep.subr.bf16.mxu0 %v18547_v50 }
 0x7cb   : > { %v19812_v56 = vpop.f32.mrb[136].mxu1 }
 0x7cc   : > { %v15745_v48 = vpop.f32.mrb[137].mxu1 }
 0x7cd   : > { %15608 = vmatpush3.bf16.msra.mxu0 %v17726_v14  ;;  %v19814_v18 = vpop.f32.mrb[138].mxu1  ;;  %v17758_v14 = vld [vmem:[#allocation2 + $0x5d0] sm:$0xff]  }
 0x7ce   : > { %15609 = vmatprep.subr.bf16.mxu0 %v18547_v50  ;;  %v15746_v2 = vpop.f32.mrb[139].mxu1  ;;  %v5577_v42 = vpack.c.bf16 %v19814_v18, %v19812_v56 }
 0x7cf   : > { %v5864_v2 = vld [vmem:[#allocation13] sm:$0x3] }
 0x7d1   : > { %15610 = vmatpush3.bf16.msra.mxu0 %v17727_v23  ;;  %v17759_v23 = vld [vmem:[#allocation2 + $0x5d8] sm:$0xff]  }
 0x7d2   : > { %15611 = vmatprep.subr.bf16.mxu0 %v18547_v50 }
 0x7d3   : > { %v19826_v30 = vpop.f32.mrb[140].mxu1 }
 0x7d5   : > { %15612 = vmatpush3.bf16.msra.mxu0 %v17728_v32  ;;  %v17760_v32 = vld [vmem:[#allocation2 + $0x5e0] sm:$0xff]  }
 0x7d6   : > { %15617 = vmatprep.subr.bf16.mxu0 %v18547_v50 }
 0x7d8   : > { %15614 = vmatmul.mubr.bf16.vlgmr.msra.gmra.mrb[72].mxu0 %v4507_v39  ;;  %v15771_v39 = vpop.f32.mrb[141].mxu1 }
 0x7d9   : > { %15618 = vmatpush3.bf16.msra.mxu0 %v19720_v38  ;;  %15619 = vmatprep.mubr.msk.bf16.mxu0 %vm18548_vm0, %v18547_v50  ;;  %v19829_v16 = vpop.f32.mrb[142].mxu1 }
 0x7da   : > { %15623 = vmatprep.subr.bf16.mxu0 %v18547_v50  ;;  %v5738_v17 = vpack.c.bf16 %v19829_v16, %v19826_v30  ;;  %v15772_v13 = vpop.f32.mrb[143].mxu1  ;;  %v17794_v30 = vld [vmem:[#allocation2 + $0x730] sm:$0xff]  }
 0x7e0   : > { %15620 = vmatmul.mubr.msk.bf16.vlgmr.msra.gmra.mrb[76].mxu0 %vm4462_vm2, %v17729_v10  ;;  %v17762_v10 = vld [vmem:[#allocation2 + $0x5f0] sm:$0xff]  }
 0x7e1   : > { %15624 = vmatpush3.bf16.msra.mxu0 %v17730_v15  ;;  %15639 = vmatprep.mubr.msk.bf16.mxu0 %vm18548_vm0, %v18547_v50  ;;  %v17763_v15 = vld [vmem:[#allocation2 + $0x5f8] sm:$0xff]  }
 0x7e2   : > { %15625 = vmatprep.subr.bf16.mxu0 %v18547_v50 }
 0x7e5   : > { %15626 = vmatpush3.bf16.msra.mxu0 %v17731_v20  ;;  %v17764_v20 = vld [vmem:[#allocation2 + $0x600] sm:$0xff]  }
 0x7e6   : > { %15627 = vmatprep.subr.bf16.mxu0 %v18547_v50 }
 0x7e9   : > { %15628 = vmatpush3.bf16.msra.mxu0 %v17732_v55  ;;  %v17765_v55 = vld [vmem:[#allocation2 + $0x608] sm:$0xff]  }
 0x7ea   : > { %15629 = vmatprep.subr.bf16.mxu0 %v18547_v50 }
 0x7ed   : > { %15630 = vmatpush3.bf16.msra.mxu0 %v17733_v62  ;;  %v17766_v62 = vld [vmem:[#allocation2 + $0x610] sm:$0xff]  }
 0x7ee   : > { %15631 = vmatprep.subr.bf16.mxu0 %v18547_v50 }
 0x7f1   : > { %15632 = vmatpush3.bf16.msra.mxu0 %v17734_v0  ;;  %v17767_v0 = vld [vmem:[#allocation2 + $0x618] sm:$0xff]  }
 0x7f2   : > { %15633 = vmatprep.subr.bf16.mxu0 %v18547_v50 }
 0x7f5   : > { %15634 = vmatpush3.bf16.msra.mxu0 %v17735_v63  ;;  %v17768_v63 = vld [vmem:[#allocation2 + $0x620] sm:$0xff]  }
 0x7f6   : > { %15635 = vmatprep.subr.bf16.mxu0 %v18547_v50 }
 0x7f9   : > { %15636 = vmatpush3.bf16.msra.mxu0 %v17736_v4  ;;  %v17769_v4 = vld [vmem:[#allocation2 + $0x628] sm:$0xff]  }
 0x7fa   : > { %15637 = vmatprep.subr.bf16.mxu0 %v18547_v50 }
 0x7fd   : > { %15638 = vmatpush3.bf16.msra.mxu0 %v17737_v5  ;;  %v17770_v5 = vld [vmem:[#allocation2 + $0x630] sm:$0xff]  }
 0x7fe   : > { %15643 = vmatprep.subr.bf16.mxu0 %v18547_v50 }
 0x8b3   : > { %v4818_v60 = vpop.f32.mrb[76].mxu0 }
 0x8b4   : > { %v15621_v43 = vpop.f32.mrb[77].mxu0 }
 0x8b5   : > { %v4821_v53 = vpop.f32.mrb[78].mxu0  ;;  %v17773_v43 = vld [vmem:[#allocation2 + $0x648] sm:$0xff]  }
 0x8b6   : > { %v4825_v54 = vpack.c.bf16 %v4821_v53, %v4818_v60  ;;  %v15622_v58 = vpop.f32.mrb[79].mxu0  ;;  %v17772_v60 = vld [vmem:[#allocation2 + $0x640] sm:$0xff]   ;;  %v17774_v53 = vld [vmem:[#allocation2 + $0x650] sm:$0xff]  }
 0x8b7   : > { %v17776_v58 = vld [vmem:[#allocation2 + $0x660] sm:$0xff]  }
 0x8b8   : > { %15640 = vmatmul.mubr.bf16.vlgmr.msra.gmra.mrb[72].mxu0 %v4825_v54  ;;  %v17775_v54 = vld [vmem:[#allocation2 + $0x658] sm:$0xff]  }
 0x8b9   : > { %15644 = vmatpush3.bf16.msra.mxu0 %v19720_v38  ;;  %15645 = vmatprep.mubr.msk.bf16.mxu0 %vm18548_vm0, %v18547_v50 }
 0x8ba   : > { %15649 = vmatprep.subr.bf16.mxu0 %v18547_v50 }
 0x8c0   : > { %15646 = vmatmul.mubr.msk.bf16.vlgmr.msra.gmra.mrb[80].mxu0 %vm4462_vm2, %v17738_v31  ;;  %v17777_v31 = vld [vmem:[#allocation2 + $0x668] sm:$0xff]  }
 0x8c1   : > { %15650 = vmatpush3.bf16.msra.mxu0 %v17740_v37  ;;  %15665 = vmatprep.mubr.msk.bf16.mxu0 %vm18548_vm0, %v18547_v50  ;;  %v17778_v37 = vld [vmem:[#allocation2 + $0x670] sm:$0xff]  }
 0x8c2   : > { %15651 = vmatprep.subr.bf16.mxu0 %v18547_v50 }
 0x8c5   : > { %15652 = vmatpush3.bf16.msra.mxu0 %v17741_v41  ;;  %v17779_v41 = vld [vmem:[#allocation2 + $0x678] sm:$0xff]  }
 0x8c6   : > { %15653 = vmatprep.subr.bf16.mxu0 %v18547_v50 }
 0x8c9   : > { %15654 = vmatpush3.bf16.msra.mxu0 %v17742_v49  ;;  %v17780_v49 = vld [vmem:[#allocation2 + $0x680] sm:$0xff]  }
 0x8ca   : > { %15655 = vmatprep.subr.bf16.mxu0 %v18547_v50 }
 0x8cd   : > { %15656 = vmatpush3.bf16.msra.mxu0 %v17743_v7  ;;  %v17781_v7 = vld [vmem:[#allocation2 + $0x688] sm:$0xff]  }
 0x8ce   : > { %15657 = vmatprep.subr.bf16.mxu0 %v18547_v50 }
 0x8d1   : > { %15658 = vmatpush3.bf16.msra.mxu0 %v17744_v11  ;;  %v17782_v11 = vld [vmem:[#allocation2 + $0x690] sm:$0xff]  }
 0x8d2   : > { %15659 = vmatprep.subr.bf16.mxu0 %v18547_v50 }
 0x8d5   : > { %15660 = vmatpush3.bf16.msra.mxu0 %v17745_v45  ;;  %v17783_v45 = vld [vmem:[#allocation2 + $0x698] sm:$0xff]  }
 0x8d6   : > { %15661 = vmatprep.subr.bf16.mxu0 %v18547_v50 }
 0x8d9   : > { %15662 = vmatpush3.bf16.msra.mxu0 %v17746_v52  ;;  %v17784_v52 = vld [vmem:[#allocation2 + $0x6a0] sm:$0xff]  }
 0x8da   : > { %15663 = vmatprep.subr.bf16.mxu0 %v18547_v50 }
 0x8dd   : > { %15664 = vmatpush3.bf16.msra.mxu0 %v17747_v1  ;;  %v17785_v1 = vld [vmem:[#allocation2 + $0x6a8] sm:$0xff]  }
 0x8de   : > { %15669 = vmatprep.subr.bf16.mxu0 %v18547_v50 }
 0x993   : > { %v4979_v9 = vpop.f32.mrb[80].mxu0 }
 0x994   : > { %v15647_v47 = vpop.f32.mrb[81].mxu0 }
 0x995   : > { %v4982_v12 = vpop.f32.mrb[82].mxu0 }
 0x996   : > { %v4986_v3 = vpack.c.bf16 %v4982_v12, %v4979_v9  ;;  %v15648_v19 = vpop.f32.mrb[83].mxu0  ;;  %v6470_v12 = vld [vmem:[#allocation13 + $0x8] sm:$0x3] }
 0x997   : > { %v17789_v19 = vld [vmem:[#allocation2 + $0x708] sm:$0xff]  }
 0x998   : > { %15666 = vmatmul.mubr.bf16.vlgmr.msra.gmra.mrb[72].mxu0 %v4986_v3  ;;  %v17788_v3 = vld [vmem:[#allocation2 + $0x700] sm:$0xff]  }
 0x999   : > { %15670 = vmatpush3.bf16.msra.mxu0 %v17748_v33  ;;  %15685 = vmatprep.mubr.msk.bf16.mxu0 %vm18548_vm0, %v18547_v50  ;;  %v5927_v33 = vld [vmem:[#allocation13 + $0x2] sm:$0x3] }
 0x99a   : > { %15671 = vmatprep.subr.bf16.mxu0 %v18547_v50 }
 0x99d   : > { %15672 = vmatpush3.bf16.msra.mxu0 %v17749_v26  ;;  %v6774_v26 = vld [vmem:[#allocation13 + $0xc] sm:$0x3] }
 0x99e   : > { %15673 = vmatprep.subr.bf16.mxu0 %v18547_v50 }
 0x9a1   : > { %15674 = vmatpush3.bf16.msra.mxu0 %v17750_v27  ;;  %v17790_v27 = vld [vmem:[#allocation2 + $0x710] sm:$0xff]  }
 0x9a2   : > { %15675 = vmatprep.subr.bf16.mxu0 %v18547_v50 }
 0x9a5   : > { %15676 = vmatpush3.bf16.msra.mxu0 %v17751_v34  ;;  %v17791_v34 = vld [vmem:[#allocation2 + $0x718] sm:$0xff]  }
 0x9a6   : > { %15677 = vmatprep.subr.bf16.mxu0 %v18547_v50 }
 0x9a9   : > { %15678 = vmatpush3.bf16.msra.mxu0 %v17752_v44  ;;  %v6926_v44 = vld [vmem:[#allocation13 + $0xe] sm:$0x3] }
 0x9aa   : > { %15679 = vmatprep.subr.bf16.mxu0 %v18547_v50 }
 0x9ad   : > { %15680 = vmatpush3.bf16.msra.mxu0 %v17753_v6  ;;  %v17792_v6 = vld [vmem:[#allocation2 + $0x720] sm:$0xff]  }
 0x9ae   : > { %15681 = vmatprep.subr.bf16.mxu0 %v18547_v50 }
 0x9b1   : > { %15682 = vmatpush3.bf16.msra.mxu0 %v17754_v24  ;;  %v17793_v24 = vld [vmem:[#allocation2 + $0x728] sm:$0xff]  }
 0x9b2   : > { %15683 = vmatprep.subr.bf16.mxu0 %v18547_v50 }
 0x9b5   : > { %15684 = vmatpush3.bf16.msra.mxu0 %v17755_v35  ;;  %v17795_v35 = vld [vmem:[#allocation2 + $0x738] sm:$0xff]  }
 0x9b6   : > { %15695 = vmatprep.subr.bf16.mxu0 %v18547_v50 }
 0x9b8   : > { %15686 = vmatmul.mubr.bf16.vlgmr.msra.gmra.mrb[72].mxu0 %v19720_v38  ;;  %v17761_v38 = vld [vmem:[#allocation2 + $0x5e8] sm:$0xff]  }
 0x9b9   : > { %15696 = vmatpush3.bf16.msra.mxu0 %v17756_v21  ;;  %15711 = vmatprep.mubr.msk.bf16.mxu0 %vm18548_vm0, %v18547_v50 }
 0x9ba   : > { %15697 = vmatprep.subr.bf16.mxu0 %v18547_v50 }
 0x9bd   : > { %15698 = vmatpush3.bf16.msra.mxu0 %v17757_v25  ;;  %v17796_v25 = vld [vmem:[#allocation2 + $0x6c0] sm:$0xff]  }
 0x9be   : > { %15699 = vmatprep.subr.bf16.mxu0 %v18547_v50 }
 0x9c1   : > { %15700 = vmatpush3.bf16.msra.mxu0 %v17758_v14 }
 0x9c2   : > { %15701 = vmatprep.subr.bf16.mxu0 %v18547_v50 }
 0x9c5   : > { %15702 = vmatpush3.bf16.msra.mxu0 %v17759_v23 }
 0x9c6   : > { %15703 = vmatprep.subr.bf16.mxu0 %v18547_v50 }
 0x9c9   : > { %15704 = vmatpush3.bf16.msra.mxu0 %v17760_v32 }
 0x9ca   : > { %15705 = vmatprep.subr.bf16.mxu0 %v18547_v50 }
 0x9cd   : > { %15706 = vmatpush3.bf16.msra.mxu0 %v17761_v38 }
 0x9ce   : > { %15707 = vmatprep.subr.bf16.mxu0 %v18547_v50 }
 0x9d1   : > { %15708 = vmatpush3.bf16.msra.mxu0 %v17762_v10  ;;  %v17797_v10 = vld [vmem:[#allocation2 + $0x6c8] sm:$0xff]  }
 0x9d2   : > { %15709 = vmatprep.subr.bf16.mxu0 %v18547_v50 }
 0x9d5   : > { %15710 = vmatpush3.bf16.msra.mxu0 %v17763_v15  ;;  %v17798_v15 = vld [vmem:[#allocation2 + $0x6d0] sm:$0xff]  }
 0x9d6   : > { %15721 = vmatprep.subr.bf16.mxu0 %v18547_v50 }
 0x9d8   : > { %15712 = vmatmul.mubr.bf16.vlgmr.msra.gmra.mrb[72].mxu0 %v5255_v57  ;;  %v13400_v57 = vld [vmem:[#allocation7 + $0x2] ss:$0 sm:$0xff] }
 0x9d9   : > { %15722 = vmatpush3.bf16.msra.mxu0 %v17764_v20  ;;  %15737 = vmatprep.mubr.msk.bf16.mxu0 %vm18548_vm0, %v18547_v50  ;;  %v17799_v20 = vld [vmem:[#allocation2 + $0x6d8] sm:$0xff]  }
 0x9da   : > { %15723 = vmatprep.subr.bf16.mxu0 %v18547_v50 }
 0x9dd   : > { %15724 = vmatpush3.bf16.msra.mxu0 %v17765_v55  ;;  %v17800_v55 = vld [vmem:[#allocation2 + $0x6e0] sm:$0xff]  }
 0x9de   : > { %15725 = vmatprep.subr.bf16.mxu0 %v18547_v50 }
 0x9e1   : > { %15726 = vmatpush3.bf16.msra.mxu0 %v17766_v62  ;;  %v17801_v62 = vld [vmem:[#allocation2 + $0x6e8] sm:$0xff]  }
 0x9e2   : > { %15727 = vmatprep.subr.bf16.mxu0 %v18547_v50 }
 0x9e5   : > { %15728 = vmatpush3.bf16.msra.mxu0 %v17767_v0  ;;  %v17802_v0 = vld [vmem:[#allocation2 + $0x6f0] sm:$0xff]  }
 0x9e6   : > { %15729 = vmatprep.subr.bf16.mxu0 %v18547_v50 }
 0x9e9   : > { %15730 = vmatpush3.bf16.msra.mxu0 %v17768_v63  ;;  %v17803_v63 = vld [vmem:[#allocation2 + $0x6f8] sm:$0xff]  }
 0x9ea   : > { %15731 = vmatprep.subr.bf16.mxu0 %v18547_v50 }
 0x9ed   : > { %15732 = vmatpush3.bf16.msra.mxu0 %v17769_v4 }
 0x9ee   : > { %15733 = vmatprep.subr.bf16.mxu0 %v18547_v50 }
 0x9f1   : > { %15734 = vmatpush3.bf16.msra.mxu0 %v17770_v5  ;;  %v6166_v5 = vld [vmem:[#allocation13 + $0x4] sm:$0x3] }
 0x9f2   : > { %15735 = vmatprep.subr.bf16.mxu0 %v18547_v50 }
 0x9f5   : > { %15736 = vmatpush3.bf16.msra.mxu0 %v17771_v29  ;;  %v17804_v29 = vld [vmem:[#allocation2 + $0x740] sm:$0xff]  }
 0x9f6   : > { %15747 = vmatprep.subr.bf16.mxu0 %v18547_v50 }
 0x9f8   : > { %15738 = vmatmul.mubr.bf16.vlgmr.msra.gmra.mrb[72].mxu0 %v5416_v51 }
 0x9f9   : > { %15748 = vmatpush3.bf16.msra.mxu0 %v17772_v60  ;;  %15763 = vmatprep.mubr.msk.bf16.mxu0 %vm18548_vm0, %v18547_v50  ;;  %v17805_v60 = vld [vmem:[#allocation2 + $0x748] sm:$0xff]  }
 0x9fa   : > { %15749 = vmatprep.subr.bf16.mxu0 %v18547_v50 }
 0x9fd   : > { %15750 = vmatpush3.bf16.msra.mxu0 %v17773_v43  ;;  %v17806_v43 = vld [vmem:[#allocation2 + $0x750] sm:$0xff]  }
 0x9fe   : > { %15751 = vmatprep.subr.bf16.mxu0 %v18547_v50 }
 0xa01   : > { %15752 = vmatpush3.bf16.msra.mxu0 %v17774_v53  ;;  %v17807_v53 = vld [vmem:[#allocation2 + $0x758] sm:$0xff]  }
 0xa02   : > { %15753 = vmatprep.subr.bf16.mxu0 %v18547_v50 }
 0xa05   : > { %15754 = vmatpush3.bf16.msra.mxu0 %v17775_v54  ;;  %v17808_v54 = vld [vmem:[#allocation2 + $0x760] sm:$0xff]  }
 0xa06   : > { %15755 = vmatprep.subr.bf16.mxu0 %v18547_v50 }
 0xa09   : > { %15756 = vmatpush3.bf16.msra.mxu0 %v17776_v58  ;;  %v17809_v58 = vld [vmem:[#allocation2 + $0x768] sm:$0xff]  }
 0xa0a   : > { %15757 = vmatprep.subr.bf16.mxu0 %v18547_v50 }
 0xa0d   : > { %15758 = vmatpush3.bf16.msra.mxu0 %v17777_v31  ;;  %v17810_v31 = vld [vmem:[#allocation2 + $0x770] sm:$0xff]  }
 0xa0e   : > { %15759 = vmatprep.subr.bf16.mxu0 %v18547_v50 }
 0xa11   : > { %15760 = vmatpush3.bf16.msra.mxu0 %v17778_v37  ;;  %v17811_v37 = vld [vmem:[#allocation2 + $0x778] sm:$0xff]  }
 0xa12   : > { %15761 = vmatprep.subr.bf16.mxu0 %v18547_v50 }
 0xa15   : > { %15762 = vmatpush3.bf16.msra.mxu0 %v17779_v41  ;;  %v7078_v41 = vld [vmem:[#allocation13 + $0x10] sm:$0x3] }
 0xa16   : > { %15773 = vmatprep.subr.bf16.mxu0 %v18547_v50 }
 0xa18   : > { %15764 = vmatmul.mubr.bf16.vlgmr.msra.gmra.mrb[72].mxu0 %v5577_v42  ;;  %v6622_v42 = vld [vmem:[#allocation13 + $0xa] sm:$0x3] }
 0xa19   : > { %15774 = vmatpush3.bf16.msra.mxu0 %v17780_v49  ;;  %15789 = vmatprep.mubr.msk.bf16.mxu0 %vm18548_vm0, %v18547_v50 }
 0xa1a   : > { %15775 = vmatprep.subr.bf16.mxu0 %v18547_v50 }
 0xa1d   : > { %15776 = vmatpush3.bf16.msra.mxu0 %v17781_v7 }
 0xa1e   : > { %15777 = vmatprep.subr.bf16.mxu0 %v18547_v50 }
 0xa21   : > { %15778 = vmatpush3.bf16.msra.mxu0 %v17782_v11 }
 0xa22   : > { %15779 = vmatprep.subr.bf16.mxu0 %v18547_v50 }
 0xa25   : > { %15780 = vmatpush3.bf16.msra.mxu0 %v17783_v45 }
 0xa26   : > { %15781 = vmatprep.subr.bf16.mxu0 %v18547_v50 }
 0xa29   : > { %15782 = vmatpush3.bf16.msra.mxu0 %v17784_v52 }
 0xa2a   : > { %15783 = vmatprep.subr.bf16.mxu0 %v18547_v50 }
 0xa2d   : > { %15784 = vmatpush3.bf16.msra.mxu0 %v17785_v1  ;;  %v6318_v1 = vld [vmem:[#allocation13 + $0x6] sm:$0x3] }
 0xa2e   : > { %15785 = vmatprep.subr.bf16.mxu0 %v18547_v50 }
 0xa31   : > { %15786 = vmatpush3.bf16.msra.mxu0 %v17786_v28  ;;  %v17812_v28 = vld [vmem:[#allocation2 + $0x780] sm:$0xff]  }
 0xa32   : > { %15787 = vmatprep.subr.bf16.mxu0 %v18547_v50 }
 0xa35   : > { %15788 = vmatpush3.bf16.msra.mxu0 %v17787_v36  ;;  %v17813_v36 = vld [vmem:[#allocation2 + $0x788] sm:$0xff]  }
 0xa36   : > { %15897 = vmatprep.subr.bf16.mxu0 %v18547_v50 }
 0xa38   : > { %15790 = vmatmul.mubr.bf16.vlgmr.msra.gmra.mrb[72].mxu0 %v5738_v17 }
 0xa39   : > { %15899 = vmatprep.mubr.msk.bf16.mxu0 %vm18548_vm0, %v18547_v50 }
 0xb0b   : > { %v5838_v59 = vpop.f32.mrb[72].mxu0 }
 0xb0c   : > { %v5852_v61 = vmul.f32 %v13399_v40, %v5838_v59  ;;  %v15791_v22 = vpop.f32.mrb[73].mxu0  ;;  %v17815_v59 = vld [vmem:[#allocation2 + $0x798] sm:$0xff]  }
 0xb0d   : > { %v5841_v46 = vpop.f32.mrb[74].mxu0  ;;  %v17818_v22 = vld [vmem:[#allocation2 + $0x7b0] sm:$0xff]  }
 0xb0e   : > { %v5859_v8 = vadd.f32 %v13400_v57, %v5852_v61  ;;  %v5853_v51 = vmul.f32 %v13399_v40, %v5841_v46  ;;  %v15792_v56 = vpop.f32.mrb[75].mxu0  ;;  %v17814_v40 = vld [vmem:[#allocation2 + $0x790] sm:$0xff]   ;;  %v17817_v61 = vld [vmem:[#allocation2 + $0x7a8] sm:$0xff]   ;;  %v17819_v46 = vld [vmem:[#allocation2 + $0x7b8] sm:$0xff]  }
 0xb10   : > { %v5860_v48 = vadd.f32 %v13400_v57, %v5853_v51  ;;  %v5861_v9 = vmax.f32 %v5859_v8, 0.0  ;;  %v17816_v57 = vld [vmem:[#allocation2 + $0x7a0] sm:$0xff]  }
 0xb12   : > { %v5862_v18 = vmax.f32 %v5860_v48, 0.0 }
 0xb14   : > { %v19889_v47 = vpack.c.bf16 %v5862_v18, %v5861_v9 }
 0xb16   : > { %15794 = vmatpush3.bf16.msra.mxu1 %v19889_v47  ;;  %15898 = vmatpush3.bf16.msra.mxu0 %v19889_v47 }
 0xb17   : > { %15799 = vmatprep.subr.bf16.mxu1 %v18547_v50  ;;  %15923 = vmatprep.subr.bf16.mxu0 %v18547_v50 }
 0xb19   : > { %15796 = vmatmul.mubr.msk.bf16.vlgmr.msra.gmra.mrb[144].mxu1 %vm4462_vm2, %v5864_v2  ;;  %15900 = vmatmul.mubr.msk.bf16.vlgmr.msra.gmra.mrb[84].mxu0 %vm4462_vm2, %v6470_v12 }
 0xb1a   : > { %15800 = vmatpush3.bf16.msra.mxu1 %v19889_v47  ;;  %15924 = vmatpush3.bf16.msra.mxu0 %v19889_v47 }
 0xb1b   : > { %15801 = vmatprep.mubr.msk.bf16.mxu1 %vm18548_vm0, %v18547_v50  ;;  %15925 = vmatprep.mubr.msk.bf16.mxu0 %vm18548_vm0, %v18547_v50 }
 0xb1c   : > { %15949 = vmatprep.subr.bf16.mxu0 %v18547_v50  ;;  %15805 = vmatprep.subr.bf16.mxu1 %v18547_v50 }
 0xb21   : > { %15802 = vmatmul.mubr.msk.bf16.vlgmr.msra.gmra.mrb[148].mxu1 %vm4462_vm2, %v5927_v33  ;;  %15926 = vmatmul.mubr.msk.bf16.vlgmr.msra.gmra.mrb[88].mxu0 %vm4462_vm2, %v6622_v42 }
 0xb22   : > { %15950 = vmatpush3.bf16.msra.mxu0 %v19889_v47  ;;  %15951 = vmatprep.mubr.msk.bf16.mxu0 %vm18548_vm0, %v18547_v50 }
 0xb23   : > { %15975 = vmatprep.subr.bf16.mxu0 %v18547_v50  ;;  %15806 = vmatpush3.bf16.msra.mxu1 %v17788_v3 }
 0xb24   : > { %15807 = vmatprep.subr.bf16.mxu1 %v18547_v50  ;;  %15821 = vmatprep.mubr.msk.bf16.mxu1 %vm18548_vm0, %v18547_v50 }
 0xb27   : > { %15808 = vmatpush3.bf16.msra.mxu1 %v17789_v19 }
 0xb28   : > { %15809 = vmatprep.subr.bf16.mxu1 %v18547_v50 }
 0xb29   : > { %15952 = vmatmul.mubr.msk.bf16.vlgmr.msra.gmra.mrb[92].mxu0 %vm4462_vm2, %v6774_v26 }
 0xb2a   : > { %15976 = vmatpush3.bf16.msra.mxu0 %v19889_v47  ;;  %15977 = vmatprep.mubr.msk.bf16.mxu0 %vm18548_vm0, %v18547_v50 }
 0xb2b   : > { %16001 = vmatprep.subr.bf16.mxu0 %v18547_v50  ;;  %15810 = vmatpush3.bf16.msra.mxu1 %v17790_v27 }
 0xb2c   : > { %15811 = vmatprep.subr.bf16.mxu1 %v18547_v50 }
 0xb2f   : > { %15812 = vmatpush3.bf16.msra.mxu1 %v17791_v34  ;;  %v17820_v34 = vld [vmem:[#allocation2 + $0x7c0] sm:$0xff]  }
 0xb30   : > { %15813 = vmatprep.subr.bf16.mxu1 %v18547_v50 }
 0xb31   : > { %15978 = vmatmul.mubr.msk.bf16.vlgmr.msra.gmra.mrb[96].mxu0 %vm4462_vm2, %v6926_v44 }
 0xb32   : > { %16002 = vmatpush3.bf16.msra.mxu0 %v19889_v47  ;;  %16003 = vmatprep.mubr.msk.bf16.mxu0 %vm18548_vm0, %v18547_v50 }
 0xb33   : > { %15814 = vmatpush3.bf16.msra.mxu1 %v17792_v6  ;;  %16027 = vmatprep.subr.bf16.mxu0 %v18547_v50 }
 0xb34   : > { %15815 = vmatprep.subr.bf16.mxu1 %v18547_v50 }
 0xb37   : > { %15816 = vmatpush3.bf16.msra.mxu1 %v17793_v24 }
 0xb38   : > { %15817 = vmatprep.subr.bf16.mxu1 %v18547_v50 }
 0xb39   : > { %16004 = vmatmul.mubr.msk.bf16.vlgmr.msra.gmra.mrb[100].mxu0 %vm4462_vm2, %v7078_v41  ;;  %v17841_v41 = vld [vmem:[#allocation2 + $0x868] sm:$0xff]  }
 0xb3a   : > { %16029 = vmatprep.mubr.msk.bf16.mxu0 %vm18548_vm0, %v18547_v50 }
 0xb3b   : > { %15818 = vmatpush3.bf16.msra.mxu1 %v17794_v30 }
 0xb3c   : > { %15819 = vmatprep.subr.bf16.mxu1 %v18547_v50 }
 0xb3f   : > { %15820 = vmatpush3.bf16.msra.mxu1 %v17795_v35 }
 0xb40   : > { %15825 = vmatprep.subr.bf16.mxu1 %v18547_v50 }
 0xbec   : > { %v5902_v39 = vpop.f32.mrb[144].mxu1  ;;  %v6508_v8 = vpop.f32.mrb[84].mxu0 }
 0xbed   : > { %v15797_v16 = vpop.f32.mrb[145].mxu1  ;;  %v5908_v4 = vpack.c.bf16 %v5902_v39, %v5902_v39  ;;  %v15901_v51 = vpop.f32.mrb[85].mxu0 }
 0xbee   : > { %v5905_v17 = vpop.f32.mrb[146].mxu1  ;;  %v6511_v56 = vpop.f32.mrb[86].mxu0  ;;  %v17821_v16 = vld [vmem:[#allocation2 + $0x7c8] sm:$0xff]   ;;  %v17855_v51 = vld [vmem:[#allocation2 + $0x8d8] sm:$0xff]  }
 0xbef   : > { %v15798_v13 = vpop.f32.mrb[147].mxu1  ;;  %v15902_v48 = vpop.f32.mrb[87].mxu0  ;;  %v17822_v17 = vld [vmem:[#allocation2 + $0x7d0] sm:$0xff]   ;;  %v17856_v56 = vld [vmem:[#allocation2 + $0x8e0] sm:$0xff]  }
 0xbf0   : > { %v17823_v13 = vld [vmem:[#allocation2 + $0x7d8] sm:$0xff]   ;;  %v17857_v48 = vld [vmem:[#allocation2 + $0x8e8] sm:$0xff]  }
 0xbf4   : > { %v5965_v21 = vpop.f32.mrb[148].mxu1  ;;  %v19974_v9 = vpop.f32.mrb[88].mxu0 }
 0xbf5   : > { %v5971_v14 = vpack.c.bf16 %v5965_v21, %v5965_v21  ;;  %v15803_v23 = vpop.f32.mrb[149].mxu1  ;;  %v15927_v18 = vpop.f32.mrb[89].mxu0  ;;  %v17824_v21 = vld [vmem:[#allocation2 + $0x7e0] sm:$0xff]  }
 0xbf6   : > { %v5968_v32 = vpop.f32.mrb[150].mxu1  ;;  %v17827_v23 = vld [vmem:[#allocation2 + $0x7f8] sm:$0xff]  }
 0xbf7   : > { %15822 = vmatmul.mubr.bf16.vlgmr.msra.gmra.mrb[152].mxu1 %v5971_v14  ;;  %v15804_v38 = vpop.f32.mrb[151].mxu1  ;;  %v17826_v14 = vld [vmem:[#allocation2 + $0x7f0] sm:$0xff]   ;;  %v17859_v18 = vld [vmem:[#allocation2 + $0x8f8] sm:$0xff]  }
 0xbf8   : > { %15826 = vmatpush3.bf16.msra.mxu1 %v17796_v25  ;;  %15841 = vmatprep.mubr.msk.bf16.mxu1 %vm18548_vm0, %v18547_v50  ;;  %v17825_v25 = vld [vmem:[#allocation2 + $0x7e8] sm:$0xff]  }
 0xbf9   : > { %15827 = vmatprep.subr.bf16.mxu1 %v18547_v50 }
 0xbfc   : > { %15828 = vmatpush3.bf16.msra.mxu1 %v17797_v10  ;;  %v6514_v10 = vpack.c.bf16 %v6508_v8, %v6508_v8  ;;  %v17854_v8 = vld [vmem:[#allocation2 + $0x8d0] sm:$0xff]  }
 0xbfd   : > { %15829 = vmatprep.subr.bf16.mxu1 %v18547_v50 }
 0xc00   : > { %15830 = vmatpush3.bf16.msra.mxu1 %v17798_v15 }
 0xc01   : > { %15831 = vmatprep.subr.bf16.mxu1 %v18547_v50 }
 0xc04   : > { %15832 = vmatpush3.bf16.msra.mxu1 %v17799_v20  ;;  %v17828_v20 = vld [vmem:[#allocation2 + $0x800] sm:$0xff]  }
 0xc05   : > { %15833 = vmatprep.subr.bf16.mxu1 %v18547_v50 }
 0xc08   : > { %15834 = vmatpush3.bf16.msra.mxu1 %v17800_v55 }
 0xc09   : > { %15835 = vmatprep.subr.bf16.mxu1 %v18547_v50 }
 0xc0c   : > { %15836 = vmatpush3.bf16.msra.mxu1 %v17801_v62  ;;  %v17829_v62 = vld [vmem:[#allocation2 + $0x808] sm:$0xff]  }
 0xc0d   : > { %15837 = vmatprep.subr.bf16.mxu1 %v18547_v50 }
 0xc10   : > { %15838 = vmatpush3.bf16.msra.mxu1 %v17802_v0  ;;  %v17830_v0 = vld [vmem:[#allocation2 + $0x810] sm:$0xff]  }
 0xc11   : > { %15839 = vmatprep.subr.bf16.mxu1 %v18547_v50 }
 0xc14   : > { %15840 = vmatpush3.bf16.msra.mxu1 %v17803_v63  ;;  %v17831_v63 = vld [vmem:[#allocation2 + $0x818] sm:$0xff]  }
 0xc15   : > { %15845 = vmatprep.subr.bf16.mxu1 %v18547_v50 }
 0xc17   : > { %15842 = vmatmul.mubr.bf16.vlgmr.msra.gmra.mrb[152].mxu1 %v5908_v4  ;;  %v17832_v4 = vld [vmem:[#allocation2 + $0x820] sm:$0xff]  }
 0xc18   : > { %15846 = vmatpush3.bf16.msra.mxu1 %v19889_v47  ;;  %15847 = vmatprep.mubr.msk.bf16.mxu1 %vm18548_vm0, %v18547_v50 }
 0xc19   : > { %15851 = vmatprep.subr.bf16.mxu1 %v18547_v50 }
 0xc1f   : > { %15848 = vmatmul.mubr.msk.bf16.vlgmr.msra.gmra.mrb[156].mxu1 %vm4462_vm2, %v6166_v5  ;;  %v17833_v5 = vld [vmem:[#allocation2 + $0x828] sm:$0xff]  }
 0xc20   : > { %15852 = vmatpush3.bf16.msra.mxu1 %v17804_v29  ;;  %15867 = vmatprep.mubr.msk.bf16.mxu1 %vm18548_vm0, %v18547_v50  ;;  %v17834_v29 = vld [vmem:[#allocation2 + $0x830] sm:$0xff]  }
 0xc21   : > { %15853 = vmatprep.subr.bf16.mxu1 %v18547_v50 }
 0xc24   : > { %15854 = vmatpush3.bf16.msra.mxu1 %v17805_v60  ;;  %v17835_v60 = vld [vmem:[#allocation2 + $0x838] sm:$0xff]  }
 0xc25   : > { %15855 = vmatprep.subr.bf16.mxu1 %v18547_v50 }
 0xc28   : > { %15856 = vmatpush3.bf16.msra.mxu1 %v17806_v43  ;;  %v6666_v43 = vpack.c.bf16 %v19974_v9, %v19974_v9  ;;  %v17858_v9 = vld [vmem:[#allocation2 + $0x8f0] sm:$0xff]  }
 0xc29   : > { %15857 = vmatprep.subr.bf16.mxu1 %v18547_v50 }
 0xc2c   : > { %15858 = vmatpush3.bf16.msra.mxu1 %v17807_v53  ;;  %v17836_v53 = vld [vmem:[#allocation2 + $0x840] sm:$0xff]  }
 0xc2d   : > { %15859 = vmatprep.subr.bf16.mxu1 %v18547_v50 }
 0xc30   : > { %15860 = vmatpush3.bf16.msra.mxu1 %v17808_v54  ;;  %v17837_v54 = vld [vmem:[#allocation2 + $0x848] sm:$0xff]  }
 0xc31   : > { %15861 = vmatprep.subr.bf16.mxu1 %v18547_v50 }
 0xc34   : > { %15862 = vmatpush3.bf16.msra.mxu1 %v17809_v58  ;;  %v17838_v58 = vld [vmem:[#allocation2 + $0x850] sm:$0xff]  }
 0xc35   : > { %15863 = vmatprep.subr.bf16.mxu1 %v18547_v50 }
 0xc38   : > { %15864 = vmatpush3.bf16.msra.mxu1 %v17810_v31  ;;  %v17839_v31 = vld [vmem:[#allocation2 + $0x858] sm:$0xff]  }
 0xc39   : > { %15865 = vmatprep.subr.bf16.mxu1 %v18547_v50 }
 0xc3c   : > { %15866 = vmatpush3.bf16.msra.mxu1 %v17811_v37  ;;  %v17840_v37 = vld [vmem:[#allocation2 + $0x860] sm:$0xff]  }
 0xc3d   : > { %15871 = vmatprep.subr.bf16.mxu1 %v18547_v50 }
 0xcf2   : > { %v6204_v49 = vpop.f32.mrb[156].mxu1 }
 0xcf3   : > { %v6210_v7 = vpack.c.bf16 %v6204_v49, %v6204_v49  ;;  %v15849_v11 = vpop.f32.mrb[157].mxu1  ;;  %v17842_v49 = vld [vmem:[#allocation2 + $0x870] sm:$0xff]  }
 0xcf4   : > { %v6207_v45 = vpop.f32.mrb[158].mxu1 }
 0xcf5   : > { %15868 = vmatmul.mubr.bf16.vlgmr.msra.gmra.mrb[152].mxu1 %v6210_v7  ;;  %v15850_v52 = vpop.f32.mrb[159].mxu1  ;;  %v17843_v7 = vld [vmem:[#allocation2 + $0x878] sm:$0xff]   ;;  %v17844_v45 = vld [vmem:[#allocation2 + $0x880] sm:$0xff]  }
 0xcf6   : > { %15872 = vmatpush3.bf16.msra.mxu1 %v19889_v47  ;;  %15873 = vmatprep.mubr.msk.bf16.mxu1 %vm18548_vm0, %v18547_v50  ;;  %v6663_v47 = vpop.f32.mrb[90].mxu0  ;;  %v17845_v52 = vld [vmem:[#allocation2 + $0x888] sm:$0xff]  }
 0xcf7   : > { %15877 = vmatprep.subr.bf16.mxu1 %v18547_v50  ;;  %v15928_v2 = vpop.f32.mrb[91].mxu0 }
 0xcf8   : > { %v19976_v12 = vpop.f32.mrb[92].mxu0  ;;  %v13482_v2 = vld [vmem:[#allocation5 + $0x3] ss:$0 sm:$0xff] }
 0xcf9   : > { %v15953_v33 = vpop.f32.mrb[93].mxu0  ;;  %v6818_v11 = vpack.c.bf16 %v19976_v12, %v19976_v12 }
 0xcfa   : > { %v6815_v42 = vpop.f32.mrb[94].mxu0  ;;  %v13483_v33 = vld [vmem:[#allocation7 + $0x3] ss:$0 sm:$0xff] }
 0xcfb   : > { %v15954_v3 = vpop.f32.mrb[95].mxu0 }
 0xcfc   : > { %v19978_v19 = vpop.f32.mrb[96].mxu0 }
 0xcfd   : > { %15874 = vmatmul.mubr.msk.bf16.vlgmr.msra.gmra.mrb[160].mxu1 %vm4462_vm2, %v6318_v1  ;;  %v15979_v26 = vpop.f32.mrb[97].mxu0  ;;  %v17846_v1 = vld [vmem:[#allocation2 + $0x890] sm:$0xff]  }
 0xcfe   : > { %15878 = vmatpush3.bf16.msra.mxu1 %v17812_v28  ;;  %15893 = vmatprep.mubr.msk.bf16.mxu1 %vm18548_vm0, %v18547_v50  ;;  %v6967_v44 = vpop.f32.mrb[98].mxu0  ;;  %v17847_v28 = vld [vmem:[#allocation2 + $0x898] sm:$0xff]  }
 0xcff   : > { %15879 = vmatprep.subr.bf16.mxu1 %v18547_v50  ;;  %v15980_v30 = vpop.f32.mrb[99].mxu0 }
 0xd00   : > { %v19989_v32 = vpop.f32.mrb[100].mxu0  ;;  %v20058_v30 = vld [vmem:[%s20841_s8 + $0xa] sm:$0x3] }
 0xd01   : > { %v16005_v38 = vpop.f32.mrb[101].mxu0  ;;  %v7122_v47 = vpack.c.bf16 %v19989_v32, %v19989_v32  ;;  %v17866_v32 = vld [vmem:[#allocation2 + $0x970] sm:$0xff]  }
 0xd02   : > { %15880 = vmatpush3.bf16.msra.mxu1 %v17813_v36  ;;  %v7119_v15 = vpop.f32.mrb[102].mxu0  ;;  %v17848_v36 = vld [vmem:[#allocation2 + $0x8a0] sm:$0xff]   ;;  %v17867_v38 = vld [vmem:[#allocation2 + $0x978] sm:$0xff]  }
 0xd03   : > { %15881 = vmatprep.subr.bf16.mxu1 %v18547_v50  ;;  %v16006_v55 = vpop.f32.mrb[103].mxu0 }
 0xd06   : > { %15882 = vmatpush3.bf16.msra.mxu1 %v17814_v40  ;;  %v17849_v40 = vld [vmem:[#allocation2 + $0x8a8] sm:$0xff]  }
 0xd07   : > { %15883 = vmatprep.subr.bf16.mxu1 %v18547_v50 }
 0xd0a   : > { %15884 = vmatpush3.bf16.msra.mxu1 %v17815_v59  ;;  %v17850_v59 = vld [vmem:[#allocation2 + $0x8b0] sm:$0xff]  }
 0xd0b   : > { %15885 = vmatprep.subr.bf16.mxu1 %v18547_v50 }
 0xd0e   : > { %15886 = vmatpush3.bf16.msra.mxu1 %v17816_v57  ;;  %v17851_v57 = vld [vmem:[#allocation2 + $0x8b8] sm:$0xff]  }
 0xd0f   : > { %15887 = vmatprep.subr.bf16.mxu1 %v18547_v50 }
 0xd12   : > { %15888 = vmatpush3.bf16.msra.mxu1 %v17817_v61  ;;  %v6970_v61 = vpack.c.bf16 %v19978_v19, %v19978_v19 }
 0xd13   : > { %15889 = vmatprep.subr.bf16.mxu1 %v18547_v50 }
 0xd16   : > { %15890 = vmatpush3.bf16.msra.mxu1 %v17818_v22  ;;  %v17852_v22 = vld [vmem:[#allocation2 + $0x8c0] sm:$0xff]  }
 0xd17   : > { %15891 = vmatprep.subr.bf16.mxu1 %v18547_v50 }
 0xd1a   : > { %15892 = vmatpush3.bf16.msra.mxu1 %v17819_v46  ;;  %v17853_v46 = vld [vmem:[#allocation2 + $0x8c8] sm:$0xff]  }
 0xd1b   : > { %15903 = vmatprep.subr.bf16.mxu1 %v18547_v50 }
 0xdd0   : > { %v6356_v27 = vpop.f32.mrb[160].mxu1 }
 0xdd1   : > { %v6362_v6 = vpack.c.bf16 %v6356_v27, %v6356_v27  ;;  %v15875_v24 = vpop.f32.mrb[161].mxu1 }
 0xdd2   : > { %v6359_v35 = vpop.f32.mrb[162].mxu1  ;;  %v20053_v24 = vld [vmem:[%s20841_s8] sm:$0x3] }
 0xdd3   : > { %15894 = vmatmul.mubr.bf16.vlgmr.msra.gmra.mrb[152].mxu1 %v6362_v6  ;;  %v15876_v39 = vpop.f32.mrb[163].mxu1  ;;  %v20077_v35 = vld [vmem:[%s20841_s8 + $0x2] sm:$0x3] }
 0xdd4   : > { %15904 = vmatpush3.bf16.msra.mxu1 %v17820_v34  ;;  %15919 = vmatprep.mubr.msk.bf16.mxu1 %vm18548_vm0, %v18547_v50  ;;  %v20082_v39 = vld [vmem:[%s20841_s8 + $0xc] sm:$0x3] }
 0xdd5   : > { %15905 = vmatprep.subr.bf16.mxu1 %v18547_v50 }
 0xdd8   : > { %15906 = vmatpush3.bf16.msra.mxu1 %v17821_v16  ;;  %v17860_v16 = vld [vmem:[#allocation2 + $0x940] sm:$0xff]  }
 0xdd9   : > { %15907 = vmatprep.subr.bf16.mxu1 %v18547_v50 }
 0xddc   : > { %15908 = vmatpush3.bf16.msra.mxu1 %v17822_v17  ;;  %v17861_v17 = vld [vmem:[#allocation2 + $0x948] sm:$0xff]  }
 0xddd   : > { %15909 = vmatprep.subr.bf16.mxu1 %v18547_v50 }
 0xde0   : > { %15910 = vmatpush3.bf16.msra.mxu1 %v17823_v13  ;;  %v20098_v13 = vld [vmem:[%s20841_s8 + $0xe] sm:$0x3] }
 0xde1   : > { %15911 = vmatprep.subr.bf16.mxu1 %v18547_v50 }
 0xde4   : > { %15912 = vmatpush3.bf16.msra.mxu1 %v17824_v21  ;;  %v17862_v21 = vld [vmem:[#allocation2 + $0x950] sm:$0xff]  }
 0xde5   : > { %15913 = vmatprep.subr.bf16.mxu1 %v18547_v50 }
 0xde8   : > { %15914 = vmatpush3.bf16.msra.mxu1 %v17825_v25  ;;  %v17863_v25 = vld [vmem:[#allocation2 + $0x958] sm:$0xff]  }
 0xde9   : > { %15915 = vmatprep.subr.bf16.mxu1 %v18547_v50 }
 0xdec   : > { %15916 = vmatpush3.bf16.msra.mxu1 %v17826_v14  ;;  %v17864_v14 = vld [vmem:[#allocation2 + $0x960] sm:$0xff]  }
 0xded   : > { %15917 = vmatprep.subr.bf16.mxu1 %v18547_v50 }
 0xdf0   : > { %15918 = vmatpush3.bf16.msra.mxu1 %v17827_v23  ;;  %v17865_v23 = vld [vmem:[#allocation2 + $0x968] sm:$0xff]  }
 0xdf1   : > { %15929 = vmatprep.subr.bf16.mxu1 %v18547_v50 }
 0xdf3   : > { %15920 = vmatmul.mubr.bf16.vlgmr.msra.gmra.mrb[152].mxu1 %v6514_v10 }
 0xdf4   : > { %15930 = vmatpush3.bf16.msra.mxu1 %v17828_v20  ;;  %15945 = vmatprep.mubr.msk.bf16.mxu1 %vm18548_vm0, %v18547_v50 }
 0xdf5   : > { %15931 = vmatprep.subr.bf16.mxu1 %v18547_v50 }
 0xdf8   : > { %15932 = vmatpush3.bf16.msra.mxu1 %v17829_v62 }
 0xdf9   : > { %15933 = vmatprep.subr.bf16.mxu1 %v18547_v50 }
 0xdfc   : > { %15934 = vmatpush3.bf16.msra.mxu1 %v17830_v0  ;;  %v17868_v0 = vld [vmem:[#allocation2 + $0x900] sm:$0xff]  }
 0xdfd   : > { %15935 = vmatprep.subr.bf16.mxu1 %v18547_v50 }
 0xe00   : > { %15936 = vmatpush3.bf16.msra.mxu1 %v17831_v63 }
 0xe01   : > { %15937 = vmatprep.subr.bf16.mxu1 %v18547_v50 }
 0xe04   : > { %15938 = vmatpush3.bf16.msra.mxu1 %v17832_v4 }
 0xe05   : > { %15939 = vmatprep.subr.bf16.mxu1 %v18547_v50 }
 0xe08   : > { %15940 = vmatpush3.bf16.msra.mxu1 %v17833_v5 }
 0xe09   : > { %15941 = vmatprep.subr.bf16.mxu1 %v18547_v50 }
 0xe0c   : > { %15942 = vmatpush3.bf16.msra.mxu1 %v17834_v29 }
 0xe0d   : > { %15943 = vmatprep.subr.bf16.mxu1 %v18547_v50 }
 0xe10   : > { %15944 = vmatpush3.bf16.msra.mxu1 %v17835_v60  ;;  %v17869_v60 = vld [vmem:[#allocation2 + $0x908] sm:$0xff]  }
 0xe11   : > { %15955 = vmatprep.subr.bf16.mxu1 %v18547_v50 }
 0xe13   : > { %15946 = vmatmul.mubr.bf16.vlgmr.msra.gmra.mrb[152].mxu1 %v6666_v43  ;;  %v17870_v43 = vld [vmem:[#allocation2 + $0x910] sm:$0xff]  }
 0xe14   : > { %15956 = vmatpush3.bf16.msra.mxu1 %v17836_v53  ;;  %15971 = vmatprep.mubr.msk.bf16.mxu1 %vm18548_vm0, %v18547_v50  ;;  %v17871_v53 = vld [vmem:[#allocation2 + $0x918] sm:$0xff]  }
 0xe15   : > { %15957 = vmatprep.subr.bf16.mxu1 %v18547_v50 }
 0xe18   : > { %15958 = vmatpush3.bf16.msra.mxu1 %v17837_v54  ;;  %v17872_v54 = vld [vmem:[#allocation2 + $0x920] sm:$0xff]  }
 0xe19   : > { %15959 = vmatprep.subr.bf16.mxu1 %v18547_v50 }
 0xe1c   : > { %15960 = vmatpush3.bf16.msra.mxu1 %v17838_v58  ;;  %v17873_v58 = vld [vmem:[#allocation2 + $0x928] sm:$0xff]  }
 0xe1d   : > { %15961 = vmatprep.subr.bf16.mxu1 %v18547_v50 }
 0xe20   : > { %15962 = vmatpush3.bf16.msra.mxu1 %v17839_v31  ;;  %v17874_v31 = vld [vmem:[#allocation2 + $0x930] sm:$0xff]  }
 0xe21   : > { %15963 = vmatprep.subr.bf16.mxu1 %v18547_v50 }
 0xe24   : > { %15964 = vmatpush3.bf16.msra.mxu1 %v17840_v37  ;;  %v17875_v37 = vld [vmem:[#allocation2 + $0x938] sm:$0xff]  }
 0xe25   : > { %15965 = vmatprep.subr.bf16.mxu1 %v18547_v50 }
 0xe28   : > { %15966 = vmatpush3.bf16.msra.mxu1 %v17841_v41 }
 0xe29   : > { %15967 = vmatprep.subr.bf16.mxu1 %v18547_v50 }
 0xe2c   : > { %15968 = vmatpush3.bf16.msra.mxu1 %v17842_v49  ;;  %v20130_v49 = vld [vmem:[%s20841_s8 + $0x4] sm:$0x3] }
 0xe2d   : > { %15969 = vmatprep.subr.bf16.mxu1 %v18547_v50 }
 0xe30   : > { %15970 = vmatpush3.bf16.msra.mxu1 %v17843_v7  ;;  %v17876_v7 = vld [vmem:[#allocation2 + $0x980] sm:$0xff]  }
 0xe31   : > { %15981 = vmatprep.subr.bf16.mxu1 %v18547_v50 }
 0xe33   : > { %15972 = vmatmul.mubr.bf16.vlgmr.msra.gmra.mrb[152].mxu1 %v6818_v11  ;;  %v17877_v11 = vld [vmem:[#allocation2 + $0x988] sm:$0xff]  }
 0xe34   : > { %15982 = vmatpush3.bf16.msra.mxu1 %v17844_v45  ;;  %15997 = vmatprep.mubr.msk.bf16.mxu1 %vm18548_vm0, %v18547_v50  ;;  %v17878_v45 = vld [vmem:[#allocation2 + $0x990] sm:$0xff]  }
 0xe35   : > { %15983 = vmatprep.subr.bf16.mxu1 %v18547_v50 }
 0xe38   : > { %15984 = vmatpush3.bf16.msra.mxu1 %v17845_v52  ;;  %v17879_v52 = vld [vmem:[#allocation2 + $0x998] sm:$0xff]  }
 0xe39   : > { %15985 = vmatprep.subr.bf16.mxu1 %v18547_v50 }
 0xe3c   : > { %15986 = vmatpush3.bf16.msra.mxu1 %v17846_v1  ;;  %v17880_v1 = vld [vmem:[#allocation2 + $0x9a0] sm:$0xff]  }
 0xe3d   : > { %15987 = vmatprep.subr.bf16.mxu1 %v18547_v50 }
 0xe40   : > { %15988 = vmatpush3.bf16.msra.mxu1 %v17847_v28  ;;  %v17881_v28 = vld [vmem:[#allocation2 + $0x9a8] sm:$0xff]  }
 0xe41   : > { %15989 = vmatprep.subr.bf16.mxu1 %v18547_v50 }
 0xe44   : > { %15990 = vmatpush3.bf16.msra.mxu1 %v17848_v36  ;;  %v17882_v36 = vld [vmem:[#allocation2 + $0x9b0] sm:$0xff]  }
 0xe45   : > { %15991 = vmatprep.subr.bf16.mxu1 %v18547_v50 }
 0xe48   : > { %15992 = vmatpush3.bf16.msra.mxu1 %v17849_v40  ;;  %v17883_v40 = vld [vmem:[#allocation2 + $0x9b8] sm:$0xff]  }
 0xe49   : > { %15993 = vmatprep.subr.bf16.mxu1 %v18547_v50 }
 0xe4c   : > { %15994 = vmatpush3.bf16.msra.mxu1 %v17850_v59  ;;  %v20147_v59 = vld [vmem:[%s20841_s8 + $0x10] sm:$0x3] }
 0xe4d   : > { %15995 = vmatprep.subr.bf16.mxu1 %v18547_v50 }
 0xe50   : > { %15996 = vmatpush3.bf16.msra.mxu1 %v17851_v57 }
 0xe51   : > { %16007 = vmatprep.subr.bf16.mxu1 %v18547_v50 }
 0xe53   : > { %15998 = vmatmul.mubr.bf16.vlgmr.msra.gmra.mrb[152].mxu1 %v6970_v61 }
 0xe54   : > { %16008 = vmatpush3.bf16.msra.mxu1 %v17852_v22  ;;  %16023 = vmatprep.mubr.msk.bf16.mxu1 %vm18548_vm0, %v18547_v50 }
 0xe55   : > { %16009 = vmatprep.subr.bf16.mxu1 %v18547_v50 }
 0xe58   : > { %16010 = vmatpush3.bf16.msra.mxu1 %v17853_v46 }
 0xe59   : > { %16011 = vmatprep.subr.bf16.mxu1 %v18547_v50 }
 0xe5c   : > { %16012 = vmatpush3.bf16.msra.mxu1 %v17854_v8 }
 0xe5d   : > { %16013 = vmatprep.subr.bf16.mxu1 %v18547_v50 }
 0xe60   : > { %16014 = vmatpush3.bf16.msra.mxu1 %v17855_v51  ;;  %v20160_v51 = vld [vmem:[%s20841_s8 + $0x6] sm:$0x3] }
 0xe61   : > { %16015 = vmatprep.subr.bf16.mxu1 %v18547_v50 }
 0xe64   : > { %16016 = vmatpush3.bf16.msra.mxu1 %v17856_v56  ;;  %v17884_v56 = vld [vmem:[#allocation2 + $0x9c0] sm:$0xff]  }
 0xe65   : > { %16017 = vmatprep.subr.bf16.mxu1 %v18547_v50 }
 0xe68   : > { %16018 = vmatpush3.bf16.msra.mxu1 %v17857_v48  ;;  %v17885_v48 = vld [vmem:[#allocation2 + $0x9c8] sm:$0xff]  }
 0xe69   : > { %16019 = vmatprep.subr.bf16.mxu1 %v18547_v50 }
 0xe6c   : > { %16020 = vmatpush3.bf16.msra.mxu1 %v17858_v9  ;;  %v17886_v9 = vld [vmem:[#allocation2 + $0x9d0] sm:$0xff]  }
 0xe6d   : > { %16021 = vmatprep.subr.bf16.mxu1 %v18547_v50 }
 0xe70   : > { %16022 = vmatpush3.bf16.msra.mxu1 %v17859_v18  ;;  %v17887_v18 = vld [vmem:[#allocation2 + $0x9d8] sm:$0xff]  }
 0xe71   : > { %16151 = vmatprep.subr.bf16.mxu1 %v18547_v50 }
 0xe73   : > { %16024 = vmatmul.mubr.bf16.vlgmr.msra.gmra.mrb[152].mxu1 %v7122_v47  ;;  %v17888_v47 = vld [vmem:[#allocation2 + $0x9e0] sm:$0xff]  }
 0xe74   : > { %16153 = vmatprep.mubr.msk.bf16.mxu1 %vm18548_vm0, %v18547_v50 }
 0xf46   : > { %v7222_v12 = vpop.f32.mrb[152].mxu1 }
 0xf47   : > { %v7234_v42 = vmul.f32 %v13482_v2, %v7222_v12  ;;  %v16025_v3 = vpop.f32.mrb[153].mxu1  ;;  %v17889_v2 = vld [vmem:[#allocation2 + $0x9e8] sm:$0xff]   ;;  %v17890_v12 = vld [vmem:[#allocation2 + $0x9f0] sm:$0xff]  }
 0xf48   : > { %v7225_v19 = vpop.f32.mrb[154].mxu1 }
 0xf49   : > { %v7240_v26 = vadd.f32 %v13483_v33, %v7234_v42  ;;  %v16026_v27 = vpop.f32.mrb[155].mxu1  ;;  %v17891_v33 = vld [vmem:[#allocation2 + $0x9f8] sm:$0xff]  }
 0xf4b   : > { %v7241_v34 = vmax.f32 %v7240_v26, 0.0 }
 0xf4d   : > { %v20042_v44 = vpack.c.bf16 %v7241_v34, %v7241_v34 }
 0xf4f   : > { %v20046_v6 = vsel %vm7248_vm3, %v20042_v44, 0 }
 0xf50   : > { %16028 = vmatpush3.bf16.msra.mxu0 %v20046_v6  ;;  %16152 = vmatpush3.bf16.msra.mxu1 %v20046_v6 }
 0xf51   : > { %16033 = vmatprep.subr.bf16.mxu0 %v18547_v50  ;;  %16177 = vmatprep.subr.bf16.mxu1 %v18547_v50 }
 0xf53   : > { %16030 = vmatmul.mubr.msk.bf16.vlgmr.msra.gmra.mrb[104].mxu0 %vm7244_vm4, %v20053_v24  ;;  %16154 = vmatmul.mubr.msk.bf16.vlgmr.msra.gmra.mrb[164].mxu1 %vm7244_vm4, %v20058_v30 }
 0xf54   : > { %16034 = vmatpush3.bf16.msra.mxu0 %v20046_v6  ;;  %16178 = vmatpush3.bf16.msra.mxu1 %v20046_v6 }
 0xf55   : > { %16035 = vmatprep.mubr.msk.bf16.mxu0 %vm18548_vm0, %v18547_v50  ;;  %16179 = vmatprep.mubr.msk.bf16.mxu1 %vm18548_vm0, %v18547_v50 }
 0xf56   : > { %16203 = vmatprep.subr.bf16.mxu1 %v18547_v50  ;;  %16039 = vmatprep.subr.bf16.mxu0 %v18547_v50 }
 0xf5b   : > { %16036 = vmatmul.mubr.msk.bf16.vlgmr.msra.gmra.mrb[108].mxu0 %vm7244_vm4, %v20077_v35  ;;  %16180 = vmatmul.mubr.msk.bf16.vlgmr.msra.gmra.mrb[168].mxu1 %vm7244_vm4, %v20082_v39 }
 0xf5c   : > { %16204 = vmatpush3.bf16.msra.mxu1 %v20046_v6  ;;  %16205 = vmatprep.mubr.msk.bf16.mxu1 %vm18548_vm0, %v18547_v50 }
 0xf5d   : > { %16229 = vmatprep.subr.bf16.mxu1 %v18547_v50  ;;  %16040 = vmatpush3.bf16.msra.mxu0 %v17860_v16 }
 0xf5e   : > { %16041 = vmatprep.subr.bf16.mxu0 %v18547_v50  ;;  %16055 = vmatprep.mubr.msk.bf16.mxu0 %vm18548_vm0, %v18547_v50 }
 0xf61   : > { %16042 = vmatpush3.bf16.msra.mxu0 %v17861_v17 }
 0xf62   : > { %16043 = vmatprep.subr.bf16.mxu0 %v18547_v50 }
 0xf63   : > { %16206 = vmatmul.mubr.msk.bf16.vlgmr.msra.gmra.mrb[172].mxu1 %vm7244_vm4, %v20098_v13 }
 0xf64   : > { %16230 = vmatpush3.bf16.msra.mxu1 %v20046_v6  ;;  %16231 = vmatprep.mubr.msk.bf16.mxu1 %vm18548_vm0, %v18547_v50 }
 0xf65   : > { %16044 = vmatpush3.bf16.msra.mxu0 %v17862_v21  ;;  %16255 = vmatprep.subr.bf16.mxu1 %v18547_v50 }
 0xf66   : > { %16045 = vmatprep.subr.bf16.mxu0 %v18547_v50 }
 0xf69   : > { %16046 = vmatpush3.bf16.msra.mxu0 %v17863_v25 }
 0xf6a   : > { %16047 = vmatprep.subr.bf16.mxu0 %v18547_v50 }
 0xf6b   : > { %16232 = vmatmul.mubr.msk.bf16.vlgmr.msra.gmra.mrb[176].mxu1 %vm7244_vm4, %v20147_v59 }
 0xf6c   : > { %16257 = vmatprep.mubr.msk.bf16.mxu1 %vm18548_vm0, %v18547_v50 }
 0xf6d   : > { %16048 = vmatpush3.bf16.msra.mxu0 %v17864_v14  ;;  %v17892_v14 = vld [vmem:[#allocation2 + $0xa00] sm:$0xff]  }
 0xf6e   : > { %16049 = vmatprep.subr.bf16.mxu0 %v18547_v50 }
 0xf71   : > { %16050 = vmatpush3.bf16.msra.mxu0 %v17865_v23 }
 0xf72   : > { %16051 = vmatprep.subr.bf16.mxu0 %v18547_v50 }
 0xf75   : > { %16052 = vmatpush3.bf16.msra.mxu0 %v17866_v32 }
 0xf76   : > { %16053 = vmatprep.subr.bf16.mxu0 %v18547_v50 }
 0xf79   : > { %16054 = vmatpush3.bf16.msra.mxu0 %v17867_v38 }
 0xf7a   : > { %16059 = vmatprep.subr.bf16.mxu0 %v18547_v50 }
0x1026   : > { %v7286_v10 = vpop.f32.mrb[104].mxu0  ;;  %v20174_v42 = vpop.f32.mrb[164].mxu1 }
0x1027   : > { %v16031_v15 = vpop.f32.mrb[105].mxu0  ;;  %v7292_v41 = vpack.c.bf16 %v7286_v10, %v7286_v10  ;;  %v16155_v3 = vpop.f32.mrb[165].mxu1 }
0x1028   : > { %v7289_v20 = vpop.f32.mrb[106].mxu0  ;;  %v8001_v19 = vpop.f32.mrb[166].mxu1  ;;  %v17924_v3 = vld [vmem:[#allocation2 + $0xb00] sm:$0xff]  }
0x1029   : > { %v16032_v55 = vpop.f32.mrb[107].mxu0  ;;  %v16156_v26 = vpop.f32.mrb[167].mxu1  ;;  %v17925_v19 = vld [vmem:[#allocation2 + $0xb08] sm:$0xff]  }
0x102a   : > { %v17893_v55 = vld [vmem:[#allocation2 + $0xa08] sm:$0xff]   ;;  %v17926_v26 = vld [vmem:[#allocation2 + $0xb10] sm:$0xff]  }
0x102e   : > { %v7349_v62 = vpop.f32.mrb[108].mxu0  ;;  %v20176_v27 = vpop.f32.mrb[168].mxu1 }
0x102f   : > { %v7355_v63 = vpack.c.bf16 %v7349_v62, %v7349_v62  ;;  %v16037_v4 = vpop.f32.mrb[109].mxu0  ;;  %v16181_v34 = vpop.f32.mrb[169].mxu1  ;;  %v17894_v62 = vld [vmem:[#allocation2 + $0xa10] sm:$0xff]  }
0x1030   : > { %v7352_v5 = vpop.f32.mrb[110].mxu0  ;;  %v17897_v4 = vld [vmem:[#allocation2 + $0xa28] sm:$0xff]   ;;  %v17928_v34 = vld [vmem:[#allocation2 + $0xb20] sm:$0xff]  }
0x1031   : > { %16056 = vmatmul.mubr.bf16.vlgmr.msra.gmra.mrb[112].mxu0 %v7355_v63  ;;  %v16038_v29 = vpop.f32.mrb[111].mxu0  ;;  %v17896_v63 = vld [vmem:[#allocation2 + $0xa20] sm:$0xff]   ;;  %v17898_v5 = vld [vmem:[#allocation2 + $0xa30] sm:$0xff]  }
0x1032   : > { %16060 = vmatpush3.bf16.msra.mxu0 %v17868_v0  ;;  %16075 = vmatprep.mubr.msk.bf16.mxu0 %vm18548_vm0, %v18547_v50  ;;  %v17895_v0 = vld [vmem:[#allocation2 + $0xa18] sm:$0xff]  }
0x1033   : > { %16061 = vmatprep.subr.bf16.mxu0 %v18547_v50  ;;  %v17899_v29 = vld [vmem:[#allocation2 + $0xa38] sm:$0xff]  }
0x1036   : > { %16062 = vmatpush3.bf16.msra.mxu0 %v17869_v60 }
0x1037   : > { %16063 = vmatprep.subr.bf16.mxu0 %v18547_v50 }
0x103a   : > { %16064 = vmatpush3.bf16.msra.mxu0 %v17870_v43 }
0x103b   : > { %16065 = vmatprep.subr.bf16.mxu0 %v18547_v50 }
0x103e   : > { %16066 = vmatpush3.bf16.msra.mxu0 %v17871_v53 }
0x103f   : > { %16067 = vmatprep.subr.bf16.mxu0 %v18547_v50 }
0x1042   : > { %16068 = vmatpush3.bf16.msra.mxu0 %v17872_v54  ;;  %v17900_v54 = vld [vmem:[#allocation2 + $0xa40] sm:$0xff]  }
0x1043   : > { %16069 = vmatprep.subr.bf16.mxu0 %v18547_v50 }
0x1046   : > { %16070 = vmatpush3.bf16.msra.mxu0 %v17873_v58 }
0x1047   : > { %16071 = vmatprep.subr.bf16.mxu0 %v18547_v50 }
0x104a   : > { %16072 = vmatpush3.bf16.msra.mxu0 %v17874_v31  ;;  %v17901_v31 = vld [vmem:[#allocation2 + $0xa48] sm:$0xff]  }
0x104b   : > { %16073 = vmatprep.subr.bf16.mxu0 %v18547_v50 }
0x104e   : > { %16074 = vmatpush3.bf16.msra.mxu0 %v17875_v37  ;;  %v17902_v37 = vld [vmem:[#allocation2 + $0xa50] sm:$0xff]  }
0x104f   : > { %16079 = vmatprep.subr.bf16.mxu0 %v18547_v50 }
0x1051   : > { %16076 = vmatmul.mubr.bf16.vlgmr.msra.gmra.mrb[112].mxu0 %v7292_v41  ;;  %v17903_v41 = vld [vmem:[#allocation2 + $0xa58] sm:$0xff]  }
0x1052   : > { %16080 = vmatpush3.bf16.msra.mxu0 %v20046_v6  ;;  %16081 = vmatprep.mubr.msk.bf16.mxu0 %vm18548_vm0, %v18547_v50 }
0x1053   : > { %16085 = vmatprep.subr.bf16.mxu0 %v18547_v50 }
0x1059   : > { %16082 = vmatmul.mubr.msk.bf16.vlgmr.msra.gmra.mrb[116].mxu0 %vm7244_vm4, %v20130_v49 }
0x105a   : > { %16086 = vmatpush3.bf16.msra.mxu0 %v17876_v7  ;;  %16101 = vmatprep.mubr.msk.bf16.mxu0 %vm18548_vm0, %v18547_v50  ;;  %v17904_v7 = vld [vmem:[#allocation2 + $0xa60] sm:$0xff]  }
0x105b   : > { %16087 = vmatprep.subr.bf16.mxu0 %v18547_v50 }
0x105e   : > { %16088 = vmatpush3.bf16.msra.mxu0 %v17877_v11  ;;  %v17906_v11 = vld [vmem:[#allocation2 + $0xa70] sm:$0xff]  }
0x105f   : > { %16089 = vmatprep.subr.bf16.mxu0 %v18547_v50 }
0x1062   : > { %16090 = vmatpush3.bf16.msra.mxu0 %v17878_v45  ;;  %v17907_v45 = vld [vmem:[#allocation2 + $0xa78] sm:$0xff]  }
0x1063   : > { %16091 = vmatprep.subr.bf16.mxu0 %v18547_v50 }
0x1066   : > { %16092 = vmatpush3.bf16.msra.mxu0 %v17879_v52  ;;  %v8004_v52 = vpack.c.bf16 %v20174_v42, %v20174_v42 }
0x1067   : > { %16093 = vmatprep.subr.bf16.mxu0 %v18547_v50 }
0x106a   : > { %16094 = vmatpush3.bf16.msra.mxu0 %v17880_v1  ;;  %v17908_v1 = vld [vmem:[#allocation2 + $0xa80] sm:$0xff]  }
0x106b   : > { %16095 = vmatprep.subr.bf16.mxu0 %v18547_v50 }
0x106e   : > { %16096 = vmatpush3.bf16.msra.mxu0 %v17881_v28  ;;  %v17909_v28 = vld [vmem:[#allocation2 + $0xa88] sm:$0xff]  }
0x106f   : > { %16097 = vmatprep.subr.bf16.mxu0 %v18547_v50 }
0x1072   : > { %16098 = vmatpush3.bf16.msra.mxu0 %v17882_v36  ;;  %v17910_v36 = vld [vmem:[#allocation2 + $0xa90] sm:$0xff]  }
0x1073   : > { %16099 = vmatprep.subr.bf16.mxu0 %v18547_v50 }
0x1076   : > { %16100 = vmatpush3.bf16.msra.mxu0 %v17883_v40  ;;  %v17911_v40 = vld [vmem:[#allocation2 + $0xa98] sm:$0xff]  }
0x1077   : > { %16105 = vmatprep.subr.bf16.mxu0 %v18547_v50 }
0x112c   : > { %v7588_v57 = vpop.f32.mrb[116].mxu0 }
0x112d   : > { %v7594_v61 = vpack.c.bf16 %v7588_v57, %v7588_v57  ;;  %v16083_v22 = vpop.f32.mrb[117].mxu0  ;;  %v17912_v57 = vld [vmem:[#allocation2 + $0xaa0] sm:$0xff]  }
0x112e   : > { %v7591_v46 = vpop.f32.mrb[118].mxu0  ;;  %v17914_v22 = vld [vmem:[#allocation2 + $0xab0] sm:$0xff]  }
0x112f   : > { %16102 = vmatmul.mubr.bf16.vlgmr.msra.gmra.mrb[112].mxu0 %v7594_v61  ;;  %v16084_v8 = vpop.f32.mrb[119].mxu0  ;;  %v17913_v61 = vld [vmem:[#allocation2 + $0xaa8] sm:$0xff]   ;;  %v17915_v46 = vld [vmem:[#allocation2 + $0xab8] sm:$0xff]  }
0x1130   : > { %16106 = vmatpush3.bf16.msra.mxu0 %v20046_v6  ;;  %16107 = vmatprep.mubr.msk.bf16.mxu0 %vm18548_vm0, %v18547_v50  ;;  %v8153_v6 = vpop.f32.mrb[170].mxu1  ;;  %v8156_v8 = vpack.c.bf16 %v20176_v27, %v20176_v27  ;;  %v17927_v27 = vld [vmem:[#allocation2 + $0xb18] sm:$0xff]  }
0x1131   : > { %16111 = vmatprep.subr.bf16.mxu0 %v18547_v50  ;;  %v16182_v16 = vpop.f32.mrb[171].mxu1  ;;  %v17929_v6 = vld [vmem:[#allocation2 + $0xb28] sm:$0xff]  }
0x1132   : > { %v20178_v17 = vpop.f32.mrb[172].mxu1  ;;  %v17930_v16 = vld [vmem:[#allocation2 + $0xb30] sm:$0xff]  }
0x1133   : > { %v16207_v21 = vpop.f32.mrb[173].mxu1  ;;  %v8308_v42 = vpack.c.bf16 %v20178_v17, %v20178_v17  ;;  %v17931_v17 = vld [vmem:[#allocation2 + $0xb38] sm:$0xff]  }
0x1134   : > { %v8305_v23 = vpop.f32.mrb[174].mxu1 }
0x1135   : > { %v16208_v10 = vpop.f32.mrb[175].mxu1  ;;  %v13572_v23 = vld [vmem:[#allocation7 + $0x4] ss:$0 sm:$0xff] }
0x1136   : > { %v20189_v60 = vpop.f32.mrb[176].mxu1 }
0x1137   : > { %16108 = vmatmul.mubr.msk.bf16.vlgmr.msra.gmra.mrb[120].mxu0 %vm7244_vm4, %v20160_v51  ;;  %v16233_v43 = vpop.f32.mrb[177].mxu1  ;;  %v8460_v21 = vpack.c.bf16 %v20189_v60, %v20189_v60 }
0x1138   : > { %16112 = vmatpush3.bf16.msra.mxu0 %v17884_v56  ;;  %16127 = vmatprep.mubr.msk.bf16.mxu0 %vm18548_vm0, %v18547_v50  ;;  %v8457_v53 = vpop.f32.mrb[178].mxu1  ;;  %v17916_v56 = vld [vmem:[#allocation2 + $0xac0] sm:$0xff]  }
0x1139   : > { %16113 = vmatprep.subr.bf16.mxu0 %v18547_v50  ;;  %v16234_v58 = vpop.f32.mrb[179].mxu1 }
0x113c   : > { %16114 = vmatpush3.bf16.msra.mxu0 %v17885_v48  ;;  %v17917_v48 = vld [vmem:[#allocation2 + $0xac8] sm:$0xff]  }
0x113d   : > { %16115 = vmatprep.subr.bf16.mxu0 %v18547_v50 }
0x1140   : > { %16116 = vmatpush3.bf16.msra.mxu0 %v17886_v9  ;;  %v17918_v9 = vld [vmem:[#allocation2 + $0xad0] sm:$0xff]  }
0x1141   : > { %16117 = vmatprep.subr.bf16.mxu0 %v18547_v50 }
0x1144   : > { %16118 = vmatpush3.bf16.msra.mxu0 %v17887_v18  ;;  %v17919_v18 = vld [vmem:[#allocation2 + $0xad8] sm:$0xff]  }
0x1145   : > { %16119 = vmatprep.subr.bf16.mxu0 %v18547_v50 }
0x1148   : > { %16120 = vmatpush3.bf16.msra.mxu0 %v17888_v47  ;;  %v17920_v47 = vld [vmem:[#allocation2 + $0xae0] sm:$0xff]  }
0x1149   : > { %16121 = vmatprep.subr.bf16.mxu0 %v18547_v50 }
0x114c   : > { %16122 = vmatpush3.bf16.msra.mxu0 %v17889_v2  ;;  %v17921_v2 = vld [vmem:[#allocation2 + $0xae8] sm:$0xff]  }
0x114d   : > { %16123 = vmatprep.subr.bf16.mxu0 %v18547_v50 }
0x1150   : > { %16124 = vmatpush3.bf16.msra.mxu0 %v17890_v12  ;;  %v17922_v12 = vld [vmem:[#allocation2 + $0xaf0] sm:$0xff]  }
0x1151   : > { %16125 = vmatprep.subr.bf16.mxu0 %v18547_v50 }
0x1154   : > { %16126 = vmatpush3.bf16.msra.mxu0 %v17891_v33  ;;  %v17923_v33 = vld [vmem:[#allocation2 + $0xaf8] sm:$0xff]  }
0x1155   : > { %16131 = vmatprep.subr.bf16.mxu0 %v18547_v50 }
0x120a   : > { %v7740_v25 = vpop.f32.mrb[120].mxu0 }
0x120b   : > { %v7746_v32 = vpack.c.bf16 %v7740_v25, %v7740_v25  ;;  %v16109_v38 = vpop.f32.mrb[121].mxu0  ;;  %v13571_v25 = vld [vmem:[#allocation5 + $0x4] ss:$0 sm:$0xff] }
0x120c   : > { %v7743_v15 = vpop.f32.mrb[122].mxu0 }
0x120d   : > { %16128 = vmatmul.mubr.bf16.vlgmr.msra.gmra.mrb[112].mxu0 %v7746_v32  ;;  %v16110_v20 = vpop.f32.mrb[123].mxu0 }
0x120e   : > { %16132 = vmatpush3.bf16.msra.mxu0 %v17892_v14  ;;  %16147 = vmatprep.mubr.msk.bf16.mxu0 %vm18548_vm0, %v18547_v50 }
0x120f   : > { %16133 = vmatprep.subr.bf16.mxu0 %v18547_v50 }
0x1212   : > { %16134 = vmatpush3.bf16.msra.mxu0 %v17893_v55 }
0x1213   : > { %16135 = vmatprep.subr.bf16.mxu0 %v18547_v50 }
0x1216   : > { %16136 = vmatpush3.bf16.msra.mxu0 %v17894_v62 }
0x1217   : > { %16137 = vmatprep.subr.bf16.mxu0 %v18547_v50 }
0x121a   : > { %16138 = vmatpush3.bf16.msra.mxu0 %v17895_v0 }
0x121b   : > { %16139 = vmatprep.subr.bf16.mxu0 %v18547_v50 }
0x121e   : > { %16140 = vmatpush3.bf16.msra.mxu0 %v17896_v63  ;;  %v17932_v63 = vld [vmem:[#allocation2 + $0xb80] sm:$0xff]  }
0x121f   : > { %16141 = vmatprep.subr.bf16.mxu0 %v18547_v50 }
0x1222   : > { %16142 = vmatpush3.bf16.msra.mxu0 %v17897_v4  ;;  %v17938_v4 = vld [vmem:[#allocation2 + $0xbb0] sm:$0xff]  }
0x1223   : > { %16143 = vmatprep.subr.bf16.mxu0 %v18547_v50 }
0x1226   : > { %16144 = vmatpush3.bf16.msra.mxu0 %v17898_v5  ;;  %v17939_v5 = vld [vmem:[#allocation2 + $0xbb8] sm:$0xff]  }
0x1227   : > { %16145 = vmatprep.subr.bf16.mxu0 %v18547_v50 }
0x122a   : > { %16146 = vmatpush3.bf16.msra.mxu0 %v17899_v29 }
0x122b   : > { %16157 = vmatprep.subr.bf16.mxu0 %v18547_v50 }
0x122d   : > { %16148 = vmatmul.mubr.bf16.vlgmr.msra.gmra.mrb[112].mxu0 %v20042_v44  ;;  %v17905_v44 = vld [vmem:[#allocation2 + $0xa68] sm:$0xff]  }
0x122e   : > { %16158 = vmatpush3.bf16.msra.mxu0 %v17900_v54  ;;  %16173 = vmatprep.mubr.msk.bf16.mxu0 %vm18548_vm0, %v18547_v50  ;;  %v17940_v54 = vld [vmem:[#allocation2 + $0xb40] sm:$0xff]  }
0x122f   : > { %16159 = vmatprep.subr.bf16.mxu0 %v18547_v50 }
0x1232   : > { %16160 = vmatpush3.bf16.msra.mxu0 %v17901_v31 }
0x1233   : > { %16161 = vmatprep.subr.bf16.mxu0 %v18547_v50 }
0x1236   : > { %16162 = vmatpush3.bf16.msra.mxu0 %v17902_v37 }
0x1237   : > { %16163 = vmatprep.subr.bf16.mxu0 %v18547_v50 }
0x123a   : > { %16164 = vmatpush3.bf16.msra.mxu0 %v17903_v41 }
0x123b   : > { %16165 = vmatprep.subr.bf16.mxu0 %v18547_v50 }
0x123e   : > { %16166 = vmatpush3.bf16.msra.mxu0 %v17904_v7  ;;  %v17941_v7 = vld [vmem:[#allocation2 + $0xb48] sm:$0xff]  }
0x123f   : > { %16167 = vmatprep.subr.bf16.mxu0 %v18547_v50 }
0x1242   : > { %16168 = vmatpush3.bf16.msra.mxu0 %v17905_v44  ;;  %v17942_v44 = vld [vmem:[#allocation2 + $0xb50] sm:$0xff]  }
0x1243   : > { %16169 = vmatprep.subr.bf16.mxu0 %v18547_v50 }
0x1246   : > { %16170 = vmatpush3.bf16.msra.mxu0 %v17906_v11  ;;  %v17943_v11 = vld [vmem:[#allocation2 + $0xb58] sm:$0xff]  }
0x1247   : > { %16171 = vmatprep.subr.bf16.mxu0 %v18547_v50 }
0x124a   : > { %16172 = vmatpush3.bf16.msra.mxu0 %v17907_v45  ;;  %v17944_v45 = vld [vmem:[#allocation2 + $0xb60] sm:$0xff]  }
0x124b   : > { %16183 = vmatprep.subr.bf16.mxu0 %v18547_v50 }
0x124d   : > { %16174 = vmatmul.mubr.bf16.vlgmr.msra.gmra.mrb[112].mxu0 %v8004_v52  ;;  %v17945_v52 = vld [vmem:[#allocation2 + $0xb68] sm:$0xff]  }
0x124e   : > { %16184 = vmatpush3.bf16.msra.mxu0 %v17908_v1  ;;  %16199 = vmatprep.mubr.msk.bf16.mxu0 %vm18548_vm0, %v18547_v50  ;;  %v17946_v1 = vld [vmem:[#allocation2 + $0xb70] sm:$0xff]  }
0x124f   : > { %16185 = vmatprep.subr.bf16.mxu0 %v18547_v50 }
0x1252   : > { %16186 = vmatpush3.bf16.msra.mxu0 %v17909_v28  ;;  %v17947_v28 = vld [vmem:[#allocation2 + $0xb78] sm:$0xff]  }
0x1253   : > { %16187 = vmatprep.subr.bf16.mxu0 %v18547_v50 }
0x1256   : > { %16188 = vmatpush3.bf16.msra.mxu0 %v17910_v36 }
0x1257   : > { %16189 = vmatprep.subr.bf16.mxu0 %v18547_v50 }
0x125a   : > { %16190 = vmatpush3.bf16.msra.mxu0 %v17911_v40  ;;  %v17948_v40 = vld [vmem:[#allocation2 + $0xbc0] sm:$0xff]  }
0x125b   : > { %16191 = vmatprep.subr.bf16.mxu0 %v18547_v50 }
0x125e   : > { %16192 = vmatpush3.bf16.msra.mxu0 %v17912_v57  ;;  %v17949_v57 = vld [vmem:[#allocation2 + $0xbc8] sm:$0xff]  }
0x125f   : > { %16193 = vmatprep.subr.bf16.mxu0 %v18547_v50 }
0x1262   : > { %16194 = vmatpush3.bf16.msra.mxu0 %v17913_v61  ;;  %v17950_v61 = vld [vmem:[#allocation2 + $0xbd0] sm:$0xff]  }
0x1263   : > { %16195 = vmatprep.subr.bf16.mxu0 %v18547_v50 }
0x1266   : > { %16196 = vmatpush3.bf16.msra.mxu0 %v17914_v22  ;;  %v17951_v22 = vld [vmem:[#allocation2 + $0xbd8] sm:$0xff]  }
0x1267   : > { %16197 = vmatprep.subr.bf16.mxu0 %v18547_v50 }
0x126a   : > { %16198 = vmatpush3.bf16.msra.mxu0 %v17915_v46  ;;  %v17952_v46 = vld [vmem:[#allocation2 + $0xbe0] sm:$0xff]  }
0x126b   : > { %16209 = vmatprep.subr.bf16.mxu0 %v18547_v50 }
0x126d   : > { %16200 = vmatmul.mubr.bf16.vlgmr.msra.gmra.mrb[112].mxu0 %v8156_v8  ;;  %v17954_v8 = vld [vmem:[#allocation2 + $0xbf0] sm:$0xff]  }
0x126e   : > { %16210 = vmatpush3.bf16.msra.mxu0 %v17916_v56  ;;  %16225 = vmatprep.mubr.msk.bf16.mxu0 %vm18548_vm0, %v18547_v50  ;;  %v17955_v56 = vld [vmem:[#allocation2 + $0xbf8] sm:$0xff]  }
0x126f   : > { %16211 = vmatprep.subr.bf16.mxu0 %v18547_v50 }
0x1272   : > { %16212 = vmatpush3.bf16.msra.mxu0 %v17917_v48 }
0x1273   : > { %16213 = vmatprep.subr.bf16.mxu0 %v18547_v50 }
0x1276   : > { %16214 = vmatpush3.bf16.msra.mxu0 %v17918_v9 }
0x1277   : > { %16215 = vmatprep.subr.bf16.mxu0 %v18547_v50 }
0x127a   : > { %16216 = vmatpush3.bf16.msra.mxu0 %v17919_v18 }
0x127b   : > { %16217 = vmatprep.subr.bf16.mxu0 %v18547_v50 }
0x127e   : > { %16218 = vmatpush3.bf16.msra.mxu0 %v17920_v47 }
0x127f   : > { %16219 = vmatprep.subr.bf16.mxu0 %v18547_v50 }
0x1282   : > { %16220 = vmatpush3.bf16.msra.mxu0 %v17921_v2 }
0x1283   : > { %16221 = vmatprep.subr.bf16.mxu0 %v18547_v50 }
0x1286   : > { %16222 = vmatpush3.bf16.msra.mxu0 %v17922_v12  ;;  %v17956_v12 = vld [vmem:[#allocation2 + $0xc00] sm:$0xff]  }
0x1287   : > { %16223 = vmatprep.subr.bf16.mxu0 %v18547_v50 }
0x128a   : > { %16224 = vmatpush3.bf16.msra.mxu0 %v17923_v33  ;;  %v17957_v33 = vld [vmem:[#allocation2 + $0xc08] sm:$0xff]  }
0x128b   : > { %16235 = vmatprep.subr.bf16.mxu0 %v18547_v50 }
0x128d   : > { %16226 = vmatmul.mubr.bf16.vlgmr.msra.gmra.mrb[112].mxu0 %v8308_v42  ;;  %v17958_v42 = vld [vmem:[#allocation2 + $0xc10] sm:$0xff]  }
0x128e   : > { %16236 = vmatpush3.bf16.msra.mxu0 %v17924_v3  ;;  %16251 = vmatprep.mubr.msk.bf16.mxu0 %vm18548_vm0, %v18547_v50  ;;  %v17959_v3 = vld [vmem:[#allocation2 + $0xc18] sm:$0xff]  }
0x128f   : > { %16237 = vmatprep.subr.bf16.mxu0 %v18547_v50 }
0x1292   : > { %16238 = vmatpush3.bf16.msra.mxu0 %v17925_v19  ;;  %v17960_v19 = vld [vmem:[#allocation2 + $0xc20] sm:$0xff]  }
0x1293   : > { %16239 = vmatprep.subr.bf16.mxu0 %v18547_v50 }
0x1296   : > { %16240 = vmatpush3.bf16.msra.mxu0 %v17926_v26  ;;  %v17962_v26 = vld [vmem:[#allocation2 + $0xc30] sm:$0xff]  }
0x1297   : > { %16241 = vmatprep.subr.bf16.mxu0 %v18547_v50 }
0x129a   : > { %16242 = vmatpush3.bf16.msra.mxu0 %v17927_v27  ;;  %v17963_v27 = vld [vmem:[#allocation2 + $0xc38] sm:$0xff]  }
0x129b   : > { %16243 = vmatprep.subr.bf16.mxu0 %v18547_v50 }
0x129e   : > { %16244 = vmatpush3.bf16.msra.mxu0 %v17928_v34 }
0x129f   : > { %16245 = vmatprep.subr.bf16.mxu0 %v18547_v50 }
0x12a2   : > { %16246 = vmatpush3.bf16.msra.mxu0 %v17929_v6 }
0x12a3   : > { %16247 = vmatprep.subr.bf16.mxu0 %v18547_v50 }
0x12a6   : > { %16248 = vmatpush3.bf16.msra.mxu0 %v17930_v16 }
0x12a7   : > { %16249 = vmatprep.subr.bf16.mxu0 %v18547_v50 }
0x12aa   : > { %16250 = vmatpush3.bf16.msra.mxu0 %v17931_v17 }
0x12ab   : > { %16379 = vmatprep.subr.bf16.mxu0 %v18547_v50 }
0x12ad   : > { %16252 = vmatmul.mubr.bf16.vlgmr.msra.gmra.mrb[112].mxu0 %v8460_v21 }
0x12ae   : > { %16381 = vmatprep.mubr.msk.bf16.mxu0 %vm18548_vm0, %v18547_v50 }
0x1380   : > { %v8560_v14 = vpop.f32.mrb[112].mxu0 }
0x1381   : > { %v8572_v32 = vmul.f32 %v13571_v25, %v8560_v14  ;;  %v16253_v38 = vpop.f32.mrb[113].mxu0 }
0x1382   : > { %v8563_v10 = vpop.f32.mrb[114].mxu0 }
0x1383   : > { %v8578_v15 = vadd.f32 %v13572_v23, %v8572_v32  ;;  %v16254_v20 = vpop.f32.mrb[115].mxu0 }
0x1385   : > { %v8579_v55 = vmax.f32 %v8578_v15, 0.0  ;;  %v17964_v15 = vld [vmem:[#allocation2 + $0xc40] sm:$0xff]  }
0x1387   : > { %v20243_v62 = vpack.c.bf16 %v8579_v55, %v8579_v55 }
0x1389   : > { %v20247_v0 = vsel %vm7248_vm3, %v20243_v62, 0 }
0x138a   : > { %16256 = vmatpush3.bf16.msra.mxu1 %v20247_v0  ;;  %16380 = vmatpush3.bf16.msra.mxu0 %v20247_v0 }
0x138b   : > { %16261 = vmatprep.subr.bf16.mxu1 %v18547_v50  ;;  %16405 = vmatprep.subr.bf16.mxu0 %v18547_v50 }
0x138d   : > { %16258 = vmatmul.mubr.msk.bf16.vlgmr.msra.gmra.mrb[180].mxu1 %vm7244_vm4, %v20053_v24  ;;  %16382 = vmatmul.mubr.msk.bf16.vlgmr.msra.gmra.mrb[124].mxu0 %vm7244_vm4, %v20058_v30  ;;  %v17933_v24 = vld [vmem:[#allocation2 + $0xb88] sm:$0xff]   ;;  %v17934_v30 = vld [vmem:[#allocation2 + $0xb90] sm:$0xff]  }
0x138e   : > { %16262 = vmatpush3.bf16.msra.mxu1 %v20247_v0  ;;  %16406 = vmatpush3.bf16.msra.mxu0 %v20247_v0 }
0x138f   : > { %16263 = vmatprep.mubr.msk.bf16.mxu1 %vm18548_vm0, %v18547_v50  ;;  %16407 = vmatprep.mubr.msk.bf16.mxu0 %vm18548_vm0, %v18547_v50 }
0x1390   : > { %16431 = vmatprep.subr.bf16.mxu0 %v18547_v50  ;;  %16267 = vmatprep.subr.bf16.mxu1 %v18547_v50 }
0x1395   : > { %16264 = vmatmul.mubr.msk.bf16.vlgmr.msra.gmra.mrb[184].mxu1 %vm7244_vm4, %v20077_v35  ;;  %16408 = vmatmul.mubr.msk.bf16.vlgmr.msra.gmra.mrb[128].mxu0 %vm7244_vm4, %v20082_v39  ;;  %v17935_v35 = vld [vmem:[#allocation2 + $0xb98] sm:$0xff]   ;;  %v17936_v39 = vld [vmem:[#allocation2 + $0xba0] sm:$0xff]  }
0x1396   : > { %16432 = vmatpush3.bf16.msra.mxu0 %v20247_v0  ;;  %16433 = vmatprep.mubr.msk.bf16.mxu0 %vm18548_vm0, %v18547_v50 }
0x1397   : > { %16457 = vmatprep.subr.bf16.mxu0 %v18547_v50  ;;  %16268 = vmatpush3.bf16.msra.mxu1 %v17932_v63 }
0x1398   : > { %16269 = vmatprep.subr.bf16.mxu1 %v18547_v50  ;;  %16283 = vmatprep.mubr.msk.bf16.mxu1 %vm18548_vm0, %v18547_v50 }
0x139b   : > { %16270 = vmatpush3.bf16.msra.mxu1 %v17933_v24 }
0x139c   : > { %16271 = vmatprep.subr.bf16.mxu1 %v18547_v50 }
0x139d   : > { %16434 = vmatmul.mubr.msk.bf16.vlgmr.msra.gmra.mrb[132].mxu0 %vm7244_vm4, %v20098_v13  ;;  %v17937_v13 = vld [vmem:[#allocation2 + $0xba8] sm:$0xff]  }
0x139e   : > { %16458 = vmatpush3.bf16.msra.mxu0 %v20247_v0  ;;  %16459 = vmatprep.mubr.msk.bf16.mxu0 %vm18548_vm0, %v18547_v50 }
0x139f   : > { %16272 = vmatpush3.bf16.msra.mxu1 %v17934_v30  ;;  %16483 = vmatprep.subr.bf16.mxu0 %v18547_v50 }
0x13a0   : > { %16273 = vmatprep.subr.bf16.mxu1 %v18547_v50 }
0x13a3   : > { %16274 = vmatpush3.bf16.msra.mxu1 %v17935_v35  ;;  %v17965_v35 = vld [vmem:[#allocation2 + $0xc48] sm:$0xff]  }
0x13a4   : > { %16275 = vmatprep.subr.bf16.mxu1 %v18547_v50 }
0x13a5   : > { %16460 = vmatmul.mubr.msk.bf16.vlgmr.msra.gmra.mrb[136].mxu0 %vm7244_vm4, %v20147_v59 }
0x13a6   : > { %16485 = vmatprep.mubr.msk.bf16.mxu0 %vm18548_vm0, %v18547_v50 }
0x13a7   : > { %16276 = vmatpush3.bf16.msra.mxu1 %v17936_v39  ;;  %v17966_v39 = vld [vmem:[#allocation2 + $0xc50] sm:$0xff]  }
0x13a8   : > { %16277 = vmatprep.subr.bf16.mxu1 %v18547_v50 }
0x13ab   : > { %16278 = vmatpush3.bf16.msra.mxu1 %v17937_v13  ;;  %v17967_v13 = vld [vmem:[#allocation2 + $0xc58] sm:$0xff]  }
0x13ac   : > { %16279 = vmatprep.subr.bf16.mxu1 %v18547_v50 }
0x13af   : > { %16280 = vmatpush3.bf16.msra.mxu1 %v17938_v4  ;;  %v17968_v4 = vld [vmem:[#allocation2 + $0xc60] sm:$0xff]  }
0x13b0   : > { %16281 = vmatprep.subr.bf16.mxu1 %v18547_v50 }
0x13b3   : > { %16282 = vmatpush3.bf16.msra.mxu1 %v17939_v5  ;;  %v17969_v5 = vld [vmem:[#allocation2 + $0xc68] sm:$0xff]  }
0x13b4   : > { %16287 = vmatprep.subr.bf16.mxu1 %v18547_v50 }
0x1460   : > { %v8618_v29 = vpop.f32.mrb[180].mxu1  ;;  %v20335_v34 = vpop.f32.mrb[124].mxu0 }
0x1461   : > { %v16259_v59 = vpop.f32.mrb[181].mxu1  ;;  %v8624_v36 = vpack.c.bf16 %v8618_v29, %v8618_v29  ;;  %v16383_v6 = vpop.f32.mrb[125].mxu0  ;;  %v17970_v29 = vld [vmem:[#allocation2 + $0xc70] sm:$0xff]  }
0x1462   : > { %v8621_v60 = vpop.f32.mrb[182].mxu1  ;;  %v9313_v16 = vpop.f32.mrb[126].mxu0  ;;  %v17971_v59 = vld [vmem:[#allocation2 + $0xc78] sm:$0xff]  }
0x1463   : > { %v16260_v43 = vpop.f32.mrb[183].mxu1  ;;  %v16384_v17 = vpop.f32.mrb[127].mxu0  ;;  %v13653_v16 = vld [vmem:[#allocation5 + $0x5] ss:$0 sm:$0xff] }
0x1468   : > { %v8676_v53 = vpop.f32.mrb[184].mxu1  ;;  %v20337_v21 = vpop.f32.mrb[128].mxu0 }
0x1469   : > { %v8682_v58 = vpack.c.bf16 %v8676_v53, %v8676_v53  ;;  %v16265_v31 = vpop.f32.mrb[185].mxu1  ;;  %v16409_v25 = vpop.f32.mrb[129].mxu0 }
0x146a   : > { %v8679_v37 = vpop.f32.mrb[186].mxu1  ;;  %v9460_v14 = vpop.f32.mrb[130].mxu0  ;;  %v17973_v31 = vld [vmem:[#allocation2 + $0xc88] sm:$0xff]  }
0x146b   : > { %16284 = vmatmul.mubr.bf16.vlgmr.msra.gmra.mrb[188].mxu1 %v8682_v58  ;;  %v16266_v41 = vpop.f32.mrb[187].mxu1  ;;  %v16410_v23 = vpop.f32.mrb[131].mxu0  ;;  %v17974_v37 = vld [vmem:[#allocation2 + $0xc90] sm:$0xff]  }
0x146c   : > { %16288 = vmatpush3.bf16.msra.mxu1 %v17940_v54  ;;  %16303 = vmatprep.mubr.msk.bf16.mxu1 %vm18548_vm0, %v18547_v50  ;;  %v17972_v54 = vld [vmem:[#allocation2 + $0xc80] sm:$0xff]   ;;  %v17975_v41 = vld [vmem:[#allocation2 + $0xc98] sm:$0xff]  }
0x146d   : > { %16289 = vmatprep.subr.bf16.mxu1 %v18547_v50 }
0x1470   : > { %16290 = vmatpush3.bf16.msra.mxu1 %v17941_v7  ;;  %v20339_v32 = vpop.f32.mrb[132].mxu0  ;;  %v17976_v7 = vld [vmem:[#allocation2 + $0xca0] sm:$0xff]  }
0x1471   : > { %16291 = vmatprep.subr.bf16.mxu1 %v18547_v50  ;;  %v16435_v38 = vpop.f32.mrb[133].mxu0 }
0x1472   : > { %v9607_v20 = vpop.f32.mrb[134].mxu0 }
0x1473   : > { %v16436_v63 = vpop.f32.mrb[135].mxu0 }
0x1474   : > { %16292 = vmatpush3.bf16.msra.mxu1 %v17942_v44  ;;  %v17978_v44 = vld [vmem:[#allocation2 + $0xcb0] sm:$0xff]   ;;  %v18004_v63 = vld [vmem:[#allocation2 + $0xdc0] sm:$0xff]  }
0x1475   : > { %16293 = vmatprep.subr.bf16.mxu1 %v18547_v50 }
0x1478   : > { %16294 = vmatpush3.bf16.msra.mxu1 %v17943_v11  ;;  %v20350_v60 = vpop.f32.mrb[136].mxu0  ;;  %v17979_v11 = vld [vmem:[#allocation2 + $0xcb8] sm:$0xff]  }
0x1479   : > { %16295 = vmatprep.subr.bf16.mxu1 %v18547_v50  ;;  %v16461_v43 = vpop.f32.mrb[137].mxu0  ;;  %v9757_v6 = vpack.c.bf16 %v20350_v60, %v20350_v60  ;;  %v18010_v60 = vld [vmem:[#allocation2 + $0xdf0] sm:$0xff]  }
0x147a   : > { %v9754_v53 = vpop.f32.mrb[138].mxu0  ;;  %v18011_v43 = vld [vmem:[#allocation2 + $0xdf8] sm:$0xff]  }
0x147b   : > { %v16462_v58 = vpop.f32.mrb[139].mxu0 }
0x147c   : > { %16296 = vmatpush3.bf16.msra.mxu1 %v17944_v45  ;;  %v9316_v45 = vpack.c.bf16 %v20335_v34, %v20335_v34  ;;  %v18003_v34 = vld [vmem:[#allocation2 + $0xd78] sm:$0xff]  }
0x147d   : > { %16297 = vmatprep.subr.bf16.mxu1 %v18547_v50 }
0x1480   : > { %16298 = vmatpush3.bf16.msra.mxu1 %v17945_v52  ;;  %v17980_v52 = vld [vmem:[#allocation2 + $0xcc0] sm:$0xff]  }
0x1481   : > { %16299 = vmatprep.subr.bf16.mxu1 %v18547_v50 }
0x1484   : > { %16300 = vmatpush3.bf16.msra.mxu1 %v17946_v1  ;;  %v17981_v1 = vld [vmem:[#allocation2 + $0xcc8] sm:$0xff]  }
0x1485   : > { %16301 = vmatprep.subr.bf16.mxu1 %v18547_v50 }
0x1488   : > { %16302 = vmatpush3.bf16.msra.mxu1 %v17947_v28  ;;  %v17982_v28 = vld [vmem:[#allocation2 + $0xcd0] sm:$0xff]  }
0x1489   : > { %16307 = vmatprep.subr.bf16.mxu1 %v18547_v50 }
0x148b   : > { %16304 = vmatmul.mubr.bf16.vlgmr.msra.gmra.mrb[188].mxu1 %v8624_v36  ;;  %v17983_v36 = vld [vmem:[#allocation2 + $0xcd8] sm:$0xff]  }
0x148c   : > { %16308 = vmatpush3.bf16.msra.mxu1 %v20247_v0  ;;  %16309 = vmatprep.mubr.msk.bf16.mxu1 %vm18548_vm0, %v18547_v50 }
0x148d   : > { %16313 = vmatprep.subr.bf16.mxu1 %v18547_v50 }
0x1493   : > { %16310 = vmatmul.mubr.msk.bf16.vlgmr.msra.gmra.mrb[192].mxu1 %vm7244_vm4, %v20130_v49  ;;  %v17953_v49 = vld [vmem:[#allocation2 + $0xbe8] sm:$0xff]  }
0x1494   : > { %16314 = vmatpush3.bf16.msra.mxu1 %v17948_v40  ;;  %16329 = vmatprep.mubr.msk.bf16.mxu1 %vm18548_vm0, %v18547_v50  ;;  %v17984_v40 = vld [vmem:[#allocation2 + $0xce0] sm:$0xff]  }
0x1495   : > { %16315 = vmatprep.subr.bf16.mxu1 %v18547_v50 }
0x1498   : > { %16316 = vmatpush3.bf16.msra.mxu1 %v17949_v57  ;;  %v17985_v57 = vld [vmem:[#allocation2 + $0xce8] sm:$0xff]  }
0x1499   : > { %16317 = vmatprep.subr.bf16.mxu1 %v18547_v50 }
0x149c   : > { %16318 = vmatpush3.bf16.msra.mxu1 %v17950_v61  ;;  %v17986_v61 = vld [vmem:[#allocation2 + $0xcf0] sm:$0xff]  }
0x149d   : > { %16319 = vmatprep.subr.bf16.mxu1 %v18547_v50 }
0x14a0   : > { %16320 = vmatpush3.bf16.msra.mxu1 %v17951_v22  ;;  %v17987_v22 = vld [vmem:[#allocation2 + $0xcf8] sm:$0xff]  }
0x14a1   : > { %16321 = vmatprep.subr.bf16.mxu1 %v18547_v50 }
0x14a4   : > { %16322 = vmatpush3.bf16.msra.mxu1 %v17952_v46  ;;  %v9463_v46 = vpack.c.bf16 %v20337_v21, %v20337_v21  ;;  %v13654_v21 = vld [vmem:[#allocation7 + $0x5] ss:$0 sm:$0xff] }
0x14a5   : > { %16323 = vmatprep.subr.bf16.mxu1 %v18547_v50 }
0x14a8   : > { %16324 = vmatpush3.bf16.msra.mxu1 %v17953_v49  ;;  %v17988_v49 = vld [vmem:[#allocation2 + $0xd00] sm:$0xff]  }
0x14a9   : > { %16325 = vmatprep.subr.bf16.mxu1 %v18547_v50 }
0x14ac   : > { %16326 = vmatpush3.bf16.msra.mxu1 %v17954_v8  ;;  %v17989_v8 = vld [vmem:[#allocation2 + $0xd08] sm:$0xff]  }
0x14ad   : > { %16327 = vmatprep.subr.bf16.mxu1 %v18547_v50 }
0x14b0   : > { %16328 = vmatpush3.bf16.msra.mxu1 %v17955_v56  ;;  %v17990_v56 = vld [vmem:[#allocation2 + $0xd10] sm:$0xff]  }
0x14b1   : > { %16333 = vmatprep.subr.bf16.mxu1 %v18547_v50 }
0x1566   : > { %v8910_v48 = vpop.f32.mrb[192].mxu1 }
0x1567   : > { %v8916_v9 = vpack.c.bf16 %v8910_v48, %v8910_v48  ;;  %v16311_v18 = vpop.f32.mrb[193].mxu1  ;;  %v17991_v48 = vld [vmem:[#allocation2 + $0xd18] sm:$0xff]  }
0x1568   : > { %v8913_v47 = vpop.f32.mrb[194].mxu1  ;;  %v17993_v18 = vld [vmem:[#allocation2 + $0xd28] sm:$0xff]  }
0x1569   : > { %16330 = vmatmul.mubr.bf16.vlgmr.msra.gmra.mrb[188].mxu1 %v8916_v9  ;;  %v16312_v2 = vpop.f32.mrb[195].mxu1  ;;  %v17992_v9 = vld [vmem:[#allocation2 + $0xd20] sm:$0xff]   ;;  %v17994_v47 = vld [vmem:[#allocation2 + $0xd30] sm:$0xff]  }
0x156a   : > { %16334 = vmatpush3.bf16.msra.mxu1 %v20247_v0  ;;  %16335 = vmatprep.mubr.msk.bf16.mxu1 %vm18548_vm0, %v18547_v50  ;;  %v17995_v2 = vld [vmem:[#allocation2 + $0xd38] sm:$0xff]  }
0x156b   : > { %16339 = vmatprep.subr.bf16.mxu1 %v18547_v50 }
0x1571   : > { %16336 = vmatmul.mubr.msk.bf16.vlgmr.msra.gmra.mrb[196].mxu1 %vm7244_vm4, %v20160_v51  ;;  %v17961_v51 = vld [vmem:[#allocation2 + $0xc28] sm:$0xff]  }
0x1572   : > { %16340 = vmatpush3.bf16.msra.mxu1 %v17956_v12  ;;  %16355 = vmatprep.mubr.msk.bf16.mxu1 %vm18548_vm0, %v18547_v50  ;;  %v9610_v12 = vpack.c.bf16 %v20339_v32, %v20339_v32 }
0x1573   : > { %16341 = vmatprep.subr.bf16.mxu1 %v18547_v50 }
0x1576   : > { %16342 = vmatpush3.bf16.msra.mxu1 %v17957_v33  ;;  %v17996_v33 = vld [vmem:[#allocation2 + $0xd40] sm:$0xff]  }
0x1577   : > { %16343 = vmatprep.subr.bf16.mxu1 %v18547_v50 }
0x157a   : > { %16344 = vmatpush3.bf16.msra.mxu1 %v17958_v42  ;;  %v17997_v42 = vld [vmem:[#allocation2 + $0xd48] sm:$0xff]  }
0x157b   : > { %16345 = vmatprep.subr.bf16.mxu1 %v18547_v50 }
0x157e   : > { %16346 = vmatpush3.bf16.msra.mxu1 %v17959_v3  ;;  %v17998_v3 = vld [vmem:[#allocation2 + $0xd50] sm:$0xff]  }
0x157f   : > { %16347 = vmatprep.subr.bf16.mxu1 %v18547_v50 }
0x1582   : > { %16348 = vmatpush3.bf16.msra.mxu1 %v17960_v19  ;;  %v17999_v19 = vld [vmem:[#allocation2 + $0xd58] sm:$0xff]  }
0x1583   : > { %16349 = vmatprep.subr.bf16.mxu1 %v18547_v50 }
0x1586   : > { %16350 = vmatpush3.bf16.msra.mxu1 %v17961_v51  ;;  %v18000_v51 = vld [vmem:[#allocation2 + $0xd60] sm:$0xff]  }
0x1587   : > { %16351 = vmatprep.subr.bf16.mxu1 %v18547_v50 }
0x158a   : > { %16352 = vmatpush3.bf16.msra.mxu1 %v17962_v26  ;;  %v18001_v26 = vld [vmem:[#allocation2 + $0xd68] sm:$0xff]  }
0x158b   : > { %16353 = vmatprep.subr.bf16.mxu1 %v18547_v50 }
0x158e   : > { %16354 = vmatpush3.bf16.msra.mxu1 %v17963_v27  ;;  %v18002_v27 = vld [vmem:[#allocation2 + $0xd70] sm:$0xff]  }
0x158f   : > { %16359 = vmatprep.subr.bf16.mxu1 %v18547_v50 }
0x1644   : > { %v9057_v10 = vpop.f32.mrb[196].mxu1 }
0x1645   : > { %v9063_v55 = vpack.c.bf16 %v9057_v10, %v9057_v10  ;;  %v16337_v0 = vpop.f32.mrb[197].mxu1 }
0x1646   : > { %v9060_v24 = vpop.f32.mrb[198].mxu1  ;;  %v18189_v0 = vld [vmem:[%s20841_s8 + $0xa] sm:$0x3] }
0x1647   : > { %16356 = vmatmul.mubr.bf16.vlgmr.msra.gmra.mrb[188].mxu1 %v9063_v55  ;;  %v16338_v30 = vpop.f32.mrb[199].mxu1  ;;  %v18188_v55 = vld [vmem:[%s20841_s8] sm:$0x3]  ;;  %v18190_v24 = vld [vmem:[%s20841_s8 + $0x2] sm:$0x3] }
0x1648   : > { %16360 = vmatpush3.bf16.msra.mxu1 %v17964_v15  ;;  %16375 = vmatprep.mubr.msk.bf16.mxu1 %vm18548_vm0, %v18547_v50  ;;  %v18191_v30 = vld [vmem:[%s20841_s8 + $0xc] sm:$0x3] }
0x1649   : > { %16361 = vmatprep.subr.bf16.mxu1 %v18547_v50 }
0x164c   : > { %16362 = vmatpush3.bf16.msra.mxu1 %v17965_v35  ;;  %v18005_v35 = vld [vmem:[#allocation2 + $0xdc8] sm:$0xff]  }
0x164d   : > { %16363 = vmatprep.subr.bf16.mxu1 %v18547_v50 }
0x1650   : > { %16364 = vmatpush3.bf16.msra.mxu1 %v17966_v39  ;;  %v18006_v39 = vld [vmem:[#allocation2 + $0xdd0] sm:$0xff]  }
0x1651   : > { %16365 = vmatprep.subr.bf16.mxu1 %v18547_v50 }
0x1654   : > { %16366 = vmatpush3.bf16.msra.mxu1 %v17967_v13  ;;  %v18192_v13 = vld [vmem:[%s20841_s8 + $0xe] sm:$0x3] }
0x1655   : > { %16367 = vmatprep.subr.bf16.mxu1 %v18547_v50 }
0x1658   : > { %16368 = vmatpush3.bf16.msra.mxu1 %v17968_v4  ;;  %v18007_v4 = vld [vmem:[#allocation2 + $0xdd8] sm:$0xff]  }
0x1659   : > { %16369 = vmatprep.subr.bf16.mxu1 %v18547_v50 }
0x165c   : > { %16370 = vmatpush3.bf16.msra.mxu1 %v17969_v5  ;;  %v18008_v5 = vld [vmem:[#allocation2 + $0xde0] sm:$0xff]  }
0x165d   : > { %16371 = vmatprep.subr.bf16.mxu1 %v18547_v50 }
0x1660   : > { %16372 = vmatpush3.bf16.msra.mxu1 %v17970_v29  ;;  %v18193_v29 = vld [vmem:[%s20841_s8 + $0x10] sm:$0x3] }
0x1661   : > { %16373 = vmatprep.subr.bf16.mxu1 %v18547_v50 }
0x1664   : > { %16374 = vmatpush3.bf16.msra.mxu1 %v17971_v59  ;;  %v18009_v59 = vld [vmem:[#allocation2 + $0xde8] sm:$0xff]  }
0x1665   : > { %16385 = vmatprep.subr.bf16.mxu1 %v18547_v50 }
0x1667   : > { %16376 = vmatmul.mubr.bf16.vlgmr.msra.gmra.mrb[188].mxu1 %v20243_v62  ;;  %v17977_v62 = vld [vmem:[#allocation2 + $0xca8] sm:$0xff]  }
0x1668   : > { %16386 = vmatpush3.bf16.msra.mxu1 %v17972_v54  ;;  %16401 = vmatprep.mubr.msk.bf16.mxu1 %vm18548_vm0, %v18547_v50 }
0x1669   : > { %16387 = vmatprep.subr.bf16.mxu1 %v18547_v50 }
0x166c   : > { %16388 = vmatpush3.bf16.msra.mxu1 %v17973_v31 }
0x166d   : > { %16389 = vmatprep.subr.bf16.mxu1 %v18547_v50 }
0x1670   : > { %16390 = vmatpush3.bf16.msra.mxu1 %v17974_v37 }
0x1671   : > { %16391 = vmatprep.subr.bf16.mxu1 %v18547_v50 }
0x1674   : > { %16392 = vmatpush3.bf16.msra.mxu1 %v17975_v41  ;;  %v18012_v41 = vld [vmem:[#allocation2 + $0xd80] sm:$0xff]  }
0x1675   : > { %16393 = vmatprep.subr.bf16.mxu1 %v18547_v50 }
0x1678   : > { %16394 = vmatpush3.bf16.msra.mxu1 %v17976_v7 }
0x1679   : > { %16395 = vmatprep.subr.bf16.mxu1 %v18547_v50 }
0x167c   : > { %16396 = vmatpush3.bf16.msra.mxu1 %v17977_v62 }
0x167d   : > { %16397 = vmatprep.subr.bf16.mxu1 %v18547_v50 }
0x1680   : > { %16398 = vmatpush3.bf16.msra.mxu1 %v17978_v44 }
0x1681   : > { %16399 = vmatprep.subr.bf16.mxu1 %v18547_v50 }
0x1684   : > { %16400 = vmatpush3.bf16.msra.mxu1 %v17979_v11 }
0x1685   : > { %16411 = vmatprep.subr.bf16.mxu1 %v18547_v50 }
0x1687   : > { %16402 = vmatmul.mubr.bf16.vlgmr.msra.gmra.mrb[188].mxu1 %v9316_v45  ;;  %v18013_v45 = vld [vmem:[#allocation2 + $0xd88] sm:$0xff]  }
0x1688   : > { %16412 = vmatpush3.bf16.msra.mxu1 %v17980_v52  ;;  %16427 = vmatprep.mubr.msk.bf16.mxu1 %vm18548_vm0, %v18547_v50  ;;  %v18014_v52 = vld [vmem:[#allocation2 + $0xd90] sm:$0xff]  }
0x1689   : > { %16413 = vmatprep.subr.bf16.mxu1 %v18547_v50 }
0x168c   : > { %16414 = vmatpush3.bf16.msra.mxu1 %v17981_v1  ;;  %v18015_v1 = vld [vmem:[#allocation2 + $0xd98] sm:$0xff]  }
0x168d   : > { %16415 = vmatprep.subr.bf16.mxu1 %v18547_v50 }
0x1690   : > { %16416 = vmatpush3.bf16.msra.mxu1 %v17982_v28  ;;  %v18016_v28 = vld [vmem:[#allocation2 + $0xda0] sm:$0xff]  }
0x1691   : > { %16417 = vmatprep.subr.bf16.mxu1 %v18547_v50 }
0x1694   : > { %16418 = vmatpush3.bf16.msra.mxu1 %v17983_v36  ;;  %v18017_v36 = vld [vmem:[#allocation2 + $0xda8] sm:$0xff]  }
0x1695   : > { %16419 = vmatprep.subr.bf16.mxu1 %v18547_v50 }
0x1698   : > { %16420 = vmatpush3.bf16.msra.mxu1 %v17984_v40  ;;  %v18018_v40 = vld [vmem:[#allocation2 + $0xdb0] sm:$0xff]  }
0x1699   : > { %16421 = vmatprep.subr.bf16.mxu1 %v18547_v50 }
0x169c   : > { %16422 = vmatpush3.bf16.msra.mxu1 %v17985_v57  ;;  %v18019_v57 = vld [vmem:[#allocation2 + $0xdb8] sm:$0xff]  }
0x169d   : > { %16423 = vmatprep.subr.bf16.mxu1 %v18547_v50 }
0x16a0   : > { %16424 = vmatpush3.bf16.msra.mxu1 %v17986_v61 }
0x16a1   : > { %16425 = vmatprep.subr.bf16.mxu1 %v18547_v50 }
0x16a4   : > { %16426 = vmatpush3.bf16.msra.mxu1 %v17987_v22  ;;  %v18020_v22 = vld [vmem:[#allocation2 + $0xe00] sm:$0xff]  }
0x16a5   : > { %16437 = vmatprep.subr.bf16.mxu1 %v18547_v50 }
0x16a7   : > { %16428 = vmatmul.mubr.bf16.vlgmr.msra.gmra.mrb[188].mxu1 %v9463_v46  ;;  %v18194_v46 = vld [vmem:[%s20841_s8 + $0x4] sm:$0x3] }
0x16a8   : > { %16438 = vmatpush3.bf16.msra.mxu1 %v17988_v49  ;;  %16453 = vmatprep.mubr.msk.bf16.mxu1 %vm18548_vm0, %v18547_v50  ;;  %v18021_v49 = vld [vmem:[#allocation2 + $0xe08] sm:$0xff]  }
0x16a9   : > { %16439 = vmatprep.subr.bf16.mxu1 %v18547_v50 }
0x16ac   : > { %16440 = vmatpush3.bf16.msra.mxu1 %v17989_v8  ;;  %v18022_v8 = vld [vmem:[#allocation2 + $0xe10] sm:$0xff]  }
0x16ad   : > { %16441 = vmatprep.subr.bf16.mxu1 %v18547_v50 }
0x16b0   : > { %16442 = vmatpush3.bf16.msra.mxu1 %v17990_v56  ;;  %v18023_v56 = vld [vmem:[#allocation2 + $0xe18] sm:$0xff]  }
0x16b1   : > { %16443 = vmatprep.subr.bf16.mxu1 %v18547_v50 }
0x16b4   : > { %16444 = vmatpush3.bf16.msra.mxu1 %v17991_v48  ;;  %v18024_v48 = vld [vmem:[#allocation2 + $0xe20] sm:$0xff]  }
0x16b5   : > { %16445 = vmatprep.subr.bf16.mxu1 %v18547_v50 }
0x16b8   : > { %16446 = vmatpush3.bf16.msra.mxu1 %v17992_v9  ;;  %v18025_v9 = vld [vmem:[#allocation2 + $0xe28] sm:$0xff]  }
0x16b9   : > { %16447 = vmatprep.subr.bf16.mxu1 %v18547_v50 }
0x16bc   : > { %16448 = vmatpush3.bf16.msra.mxu1 %v17993_v18  ;;  %v18026_v18 = vld [vmem:[#allocation2 + $0xe30] sm:$0xff]  }
0x16bd   : > { %16449 = vmatprep.subr.bf16.mxu1 %v18547_v50 }
0x16c0   : > { %16450 = vmatpush3.bf16.msra.mxu1 %v17994_v47  ;;  %v18027_v47 = vld [vmem:[#allocation2 + $0xe38] sm:$0xff]  }
0x16c1   : > { %16451 = vmatprep.subr.bf16.mxu1 %v18547_v50 }
0x16c4   : > { %16452 = vmatpush3.bf16.msra.mxu1 %v17995_v2 }
0x16c5   : > { %16463 = vmatprep.subr.bf16.mxu1 %v18547_v50 }
0x16c7   : > { %16454 = vmatmul.mubr.bf16.vlgmr.msra.gmra.mrb[188].mxu1 %v9610_v12 }
0x16c8   : > { %16464 = vmatpush3.bf16.msra.mxu1 %v17996_v33  ;;  %16479 = vmatprep.mubr.msk.bf16.mxu1 %vm18548_vm0, %v18547_v50 }
0x16c9   : > { %16465 = vmatprep.subr.bf16.mxu1 %v18547_v50 }
0x16cc   : > { %16466 = vmatpush3.bf16.msra.mxu1 %v17997_v42 }
0x16cd   : > { %16467 = vmatprep.subr.bf16.mxu1 %v18547_v50 }
0x16d0   : > { %16468 = vmatpush3.bf16.msra.mxu1 %v17998_v3 }
0x16d1   : > { %16469 = vmatprep.subr.bf16.mxu1 %v18547_v50 }
0x16d4   : > { %16470 = vmatpush3.bf16.msra.mxu1 %v17999_v19  ;;  %v18028_v19 = vld [vmem:[#allocation2 + $0xe40] sm:$0xff]  }
0x16d5   : > { %16471 = vmatprep.subr.bf16.mxu1 %v18547_v50 }
0x16d8   : > { %16472 = vmatpush3.bf16.msra.mxu1 %v18000_v51  ;;  %v18195_v51 = vld [vmem:[%s20841_s8 + $0x6] sm:$0x3] }
0x16d9   : > { %16473 = vmatprep.subr.bf16.mxu1 %v18547_v50 }
0x16dc   : > { %16474 = vmatpush3.bf16.msra.mxu1 %v18001_v26  ;;  %v18029_v26 = vld [vmem:[#allocation2 + $0xe48] sm:$0xff]  }
0x16dd   : > { %16475 = vmatprep.subr.bf16.mxu1 %v18547_v50 }
0x16e0   : > { %16476 = vmatpush3.bf16.msra.mxu1 %v18002_v27  ;;  %v18030_v27 = vld [vmem:[#allocation2 + $0xe50] sm:$0xff]  }
0x16e1   : > { %16477 = vmatprep.subr.bf16.mxu1 %v18547_v50 }
0x16e4   : > { %16478 = vmatpush3.bf16.msra.mxu1 %v18003_v34  ;;  %v18031_v34 = vld [vmem:[#allocation2 + $0xe58] sm:$0xff]  }
0x16e5   : > { %16607 = vmatprep.subr.bf16.mxu1 %v18547_v50 }
0x16e7   : > { %16480 = vmatmul.mubr.bf16.vlgmr.msra.gmra.mrb[188].mxu1 %v9757_v6  ;;  %v18032_v6 = vld [vmem:[#allocation2 + $0xe60] sm:$0xff]  }
0x16e8   : > { %16609 = vmatprep.mubr.msk.bf16.mxu1 %vm18548_vm0, %v18547_v50 }
0x17ba   : > { %v9857_v17 = vpop.f32.mrb[188].mxu1 }
0x17bb   : > { %v9869_v25 = vmul.f32 %v13653_v16, %v9857_v17  ;;  %v16481_v14 = vpop.f32.mrb[189].mxu1  ;;  %v18033_v16 = vld [vmem:[#allocation2 + $0xe68] sm:$0xff]   ;;  %v18034_v17 = vld [vmem:[#allocation2 + $0xe70] sm:$0xff]  }
0x17bc   : > { %v9860_v23 = vpop.f32.mrb[190].mxu1 }
0x17bd   : > { %v9875_v32 = vadd.f32 %v13654_v21, %v9869_v25  ;;  %v16482_v38 = vpop.f32.mrb[191].mxu1  ;;  %v18035_v21 = vld [vmem:[#allocation2 + $0xe78] sm:$0xff]  }
0x17bf   : > { %v9876_v10 = vmax.f32 %v9875_v32, 0.0 }
0x17c1   : > { %v20404_v15 = vpack.c.bf16 %v9876_v10, %v9876_v10 }
0x17c3   : > { %v20408_v20 = vsel %vm7248_vm3, %v20404_v15, 0 }
0x17c4   : > { %16484 = vmatpush3.bf16.msra.mxu0 %v20408_v20  ;;  %16608 = vmatpush3.bf16.msra.mxu1 %v20408_v20 }
0x17c5   : > { %16489 = vmatprep.subr.bf16.mxu0 %v18547_v50  ;;  %16633 = vmatprep.subr.bf16.mxu1 %v18547_v50 }
0x17c7   : > { %16486 = vmatmul.mubr.msk.bf16.vlgmr.msra.gmra.mrb[140].mxu0 %vm7244_vm4, %v18188_v55  ;;  %16610 = vmatmul.mubr.msk.bf16.vlgmr.msra.gmra.mrb[200].mxu1 %vm7244_vm4, %v18189_v0 }
0x17c8   : > { %16490 = vmatpush3.bf16.msra.mxu0 %v20408_v20  ;;  %16634 = vmatpush3.bf16.msra.mxu1 %v20408_v20 }
0x17c9   : > { %16491 = vmatprep.mubr.msk.bf16.mxu0 %vm18548_vm0, %v18547_v50  ;;  %16635 = vmatprep.mubr.msk.bf16.mxu1 %vm18548_vm0, %v18547_v50 }
0x17ca   : > { %16659 = vmatprep.subr.bf16.mxu1 %v18547_v50  ;;  %16495 = vmatprep.subr.bf16.mxu0 %v18547_v50 }
0x17cf   : > { %16492 = vmatmul.mubr.msk.bf16.vlgmr.msra.gmra.mrb[144].mxu0 %vm7244_vm4, %v18190_v24  ;;  %16636 = vmatmul.mubr.msk.bf16.vlgmr.msra.gmra.mrb[204].mxu1 %vm7244_vm4, %v18191_v30  ;;  %v18036_v30 = vld [vmem:[#allocation2 + $0xe80] sm:$0xff]  }
0x17d0   : > { %16660 = vmatpush3.bf16.msra.mxu1 %v20408_v20  ;;  %16661 = vmatprep.mubr.msk.bf16.mxu1 %vm18548_vm0, %v18547_v50 }
0x17d1   : > { %16685 = vmatprep.subr.bf16.mxu1 %v18547_v50  ;;  %16496 = vmatpush3.bf16.msra.mxu0 %v18004_v63 }
0x17d2   : > { %16497 = vmatprep.subr.bf16.mxu0 %v18547_v50  ;;  %16511 = vmatprep.mubr.msk.bf16.mxu0 %vm18548_vm0, %v18547_v50 }
0x17d5   : > { %16498 = vmatpush3.bf16.msra.mxu0 %v18005_v35 }
0x17d6   : > { %16499 = vmatprep.subr.bf16.mxu0 %v18547_v50 }
0x17d7   : > { %16662 = vmatmul.mubr.msk.bf16.vlgmr.msra.gmra.mrb[208].mxu1 %vm7244_vm4, %v18192_v13 }
0x17d8   : > { %16686 = vmatpush3.bf16.msra.mxu1 %v20408_v20  ;;  %16687 = vmatprep.mubr.msk.bf16.mxu1 %vm18548_vm0, %v18547_v50 }
0x17d9   : > { %16500 = vmatpush3.bf16.msra.mxu0 %v18006_v39  ;;  %16711 = vmatprep.subr.bf16.mxu1 %v18547_v50 }
0x17da   : > { %16501 = vmatprep.subr.bf16.mxu0 %v18547_v50 }
0x17dd   : > { %16502 = vmatpush3.bf16.msra.mxu0 %v18007_v4 }
0x17de   : > { %16503 = vmatprep.subr.bf16.mxu0 %v18547_v50 }
0x17df   : > { %16688 = vmatmul.mubr.msk.bf16.vlgmr.msra.gmra.mrb[212].mxu1 %vm7244_vm4, %v18193_v29 }
0x17e0   : > { %16713 = vmatprep.mubr.msk.bf16.mxu1 %vm18548_vm0, %v18547_v50 }
0x17e1   : > { %16504 = vmatpush3.bf16.msra.mxu0 %v18008_v5 }
0x17e2   : > { %16505 = vmatprep.subr.bf16.mxu0 %v18547_v50 }
0x17e5   : > { %16506 = vmatpush3.bf16.msra.mxu0 %v18009_v59  ;;  %v18037_v59 = vld [vmem:[#allocation2 + $0xe88] sm:$0xff]  }
0x17e6   : > { %16507 = vmatprep.subr.bf16.mxu0 %v18547_v50 }
0x17e9   : > { %16508 = vmatpush3.bf16.msra.mxu0 %v18010_v60  ;;  %v18038_v60 = vld [vmem:[#allocation2 + $0xe90] sm:$0xff]  }
0x17ea   : > { %16509 = vmatprep.subr.bf16.mxu0 %v18547_v50 }
0x17ed   : > { %16510 = vmatpush3.bf16.msra.mxu0 %v18011_v43  ;;  %v18039_v43 = vld [vmem:[#allocation2 + $0xe98] sm:$0xff]  }
0x17ee   : > { %16515 = vmatprep.subr.bf16.mxu0 %v18547_v50 }
0x189a   : > { %v9915_v53 = vpop.f32.mrb[140].mxu0  ;;  %v20512_v25 = vpop.f32.mrb[200].mxu1 }
0x189b   : > { %v16487_v54 = vpop.f32.mrb[141].mxu0  ;;  %v9921_v61 = vpack.c.bf16 %v9915_v53, %v9915_v53  ;;  %v16611_v14 = vpop.f32.mrb[201].mxu1  ;;  %v18040_v53 = vld [vmem:[#allocation2 + $0xea0] sm:$0xff]  }
0x189c   : > { %v9918_v58 = vpop.f32.mrb[142].mxu0  ;;  %v10610_v23 = vpop.f32.mrb[202].mxu1  ;;  %v18041_v54 = vld [vmem:[#allocation2 + $0xea8] sm:$0xff]  }
0x189d   : > { %v16488_v31 = vpop.f32.mrb[143].mxu0  ;;  %v16612_v32 = vpop.f32.mrb[203].mxu1  ;;  %v18042_v58 = vld [vmem:[#allocation2 + $0xeb0] sm:$0xff]   ;;  %v13735_v23 = vld [vmem:[#allocation5 + $0x6] ss:$0 sm:$0xff] }
0x189e   : > { %v18043_v31 = vld [vmem:[#allocation2 + $0xeb8] sm:$0xff]  }
0x18a2   : > { %v9973_v37 = vpop.f32.mrb[144].mxu0  ;;  %v20514_v38 = vpop.f32.mrb[204].mxu1 }
0x18a3   : > { %v9979_v7 = vpack.c.bf16 %v9973_v37, %v9973_v37  ;;  %v16493_v62 = vpop.f32.mrb[145].mxu0  ;;  %v16637_v10 = vpop.f32.mrb[205].mxu1 }
0x18a4   : > { %v9976_v44 = vpop.f32.mrb[146].mxu0  ;;  %v18044_v62 = vld [vmem:[#allocation2 + $0xec0] sm:$0xff]  }
0x18a5   : > { %16512 = vmatmul.mubr.bf16.vlgmr.msra.gmra.mrb[148].mxu0 %v9979_v7  ;;  %v16494_v11 = vpop.f32.mrb[147].mxu0 }
0x18a6   : > { %16516 = vmatpush3.bf16.msra.mxu0 %v18012_v41  ;;  %16531 = vmatprep.mubr.msk.bf16.mxu0 %vm18548_vm0, %v18547_v50  ;;  %v18045_v11 = vld [vmem:[#allocation2 + $0xec8] sm:$0xff]  }
0x18a7   : > { %16517 = vmatprep.subr.bf16.mxu0 %v18547_v50 }
0x18aa   : > { %16518 = vmatpush3.bf16.msra.mxu0 %v18013_v45  ;;  %v18046_v45 = vld [vmem:[#allocation2 + $0xed0] sm:$0xff]  }
0x18ab   : > { %16519 = vmatprep.subr.bf16.mxu0 %v18547_v50 }
0x18ae   : > { %16520 = vmatpush3.bf16.msra.mxu0 %v18014_v52  ;;  %v18047_v52 = vld [vmem:[#allocation2 + $0xed8] sm:$0xff]  }
0x18af   : > { %16521 = vmatprep.subr.bf16.mxu0 %v18547_v50 }
0x18b2   : > { %16522 = vmatpush3.bf16.msra.mxu0 %v18015_v1  ;;  %v18048_v1 = vld [vmem:[#allocation2 + $0xee0] sm:$0xff]  }
0x18b3   : > { %16523 = vmatprep.subr.bf16.mxu0 %v18547_v50 }
0x18b6   : > { %16524 = vmatpush3.bf16.msra.mxu0 %v18016_v28  ;;  %v18050_v28 = vld [vmem:[#allocation2 + $0xef0] sm:$0xff]  }
0x18b7   : > { %16525 = vmatprep.subr.bf16.mxu0 %v18547_v50 }
0x18ba   : > { %16526 = vmatpush3.bf16.msra.mxu0 %v18017_v36  ;;  %v18051_v36 = vld [vmem:[#allocation2 + $0xef8] sm:$0xff]  }
0x18bb   : > { %16527 = vmatprep.subr.bf16.mxu0 %v18547_v50 }
0x18be   : > { %16528 = vmatpush3.bf16.msra.mxu0 %v18018_v40  ;;  %v10613_v40 = vpack.c.bf16 %v20512_v25, %v20512_v25  ;;  %v18075_v25 = vld [vmem:[#allocation2 + $0xfb8] sm:$0xff]  }
0x18bf   : > { %16529 = vmatprep.subr.bf16.mxu0 %v18547_v50 }
0x18c2   : > { %16530 = vmatpush3.bf16.msra.mxu0 %v18019_v57  ;;  %v18052_v57 = vld [vmem:[#allocation2 + $0xf00] sm:$0xff]  }
0x18c3   : > { %16535 = vmatprep.subr.bf16.mxu0 %v18547_v50 }
0x18c5   : > { %16532 = vmatmul.mubr.bf16.vlgmr.msra.gmra.mrb[148].mxu0 %v9921_v61  ;;  %v18053_v61 = vld [vmem:[#allocation2 + $0xf08] sm:$0xff]  }
0x18c6   : > { %16536 = vmatpush3.bf16.msra.mxu0 %v20408_v20  ;;  %16537 = vmatprep.mubr.msk.bf16.mxu0 %vm18548_vm0, %v18547_v50 }
0x18c7   : > { %16541 = vmatprep.subr.bf16.mxu0 %v18547_v50 }
0x18cd   : > { %16538 = vmatmul.mubr.msk.bf16.vlgmr.msra.gmra.mrb[152].mxu0 %vm7244_vm4, %v18194_v46  ;;  %v18055_v46 = vld [vmem:[#allocation2 + $0xf18] sm:$0xff]  }
0x18ce   : > { %16542 = vmatpush3.bf16.msra.mxu0 %v18020_v22  ;;  %16557 = vmatprep.mubr.msk.bf16.mxu0 %vm18548_vm0, %v18547_v50  ;;  %v18054_v22 = vld [vmem:[#allocation2 + $0xf10] sm:$0xff]  }
0x18cf   : > { %16543 = vmatprep.subr.bf16.mxu0 %v18547_v50 }
0x18d2   : > { %16544 = vmatpush3.bf16.msra.mxu0 %v18021_v49  ;;  %v18056_v49 = vld [vmem:[#allocation2 + $0xf20] sm:$0xff]  }
0x18d3   : > { %16545 = vmatprep.subr.bf16.mxu0 %v18547_v50 }
0x18d6   : > { %16546 = vmatpush3.bf16.msra.mxu0 %v18022_v8  ;;  %v18057_v8 = vld [vmem:[#allocation2 + $0xf28] sm:$0xff]  }
0x18d7   : > { %16547 = vmatprep.subr.bf16.mxu0 %v18547_v50 }
0x18da   : > { %16548 = vmatpush3.bf16.msra.mxu0 %v18023_v56  ;;  %v18058_v56 = vld [vmem:[#allocation2 + $0xf30] sm:$0xff]  }
0x18db   : > { %16549 = vmatprep.subr.bf16.mxu0 %v18547_v50 }
0x18de   : > { %16550 = vmatpush3.bf16.msra.mxu0 %v18024_v48  ;;  %v18059_v48 = vld [vmem:[#allocation2 + $0xf38] sm:$0xff]  }
0x18df   : > { %16551 = vmatprep.subr.bf16.mxu0 %v18547_v50 }
0x18e2   : > { %16552 = vmatpush3.bf16.msra.mxu0 %v18025_v9  ;;  %v10760_v9 = vpack.c.bf16 %v20514_v38, %v20514_v38  ;;  %v13736_v38 = vld [vmem:[#allocation7 + $0x6] ss:$0 sm:$0xff] }
0x18e3   : > { %16553 = vmatprep.subr.bf16.mxu0 %v18547_v50 }
0x18e6   : > { %16554 = vmatpush3.bf16.msra.mxu0 %v18026_v18  ;;  %v18060_v18 = vld [vmem:[#allocation2 + $0xf40] sm:$0xff]  }
0x18e7   : > { %16555 = vmatprep.subr.bf16.mxu0 %v18547_v50 }
0x18ea   : > { %16556 = vmatpush3.bf16.msra.mxu0 %v18027_v47  ;;  %v18061_v47 = vld [vmem:[#allocation2 + $0xf48] sm:$0xff]  }
0x18eb   : > { %16561 = vmatprep.subr.bf16.mxu0 %v18547_v50 }
0x19a0   : > { %v10207_v2 = vpop.f32.mrb[152].mxu0 }
0x19a1   : > { %v10213_v12 = vpack.c.bf16 %v10207_v2, %v10207_v2  ;;  %v16539_v33 = vpop.f32.mrb[153].mxu0  ;;  %v18062_v2 = vld [vmem:[#allocation2 + $0xf50] sm:$0xff]  }
0x19a2   : > { %v10210_v42 = vpop.f32.mrb[154].mxu0  ;;  %v18064_v33 = vld [vmem:[#allocation2 + $0xf60] sm:$0xff]  }
0x19a3   : > { %16558 = vmatmul.mubr.bf16.vlgmr.msra.gmra.mrb[148].mxu0 %v10213_v12  ;;  %v16540_v3 = vpop.f32.mrb[155].mxu0  ;;  %v18063_v12 = vld [vmem:[#allocation2 + $0xf58] sm:$0xff]   ;;  %v18065_v42 = vld [vmem:[#allocation2 + $0xf68] sm:$0xff]  }
0x19a4   : > { %16562 = vmatpush3.bf16.msra.mxu0 %v20408_v20  ;;  %16563 = vmatprep.mubr.msk.bf16.mxu0 %vm18548_vm0, %v18547_v50  ;;  %v10757_v20 = vpop.f32.mrb[206].mxu1  ;;  %v18066_v3 = vld [vmem:[#allocation2 + $0xf70] sm:$0xff]  }
0x19a5   : > { %16567 = vmatprep.subr.bf16.mxu0 %v18547_v50  ;;  %v16638_v55 = vpop.f32.mrb[207].mxu1 }
0x19a6   : > { %v20516_v0 = vpop.f32.mrb[208].mxu1 }
0x19a7   : > { %v16663_v63 = vpop.f32.mrb[209].mxu1 }
0x19a8   : > { %v10904_v35 = vpop.f32.mrb[210].mxu1 }
0x19a9   : > { %v16664_v4 = vpop.f32.mrb[211].mxu1 }
0x19aa   : > { %v20527_v37 = vpop.f32.mrb[212].mxu1  ;;  %v13738_v4 = vld [vmem:[%s20842_s9 + $0x1] sm:$0x1] }
0x19ab   : > { %16564 = vmatmul.mubr.msk.bf16.vlgmr.msra.gmra.mrb[156].mxu0 %vm7244_vm4, %v18195_v51  ;;  %v16689_v41 = vpop.f32.mrb[213].mxu1  ;;  %v10907_v51 = vpack.c.bf16 %v20516_v0, %v20516_v0  ;;  %v11054_v14 = vpack.c.bf16 %v20527_v37, %v20527_v37  ;;  %v18082_v37 = vld [vmem:[#allocation2 + $0x1030] sm:$0xff]  }
0x19ac   : > { %16568 = vmatpush3.bf16.msra.mxu0 %v18028_v19  ;;  %16583 = vmatprep.mubr.msk.bf16.mxu0 %vm18548_vm0, %v18547_v50  ;;  %v11051_v7 = vpop.f32.mrb[214].mxu1  ;;  %v18067_v19 = vld [vmem:[#allocation2 + $0xf78] sm:$0xff]  }
0x19ad   : > { %16569 = vmatprep.subr.bf16.mxu0 %v18547_v50  ;;  %v16690_v44 = vpop.f32.mrb[215].mxu1  ;;  %v18083_v41 = vld [vmem:[#allocation2 + $0x1038] sm:$0xff]  }
0x19b0   : > { %16570 = vmatpush3.bf16.msra.mxu0 %v18029_v26  ;;  %v18068_v26 = vld [vmem:[#allocation2 + $0xf80] sm:$0xff]  }
0x19b1   : > { %16571 = vmatprep.subr.bf16.mxu0 %v18547_v50 }
0x19b4   : > { %16572 = vmatpush3.bf16.msra.mxu0 %v18030_v27  ;;  %v18069_v27 = vld [vmem:[#allocation2 + $0xf88] sm:$0xff]  }
0x19b5   : > { %16573 = vmatprep.subr.bf16.mxu0 %v18547_v50 }
0x19b8   : > { %16574 = vmatpush3.bf16.msra.mxu0 %v18031_v34  ;;  %v18070_v34 = vld [vmem:[#allocation2 + $0xf90] sm:$0xff]  }
0x19b9   : > { %16575 = vmatprep.subr.bf16.mxu0 %v18547_v50 }
0x19bc   : > { %16576 = vmatpush3.bf16.msra.mxu0 %v18032_v6  ;;  %v18071_v6 = vld [vmem:[#allocation2 + $0xf98] sm:$0xff]  }
0x19bd   : > { %16577 = vmatprep.subr.bf16.mxu0 %v18547_v50 }
0x19c0   : > { %16578 = vmatpush3.bf16.msra.mxu0 %v18033_v16  ;;  %v18072_v16 = vld [vmem:[#allocation2 + $0xfa0] sm:$0xff]  }
0x19c1   : > { %16579 = vmatprep.subr.bf16.mxu0 %v18547_v50 }
0x19c4   : > { %16580 = vmatpush3.bf16.msra.mxu0 %v18034_v17  ;;  %v18073_v17 = vld [vmem:[#allocation2 + $0xfa8] sm:$0xff]  }
0x19c5   : > { %16581 = vmatprep.subr.bf16.mxu0 %v18547_v50 }
0x19c8   : > { %16582 = vmatpush3.bf16.msra.mxu0 %v18035_v21  ;;  %v18074_v21 = vld [vmem:[#allocation2 + $0xfb0] sm:$0xff]  }
0x19c9   : > { %16587 = vmatprep.subr.bf16.mxu0 %v18547_v50 }
0x1a7e   : > { %v10354_v24 = vpop.f32.mrb[156].mxu0 }
0x1a7f   : > { %v10360_v39 = vpack.c.bf16 %v10354_v24, %v10354_v24  ;;  %v16565_v13 = vpop.f32.mrb[157].mxu0 }
0x1a80   : > { %v10357_v5 = vpop.f32.mrb[158].mxu0  ;;  %v13776_v13 = vld [vmem:[%s20842_s9 + $0x4] sm:$0x1] }
0x1a81   : > { %16584 = vmatmul.mubr.bf16.vlgmr.msra.gmra.mrb[148].mxu0 %v10360_v39  ;;  %v16566_v29 = vpop.f32.mrb[159].mxu0  ;;  %v11175_v39 = vld [vmem:[%s20842_s9] sm:$0x1]  ;;  %v13786_v5 = vld [vmem:[%s20842_s9 + $0x5] sm:$0x1] }
0x1a82   : > { %16588 = vmatpush3.bf16.msra.mxu0 %v18036_v30  ;;  %16603 = vmatprep.mubr.msk.bf16.mxu0 %vm18548_vm0, %v18547_v50  ;;  %v18076_v29 = vld [vmem:[#allocation2 + $0x1000] sm:$0xff]  }
0x1a83   : > { %16589 = vmatprep.subr.bf16.mxu0 %v18547_v50 }
0x1a86   : > { %16590 = vmatpush3.bf16.msra.mxu0 %v18037_v59  ;;  %v18077_v59 = vld [vmem:[#allocation2 + $0x1008] sm:$0xff]  }
0x1a87   : > { %16591 = vmatprep.subr.bf16.mxu0 %v18547_v50 }
0x1a8a   : > { %16592 = vmatpush3.bf16.msra.mxu0 %v18038_v60  ;;  %v13796_v60 = vld [vmem:[%s20842_s9 + $0x6] sm:$0x1] }
0x1a8b   : > { %16593 = vmatprep.subr.bf16.mxu0 %v18547_v50 }
0x1a8e   : > { %16594 = vmatpush3.bf16.msra.mxu0 %v18039_v43  ;;  %v18078_v43 = vld [vmem:[#allocation2 + $0x1010] sm:$0xff]  }
0x1a8f   : > { %16595 = vmatprep.subr.bf16.mxu0 %v18547_v50 }
0x1a92   : > { %16596 = vmatpush3.bf16.msra.mxu0 %v18040_v53  ;;  %v18079_v53 = vld [vmem:[#allocation2 + $0x1018] sm:$0xff]  }
0x1a93   : > { %16597 = vmatprep.subr.bf16.mxu0 %v18547_v50 }
0x1a96   : > { %16598 = vmatpush3.bf16.msra.mxu0 %v18041_v54  ;;  %v13806_v54 = vld [vmem:[%s20842_s9 + $0x7] sm:$0x1] }
0x1a97   : > { %16599 = vmatprep.subr.bf16.mxu0 %v18547_v50 }
0x1a9a   : > { %16600 = vmatpush3.bf16.msra.mxu0 %v18042_v58  ;;  %v18080_v58 = vld [vmem:[#allocation2 + $0x1020] sm:$0xff]  }
0x1a9b   : > { %16601 = vmatprep.subr.bf16.mxu0 %v18547_v50 }
0x1a9e   : > { %16602 = vmatpush3.bf16.msra.mxu0 %v18043_v31  ;;  %v18081_v31 = vld [vmem:[#allocation2 + $0x1028] sm:$0xff]  }
0x1a9f   : > { %16613 = vmatprep.subr.bf16.mxu0 %v18547_v50 }
0x1aa1   : > { %16604 = vmatmul.mubr.bf16.vlgmr.msra.gmra.mrb[148].mxu0 %v20404_v15  ;;  %v18049_v15 = vld [vmem:[#allocation2 + $0xee8] sm:$0xff]  }
0x1aa2   : > { %16614 = vmatpush3.bf16.msra.mxu0 %v18044_v62  ;;  %16629 = vmatprep.mubr.msk.bf16.mxu0 %vm18548_vm0, %v18547_v50 }
0x1aa3   : > { %16615 = vmatprep.subr.bf16.mxu0 %v18547_v50 }
0x1aa6   : > { %16616 = vmatpush3.bf16.msra.mxu0 %v18045_v11 }
0x1aa7   : > { %16617 = vmatprep.subr.bf16.mxu0 %v18547_v50 }
0x1aaa   : > { %16618 = vmatpush3.bf16.msra.mxu0 %v18046_v45 }
0x1aab   : > { %16619 = vmatprep.subr.bf16.mxu0 %v18547_v50 }
0x1aae   : > { %16620 = vmatpush3.bf16.msra.mxu0 %v18047_v52  ;;  %v18084_v52 = vld [vmem:[#allocation2 + $0xfc0] sm:$0xff]  }
0x1aaf   : > { %16621 = vmatprep.subr.bf16.mxu0 %v18547_v50 }
0x1ab2   : > { %16622 = vmatpush3.bf16.msra.mxu0 %v18048_v1 }
0x1ab3   : > { %16623 = vmatprep.subr.bf16.mxu0 %v18547_v50 }
0x1ab6   : > { %16624 = vmatpush3.bf16.msra.mxu0 %v18049_v15 }
0x1ab7   : > { %16625 = vmatprep.subr.bf16.mxu0 %v18547_v50 }
0x1aba   : > { %16626 = vmatpush3.bf16.msra.mxu0 %v18050_v28 }
0x1abb   : > { %16627 = vmatprep.subr.bf16.mxu0 %v18547_v50 }
0x1abe   : > { %16628 = vmatpush3.bf16.msra.mxu0 %v18051_v36 }
0x1abf   : > { %16639 = vmatprep.subr.bf16.mxu0 %v18547_v50 }
0x1ac1   : > { %16630 = vmatmul.mubr.bf16.vlgmr.msra.gmra.mrb[148].mxu0 %v10613_v40  ;;  %v18085_v40 = vld [vmem:[#allocation2 + $0xfc8] sm:$0xff]  }
0x1ac2   : > { %16640 = vmatpush3.bf16.msra.mxu0 %v18052_v57  ;;  %16655 = vmatprep.mubr.msk.bf16.mxu0 %vm18548_vm0, %v18547_v50  ;;  %v18086_v57 = vld [vmem:[#allocation2 + $0xfd0] sm:$0xff]  }
0x1ac3   : > { %16641 = vmatprep.subr.bf16.mxu0 %v18547_v50 }
0x1ac6   : > { %16642 = vmatpush3.bf16.msra.mxu0 %v18053_v61  ;;  %v18087_v61 = vld [vmem:[#allocation2 + $0xfd8] sm:$0xff]  }
0x1ac7   : > { %16643 = vmatprep.subr.bf16.mxu0 %v18547_v50 }
0x1aca   : > { %16644 = vmatpush3.bf16.msra.mxu0 %v18054_v22  ;;  %v18088_v22 = vld [vmem:[#allocation2 + $0xfe0] sm:$0xff]  }
0x1acb   : > { %16645 = vmatprep.subr.bf16.mxu0 %v18547_v50 }
0x1ace   : > { %16646 = vmatpush3.bf16.msra.mxu0 %v18055_v46  ;;  %v18089_v46 = vld [vmem:[#allocation2 + $0xfe8] sm:$0xff]  }
0x1acf   : > { %16647 = vmatprep.subr.bf16.mxu0 %v18547_v50 }
0x1ad2   : > { %16648 = vmatpush3.bf16.msra.mxu0 %v18056_v49  ;;  %v18090_v49 = vld [vmem:[#allocation2 + $0xff0] sm:$0xff]  }
0x1ad3   : > { %16649 = vmatprep.subr.bf16.mxu0 %v18547_v50 }
0x1ad6   : > { %16650 = vmatpush3.bf16.msra.mxu0 %v18057_v8  ;;  %v18091_v8 = vld [vmem:[#allocation2 + $0xff8] sm:$0xff]  }
0x1ad7   : > { %16651 = vmatprep.subr.bf16.mxu0 %v18547_v50 }
0x1ada   : > { %16652 = vmatpush3.bf16.msra.mxu0 %v18058_v56 }
0x1adb   : > { %16653 = vmatprep.subr.bf16.mxu0 %v18547_v50 }
0x1ade   : > { %16654 = vmatpush3.bf16.msra.mxu0 %v18059_v48  ;;  %v13756_v48 = vld [vmem:[%s20842_s9 + $0x2] sm:$0x1] }
0x1adf   : > { %16665 = vmatprep.subr.bf16.mxu0 %v18547_v50 }
0x1ae1   : > { %16656 = vmatmul.mubr.bf16.vlgmr.msra.gmra.mrb[148].mxu0 %v10760_v9  ;;  %v18092_v9 = vld [vmem:[#allocation2 + $0x1040] sm:$0xff]  }
0x1ae2   : > { %16666 = vmatpush3.bf16.msra.mxu0 %v18060_v18  ;;  %16681 = vmatprep.mubr.msk.bf16.mxu0 %vm18548_vm0, %v18547_v50  ;;  %v18093_v18 = vld [vmem:[#allocation2 + $0x1048] sm:$0xff]  }
0x1ae3   : > { %16667 = vmatprep.subr.bf16.mxu0 %v18547_v50 }
0x1ae6   : > { %16668 = vmatpush3.bf16.msra.mxu0 %v18061_v47  ;;  %v18094_v47 = vld [vmem:[#allocation2 + $0x1050] sm:$0xff]  }
0x1ae7   : > { %16669 = vmatprep.subr.bf16.mxu0 %v18547_v50 }
0x1aea   : > { %16670 = vmatpush3.bf16.msra.mxu0 %v18062_v2  ;;  %v18095_v2 = vld [vmem:[#allocation2 + $0x1058] sm:$0xff]  }
0x1aeb   : > { %16671 = vmatprep.subr.bf16.mxu0 %v18547_v50 }
0x1aee   : > { %16672 = vmatpush3.bf16.msra.mxu0 %v18063_v12  ;;  %v18096_v12 = vld [vmem:[#allocation2 + $0x1060] sm:$0xff]  }
0x1aef   : > { %16673 = vmatprep.subr.bf16.mxu0 %v18547_v50 }
0x1af2   : > { %16674 = vmatpush3.bf16.msra.mxu0 %v18064_v33  ;;  %v18097_v33 = vld [vmem:[#allocation2 + $0x1068] sm:$0xff]  }
0x1af3   : > { %16675 = vmatprep.subr.bf16.mxu0 %v18547_v50 }
0x1af6   : > { %16676 = vmatpush3.bf16.msra.mxu0 %v18065_v42  ;;  %v18098_v42 = vld [vmem:[#allocation2 + $0x1070] sm:$0xff]  }
0x1af7   : > { %16677 = vmatprep.subr.bf16.mxu0 %v18547_v50 }
0x1afa   : > { %16678 = vmatpush3.bf16.msra.mxu0 %v18066_v3  ;;  %v18099_v3 = vld [vmem:[#allocation2 + $0x1078] sm:$0xff]  }
0x1afb   : > { %16679 = vmatprep.subr.bf16.mxu0 %v18547_v50 }
0x1afe   : > { %16680 = vmatpush3.bf16.msra.mxu0 %v18067_v19  ;;  %v13816_v19 = vld [vmem:[%s20842_s9 + $0x8] sm:$0x1] }
0x1aff   : > { %16691 = vmatprep.subr.bf16.mxu0 %v18547_v50 }
0x1b01   : > { %16682 = vmatmul.mubr.bf16.vlgmr.msra.gmra.mrb[148].mxu0 %v10907_v51 }
0x1b02   : > { %16692 = vmatpush3.bf16.msra.mxu0 %v18068_v26  ;;  %16707 = vmatprep.mubr.msk.bf16.mxu0 %vm18548_vm0, %v18547_v50 }
0x1b03   : > { %16693 = vmatprep.subr.bf16.mxu0 %v18547_v50 }
0x1b06   : > { %16694 = vmatpush3.bf16.msra.mxu0 %v18069_v27 }
0x1b07   : > { %16695 = vmatprep.subr.bf16.mxu0 %v18547_v50 }
0x1b0a   : > { %16696 = vmatpush3.bf16.msra.mxu0 %v18070_v34 }
0x1b0b   : > { %16697 = vmatprep.subr.bf16.mxu0 %v18547_v50 }
0x1b0e   : > { %16698 = vmatpush3.bf16.msra.mxu0 %v18071_v6 }
0x1b0f   : > { %16699 = vmatprep.subr.bf16.mxu0 %v18547_v50 }
0x1b12   : > { %16700 = vmatpush3.bf16.msra.mxu0 %v18072_v16  ;;  %v13766_v16 = vld [vmem:[%s20842_s9 + $0x3] sm:$0x1] }
0x1b13   : > { %16701 = vmatprep.subr.bf16.mxu0 %v18547_v50 }
0x1b16   : > { %16702 = vmatpush3.bf16.msra.mxu0 %v18073_v17  ;;  %v18100_v17 = vld [vmem:[#allocation2 + $0x1080] sm:$0xff]  }
0x1b17   : > { %16703 = vmatprep.subr.bf16.mxu0 %v18547_v50 }
0x1b1a   : > { %16704 = vmatpush3.bf16.msra.mxu0 %v18074_v21  ;;  %v18101_v21 = vld [vmem:[#allocation2 + $0x1088] sm:$0xff]  }
0x1b1b   : > { %16705 = vmatprep.subr.bf16.mxu0 %v18547_v50 }
0x1b1e   : > { %16706 = vmatpush3.bf16.msra.mxu0 %v18075_v25  ;;  %v18102_v25 = vld [vmem:[#allocation2 + $0x1090] sm:$0xff]  }
0x1b1f   : > { %16815 = vmatprep.subr.bf16.mxu0 %v18547_v50 }
0x1b21   : > { %16708 = vmatmul.mubr.bf16.vlgmr.msra.gmra.mrb[148].mxu0 %v11054_v14  ;;  %v18103_v14 = vld [vmem:[#allocation2 + $0x1098] sm:$0xff]  }
0x1b22   : > { %16817 = vmatprep.mubr.msk.bf16.mxu0 %vm18548_vm0, %v18547_v50 }
0x1bf4   : > { %v11154_v32 = vpop.f32.mrb[148].mxu0 }
0x1bf5   : > { %v11166_v10 = vmul.f32 %v13735_v23, %v11154_v32  ;;  %v16709_v20 = vpop.f32.mrb[149].mxu0  ;;  %v18104_v23 = vld [vmem:[#allocation2 + $0x10a0] sm:$0xff]   ;;  %v18105_v32 = vld [vmem:[#allocation2 + $0x10a8] sm:$0xff]  }
0x1bf6   : > { %v11157_v55 = vpop.f32.mrb[150].mxu0 }
0x1bf7   : > { %v11172_v0 = vadd.f32 %v13736_v38, %v11166_v10  ;;  %v16710_v63 = vpop.f32.mrb[151].mxu0  ;;  %v18106_v38 = vld [vmem:[#allocation2 + $0x10b0] sm:$0xff]   ;;  %v18107_v10 = vld [vmem:[#allocation2 + $0x10b8] sm:$0xff]  }
0x1bf9   : > { %v11173_v24 = vmax.f32 %v11172_v0, 0.0 }
0x1bfb   : > { %v11174_v30 = vpack.c.bf16 %v11173_v24, %v11173_v24 }
0x1bfd   : > { %v20582_v35 = vsel %vm7248_vm3, %v11174_v30, 0 }
0x1bfe   : > { %16712 = vmatpush3.bf16.msra.mxu1 %v20582_v35  ;;  %16816 = vmatpush3.bf16.msra.mxu0 %v20582_v35 }
0x1bff   : > { %16717 = vmatprep.subr.bf16.mxu1 %v18547_v50  ;;  %16841 = vmatprep.subr.bf16.mxu0 %v18547_v50 }
0x1c01   : > { %16714 = vmatmul.mubr.msk.bf16.vlgmr.msra.gmra.mrb[216].mxu1 %vm7244_vm4, %v11175_v39  ;;  %16818 = vmatmul.mubr.msk.bf16.vlgmr.msra.gmra.mrb[160].mxu0 %vm7244_vm4, %v13776_v13 }
0x1c02   : > { %16718 = vmatpush3.bf16.msra.mxu1 %v20582_v35  ;;  %16842 = vmatpush3.bf16.msra.mxu0 %v20582_v35 }
0x1c03   : > { %16719 = vmatprep.mubr.msk.bf16.mxu1 %vm18548_vm0, %v18547_v50  ;;  %16843 = vmatprep.mubr.msk.bf16.mxu0 %vm18548_vm0, %v18547_v50 }
0x1c04   : > { %16867 = vmatprep.subr.bf16.mxu0 %v18547_v50  ;;  %16723 = vmatprep.subr.bf16.mxu1 %v18547_v50 }
0x1c09   : > { %16720 = vmatmul.mubr.msk.bf16.vlgmr.msra.gmra.mrb[220].mxu1 %vm7244_vm4, %v13738_v4  ;;  %16844 = vmatmul.mubr.msk.bf16.vlgmr.msra.gmra.mrb[164].mxu0 %vm7244_vm4, %v13786_v5 }
0x1c0a   : > { %16868 = vmatpush3.bf16.msra.mxu0 %v20582_v35  ;;  %16869 = vmatprep.mubr.msk.bf16.mxu0 %vm18548_vm0, %v18547_v50 }
0x1c0b   : > { %16893 = vmatprep.subr.bf16.mxu0 %v18547_v50  ;;  %16724 = vmatpush3.bf16.msra.mxu1 %v18076_v29 }
0x1c0c   : > { %16725 = vmatprep.subr.bf16.mxu1 %v18547_v50  ;;  %16739 = vmatprep.mubr.msk.bf16.mxu1 %vm18548_vm0, %v18547_v50 }
0x1c0f   : > { %16726 = vmatpush3.bf16.msra.mxu1 %v18077_v59 }
0x1c10   : > { %16727 = vmatprep.subr.bf16.mxu1 %v18547_v50 }
0x1c11   : > { %16870 = vmatmul.mubr.msk.bf16.vlgmr.msra.gmra.mrb[168].mxu0 %vm7244_vm4, %v13796_v60 }
0x1c12   : > { %16894 = vmatpush3.bf16.msra.mxu0 %v20582_v35  ;;  %16895 = vmatprep.mubr.msk.bf16.mxu0 %vm18548_vm0, %v18547_v50 }
0x1c13   : > { %16919 = vmatprep.subr.bf16.mxu0 %v18547_v50  ;;  %16728 = vmatpush3.bf16.msra.mxu1 %v18078_v43 }
0x1c14   : > { %16729 = vmatprep.subr.bf16.mxu1 %v18547_v50 }
0x1c17   : > { %16730 = vmatpush3.bf16.msra.mxu1 %v18079_v53  ;;  %v18108_v53 = vld [vmem:[#allocation2 + $0x10c0] sm:$0xff]  }
0x1c18   : > { %16731 = vmatprep.subr.bf16.mxu1 %v18547_v50 }
0x1c19   : > { %16896 = vmatmul.mubr.msk.bf16.vlgmr.msra.gmra.mrb[172].mxu0 %vm7244_vm4, %v13806_v54 }
0x1c1a   : > { %16920 = vmatpush3.bf16.msra.mxu0 %v20582_v35  ;;  %16921 = vmatprep.mubr.msk.bf16.mxu0 %vm18548_vm0, %v18547_v50 }
0x1c1b   : > { %16732 = vmatpush3.bf16.msra.mxu1 %v18080_v58  ;;  %16945 = vmatprep.subr.bf16.mxu0 %v18547_v50 }
0x1c1c   : > { %16733 = vmatprep.subr.bf16.mxu1 %v18547_v50 }
0x1c1f   : > { %16734 = vmatpush3.bf16.msra.mxu1 %v18081_v31 }
0x1c20   : > { %16735 = vmatprep.subr.bf16.mxu1 %v18547_v50 }
0x1c21   : > { %16922 = vmatmul.mubr.msk.bf16.vlgmr.msra.gmra.mrb[176].mxu0 %vm7244_vm4, %v13816_v19 }
0x1c22   : > { %16961 = vmatprep.mubr.msk.bf16.mxu0 %vm18548_vm0, %v18547_v50 }
0x1c23   : > { %16736 = vmatpush3.bf16.msra.mxu1 %v18082_v37 }
0x1c24   : > { %16737 = vmatprep.subr.bf16.mxu1 %v18547_v50 }
0x1c27   : > { %16738 = vmatpush3.bf16.msra.mxu1 %v18083_v41 }
0x1c28   : > { %16743 = vmatprep.subr.bf16.mxu1 %v18547_v50 }
0x1cd4   : > { %v11216_v7 = vpop.f32.mrb[216].mxu1  ;;  %v11822_v20 = vpop.f32.mrb[160].mxu0 }
0x1cd5   : > { %v16715_v62 = vpop.f32.mrb[217].mxu1  ;;  %v11222_v56 = vpack.c.bf16 %v11216_v7, %v11216_v7  ;;  %v16819_v55 = vpop.f32.mrb[161].mxu0 }
0x1cd6   : > { %v11219_v44 = vpop.f32.mrb[218].mxu1  ;;  %v11825_v0 = vpop.f32.mrb[162].mxu0  ;;  %v18109_v62 = vld [vmem:[#allocation2 + $0x10c8] sm:$0xff]   ;;  %v18138_v55 = vld [vmem:[#allocation2 + $0x11b0] sm:$0xff]  }
0x1cd7   : > { %v16716_v11 = vpop.f32.mrb[219].mxu1  ;;  %v16820_v63 = vpop.f32.mrb[163].mxu0  ;;  %v18110_v44 = vld [vmem:[#allocation2 + $0x10d0] sm:$0xff]   ;;  %v18139_v0 = vld [vmem:[#allocation2 + $0x11b8] sm:$0xff]  }
0x1cd8   : > { %v18111_v11 = vld [vmem:[#allocation2 + $0x10d8] sm:$0xff]  }
0x1cdc   : > { %v11279_v45 = vpop.f32.mrb[220].mxu1  ;;  %v20694_v24 = vpop.f32.mrb[164].mxu0 }
0x1cdd   : > { %v11285_v1 = vpack.c.bf16 %v11279_v45, %v11279_v45  ;;  %v16721_v15 = vpop.f32.mrb[221].mxu1  ;;  %v16845_v30 = vpop.f32.mrb[165].mxu0  ;;  %v18112_v45 = vld [vmem:[#allocation2 + $0x10e0] sm:$0xff]   ;;  %v11980_v19 = vpack.c.bf16 %v20694_v24, %v20694_v24 }
0x1cde   : > { %v11282_v28 = vpop.f32.mrb[222].mxu1  ;;  %v18115_v15 = vld [vmem:[#allocation2 + $0x10f8] sm:$0xff]   ;;  %v18140_v24 = vld [vmem:[#allocation2 + $0x11c0] sm:$0xff]   ;;  %v18141_v30 = vld [vmem:[#allocation2 + $0x11c8] sm:$0xff]  }
0x1cdf   : > { %16740 = vmatmul.mubr.bf16.vlgmr.msra.gmra.mrb[224].mxu1 %v11285_v1  ;;  %v16722_v36 = vpop.f32.mrb[223].mxu1  ;;  %v18114_v1 = vld [vmem:[#allocation2 + $0x10f0] sm:$0xff]  }
0x1ce0   : > { %16744 = vmatpush3.bf16.msra.mxu1 %v18084_v52  ;;  %16759 = vmatprep.mubr.msk.bf16.mxu1 %vm18548_vm0, %v18547_v50  ;;  %v18113_v52 = vld [vmem:[#allocation2 + $0x10e8] sm:$0xff]  }
0x1ce1   : > { %16745 = vmatprep.subr.bf16.mxu1 %v18547_v50 }
0x1ce4   : > { %16746 = vmatpush3.bf16.msra.mxu1 %v18085_v40  ;;  %v11828_v40 = vpack.c.bf16 %v11822_v20, %v11822_v20  ;;  %v18137_v20 = vld [vmem:[#allocation2 + $0x11a8] sm:$0xff]  }
0x1ce5   : > { %16747 = vmatprep.subr.bf16.mxu1 %v18547_v50 }
0x1ce8   : > { %16748 = vmatpush3.bf16.msra.mxu1 %v18086_v57 }
0x1ce9   : > { %16749 = vmatprep.subr.bf16.mxu1 %v18547_v50 }
0x1cec   : > { %16750 = vmatpush3.bf16.msra.mxu1 %v18087_v61  ;;  %v18116_v61 = vld [vmem:[#allocation2 + $0x1100] sm:$0xff]  }
0x1ced   : > { %16751 = vmatprep.subr.bf16.mxu1 %v18547_v50 }
0x1cf0   : > { %16752 = vmatpush3.bf16.msra.mxu1 %v18088_v22 }
0x1cf1   : > { %16753 = vmatprep.subr.bf16.mxu1 %v18547_v50 }
0x1cf4   : > { %16754 = vmatpush3.bf16.msra.mxu1 %v18089_v46  ;;  %v18148_v46 = vld [vmem:[#allocation2 + $0x1300] sm:$0xff]  }
0x1cf5   : > { %16755 = vmatprep.subr.bf16.mxu1 %v18547_v50  ;;  %16946 = vmatpush3.bf16.msra.mxu0 %v18148_v46  ;;  %v12656_v46 = vld [vmem:[#allocation7 + $0x8] sm:$0x1] }
0x1cf6   : > { %16947 = vmatprep.subr.bf16.mxu0 %v18547_v50 }
0x1cf8   : > { %16756 = vmatpush3.bf16.msra.mxu1 %v18090_v49  ;;  %v18117_v49 = vld [vmem:[#allocation2 + $0x1108] sm:$0xff]  }
0x1cf9   : > { %16757 = vmatprep.subr.bf16.mxu1 %v18547_v50 }
0x1cfc   : > { %16758 = vmatpush3.bf16.msra.mxu1 %v18091_v8  ;;  %v18149_v8 = vld [vmem:[#allocation2 + $0x1308] sm:$0xff]  }
0x1cfd   : > { %16763 = vmatprep.subr.bf16.mxu1 %v18547_v50  ;;  %16948 = vmatpush3.bf16.msra.mxu0 %v18149_v8 }
0x1cfe   : > { %16949 = vmatprep.subr.bf16.mxu0 %v18547_v50 }
0x1cff   : > { %16760 = vmatmul.mubr.bf16.vlgmr.msra.gmra.mrb[224].mxu1 %v11222_v56  ;;  %v18118_v56 = vld [vmem:[#allocation2 + $0x1110] sm:$0xff]  }
0x1d00   : > { %16764 = vmatpush3.bf16.msra.mxu1 %v20582_v35  ;;  %16765 = vmatprep.mubr.msk.bf16.mxu1 %vm18548_vm0, %v18547_v50 }
0x1d01   : > { %16769 = vmatprep.subr.bf16.mxu1 %v18547_v50 }
0x1d07   : > { %16766 = vmatmul.mubr.msk.bf16.vlgmr.msra.gmra.mrb[228].mxu1 %vm7244_vm4, %v13756_v48  ;;  %v18150_v48 = vld [vmem:[#allocation2 + $0x1310] sm:$0xff]  }
0x1d08   : > { %16770 = vmatpush3.bf16.msra.mxu1 %v18092_v9  ;;  %16785 = vmatprep.mubr.msk.bf16.mxu1 %vm18548_vm0, %v18547_v50  ;;  %v18119_v9 = vld [vmem:[#allocation2 + $0x1118] sm:$0xff]  }
0x1d09   : > { %16771 = vmatprep.subr.bf16.mxu1 %v18547_v50  ;;  %16950 = vmatpush3.bf16.msra.mxu0 %v18150_v48 }
0x1d0a   : > { %16951 = vmatprep.subr.bf16.mxu0 %v18547_v50 }
0x1d0c   : > { %16772 = vmatpush3.bf16.msra.mxu1 %v18093_v18  ;;  %v18151_v18 = vld [vmem:[#allocation2 + $0x1318] sm:$0xff]  }
0x1d0d   : > { %16773 = vmatprep.subr.bf16.mxu1 %v18547_v50  ;;  %16952 = vmatpush3.bf16.msra.mxu0 %v18151_v18 }
0x1d0e   : > { %16953 = vmatprep.subr.bf16.mxu0 %v18547_v50 }
0x1d10   : > { %16774 = vmatpush3.bf16.msra.mxu1 %v18094_v47  ;;  %v18120_v47 = vld [vmem:[#allocation2 + $0x1120] sm:$0xff]  }
0x1d11   : > { %16775 = vmatprep.subr.bf16.mxu1 %v18547_v50 }
0x1d14   : > { %16776 = vmatpush3.bf16.msra.mxu1 %v18095_v2  ;;  %v18152_v2 = vld [vmem:[#allocation2 + $0x1320] sm:$0xff]  }
0x1d15   : > { %16777 = vmatprep.subr.bf16.mxu1 %v18547_v50  ;;  %16954 = vmatpush3.bf16.msra.mxu0 %v18152_v2 }
0x1d16   : > { %16955 = vmatprep.subr.bf16.mxu0 %v18547_v50 }
0x1d18   : > { %16778 = vmatpush3.bf16.msra.mxu1 %v18096_v12  ;;  %v18121_v12 = vld [vmem:[#allocation2 + $0x1128] sm:$0xff]  }
0x1d19   : > { %16779 = vmatprep.subr.bf16.mxu1 %v18547_v50 }
0x1d1c   : > { %16780 = vmatpush3.bf16.msra.mxu1 %v18097_v33  ;;  %v18153_v33 = vld [vmem:[#allocation2 + $0x1328] sm:$0xff]  }
0x1d1d   : > { %16781 = vmatprep.subr.bf16.mxu1 %v18547_v50  ;;  %16956 = vmatpush3.bf16.msra.mxu0 %v18153_v33  ;;  %v18166_v33 = vld [vmem:[#allocation14 + $0x10] sm:$0xff]  }
0x1d1e   : > { %16957 = vmatprep.subr.bf16.mxu0 %v18547_v50 }
0x1d20   : > { %16782 = vmatpush3.bf16.msra.mxu1 %v18098_v42  ;;  %v18122_v42 = vld [vmem:[#allocation2 + $0x1130] sm:$0xff]  }
0x1d21   : > { %16783 = vmatprep.subr.bf16.mxu1 %v18547_v50 }
0x1d24   : > { %16784 = vmatpush3.bf16.msra.mxu1 %v18099_v3  ;;  %v18123_v3 = vld [vmem:[#allocation2 + $0x1138] sm:$0xff]  }
0x1d25   : > { %16789 = vmatprep.subr.bf16.mxu1 %v18547_v50 }
0x1dda   : > { %v11518_v51 = vpop.f32.mrb[228].mxu1 }
0x1ddb   : > { %v11524_v26 = vpack.c.bf16 %v11518_v51, %v11518_v51  ;;  %v16767_v27 = vpop.f32.mrb[229].mxu1  ;;  %v18124_v51 = vld [vmem:[#allocation2 + $0x1140] sm:$0xff]  }
0x1ddc   : > { %v11521_v34 = vpop.f32.mrb[230].mxu1  ;;  %v18126_v27 = vld [vmem:[#allocation2 + $0x1150] sm:$0xff]  }
0x1ddd   : > { %16786 = vmatmul.mubr.bf16.vlgmr.msra.gmra.mrb[224].mxu1 %v11524_v26  ;;  %v16768_v6 = vpop.f32.mrb[231].mxu1  ;;  %v18125_v26 = vld [vmem:[#allocation2 + $0x1148] sm:$0xff]   ;;  %v18127_v34 = vld [vmem:[#allocation2 + $0x1158] sm:$0xff]  }
0x1dde   : > { %16790 = vmatpush3.bf16.msra.mxu1 %v20582_v35  ;;  %16791 = vmatprep.mubr.msk.bf16.mxu1 %vm18548_vm0, %v18547_v50  ;;  %v11977_v35 = vpop.f32.mrb[166].mxu0  ;;  %v18128_v6 = vld [vmem:[#allocation2 + $0x1160] sm:$0xff]  }
0x1ddf   : > { %16795 = vmatprep.subr.bf16.mxu1 %v18547_v50  ;;  %v16846_v39 = vpop.f32.mrb[167].mxu0  ;;  %v18142_v35 = vld [vmem:[#allocation2 + $0x11d0] sm:$0xff]  }
0x1de0   : > { %v20696_v13 = vpop.f32.mrb[168].mxu0  ;;  %v18143_v39 = vld [vmem:[#allocation2 + $0x11d8] sm:$0xff]  }
0x1de1   : > { %v16871_v4 = vpop.f32.mrb[169].mxu0 }
0x1de2   : > { %v12129_v5 = vpop.f32.mrb[170].mxu0  ;;  %v18145_v4 = vld [vmem:[#allocation2 + $0x11e8] sm:$0xff]  }
0x1de3   : > { %v16872_v29 = vpop.f32.mrb[171].mxu0  ;;  %v18146_v5 = vld [vmem:[#allocation2 + $0x11f0] sm:$0xff]  }
0x1de4   : > { %v20698_v59 = vpop.f32.mrb[172].mxu0  ;;  %v18147_v29 = vld [vmem:[#allocation2 + $0x11f8] sm:$0xff]  }
0x1de5   : > { %16792 = vmatmul.mubr.msk.bf16.vlgmr.msra.gmra.mrb[232].mxu1 %vm7244_vm4, %v13766_v16  ;;  %v16897_v60 = vpop.f32.mrb[173].mxu0  ;;  %v18129_v16 = vld [vmem:[#allocation2 + $0x1168] sm:$0xff]   ;;  %v12284_v63 = vpack.c.bf16 %v20698_v59, %v20698_v59 }
0x1de6   : > { %16796 = vmatpush3.bf16.msra.mxu1 %v18100_v17  ;;  %16811 = vmatprep.mubr.msk.bf16.mxu1 %vm18548_vm0, %v18547_v50  ;;  %v12281_v54 = vpop.f32.mrb[174].mxu0  ;;  %v18130_v17 = vld [vmem:[#allocation2 + $0x1170] sm:$0xff]  }
0x1de7   : > { %16797 = vmatprep.subr.bf16.mxu1 %v18547_v50  ;;  %v16898_v37 = vpop.f32.mrb[175].mxu0  ;;  %v18154_v60 = vld [vmem:[#allocation2 + $0x1330] sm:$0xff]  }
0x1de8   : > { %v20709_v28 = vpop.f32.mrb[176].mxu0  ;;  %16958 = vmatpush3.bf16.msra.mxu0 %v18154_v60 }
0x1de9   : > { %v16923_v36 = vpop.f32.mrb[177].mxu0  ;;  %v12436_v59 = vpack.c.bf16 %v20709_v28, %v20709_v28  ;;  %16959 = vmatprep.subr.bf16.mxu0 %v18547_v50  ;;  %v18160_v28 = vld [vmem:[#allocation2 + $0x1560] sm:$0xff]  }
0x1dea   : > { %16798 = vmatpush3.bf16.msra.mxu1 %v18101_v21  ;;  %v12433_v57 = vpop.f32.mrb[178].mxu0  ;;  %v18131_v21 = vld [vmem:[#allocation2 + $0x1178] sm:$0xff]   ;;  %v18161_v36 = vld [vmem:[#allocation2 + $0x1568] sm:$0xff]  }
0x1deb   : > { %16799 = vmatprep.subr.bf16.mxu1 %v18547_v50  ;;  %v16924_v22 = vpop.f32.mrb[179].mxu0  ;;  %v18163_v57 = vld [vmem:[#allocation2 + $0x1578] sm:$0xff]  }
0x1dee   : > { %16800 = vmatpush3.bf16.msra.mxu1 %v18102_v25  ;;  %v12132_v25 = vpack.c.bf16 %v20696_v13, %v20696_v13  ;;  %v18144_v13 = vld [vmem:[#allocation2 + $0x11e0] sm:$0xff]  }
0x1def   : > { %16801 = vmatprep.subr.bf16.mxu1 %v18547_v50 }
0x1df2   : > { %16802 = vmatpush3.bf16.msra.mxu1 %v18103_v14  ;;  %v18132_v14 = vld [vmem:[#allocation2 + $0x1180] sm:$0xff]  }
0x1df3   : > { %16803 = vmatprep.subr.bf16.mxu1 %v18547_v50 }
0x1df6   : > { %16804 = vmatpush3.bf16.msra.mxu1 %v18104_v23  ;;  %v18133_v23 = vld [vmem:[#allocation2 + $0x1188] sm:$0xff]  }
0x1df7   : > { %16805 = vmatprep.subr.bf16.mxu1 %v18547_v50 }
0x1dfa   : > { %16806 = vmatpush3.bf16.msra.mxu1 %v18105_v32  ;;  %v18134_v32 = vld [vmem:[#allocation2 + $0x1190] sm:$0xff]  }
0x1dfb   : > { %16807 = vmatprep.subr.bf16.mxu1 %v18547_v50 }
0x1dfe   : > { %16808 = vmatpush3.bf16.msra.mxu1 %v18106_v38  ;;  %v18135_v38 = vld [vmem:[#allocation2 + $0x1198] sm:$0xff]  }
0x1dff   : > { %16809 = vmatprep.subr.bf16.mxu1 %v18547_v50 }
0x1e02   : > { %16810 = vmatpush3.bf16.msra.mxu1 %v18107_v10  ;;  %v18136_v10 = vld [vmem:[#allocation2 + $0x11a0] sm:$0xff]  }
0x1e03   : > { %16821 = vmatprep.subr.bf16.mxu1 %v18547_v50 }
0x1eb8   : > { %v11670_v43 = vpop.f32.mrb[232].mxu1 }
0x1eb9   : > { %v11676_v58 = vpack.c.bf16 %v11670_v43, %v11670_v43  ;;  %v16793_v31 = vpop.f32.mrb[233].mxu1  ;;  %v18155_v43 = vld [vmem:[#allocation2 + $0x1338] sm:$0xff]  }
0x1eba   : > { %v11673_v41 = vpop.f32.mrb[234].mxu1  ;;  %16960 = vmatpush3.bf16.msra.mxu0 %v18155_v43 }
0x1ebb   : > { %16812 = vmatmul.mubr.bf16.vlgmr.msra.gmra.mrb[224].mxu1 %v11676_v58  ;;  %v16794_v7 = vpop.f32.mrb[235].mxu1  ;;  %16965 = vmatprep.subr.bf16.mxu0 %v18547_v50  ;;  %v12545_v58 = vld [vmem:[#allocation7 + $0x7] sm:$0x1] }
0x1ebc   : > { %16822 = vmatpush3.bf16.msra.mxu1 %v18108_v53  ;;  %16837 = vmatprep.mubr.msk.bf16.mxu1 %vm18548_vm0, %v18547_v50  ;;  %v12543_v53 = vld [vmem:[#allocation5 + $0x7] sm:$0x1] }
0x1ebd   : > { %16823 = vmatprep.subr.bf16.mxu1 %v18547_v50 }
0x1ec0   : > { %16824 = vmatpush3.bf16.msra.mxu1 %v18109_v62 }
0x1ec1   : > { %16825 = vmatprep.subr.bf16.mxu1 %v18547_v50 }
0x1ec4   : > { %16826 = vmatpush3.bf16.msra.mxu1 %v18110_v44 }
0x1ec5   : > { %16827 = vmatprep.subr.bf16.mxu1 %v18547_v50 }
0x1ec8   : > { %16828 = vmatpush3.bf16.msra.mxu1 %v18111_v11  ;;  %v18156_v11 = vld [vmem:[#allocation2 + $0x1540] sm:$0xff]  }
0x1ec9   : > { %16829 = vmatprep.subr.bf16.mxu1 %v18547_v50 }
0x1ecc   : > { %16830 = vmatpush3.bf16.msra.mxu1 %v18112_v45 }
0x1ecd   : > { %16831 = vmatprep.subr.bf16.mxu1 %v18547_v50 }
0x1ed0   : > { %16832 = vmatpush3.bf16.msra.mxu1 %v18113_v52  ;;  %v18157_v52 = vld [vmem:[#allocation2 + $0x1548] sm:$0xff]  }
0x1ed1   : > { %16833 = vmatprep.subr.bf16.mxu1 %v18547_v50 }
0x1ed4   : > { %16834 = vmatpush3.bf16.msra.mxu1 %v18114_v1  ;;  %v18158_v1 = vld [vmem:[#allocation2 + $0x1550] sm:$0xff]  }
0x1ed5   : > { %16835 = vmatprep.subr.bf16.mxu1 %v18547_v50 }
0x1ed8   : > { %16836 = vmatpush3.bf16.msra.mxu1 %v18115_v15  ;;  %v18159_v15 = vld [vmem:[#allocation2 + $0x1558] sm:$0xff]  }
0x1ed9   : > { %16847 = vmatprep.subr.bf16.mxu1 %v18547_v50 }
0x1edb   : > { %16838 = vmatmul.mubr.bf16.vlgmr.msra.gmra.mrb[224].mxu1 %v11828_v40  ;;  %v18162_v40 = vld [vmem:[#allocation2 + $0x1570] sm:$0xff]  }
0x1edc   : > { %16848 = vmatpush3.bf16.msra.mxu1 %v18116_v61  ;;  %16863 = vmatprep.mubr.msk.bf16.mxu1 %vm18548_vm0, %v18547_v50  ;;  %v12654_v61 = vld [vmem:[#allocation5 + $0x8] sm:$0x1] }
0x1edd   : > { %16849 = vmatprep.subr.bf16.mxu1 %v18547_v50 }
0x1ee0   : > { %16850 = vmatpush3.bf16.msra.mxu1 %v18117_v49 }
0x1ee1   : > { %16851 = vmatprep.subr.bf16.mxu1 %v18547_v50 }
0x1ee4   : > { %16852 = vmatpush3.bf16.msra.mxu1 %v18118_v56 }
0x1ee5   : > { %16853 = vmatprep.subr.bf16.mxu1 %v18547_v50 }
0x1ee8   : > { %16854 = vmatpush3.bf16.msra.mxu1 %v18119_v9 }
0x1ee9   : > { %16855 = vmatprep.subr.bf16.mxu1 %v18547_v50 }
0x1eec   : > { %16856 = vmatpush3.bf16.msra.mxu1 %v18120_v47  ;;  %v18164_v47 = vld [vmem:[#allocation14] sm:$0xff]  }
0x1eed   : > { %16857 = vmatprep.subr.bf16.mxu1 %v18547_v50 }
0x1ef0   : > { %16858 = vmatpush3.bf16.msra.mxu1 %v18121_v12  ;;  %v18165_v12 = vld [vmem:[#allocation14 + $0x8] sm:$0xff]  }
0x1ef1   : > { %16859 = vmatprep.subr.bf16.mxu1 %v18547_v50 }
0x1ef4   : > { %16860 = vmatpush3.bf16.msra.mxu1 %v18122_v42  ;;  %v18167_v42 = vld [vmem:[#allocation14 + $0x18] sm:$0xff]  }
0x1ef5   : > { %16861 = vmatprep.subr.bf16.mxu1 %v18547_v50 }
0x1ef8   : > { %16862 = vmatpush3.bf16.msra.mxu1 %v18123_v3  ;;  %v18168_v3 = vld [vmem:[#allocation14 + $0x20] sm:$0xff]  }
0x1ef9   : > { %16873 = vmatprep.subr.bf16.mxu1 %v18547_v50 }
0x1efb   : > { %16864 = vmatmul.mubr.bf16.vlgmr.msra.gmra.mrb[224].mxu1 %v11980_v19  ;;  %v18169_v19 = vld [vmem:[#allocation14 + $0x28] sm:$0xff]  }
0x1efc   : > { %16874 = vmatpush3.bf16.msra.mxu1 %v18124_v51  ;;  %16889 = vmatprep.mubr.msk.bf16.mxu1 %vm18548_vm0, %v18547_v50  ;;  %v18170_v51 = vld [vmem:[#allocation14 + $0x30] sm:$0xff]  }
0x1efd   : > { %16875 = vmatprep.subr.bf16.mxu1 %v18547_v50 }
0x1f00   : > { %16876 = vmatpush3.bf16.msra.mxu1 %v18125_v26  ;;  %v18171_v26 = vld [vmem:[#allocation14 + $0x38] sm:$0xff]  }
0x1f01   : > { %16877 = vmatprep.subr.bf16.mxu1 %v18547_v50 }
0x1f04   : > { %16878 = vmatpush3.bf16.msra.mxu1 %v18126_v27  ;;  %v12765_v27 = vld [vmem:[#allocation5 + $0x9] sm:$0x1] }
0x1f05   : > { %16879 = vmatprep.subr.bf16.mxu1 %v18547_v50 }
0x1f08   : > { %16880 = vmatpush3.bf16.msra.mxu1 %v18127_v34 }
0x1f09   : > { %16881 = vmatprep.subr.bf16.mxu1 %v18547_v50 }
0x1f0c   : > { %16882 = vmatpush3.bf16.msra.mxu1 %v18128_v6  ;;  %v12767_v6 = vld [vmem:[#allocation7 + $0x9] sm:$0x1] }
0x1f0d   : > { %16883 = vmatprep.subr.bf16.mxu1 %v18547_v50 }
0x1f10   : > { %16884 = vmatpush3.bf16.msra.mxu1 %v18129_v16 }
0x1f11   : > { %16885 = vmatprep.subr.bf16.mxu1 %v18547_v50 }
0x1f14   : > { %16886 = vmatpush3.bf16.msra.mxu1 %v18130_v17 }
0x1f15   : > { %16887 = vmatprep.subr.bf16.mxu1 %v18547_v50 }
0x1f18   : > { %16888 = vmatpush3.bf16.msra.mxu1 %v18131_v21 }
0x1f19   : > { %16899 = vmatprep.subr.bf16.mxu1 %v18547_v50 }
0x1f1b   : > { %16890 = vmatmul.mubr.bf16.vlgmr.msra.gmra.mrb[224].mxu1 %v12132_v25 }
0x1f1c   : > { %16900 = vmatpush3.bf16.msra.mxu1 %v18132_v14  ;;  %16915 = vmatprep.mubr.msk.bf16.mxu1 %vm18548_vm0, %v18547_v50 }
0x1f1d   : > { %16901 = vmatprep.subr.bf16.mxu1 %v18547_v50 }
0x1f20   : > { %16902 = vmatpush3.bf16.msra.mxu1 %v18133_v23 }
0x1f21   : > { %16903 = vmatprep.subr.bf16.mxu1 %v18547_v50 }
0x1f24   : > { %16904 = vmatpush3.bf16.msra.mxu1 %v18134_v32 }
0x1f25   : > { %16905 = vmatprep.subr.bf16.mxu1 %v18547_v50 }
0x1f28   : > { %16906 = vmatpush3.bf16.msra.mxu1 %v18135_v38  ;;  %v12787_v38 = vld [vmem:[#allocation16] sm:$0x1] }
0x1f29   : > { %16907 = vmatprep.subr.bf16.mxu1 %v18547_v50 }
0x1f2c   : > { %16908 = vmatpush3.bf16.msra.mxu1 %v18136_v10 }
0x1f2d   : > { %16909 = vmatprep.subr.bf16.mxu1 %v18547_v50 }
0x1f30   : > { %16910 = vmatpush3.bf16.msra.mxu1 %v18137_v20 }
0x1f31   : > { %16911 = vmatprep.subr.bf16.mxu1 %v18547_v50 }
0x1f34   : > { %16912 = vmatpush3.bf16.msra.mxu1 %v18138_v55 }
0x1f35   : > { %16913 = vmatprep.subr.bf16.mxu1 %v18547_v50 }
0x1f38   : > { %16914 = vmatpush3.bf16.msra.mxu1 %v18139_v0 }
0x1f39   : > { %16925 = vmatprep.subr.bf16.mxu1 %v18547_v50 }
0x1f3b   : > { %16916 = vmatmul.mubr.bf16.vlgmr.msra.gmra.mrb[224].mxu1 %v12284_v63 }
0x1f3c   : > { %16926 = vmatpush3.bf16.msra.mxu1 %v18140_v24  ;;  %16941 = vmatprep.mubr.msk.bf16.mxu1 %vm18548_vm0, %v18547_v50 }
0x1f3d   : > { %16927 = vmatprep.subr.bf16.mxu1 %v18547_v50 }
0x1f40   : > { %16928 = vmatpush3.bf16.msra.mxu1 %v18141_v30 }
0x1f41   : > { %16929 = vmatprep.subr.bf16.mxu1 %v18547_v50 }
0x1f44   : > { %16930 = vmatpush3.bf16.msra.mxu1 %v18142_v35 }
0x1f45   : > { %16931 = vmatprep.subr.bf16.mxu1 %v18547_v50 }
0x1f48   : > { %16932 = vmatpush3.bf16.msra.mxu1 %v18143_v39 }
0x1f49   : > { %16933 = vmatprep.subr.bf16.mxu1 %v18547_v50 }
0x1f4c   : > { %16934 = vmatpush3.bf16.msra.mxu1 %v18144_v13 }
0x1f4d   : > { %16935 = vmatprep.subr.bf16.mxu1 %v18547_v50 }
0x1f50   : > { %16936 = vmatpush3.bf16.msra.mxu1 %v18145_v4 }
0x1f51   : > { %16937 = vmatprep.subr.bf16.mxu1 %v18547_v50 }
0x1f54   : > { %16938 = vmatpush3.bf16.msra.mxu1 %v18146_v5 }
0x1f55   : > { %16939 = vmatprep.subr.bf16.mxu1 %v18547_v50 }
0x1f58   : > { %16940 = vmatpush3.bf16.msra.mxu1 %v18147_v29 }
0x1f5b   : > { %16942 = vmatmul.mubr.bf16.vlgmr.msra.gmra.mrb[224].mxu1 %v12436_v59 }
0x202e   : > { %v12536_v54 = vpop.f32.mrb[224].mxu1 }
0x202f   : > { %v12544_v31 = vmul.f32 %v12543_v53, %v12536_v54  ;;  %v16943_v37 = vpop.f32.mrb[225].mxu1 }
0x2030   : > { %v12539_v41 = vpop.f32.mrb[226].mxu1 }
0x2031   : > { %v12546_v7 = vadd.f32 %v12545_v58, %v12544_v31  ;;  %v16944_v62 = vpop.f32.mrb[227].mxu1 }
0x2033   : > { %v12547_v44 = vmax.f32 %v12546_v7, 0.0 }
0x2035   : > { %v12548_v45 = vpack.c.bf16 %v12547_v44, %v12547_v44 }
0x2037   : > { %16962 = vmatmul.mubr.bf16.vlgmr.msra.gmra.mrb[180].mxu0 %v12548_v45 }
0x2038   : > { %16966 = vmatpush3.bf16.msra.mxu0 %v18156_v11  ;;  %16981 = vmatprep.mubr.msk.bf16.mxu0 %vm18548_vm0, %v18547_v50 }
0x2039   : > { %16967 = vmatprep.subr.bf16.mxu0 %v18547_v50 }
0x203c   : > { %16968 = vmatpush3.bf16.msra.mxu0 %v18157_v52 }
0x203d   : > { %16969 = vmatprep.subr.bf16.mxu0 %v18547_v50 }
0x2040   : > { %16970 = vmatpush3.bf16.msra.mxu0 %v18158_v1 }
0x2041   : > { %16971 = vmatprep.subr.bf16.mxu0 %v18547_v50 }
0x2044   : > { %16972 = vmatpush3.bf16.msra.mxu0 %v18159_v15 }
0x2045   : > { %16973 = vmatprep.subr.bf16.mxu0 %v18547_v50 }
0x2048   : > { %16974 = vmatpush3.bf16.msra.mxu0 %v18160_v28 }
0x2049   : > { %16975 = vmatprep.subr.bf16.mxu0 %v18547_v50 }
0x204c   : > { %16976 = vmatpush3.bf16.msra.mxu0 %v18161_v36 }
0x204d   : > { %16977 = vmatprep.subr.bf16.mxu0 %v18547_v50 }
0x2050   : > { %16978 = vmatpush3.bf16.msra.mxu0 %v18162_v40 }
0x2051   : > { %16979 = vmatprep.subr.bf16.mxu0 %v18547_v50 }
0x2054   : > { %16980 = vmatpush3.bf16.msra.mxu0 %v18163_v57 }
0x2055   : > { %16985 = vmatprep.subr.bf16.mxu0 %v18547_v50 }
0x210a   : > { %v12648_v22 = vpop.f32.mrb[180].mxu0 }
0x210b   : > { %v12655_v49 = vmul.f32 %v12654_v61, %v12648_v22  ;;  %v16963_v8 = vpop.f32.mrb[181].mxu0 }
0x210c   : > { %v12651_v56 = vpop.f32.mrb[182].mxu0 }
0x210d   : > { %v12657_v48 = vadd.f32 %v12656_v46, %v12655_v49  ;;  %v16964_v9 = vpop.f32.mrb[183].mxu0 }
0x210f   : > { %v12658_v18 = vmax.f32 %v12657_v48, 0.0 }
0x2111   : > { %v12659_v2 = vpack.c.bf16 %v12658_v18, %v12658_v18 }
0x2113   : > { %16982 = vmatmul.mubr.bf16.vlgmr.msra.gmra.mrb[184].mxu0 %v12659_v2 }
0x2114   : > { %16986 = vmatpush3.bf16.msra.mxu0 %v18164_v47  ;;  %17001 = vmatprep.mubr.msk.bf16.mxu0 %vm18548_vm0, %v18547_v50 }
0x2115   : > { %16987 = vmatprep.subr.bf16.mxu0 %v18547_v50 }
0x2118   : > { %16988 = vmatpush3.bf16.msra.mxu0 %v18165_v12 }
0x2119   : > { %16989 = vmatprep.subr.bf16.mxu0 %v18547_v50 }
0x211c   : > { %16990 = vmatpush3.bf16.msra.mxu0 %v18166_v33 }
0x211d   : > { %16991 = vmatprep.subr.bf16.mxu0 %v18547_v50 }
0x2120   : > { %16992 = vmatpush3.bf16.msra.mxu0 %v18167_v42 }
0x2121   : > { %16993 = vmatprep.subr.bf16.mxu0 %v18547_v50 }
0x2124   : > { %16994 = vmatpush3.bf16.msra.mxu0 %v18168_v3 }
0x2125   : > { %16995 = vmatprep.subr.bf16.mxu0 %v18547_v50 }
0x2128   : > { %16996 = vmatpush3.bf16.msra.mxu0 %v18169_v19 }
0x2129   : > { %16997 = vmatprep.subr.bf16.mxu0 %v18547_v50 }
0x212c   : > { %16998 = vmatpush3.bf16.msra.mxu0 %v18170_v51 }
0x212d   : > { %16999 = vmatprep.subr.bf16.mxu0 %v18547_v50 }
0x2130   : > { %17000 = vmatpush3.bf16.msra.mxu0 %v18171_v26 }
0x21e6   : > { %v12759_v34 = vpop.f32.mrb[184].mxu0 }
0x21e7   : > { %v12766_v16 = vmul.f32 %v12765_v27, %v12759_v34  ;;  %v16983_v17 = vpop.f32.mrb[185].mxu0 }
0x21e8   : > { %v12762_v21 = vpop.f32.mrb[186].mxu0 }
0x21e9   : > { %v12768_v25 = vadd.f32 %v12767_v6, %v12766_v16  ;;  %v16984_v14 = vpop.f32.mrb[187].mxu0 }
0x21eb   : > { %v12769_v23 = vmax.f32 %v12768_v25, 0.0 }
0x21ed   : > { %v12770_v32 = vpack.c.bf16 %v12769_v23, %v12769_v23 }
0x21ef   : > { %17002 = vmatmul.mubr.bf16.vlgmr.msra.gmra.mrb[188].mxu0 %v12770_v32 }
0x22c2   : > { %v12870_v50 = vpop.f32.mrb[188].mxu0 }
0x22c3   : > { %v12871_v10 = vadd.f32 %v12870_v50, %v12787_v38  ;;  %v17003_v20 = vpop.f32.mrb[189].mxu0 }
0x22c4   : > { %v12873_v55 = vpop.f32.mrb[190].mxu0 }
0x22c5   : > { %12876 = vst [vmem:[%s534_s21] sm:$0x1] %v12871_v10  ;;  %v17004_v0 = vpop.f32.mrb[191].mxu0 }
0x22c6   : > { %18461 = shalt.err (!%p18458_p13)
}
0x22c7   : > { %s18462_s24 = scalar_lea.hbm %s20791_s17, 16  ;;  %s18466_s16 = scalar_lea.hbm %s20889_s29, 32 }
0x22c8   : > { %p18463_p12 = scmp.ne.s32.totalorder %s20791_s17, %s18462_s24  ;;  %p18467_p3 = scmp.lt.u32.totalorder %s20791_s17, %s20889_s29 }
0x22c9   : > { %p18468_p4 = scmp.lt.u32.totalorder %s18466_s16, %s18462_s24  ;;  %p18470_p8 = scmp.lt.u32.totalorder %s18462_s24, %s20791_s17 }
0x22ca   : > { %p18464_p1 = pnand %p18463_p12, %p20890_p11 }
0x22cb   : > { %p18469_p7 = por %p18468_p4, %p18467_p3 }
0x22cc   : > { %p18465_p2 = pneg %p18464_p1 }
0x22cd   : > { %p18471_p5 = por %p18470_p8, %p18469_p7 }
0x22cf   : > { %p18472_p6 = pnand %p18471_p5, %p18465_p2 }
0x22d1   : > { %18475 = shalt.err (!%p18472_p6)
}
0x22d2   : > { %17329 = dma.vmem_to_hbm [thread:$0]  (%p20890_p11), %s20793_s23, 16, %s20791_s17, %s12878_s20  }
0x22d3 PF: > { %s20891_s12 = sld [smem:[#allocation26_spill]]  ;;  %s20892_s21 = sld [smem:[#allocation24_spill]] }
0x22d4   : > { %s20893_s28 = sld [smem:[#allocation29_spill]] }
0x22d9   : > { %p17381_p0 = scmp.ge.s32.totalorder %s20891_s12, 2  ;;  %s12902_s19 = sand.u32 1, %s20892_s21  }
0x22da   : > { %p20894_p9 = scmp.ne.s32.totalorder %s20893_s28, 0  ;;  %s12903_s25 = scalar_lea.sflag [#allocation4], %s12902_s19 }
0x22dc   : > { %p17360_p10 = pnand %p17381_p0, %p20894_p9 }
0x22de   : > { %18513 = dma.done.wait (!%p17360_p10), %s12903_s25, 16  }
0x22df   : > { %18515 = vsyncadd (!%p17360_p10), %s12903_s25, 4294967280  ;;  %s20895_s24 = sld [smem:[#allocation27_spill]]  ;;  %s20896_s14 = sld [smem:[#allocation25_spill]] }
0x22e0   : > { %s20897_s23 = sld [smem:[#allocation28_spill]]  ;;  %s20898_s21 = smov %s18522_s22 }
0x22e5   : > { %p27_p13 = scmp.ge.s32.totalorder %s20895_s24, 4   ;;  %s20899_s22 = smov %s20896_s14 }
0x22e7   :  { %29 = sbr.rel (!%p27_p13) target bundleno = 11 (0xb), region = 259 }
0x22ee   :  { %12907 = vsyncpa [#allocation3], 1 }
0x22ef   :  { %12909 = vsyncpa [#allocation3 + $0x1], 1 }
0x22f0   :  { %12910 = vsyncpa [#allocation6], 1 }
0x22f1   :  { %12911 = vsyncpa [#allocation9], 1 }
0x22f2   :  { %12912 = vsyncpa [#allocation12], 1 }
0x22f3   :  { %12913 = vsyncpa [#allocation15], 1 }
0x22f4   :  { %12914 = vsyncpa [#allocation4], 1 }
0x22f5   :  { %12916 = vsyncpa [#allocation4 + $0x1], 1 }

</bundles_post_ra>
